<compile_context>
chip_gen: v7x
topology: tpu7x:2x2x1
jax: 0.10.0
libtpu: 0.0.40
codegen_flags: <defaults>
</compile_context>

<pallas_src>
import functools

import jax
import jax.numpy as jnp
from jax.experimental import pallas as pl
from jax.experimental.pallas import tpu as pltpu

# TODO(synk): MAX_VAL is an undefined module-level constant in the reference
# file; 1e7 is used here (same magnitude as the logits-mask fill value).
MAX_VAL = 1.0e7
NEG_MASK = -1.0e7        # logits_mask scatter fill value from the reference
PAD_NEG = -3.0e7         # bias on padded logit columns (never selected)
MEM_OFFBLOCK = -4.0      # bias on off-batch memory-sim entries (< min cosine)
COS_EPS = 1e-8           # torch.nn.CosineSimilarity eps


def _round_up(x, m):
    return ((x + m - 1) // m) * m


def _pad_to(x, shape):
    return jnp.pad(x, [(0, s - d) for d, s in zip(x.shape, shape)])


def _pad_gate_cols(w, hd, hdp):
    """Pad the last axis of a (..., 4*hd) LSTM gate matrix per gate block."""
    if hd == hdp:
        return w
    parts = []
    for g in range(4):
        blk = w[..., g * hd:(g + 1) * hd]
        parts.append(jnp.pad(blk, [(0, 0)] * (w.ndim - 1) + [(0, hdp - hd)]))
    return jnp.concatenate(parts, axis=-1)


def _decoder_kernel(
    # ---- inputs (whole arrays, VMEM-resident, constant over the grid) ----
    gp0_ref,       # (Bp, 4Hdp)   initial gate pre-activations (h0@Whh + b)
    c0_ref,        # (Bp, Hdp)    initial cell state
    lm0_ref,       # (Bp, Np)     initial logits mask (pads -> PAD_NEG)
    sent_ref,      # (Bp, Hep)    enc[:, 0, :]
    encT_ref,      # (Hep, Bp*Sep) batch-flattened encoder states, transposed
    encf_ref,      # (Bp*Sep, Hep) batch-flattened encoder states
    abias_ref,     # (Bp, Bp*Sep) block-diagonal + pad attention bias
    memT_ref,      # (Mdp, Bp*Mep) batch-flattened memory, transposed
    mscale_ref,    # (Bp, Bp*Mep) block-diag * (1/max(||mem||,eps))
    mbias_ref,     # (Bp, Bp*Mep) 0 own block, MEM_OFFBLOCK off block
    mmask_ref,     # (Bp, Mep)    1.0 valid / 0.0 pad memory rows
    fh_ref,        # (Hdp, 5Hdp)  [W_hh | W_mlp1]
    b1_ref,        # (1, Hdp)
    w2_ref,        # (Hdp, Np)
    b2_ref,        # (1, Np)
    flab_ref,      # (Np, 4Hdp+Hep+Mdp)  emb @ [W_ih_lab | W_dense | W_mem_lab]
    bd_ref,        # (1, Hep)
    fenc_ref,      # (Hep, 4Hdp+Mdp)     [W_ih_enc | W_mem_enc]
    bm_ref,        # (1, Mdp)
    blstm_ref,     # (1, 4Hdp)    b_ih + b_hh
    # ---- outputs ----
    logits_ref,    # (TC, Bp, Np) chunk of time-major logits
    sims_ref,      # (Bp, Mep)    masked running-max cosine sims
    # ---- scratch (persists across grid steps) ----
    gp_s,          # (Bp, 4Hdp)   carried gate pre-activations
    c_s,           # (Bp, Hdp)    carried cell state
    lm_s,          # (Bp, Np)     cumulative logits mask (in-place RMW)
    smax_s,        # (Bp, Bp*Mep) running max of block-masked sims
    *, hdp, hep, eos_id, t_chunk, t_total,
):
    chunk = pl.program_id(0)
    last = pl.num_programs(0) - 1
    bp = c_s.shape[0]
    np_ = lm_s.shape[1]
    mep = sims_ref.shape[1]

    @pl.when(chunk == 0)
    def _init():
        gp_s[...] = gp0_ref[...]
        c_s[...] = c0_ref[...]
        lm_s[...] = lm0_ref[...]
        smax_s[...] = jnp.full_like(smax_s, MEM_OFFBLOCK)
        sims_ref[...] = jnp.full_like(sims_ref, -1.0)

    # Loop-invariant loads (hoisted out of the per-step loop).
    sent = sent_ref[...]
    encT = encT_ref[...]
    encf = encf_ref[...]
    abias = abias_ref[...]
    memT = memT_ref[...]
    mscale = mscale_ref[...]
    mbias = mbias_ref[...]
    fh = fh_ref[...]
    w2 = w2_ref[...]
    flab = flab_ref[...]
    fenc = fenc_ref[...]
    b1 = b1_ref[...]
    b2 = b2_ref[...]
    bd = bd_ref[...]
    bm = bm_ref[...]
    blstm = blstm_ref[...]

    col = jax.lax.broadcasted_iota(jnp.int32, (bp, np_), 1)
    not_eos = col != eos_id

    gp = gp_s[...]
    c = c_s[...]

    # Fully-unrolled chunk body (grid boundary bounds live ranges).
    for j in range(t_chunk):
        # ---- LSTM cell: gates were fully pre-computed at end of last step ----
        i_g = jax.nn.sigmoid(gp[:, 0 * hdp:1 * hdp])
        f_g = jax.nn.sigmoid(gp[:, 1 * hdp:2 * hdp])
        g_g = jnp.tanh(gp[:, 2 * hdp:3 * hdp])
        o_g = jax.nn.sigmoid(gp[:, 3 * hdp:4 * hdp])
        c = f_g * c + i_g * g_g
        h = o_g * jnp.tanh(c)

        # ---- fused h matmul: [W_hh | W_mlp1] -> next gates slice + MLP hidden
        hw = jnp.dot(h, fh, preferred_element_type=jnp.float32)     # (Bp, 5Hdp)
        hid = jnp.maximum(hw[:, 4 * hdp:] + b1, 0.0)
        lm = lm_s[...]
        logits = jnp.dot(hid, w2, preferred_element_type=jnp.float32) + b2 + lm
        logits_ref[j] = logits                    # lane-dense chunked writeback

        # ---- greedy argmax (first-max tie-break) -> one-hot -----------------
        mx = jnp.max(logits, axis=-1, keepdims=True)
        ids = jnp.min(jnp.where(logits == mx, col, np_), axis=-1, keepdims=True)
        one_hot = (col == ids).astype(jnp.float32)
        lm_s[...] = jnp.where((one_hot > 0.0) & not_eos, NEG_MASK, lm)

        # ---- fused label table: one (B,N)@(N, 4Hd+He+Md) matmul -------------
        lab_t = jnp.dot(one_hot, flab, preferred_element_type=jnp.float32)
        query = lab_t[:, 4 * hdp:4 * hdp + hep] + bd

        # ---- attention over encoder states: flattened dense matmuls ---------
        # block-diag + pad bias; off-batch weights underflow to exactly 0.
        scores = jnp.dot(query, encT, preferred_element_type=jnp.float32) + abias
        smx = jnp.max(scores, axis=-1, keepdims=True)
        e = jnp.exp(scores - smx)
        # approx=True -> EUP vrcp (off the VPU critical path); set False for
        # exact softmax normalization if strict parity is required.
        w = e * pl.reciprocal(jnp.sum(e, axis=-1, keepdims=True), approx=True)
        attn = jnp.dot(w, encf, preferred_element_type=jnp.float32)   # (Bp, Hep)
        enc_in = sent + attn                       # eval dropout == identity

        # ---- fused enc_in matmul: [W_ih_enc | W_mem_enc] ---------------------
        ew = jnp.dot(enc_in, fenc, preferred_element_type=jnp.float32)
        mq = lab_t[:, 4 * hdp + hep:] + ew[:, 4 * hdp:] + bm          # (Bp, Mdp)

        # ---- cosine sims against flattened memory, running max --------------
        dotm = jnp.dot(mq, memT, preferred_element_type=jnp.float32)  # (Bp, Bp*Mep)
        inv_qn = jax.lax.rsqrt(
            jnp.maximum(jnp.sum(mq * mq, axis=-1, keepdims=True),
                        COS_EPS * COS_EPS))
        sim = dotm * inv_qn * mscale + mbias
        valid = (chunk * t_chunk + j) < t_total    # guard padded tail steps
        smax_s[...] = jnp.maximum(smax_s[...],
                                  jnp.where(valid, sim, MEM_OFFBLOCK))

        # ---- next step's gate pre-activations (lab + enc_ctx + h + bias) ----
        gp = lab_t[:, :4 * hdp] + ew[:, :4 * hdp] + hw[:, :4 * hdp] + blstm

    gp_s[...] = gp
    c_s[...] = c

    @pl.when(chunk == last)
    def _finalize():
        sm = smax_s[...]
        acc = sm[:, 0:mep]
        for b in range(1, bp):        # own block always wins (off-block <= -3)
            acc = jnp.maximum(acc, sm[:, b * mep:(b + 1) * mep])
        sims_ref[...] = jnp.where(mmask_ref[...] > 0.0, acc, -1.0)


def seq2mem_attn_decode(enc, enc_mask, hidden, cell, memory, memory_mask, params,
                        *, decode_max_seq_len, eos_id):
    """Eval-mode greedy decode. Returns (outputs (B,T,N), next_input_ids (B,T),
    similars (B,Me)) matching the PyTorch forward semantics."""
    B, Se, He = enc.shape
    De = hidden.shape[0]
    Hd = De * hidden.shape[2]
    Ed = params["emb"].shape[1]
    N = params["w2"].shape[0]
    Md = params["wm"].shape[0]
    Me = memory.shape[1]
    T = decode_max_seq_len
    f32 = jnp.float32

    # ---- lane / sublane padding (lane-dense stores, aligned gate slices) ----
    Bp = _round_up(B, 8)
    Sep = _round_up(Se, 128)
    Hep = _round_up(He, 128)
    Hdp = _round_up(Hd, 128)
    Np = _round_up(N, 128)
    Mdp = _round_up(Md, 128)
    Mep = _round_up(Me, 128)

    # hidden (De,B,He) -> (B, De*He) (the reference reshapes the stacked state)
    h0 = jnp.transpose(hidden, (1, 0, 2)).reshape(B, Hd).astype(f32)
    c0 = jnp.transpose(cell, (1, 0, 2)).reshape(B, Hd).astype(f32)
    h0p = _pad_to(h0, (Bp, Hdp))
    c0p = _pad_to(c0, (Bp, Hdp))

    # ---- weights, oriented for x @ W, fused and padded -----------------------
    w_ih = params["w_ih"].astype(f32)                  # (4Hd, Ed+He)
    wih_lab = w_ih[:, :Ed].T                           # (Ed, 4Hd)
    wih_enc = w_ih[:, Ed:].T                           # (He, 4Hd)
    whh = params["w_hh"].astype(f32).T                 # (Hd, 4Hd)
    blstm = (params["b_ih"] + params["b_hh"]).astype(f32).reshape(1, 4 * Hd)
    w1t = params["w1"].astype(f32).T                   # (Hd, Hd)
    w2t = params["w2"].astype(f32).T                   # (Hd, N)
    wdt = params["wd"].astype(f32).T                   # (Ed, He)
    wm = params["wm"].astype(f32)                      # (Md, Ed+He)
    wm_lab = wm[:, :Ed].T                              # (Ed, Md)
    wm_enc = wm[:, Ed:].T                              # (He, Md)
    emb = params["emb"].astype(f32)                    # (N, Ed)

    # Label-embedding table folded into all of its consumers (one matmul/step).
    flab = _pad_to(jnp.concatenate([
        _pad_gate_cols(emb @ wih_lab, Hd, Hdp),        # next-step gates (lab)
        _pad_to(emb @ wdt, (N, Hep)),                  # attention query
        _pad_to(emb @ wm_lab, (N, Mdp)),               # memory query (lab)
    ], axis=1), (Np, 4 * Hdp + Hep + Mdp))
    fenc = jnp.concatenate([
        _pad_to(_pad_gate_cols(wih_enc, Hd, Hdp), (Hep, 4 * Hdp)),
        _pad_to(wm_enc, (Hep, Mdp)),
    ], axis=1)                                         # (Hep, 4Hdp+Mdp)
    fh = jnp.concatenate([
        _pad_to(_pad_gate_cols(whh, Hd, Hdp), (Hdp, 4 * Hdp)),
        _pad_to(w1t, (Hdp, Hdp)),
    ], axis=1)                                         # (Hdp, 5Hdp)
    w2p = _pad_to(w2t, (Hdp, Np))
    b1p = _pad_to(params["b1"].astype(f32).reshape(1, Hd), (1, Hdp))
    b2p = _pad_to(params["b2"].astype(f32).reshape(1, N), (1, Np))
    bdp = _pad_to(params["bd"].astype(f32).reshape(1, He), (1, Hep))
    bmp = _pad_to(params["bm"].astype(f32).reshape(1, Md), (1, Mdp))
    blstm_p = _pad_gate_cols(blstm, Hd, Hdp)           # (1, 4Hdp)

    # Initial gate pre-activations: step-0 input is zeros -> h0@Whh + b only.
    gp0 = h0p @ fh[:, :4 * Hdp] + blstm_p              # (Bp, 4Hdp)

    # Initial cumulative logits mask: 0 on real labels, PAD_NEG on padded cols.
    lm0 = jnp.tile(
        jnp.where(jnp.arange(Np) < N, 0.0, PAD_NEG)[None, :].astype(f32),
        (Bp, 1))

    # ---- encoder precompute (loop-invariant) ---------------------------------
    enc_f = enc.astype(f32)
    enc_p = _pad_to(enc_f, (Bp, Sep, Hep))
    sent_p = _pad_to(enc_f[:, 0, :], (Bp, Hep))
    encf = enc_p.reshape(Bp * Sep, Hep)
    encT = encf.T

    eye_b = jnp.eye(Bp, dtype=bool)
    enc_valid = jnp.zeros((Bp, Sep), dtype=bool).at[:B, :Se].set(enc_mask)
    if Bp > B:   # padded batch rows: treat all real positions as valid (enc=0)
        enc_valid = enc_valid.at[B:, :Se].set(True)
    abias = jnp.where(eye_b[:, :, None] & enc_valid[None, :, :],
                      0.0, -MAX_VAL).astype(f32).reshape(Bp, Bp * Sep)

    # ---- memory precompute (loop-invariant) ----------------------------------
    mem_p = _pad_to(memory.astype(f32), (Bp, Mep, Mdp))
    memf = mem_p.reshape(Bp * Mep, Mdp)
    memT = memf.T
    inv_mn = 1.0 / jnp.maximum(jnp.sqrt(jnp.sum(mem_p * mem_p, axis=-1)),
                               COS_EPS)                               # (Bp, Mep)
    mscale = (eye_b.astype(f32)[:, :, None] * inv_mn[None, :, :]
              ).reshape(Bp, Bp * Mep)
    mbias = jnp.where(jnp.broadcast_to(eye_b[:, :, None], (Bp, Bp, Mep)),
                      0.0, MEM_OFFBLOCK).astype(f32).reshape(Bp, Bp * Mep)
    mmask_p = _pad_to(memory_mask.astype(f32), (Bp, Mep))

    # ---- grid over decode-step chunks ----------------------------------------
    t_chunk = min(T, 8)
    n_chunks = pl.cdiv(T, t_chunk)
    t_pad = n_chunks * t_chunk

    inputs = (gp0, c0p, lm0, sent_p, encT, encf, abias,
              memT, mscale, mbias, mmask_p,
              fh, b1p, w2p, b2p, flab, bdp, fenc, bmp, blstm_p)

    def _resident(arr):
        z = (0,) * arr.ndim
        return pl.BlockSpec(arr.shape, lambda t, _z=z: _z)

    in_specs = [_resident(a) for a in inputs]
    out_specs = [
        pl.BlockSpec((t_chunk, Bp, Np), lambda t: (t, 0, 0)),   # chunked logits
        pl.BlockSpec((Bp, Mep), lambda t: (0, 0)),              # resident sims
    ]
    out_shape = (
        jax.ShapeDtypeStruct((t_pad, Bp, Np), f32),
        jax.ShapeDtypeStruct((Bp, Mep), f32),
    )
    scratch_shapes = [
        pltpu.VMEM((Bp, 4 * Hdp), f32),     # gate pre-activations
        pltpu.VMEM((Bp, Hdp), f32),         # cell state
        pltpu.VMEM((Bp, Np), f32),          # cumulative logits mask
        pltpu.VMEM((Bp, Bp * Mep), f32),    # running-max sims (flattened)
    ]

    # vmem limit from the actual resident footprint (+ ~30% headroom).
    def _nbytes(a):
        return int(a.size) * a.dtype.itemsize
    est = 2 * sum(_nbytes(a) for a in inputs)
    est += 2 * (t_chunk * Bp * Np * 4) + 2 * (Bp * Mep * 4)
    est += (Bp * 4 * Hdp + Bp * Hdp + Bp * Np + Bp * Bp * Mep) * 4
    vmem_limit = min(int(est * 1.3) + (2 << 20), 96 * 1024 * 1024)

    kernel = functools.partial(
        _decoder_kernel, hdp=Hdp, hep=Hep, eos_id=int(eos_id),
        t_chunk=t_chunk, t_total=T)

    logits_tm_p, sims_p = pl.pallas_call(
        kernel,
        out_shape=out_shape,
        grid_spec=pltpu.PrefetchScalarGridSpec(
            num_scalar_prefetch=0,
            grid=(n_chunks,),
            in_specs=in_specs,
            out_specs=out_specs,
            scratch_shapes=scratch_shapes),
        compiler_params=pltpu.CompilerParams(
            dimension_semantics=("arbitrary",),
            vmem_limit_bytes=vmem_limit),
    )(*inputs)

    logits_tm = logits_tm_p[:T, :B, :N]                      # strip pads
    outputs = jnp.transpose(logits_tm, (1, 0, 2))            # (B, T, N)
    # logits already include the cumulative mask, so argmax here is identical
    # to the in-kernel greedy choice (first-max tie-break in both).
    next_input_ids = jnp.transpose(jnp.argmax(logits_tm, axis=-1))   # (B, T)
    similars = sims_p[:B, :Me]
    return outputs, next_input_ids, similars


if __name__ == "__main__":
    # Small, self-consistent shapes:
    # B=2, Se=8, He=16, De=2 -> Hd=32, Ed=8, N(output_size)=12, Md=16, Me=6, T=5
    B, Se, He, De = 2, 8, 16, 2
    Hd = De * He
    Ed, N, Md, Me, T = 8, 12, 16, 6, 5
    EOS_ID = 1

    key = jax.random.PRNGKey(0)
    ks = jax.random.split(key, 20)

    enc = jax.random.normal(ks[0], (B, Se, He), dtype=jnp.float32)
    hidden = jax.random.normal(ks[1], (De, B, He), dtype=jnp.float32)
    cell = jax.random.normal(ks[2], (De, B, He), dtype=jnp.float32)
    memory = jax.random.normal(ks[3], (B, Me, Md), dtype=jnp.float32)

    text_lengths = jnp.array([Se, 5], dtype=jnp.int32)
    enc_mask = (jax.lax.broadcasted_iota(jnp.int32, (B, Se), 1)
                < text_lengths[:, None])
    mem_lengths = jnp.array([Me, 4], dtype=jnp.int32)
    memory_mask = (jax.lax.broadcasted_iota(jnp.int32, (B, Me), 1)
                   < mem_lengths[:, None])

    s = 0.1
    params = {
        "w_ih": s * jax.random.normal(ks[4], (4 * Hd, Ed + He), jnp.float32),
        "w_hh": s * jax.random.normal(ks[5], (4 * Hd, Hd), jnp.float32),
        "b_ih": s * jax.random.normal(ks[6], (4 * Hd,), jnp.float32),
        "b_hh": s * jax.random.normal(ks[7], (4 * Hd,), jnp.float32),
        "w1": s * jax.random.normal(ks[8], (Hd, Hd), jnp.float32),
        "b1": s * jax.random.normal(ks[9], (Hd,), jnp.float32),
        "w2": s * jax.random.normal(ks[10], (N, Hd), jnp.float32),
        "b2": s * jax.random.normal(ks[11], (N,), jnp.float32),
        "wd": s * jax.random.normal(ks[12], (He, Ed), jnp.float32),   # dense_net
        "bd": s * jax.random.normal(ks[13], (He,), jnp.float32),
        "wm": s * jax.random.normal(ks[14], (Md, Ed + He), jnp.float32),  # read_memory
        "bm": s * jax.random.normal(ks[15], (Md,), jnp.float32),
        "emb": s * jax.random.normal(ks[16], (N, Ed), jnp.float32),   # label embedder
    }

    outputs, next_ids, sims = seq2mem_attn_decode(
        enc, enc_mask, hidden, cell, memory, memory_mask, params,
        decode_max_seq_len=T, eos_id=EOS_ID)

    jax.block_until_ready((outputs, next_ids, sims))
    assert outputs.shape == (B, T, N)
    assert next_ids.shape == (B, T)
    assert sims.shape == (B, Me)
    assert bool(jnp.all(jnp.isfinite(outputs)))
    assert bool(jnp.all(jnp.isfinite(sims)))
    assert bool(jnp.all((next_ids >= 0) & (next_ids < N)))
    assert bool(jnp.all(sims <= 1.0 + 1e-3))
    assert bool(jnp.all(sims >= -1.0 - 1e-3))
    print("KERNEL_OK")
</pallas_src>

<mosaic_0001>
module attributes {stable_mosaic.version = 11 : i64} {
  func.func @_decoder_kernel(%arg0: i32, %arg1: memref<8x512xf32, #tpu.memory_space<vmem>>, %arg2: memref<8x128xf32, #tpu.memory_space<vmem>>, %arg3: memref<8x128xf32, #tpu.memory_space<vmem>>, %arg4: memref<8x128xf32, #tpu.memory_space<vmem>>, %arg5: memref<128x1024xf32, #tpu.memory_space<vmem>>, %arg6: memref<1024x128xf32, #tpu.memory_space<vmem>>, %arg7: memref<8x1024xf32, #tpu.memory_space<vmem>>, %arg8: memref<128x1024xf32, #tpu.memory_space<vmem>>, %arg9: memref<8x1024xf32, #tpu.memory_space<vmem>>, %arg10: memref<8x1024xf32, #tpu.memory_space<vmem>>, %arg11: memref<8x128xf32, #tpu.memory_space<vmem>>, %arg12: memref<128x640xf32, #tpu.memory_space<vmem>>, %arg13: memref<1x128xf32, #tpu.memory_space<vmem>>, %arg14: memref<128x128xf32, #tpu.memory_space<vmem>>, %arg15: memref<1x128xf32, #tpu.memory_space<vmem>>, %arg16: memref<128x768xf32, #tpu.memory_space<vmem>>, %arg17: memref<1x128xf32, #tpu.memory_space<vmem>>, %arg18: memref<128x640xf32, #tpu.memory_space<vmem>>, %arg19: memref<1x128xf32, #tpu.memory_space<vmem>>, %arg20: memref<1x512xf32, #tpu.memory_space<vmem>>, %arg21: memref<5x8x128xf32, #tpu.memory_space<vmem>>, %arg22: memref<8x128xf32, #tpu.memory_space<vmem>>, %arg23: memref<8x512xf32, #tpu.memory_space<vmem>>, %arg24: memref<8x128xf32, #tpu.memory_space<vmem>>, %arg25: memref<8x128xf32, #tpu.memory_space<vmem>>, %arg26: memref<8x1024xf32, #tpu.memory_space<vmem>>) attributes {dimension_semantics = [#tpu.dimension_semantics<arbitrary>], iteration_bounds = array<i64: 1>, scalar_prefetch = 0 : i64, scratch_operands = 4 : i64, tpu.core_type = #tpu.core_type<tc>, window_params = [{pipeline_mode = #tpu.pipeline_mode<synchronous>, transform_indices = @transform_0, window_bounds = array<i64: 8, 512>}, {pipeline_mode = #tpu.pipeline_mode<synchronous>, transform_indices = @transform_1, window_bounds = array<i64: 8, 128>}, {pipeline_mode = #tpu.pipeline_mode<synchronous>, transform_indices = @transform_2, window_bounds = array<i64: 8, 128>}, {pipeline_mode = #tpu.pipeline_mode<synchronous>, transform_indices = @transform_3, window_bounds = array<i64: 8, 128>}, {pipeline_mode = #tpu.pipeline_mode<synchronous>, transform_indices = @transform_4, window_bounds = array<i64: 128, 1024>}, {pipeline_mode = #tpu.pipeline_mode<synchronous>, transform_indices = @transform_5, window_bounds = array<i64: 1024, 128>}, {pipeline_mode = #tpu.pipeline_mode<synchronous>, transform_indices = @transform_6, window_bounds = array<i64: 8, 1024>}, {pipeline_mode = #tpu.pipeline_mode<synchronous>, transform_indices = @transform_7, window_bounds = array<i64: 128, 1024>}, {pipeline_mode = #tpu.pipeline_mode<synchronous>, transform_indices = @transform_8, window_bounds = array<i64: 8, 1024>}, {pipeline_mode = #tpu.pipeline_mode<synchronous>, transform_indices = @transform_9, window_bounds = array<i64: 8, 1024>}, {pipeline_mode = #tpu.pipeline_mode<synchronous>, transform_indices = @transform_10, window_bounds = array<i64: 8, 128>}, {pipeline_mode = #tpu.pipeline_mode<synchronous>, transform_indices = @transform_11, window_bounds = array<i64: 128, 640>}, {pipeline_mode = #tpu.pipeline_mode<synchronous>, transform_indices = @transform_12, window_bounds = array<i64: 1, 128>}, {pipeline_mode = #tpu.pipeline_mode<synchronous>, transform_indices = @transform_13, window_bounds = array<i64: 128, 128>}, {pipeline_mode = #tpu.pipeline_mode<synchronous>, transform_indices = @transform_14, window_bounds = array<i64: 1, 128>}, {pipeline_mode = #tpu.pipeline_mode<synchronous>, transform_indices = @transform_15, window_bounds = array<i64: 128, 768>}, {pipeline_mode = #tpu.pipeline_mode<synchronous>, transform_indices = @transform_16, window_bounds = array<i64: 1, 128>}, {pipeline_mode = #tpu.pipeline_mode<synchronous>, transform_indices = @transform_17, window_bounds = array<i64: 128, 640>}, {pipeline_mode = #tpu.pipeline_mode<synchronous>, transform_indices = @transform_18, window_bounds = array<i64: 1, 128>}, {pipeline_mode = #tpu.pipeline_mode<synchronous>, transform_indices = @transform_19, window_bounds = array<i64: 1, 512>}, {transform_indices = @transform_20, window_bounds = array<i64: 5, 8, 128>}, {pipeline_mode = #tpu.pipeline_mode<synchronous>, transform_indices = @transform_21, window_bounds = array<i64: 8, 128>}]} {
    %c0_i32 = arith.constant 0 : i32
    %0 = arith.cmpi eq, %arg0, %c0_i32 : i32
    %1 = arith.extui %0 : i1 to i32
    %c0_i32_0 = arith.constant 0 : i32
    %2 = arith.cmpi ne, %1, %c0_i32_0 : i32
    scf.if %2 {
      %c0_207 = arith.constant 0 : index
      %c0_208 = arith.constant 0 : index
      %564 = vector.load %arg1[%c0_207, %c0_208] : memref<8x512xf32, #tpu.memory_space<vmem>>, vector<8x512xf32>
      %c0_209 = arith.constant 0 : index
      %c0_210 = arith.constant 0 : index
      %565 = vector.load %arg23[%c0_209, %c0_210] : memref<8x512xf32, #tpu.memory_space<vmem>>, vector<8x512xf32>
      tpu.vector_store %arg23[%c0_209, %c0_210], %564 {strides = array<i32>} : memref<8x512xf32, #tpu.memory_space<vmem>>, vector<8x512xf32>,
      %c0_211 = arith.constant 0 : index
      %c0_212 = arith.constant 0 : index
      %566 = vector.load %arg2[%c0_211, %c0_212] : memref<8x128xf32, #tpu.memory_space<vmem>>, vector<8x128xf32>
      %c0_213 = arith.constant 0 : index
      %c0_214 = arith.constant 0 : index
      %567 = vector.load %arg24[%c0_213, %c0_214] : memref<8x128xf32, #tpu.memory_space<vmem>>, vector<8x128xf32>
      tpu.vector_store %arg24[%c0_213, %c0_214], %566 {strides = array<i32>} : memref<8x128xf32, #tpu.memory_space<vmem>>, vector<8x128xf32>,
      %c0_215 = arith.constant 0 : index
      %c0_216 = arith.constant 0 : index
      %568 = vector.load %arg3[%c0_215, %c0_216] : memref<8x128xf32, #tpu.memory_space<vmem>>, vector<8x128xf32>
      %c0_217 = arith.constant 0 : index
      %c0_218 = arith.constant 0 : index
      %569 = vector.load %arg25[%c0_217, %c0_218] : memref<8x128xf32, #tpu.memory_space<vmem>>, vector<8x128xf32>
      tpu.vector_store %arg25[%c0_217, %c0_218], %568 {strides = array<i32>} : memref<8x128xf32, #tpu.memory_space<vmem>>, vector<8x128xf32>,
      %cst_219 = arith.constant -4.000000e+00 : f32
      %570 = vector.broadcast %cst_219 : f32 to vector<8x1024xf32>
      %c0_220 = arith.constant 0 : index
      %c0_221 = arith.constant 0 : index
      %571 = vector.load %arg26[%c0_220, %c0_221] : memref<8x1024xf32, #tpu.memory_space<vmem>>, vector<8x1024xf32>
      tpu.vector_store %arg26[%c0_220, %c0_221], %570 {strides = array<i32>} : memref<8x1024xf32, #tpu.memory_space<vmem>>, vector<8x1024xf32>,
      %cst_222 = arith.constant -1.000000e+00 : f32
      %572 = vector.broadcast %cst_222 : f32 to vector<8x128xf32>
      %c0_223 = arith.constant 0 : index
      %c0_224 = arith.constant 0 : index
      %573 = vector.load %arg22[%c0_223, %c0_224] : memref<8x128xf32, #tpu.memory_space<vmem>>, vector<8x128xf32>
      tpu.vector_store %arg22[%c0_223, %c0_224], %572 {strides = array<i32>} : memref<8x128xf32, #tpu.memory_space<vmem>>, vector<8x128xf32>,
    } else {
    }
    %c0 = arith.constant 0 : index
    %c0_1 = arith.constant 0 : index
    %3 = vector.load %arg4[%c0, %c0_1] : memref<8x128xf32, #tpu.memory_space<vmem>>, vector<8x128xf32>
    %c0_2 = arith.constant 0 : index
    %c0_3 = arith.constant 0 : index
    %4 = vector.load %arg5[%c0_2, %c0_3] : memref<128x1024xf32, #tpu.memory_space<vmem>>, vector<128x1024xf32>
    %c0_4 = arith.constant 0 : index
    %c0_5 = arith.constant 0 : index
    %5 = vector.load %arg6[%c0_4, %c0_5] : memref<1024x128xf32, #tpu.memory_space<vmem>>, vector<1024x128xf32>
    %c0_6 = arith.constant 0 : index
    %c0_7 = arith.constant 0 : index
    %6 = vector.load %arg7[%c0_6, %c0_7] : memref<8x1024xf32, #tpu.memory_space<vmem>>, vector<8x1024xf32>
    %c0_8 = arith.constant 0 : index
    %c0_9 = arith.constant 0 : index
    %7 = vector.load %arg8[%c0_8, %c0_9] : memref<128x1024xf32, #tpu.memory_space<vmem>>, vector<128x1024xf32>
    %c0_10 = arith.constant 0 : index
    %c0_11 = arith.constant 0 : index
    %8 = vector.load %arg9[%c0_10, %c0_11] : memref<8x1024xf32, #tpu.memory_space<vmem>>, vector<8x1024xf32>
    %c0_12 = arith.constant 0 : index
    %c0_13 = arith.constant 0 : index
    %9 = vector.load %arg10[%c0_12, %c0_13] : memref<8x1024xf32, #tpu.memory_space<vmem>>, vector<8x1024xf32>
    %c0_14 = arith.constant 0 : index
    %c0_15 = arith.constant 0 : index
    %10 = vector.load %arg12[%c0_14, %c0_15] : memref<128x640xf32, #tpu.memory_space<vmem>>, vector<128x640xf32>
    %c0_16 = arith.constant 0 : index
    %c0_17 = arith.constant 0 : index
    %11 = vector.load %arg14[%c0_16, %c0_17] : memref<128x128xf32, #tpu.memory_space<vmem>>, vector<128x128xf32>
    %c0_18 = arith.constant 0 : index
    %c0_19 = arith.constant 0 : index
    %12 = vector.load %arg16[%c0_18, %c0_19] : memref<128x768xf32, #tpu.memory_space<vmem>>, vector<128x768xf32>
    %c0_20 = arith.constant 0 : index
    %c0_21 = arith.constant 0 : index
    %13 = vector.load %arg18[%c0_20, %c0_21] : memref<128x640xf32, #tpu.memory_space<vmem>>, vector<128x640xf32>
    %c0_22 = arith.constant 0 : index
    %c0_23 = arith.constant 0 : index
    %14 = vector.load %arg13[%c0_22, %c0_23] : memref<1x128xf32, #tpu.memory_space<vmem>>, vector<1x128xf32>
    %c0_24 = arith.constant 0 : index
    %c0_25 = arith.constant 0 : index
    %15 = vector.load %arg15[%c0_24, %c0_25] : memref<1x128xf32, #tpu.memory_space<vmem>>, vector<1x128xf32>
    %c0_26 = arith.constant 0 : index
    %c0_27 = arith.constant 0 : index
    %16 = vector.load %arg17[%c0_26, %c0_27] : memref<1x128xf32, #tpu.memory_space<vmem>>, vector<1x128xf32>
    %c0_28 = arith.constant 0 : index
    %c0_29 = arith.constant 0 : index
    %17 = vector.load %arg19[%c0_28, %c0_29] : memref<1x128xf32, #tpu.memory_space<vmem>>, vector<1x128xf32>
    %c0_30 = arith.constant 0 : index
    %c0_31 = arith.constant 0 : index
    %18 = vector.load %arg20[%c0_30, %c0_31] : memref<1x512xf32, #tpu.memory_space<vmem>>, vector<1x512xf32>
    %19 = tpu.iota {dimensions = array<i32: 1>} : vector<8x128xi32>
    %c1_i32 = arith.constant 1 : i32
    %20 = vector.broadcast %c1_i32 : i32 to vector<8x128xi32>
    %21 = arith.cmpi ne, %19, %20 : vector<8x128xi32>
    %c0_32 = arith.constant 0 : index
    %c0_33 = arith.constant 0 : index
    %22 = vector.load %arg23[%c0_32, %c0_33] : memref<8x512xf32, #tpu.memory_space<vmem>>, vector<8x512xf32>
    %c0_34 = arith.constant 0 : index
    %c0_35 = arith.constant 0 : index
    %23 = vector.load %arg24[%c0_34, %c0_35] : memref<8x128xf32, #tpu.memory_space<vmem>>, vector<8x128xf32>
    %24 = vector.extract_strided_slice %22 {offsets = [0, 0], sizes = [8, 128], strides = [1, 1]} : vector<8x512xf32> to vector<8x128xf32>
    %25 = arith.negf %24 : vector<8x128xf32>
    %26 = math.exp %25 : vector<8x128xf32>
    %cst = arith.constant 1.000000e+00 : f32
    %27 = vector.broadcast %cst : f32 to vector<8x128xf32>
    %28 = arith.addf %27, %26 : vector<8x128xf32>
    %29 = arith.divf %27, %28 : vector<8x128xf32>
    %30 = vector.extract_strided_slice %22 {offsets = [0, 128], sizes = [8, 128], strides = [1, 1]} : vector<8x512xf32> to vector<8x128xf32>
    %31 = arith.negf %30 : vector<8x128xf32>
    %32 = math.exp %31 : vector<8x128xf32>
    %cst_36 = arith.constant 1.000000e+00 : f32
    %33 = vector.broadcast %cst_36 : f32 to vector<8x128xf32>
    %34 = arith.addf %33, %32 : vector<8x128xf32>
    %35 = arith.divf %33, %34 : vector<8x128xf32>
    %36 = vector.extract_strided_slice %22 {offsets = [0, 256], sizes = [8, 128], strides = [1, 1]} : vector<8x512xf32> to vector<8x128xf32>
    %37 = math.tanh %36 : vector<8x128xf32>
    %38 = vector.extract_strided_slice %22 {offsets = [0, 384], sizes = [8, 128], strides = [1, 1]} : vector<8x512xf32> to vector<8x128xf32>
    %39 = arith.negf %38 : vector<8x128xf32>
    %40 = math.exp %39 : vector<8x128xf32>
    %cst_37 = arith.constant 1.000000e+00 : f32
    %41 = vector.broadcast %cst_37 : f32 to vector<8x128xf32>
    %42 = arith.addf %41, %40 : vector<8x128xf32>
    %43 = arith.divf %41, %42 : vector<8x128xf32>
    %44 = arith.mulf %35, %23 : vector<8x128xf32>
    %45 = arith.mulf %29, %37 : vector<8x128xf32>
    %46 = arith.addf %44, %45 : vector<8x128xf32>
    %47 = math.tanh %46 : vector<8x128xf32>
    %48 = arith.mulf %43, %47 : vector<8x128xf32>
    %cst_38 = arith.constant dense<0.000000e+00> : vector<8x640xf32>
    %49 = tpu.matmul %48, %10, %cst_38 {dimension_numbers = #tpu.dot_dimension_numbers<[1], [0], [0], [1], [0, 0, 1, 1], [], []>} : vector<8x128xf32>, vector<128x640xf32>, vector<8x640xf32> -> vector<8x640xf32>
    %50 = vector.extract_strided_slice %49 {offsets = [0, 512], sizes = [8, 128], strides = [1, 1]} : vector<8x640xf32> to vector<8x128xf32>
    %51 = vector.broadcast %14 : vector<1x128xf32> to vector<8x128xf32>
    %52 = arith.addf %50, %51 : vector<8x128xf32>
    %cst_39 = arith.constant 0.000000e+00 : f32
    %53 = vector.broadcast %cst_39 : f32 to vector<8x128xf32>
    %54 = arith.maximumf %52, %53 : vector<8x128xf32>
    %c0_40 = arith.constant 0 : index
    %c0_41 = arith.constant 0 : index
    %55 = vector.load %arg25[%c0_40, %c0_41] : memref<8x128xf32, #tpu.memory_space<vmem>>, vector<8x128xf32>
    %cst_42 = arith.constant dense<0.000000e+00> : vector<8x128xf32>
    %56 = tpu.matmul %54, %11, %cst_42 {dimension_numbers = #tpu.dot_dimension_numbers<[1], [0], [0], [1], [0, 0, 1, 1], [], []>} : vector<8x128xf32>, vector<128x128xf32>, vector<8x128xf32> -> vector<8x128xf32>
    %57 = vector.broadcast %15 : vector<1x128xf32> to vector<8x128xf32>
    %58 = arith.addf %56, %57 : vector<8x128xf32>
    %59 = arith.addf %58, %55 : vector<8x128xf32>
    %c0_43 = arith.constant 0 : index
    %c0_44 = arith.constant 0 : index
    %c0_45 = arith.constant 0 : index
    %60 = vector.load %arg21[%c0_43, %c0_44, %c0_45] : memref<5x8x128xf32, #tpu.memory_space<vmem>>, vector<1x8x128xf32>
    %61 = vector.shape_cast %60 : vector<1x8x128xf32> to vector<8x128xf32>
    %62 = vector.shape_cast %59 : vector<8x128xf32> to vector<1x8x128xf32>
    tpu.vector_store %arg21[%c0_43, %c0_44, %c0_45], %62 {strides = array<i32>} : memref<5x8x128xf32, #tpu.memory_space<vmem>>, vector<1x8x128xf32>,
    %cst_46 = arith.constant dense<0xFF800000> : vector<8xf32>
    %63 = vector.multi_reduction <maximumf>, %59, %cst_46 [1] : vector<8x128xf32> to vector<8xf32>
    %64 = vector.shape_cast %63 : vector<8xf32> to vector<8x1xf32>
    %65 = vector.broadcast %64 : vector<8x1xf32> to vector<8x128xf32>
    %66 = arith.cmpf oeq, %59, %65 : vector<8x128xf32>
    %c128_i32 = arith.constant 128 : i32
    %67 = vector.broadcast %c128_i32 : i32 to vector<8x128xi32>
    %68 = arith.select %66, %19, %67 : vector<8x128xi1>, vector<8x128xi32>
    %cst_47 = arith.constant dense<2147483647> : vector<8xi32>
    %69 = vector.multi_reduction <minsi>, %68, %cst_47 [1] : vector<8x128xi32> to vector<8xi32>
    %70 = vector.shape_cast %69 : vector<8xi32> to vector<8x1xi32>
    %71 = vector.broadcast %70 : vector<8x1xi32> to vector<8x128xi32>
    %72 = arith.cmpi eq, %19, %71 : vector<8x128xi32>
    %73 = arith.extui %72 : vector<8x128xi1> to vector<8x128xi32>
    %74 = arith.sitofp %73 : vector<8x128xi32> to vector<8x128xf32>
    %cst_48 = arith.constant 0.000000e+00 : f32
    %75 = vector.broadcast %cst_48 : f32 to vector<8x128xf32>
    %76 = arith.cmpf ogt, %74, %75 : vector<8x128xf32>
    %77 = arith.andi %76, %21 : vector<8x128xi1>
    %cst_49 = arith.constant -1.000000e+07 : f32
    %78 = vector.broadcast %cst_49 : f32 to vector<8x128xf32>
    %79 = arith.select %77, %78, %55 : vector<8x128xi1>, vector<8x128xf32>
    %c0_50 = arith.constant 0 : index
    %c0_51 = arith.constant 0 : index
    %80 = vector.load %arg25[%c0_50, %c0_51] : memref<8x128xf32, #tpu.memory_space<vmem>>, vector<8x128xf32>
    tpu.vector_store %arg25[%c0_50, %c0_51], %79 {strides = array<i32>} : memref<8x128xf32, #tpu.memory_space<vmem>>, vector<8x128xf32>,
    %cst_52 = arith.constant dense<0.000000e+00> : vector<8x768xf32>
    %81 = tpu.matmul %74, %12, %cst_52 {dimension_numbers = #tpu.dot_dimension_numbers<[1], [0], [0], [1], [0, 0, 1, 1], [], []>} : vector<8x128xf32>, vector<128x768xf32>, vector<8x768xf32> -> vector<8x768xf32>
    %82 = vector.extract_strided_slice %81 {offsets = [0, 512], sizes = [8, 128], strides = [1, 1]} : vector<8x768xf32> to vector<8x128xf32>
    %83 = vector.broadcast %16 : vector<1x128xf32> to vector<8x128xf32>
    %84 = arith.addf %82, %83 : vector<8x128xf32>
    %cst_53 = arith.constant dense<0.000000e+00> : vector<8x1024xf32>
    %85 = tpu.matmul %84, %4, %cst_53 {dimension_numbers = #tpu.dot_dimension_numbers<[1], [0], [0], [1], [0, 0, 1, 1], [], []>} : vector<8x128xf32>, vector<128x1024xf32>, vector<8x1024xf32> -> vector<8x1024xf32>
    %86 = arith.addf %85, %6 : vector<8x1024xf32>
    %cst_54 = arith.constant dense<0xFF800000> : vector<8xf32>
    %87 = vector.multi_reduction <maximumf>, %86, %cst_54 [1] : vector<8x1024xf32> to vector<8xf32>
    %88 = vector.shape_cast %87 : vector<8xf32> to vector<8x1xf32>
    %89 = vector.broadcast %88 : vector<8x1xf32> to vector<8x1024xf32>
    %90 = arith.subf %86, %89 : vector<8x1024xf32>
    %91 = math.exp %90 : vector<8x1024xf32>
    %cst_55 = arith.constant dense<0.000000e+00> : vector<8xf32>
    %92 = vector.multi_reduction <add>, %91, %cst_55 [1] : vector<8x1024xf32> to vector<8xf32>
    %93 = vector.shape_cast %92 : vector<8xf32> to vector<8x1xf32>
    %94 = tpu.reciprocal %93 {approx = true} : vector<8x1xf32> -> vector<8x1xf32>
    %95 = vector.broadcast %94 : vector<8x1xf32> to vector<8x1024xf32>
    %96 = arith.mulf %91, %95 : vector<8x1024xf32>
    %cst_56 = arith.constant dense<0.000000e+00> : vector<8x128xf32>
    %97 = tpu.matmul %96, %5, %cst_56 {dimension_numbers = #tpu.dot_dimension_numbers<[1], [0], [0], [1], [0, 0, 1, 1], [], []>} : vector<8x1024xf32>, vector<1024x128xf32>, vector<8x128xf32> -> vector<8x128xf32>
    %98 = arith.addf %3, %97 : vector<8x128xf32>
    %cst_57 = arith.constant dense<0.000000e+00> : vector<8x640xf32>
    %99 = tpu.matmul %98, %13, %cst_57 {dimension_numbers = #tpu.dot_dimension_numbers<[1], [0], [0], [1], [0, 0, 1, 1], [], []>} : vector<8x128xf32>, vector<128x640xf32>, vector<8x640xf32> -> vector<8x640xf32>
    %100 = vector.extract_strided_slice %81 {offsets = [0, 640], sizes = [8, 128], strides = [1, 1]} : vector<8x768xf32> to vector<8x128xf32>
    %101 = vector.extract_strided_slice %99 {offsets = [0, 512], sizes = [8, 128], strides = [1, 1]} : vector<8x640xf32> to vector<8x128xf32>
    %102 = arith.addf %100, %101 : vector<8x128xf32>
    %103 = vector.broadcast %17 : vector<1x128xf32> to vector<8x128xf32>
    %104 = arith.addf %102, %103 : vector<8x128xf32>
    %cst_58 = arith.constant dense<0.000000e+00> : vector<8x1024xf32>
    %105 = tpu.matmul %104, %7, %cst_58 {dimension_numbers = #tpu.dot_dimension_numbers<[1], [0], [0], [1], [0, 0, 1, 1], [], []>} : vector<8x128xf32>, vector<128x1024xf32>, vector<8x1024xf32> -> vector<8x1024xf32>
    %106 = arith.mulf %104, %104 : vector<8x128xf32>
    %cst_59 = arith.constant dense<0.000000e+00> : vector<8xf32>
    %107 = vector.multi_reduction <add>, %106, %cst_59 [1] : vector<8x128xf32> to vector<8xf32>
    %108 = vector.shape_cast %107 : vector<8xf32> to vector<8x1xf32>
    %cst_60 = arith.constant 1.000000e-16 : f32
    %109 = vector.broadcast %cst_60 : f32 to vector<8x1xf32>
    %110 = arith.maximumf %108, %109 : vector<8x1xf32>
    %111 = math.rsqrt %110 : vector<8x1xf32>
    %112 = vector.broadcast %111 : vector<8x1xf32> to vector<8x1024xf32>
    %113 = arith.mulf %105, %112 : vector<8x1024xf32>
    %114 = arith.mulf %113, %8 : vector<8x1024xf32>
    %115 = arith.addf %114, %9 : vector<8x1024xf32>
    %c5_i32 = arith.constant 5 : i32
    %116 = arith.muli %arg0, %c5_i32 : i32
    %c0_i32_61 = arith.constant 0 : i32
    %117 = arith.addi %116, %c0_i32_61 : i32
    %c5_i32_62 = arith.constant 5 : i32
    %118 = arith.cmpi slt, %117, %c5_i32_62 : i32
    %c0_63 = arith.constant 0 : index
    %c0_64 = arith.constant 0 : index
    %119 = vector.load %arg26[%c0_63, %c0_64] : memref<8x1024xf32, #tpu.memory_space<vmem>>, vector<8x1024xf32>
    %cst_65 = arith.constant -4.000000e+00 : f32
    %120 = vector.broadcast %cst_65 : f32 to vector<8x1024xf32>
    %121 = arith.select %118, %115, %120 : vector<8x1024xf32>
    %122 = arith.maximumf %119, %121 : vector<8x1024xf32>
    %c0_66 = arith.constant 0 : index
    %c0_67 = arith.constant 0 : index
    %123 = vector.load %arg26[%c0_66, %c0_67] : memref<8x1024xf32, #tpu.memory_space<vmem>>, vector<8x1024xf32>
    tpu.vector_store %arg26[%c0_66, %c0_67], %122 {strides = array<i32>} : memref<8x1024xf32, #tpu.memory_space<vmem>>, vector<8x1024xf32>,
    %124 = vector.extract_strided_slice %81 {offsets = [0, 0], sizes = [8, 512], strides = [1, 1]} : vector<8x768xf32> to vector<8x512xf32>
    %125 = vector.extract_strided_slice %99 {offsets = [0, 0], sizes = [8, 512], strides = [1, 1]} : vector<8x640xf32> to vector<8x512xf32>
    %126 = arith.addf %124, %125 : vector<8x512xf32>
    %127 = vector.extract_strided_slice %49 {offsets = [0, 0], sizes = [8, 512], strides = [1, 1]} : vector<8x640xf32> to vector<8x512xf32>
    %128 = arith.addf %126, %127 : vector<8x512xf32>
    %129 = vector.broadcast %18 : vector<1x512xf32> to vector<8x512xf32>
    %130 = arith.addf %128, %129 : vector<8x512xf32>
    %131 = vector.extract_strided_slice %130 {offsets = [0, 0], sizes = [8, 128], strides = [1, 1]} : vector<8x512xf32> to vector<8x128xf32>
    %132 = arith.negf %131 : vector<8x128xf32>
    %133 = math.exp %132 : vector<8x128xf32>
    %cst_68 = arith.constant 1.000000e+00 : f32
    %134 = vector.broadcast %cst_68 : f32 to vector<8x128xf32>
    %135 = arith.addf %134, %133 : vector<8x128xf32>
    %136 = arith.divf %134, %135 : vector<8x128xf32>
    %137 = vector.extract_strided_slice %130 {offsets = [0, 128], sizes = [8, 128], strides = [1, 1]} : vector<8x512xf32> to vector<8x128xf32>
    %138 = arith.negf %137 : vector<8x128xf32>
    %139 = math.exp %138 : vector<8x128xf32>
    %cst_69 = arith.constant 1.000000e+00 : f32
    %140 = vector.broadcast %cst_69 : f32 to vector<8x128xf32>
    %141 = arith.addf %140, %139 : vector<8x128xf32>
    %142 = arith.divf %140, %141 : vector<8x128xf32>
    %143 = vector.extract_strided_slice %130 {offsets = [0, 256], sizes = [8, 128], strides = [1, 1]} : vector<8x512xf32> to vector<8x128xf32>
    %144 = math.tanh %143 : vector<8x128xf32>
    %145 = vector.extract_strided_slice %130 {offsets = [0, 384], sizes = [8, 128], strides = [1, 1]} : vector<8x512xf32> to vector<8x128xf32>
    %146 = arith.negf %145 : vector<8x128xf32>
    %147 = math.exp %146 : vector<8x128xf32>
    %cst_70 = arith.constant 1.000000e+00 : f32
    %148 = vector.broadcast %cst_70 : f32 to vector<8x128xf32>
    %149 = arith.addf %148, %147 : vector<8x128xf32>
    %150 = arith.divf %148, %149 : vector<8x128xf32>
    %151 = arith.mulf %142, %46 : vector<8x128xf32>
    %152 = arith.mulf %136, %144 : vector<8x128xf32>
    %153 = arith.addf %151, %152 : vector<8x128xf32>
    %154 = math.tanh %153 : vector<8x128xf32>
    %155 = arith.mulf %150, %154 : vector<8x128xf32>
    %cst_71 = arith.constant dense<0.000000e+00> : vector<8x640xf32>
    %156 = tpu.matmul %155, %10, %cst_71 {dimension_numbers = #tpu.dot_dimension_numbers<[1], [0], [0], [1], [0, 0, 1, 1], [], []>} : vector<8x128xf32>, vector<128x640xf32>, vector<8x640xf32> -> vector<8x640xf32>
    %157 = vector.extract_strided_slice %156 {offsets = [0, 512], sizes = [8, 128], strides = [1, 1]} : vector<8x640xf32> to vector<8x128xf32>
    %158 = vector.broadcast %14 : vector<1x128xf32> to vector<8x128xf32>
    %159 = arith.addf %157, %158 : vector<8x128xf32>
    %cst_72 = arith.constant 0.000000e+00 : f32
    %160 = vector.broadcast %cst_72 : f32 to vector<8x128xf32>
    %161 = arith.maximumf %159, %160 : vector<8x128xf32>
    %c0_73 = arith.constant 0 : index
    %c0_74 = arith.constant 0 : index
    %162 = vector.load %arg25[%c0_73, %c0_74] : memref<8x128xf32, #tpu.memory_space<vmem>>, vector<8x128xf32>
    %cst_75 = arith.constant dense<0.000000e+00> : vector<8x128xf32>
    %163 = tpu.matmul %161, %11, %cst_75 {dimension_numbers = #tpu.dot_dimension_numbers<[1], [0], [0], [1], [0, 0, 1, 1], [], []>} : vector<8x128xf32>, vector<128x128xf32>, vector<8x128xf32> -> vector<8x128xf32>
    %164 = vector.broadcast %15 : vector<1x128xf32> to vector<8x128xf32>
    %165 = arith.addf %163, %164 : vector<8x128xf32>
    %166 = arith.addf %165, %162 : vector<8x128xf32>
    %c1 = arith.constant 1 : index
    %c0_76 = arith.constant 0 : index
    %c0_77 = arith.constant 0 : index
    %167 = vector.load %arg21[%c1, %c0_76, %c0_77] : memref<5x8x128xf32, #tpu.memory_space<vmem>>, vector<1x8x128xf32>
    %168 = vector.shape_cast %167 : vector<1x8x128xf32> to vector<8x128xf32>
    %169 = vector.shape_cast %166 : vector<8x128xf32> to vector<1x8x128xf32>
    tpu.vector_store %arg21[%c1, %c0_76, %c0_77], %169 {strides = array<i32>} : memref<5x8x128xf32, #tpu.memory_space<vmem>>, vector<1x8x128xf32>,
    %cst_78 = arith.constant dense<0xFF800000> : vector<8xf32>
    %170 = vector.multi_reduction <maximumf>, %166, %cst_78 [1] : vector<8x128xf32> to vector<8xf32>
    %171 = vector.shape_cast %170 : vector<8xf32> to vector<8x1xf32>
    %172 = vector.broadcast %171 : vector<8x1xf32> to vector<8x128xf32>
    %173 = arith.cmpf oeq, %166, %172 : vector<8x128xf32>
    %c128_i32_79 = arith.constant 128 : i32
    %174 = vector.broadcast %c128_i32_79 : i32 to vector<8x128xi32>
    %175 = arith.select %173, %19, %174 : vector<8x128xi1>, vector<8x128xi32>
    %cst_80 = arith.constant dense<2147483647> : vector<8xi32>
    %176 = vector.multi_reduction <minsi>, %175, %cst_80 [1] : vector<8x128xi32> to vector<8xi32>
    %177 = vector.shape_cast %176 : vector<8xi32> to vector<8x1xi32>
    %178 = vector.broadcast %177 : vector<8x1xi32> to vector<8x128xi32>
    %179 = arith.cmpi eq, %19, %178 : vector<8x128xi32>
    %180 = arith.extui %179 : vector<8x128xi1> to vector<8x128xi32>
    %181 = arith.sitofp %180 : vector<8x128xi32> to vector<8x128xf32>
    %cst_81 = arith.constant 0.000000e+00 : f32
    %182 = vector.broadcast %cst_81 : f32 to vector<8x128xf32>
    %183 = arith.cmpf ogt, %181, %182 : vector<8x128xf32>
    %184 = arith.andi %183, %21 : vector<8x128xi1>
    %cst_82 = arith.constant -1.000000e+07 : f32
    %185 = vector.broadcast %cst_82 : f32 to vector<8x128xf32>
    %186 = arith.select %184, %185, %162 : vector<8x128xi1>, vector<8x128xf32>
    %c0_83 = arith.constant 0 : index
    %c0_84 = arith.constant 0 : index
    %187 = vector.load %arg25[%c0_83, %c0_84] : memref<8x128xf32, #tpu.memory_space<vmem>>, vector<8x128xf32>
    tpu.vector_store %arg25[%c0_83, %c0_84], %186 {strides = array<i32>} : memref<8x128xf32, #tpu.memory_space<vmem>>, vector<8x128xf32>,
    %cst_85 = arith.constant dense<0.000000e+00> : vector<8x768xf32>
    %188 = tpu.matmul %181, %12, %cst_85 {dimension_numbers = #tpu.dot_dimension_numbers<[1], [0], [0], [1], [0, 0, 1, 1], [], []>} : vector<8x128xf32>, vector<128x768xf32>, vector<8x768xf32> -> vector<8x768xf32>
    %189 = vector.extract_strided_slice %188 {offsets = [0, 512], sizes = [8, 128], strides = [1, 1]} : vector<8x768xf32> to vector<8x128xf32>
    %190 = vector.broadcast %16 : vector<1x128xf32> to vector<8x128xf32>
    %191 = arith.addf %189, %190 : vector<8x128xf32>
    %cst_86 = arith.constant dense<0.000000e+00> : vector<8x1024xf32>
    %192 = tpu.matmul %191, %4, %cst_86 {dimension_numbers = #tpu.dot_dimension_numbers<[1], [0], [0], [1], [0, 0, 1, 1], [], []>} : vector<8x128xf32>, vector<128x1024xf32>, vector<8x1024xf32> -> vector<8x1024xf32>
    %193 = arith.addf %192, %6 : vector<8x1024xf32>
    %cst_87 = arith.constant dense<0xFF800000> : vector<8xf32>
    %194 = vector.multi_reduction <maximumf>, %193, %cst_87 [1] : vector<8x1024xf32> to vector<8xf32>
    %195 = vector.shape_cast %194 : vector<8xf32> to vector<8x1xf32>
    %196 = vector.broadcast %195 : vector<8x1xf32> to vector<8x1024xf32>
    %197 = arith.subf %193, %196 : vector<8x1024xf32>
    %198 = math.exp %197 : vector<8x1024xf32>
    %cst_88 = arith.constant dense<0.000000e+00> : vector<8xf32>
    %199 = vector.multi_reduction <add>, %198, %cst_88 [1] : vector<8x1024xf32> to vector<8xf32>
    %200 = vector.shape_cast %199 : vector<8xf32> to vector<8x1xf32>
    %201 = tpu.reciprocal %200 {approx = true} : vector<8x1xf32> -> vector<8x1xf32>
    %202 = vector.broadcast %201 : vector<8x1xf32> to vector<8x1024xf32>
    %203 = arith.mulf %198, %202 : vector<8x1024xf32>
    %cst_89 = arith.constant dense<0.000000e+00> : vector<8x128xf32>
    %204 = tpu.matmul %203, %5, %cst_89 {dimension_numbers = #tpu.dot_dimension_numbers<[1], [0], [0], [1], [0, 0, 1, 1], [], []>} : vector<8x1024xf32>, vector<1024x128xf32>, vector<8x128xf32> -> vector<8x128xf32>
    %205 = arith.addf %3, %204 : vector<8x128xf32>
    %cst_90 = arith.constant dense<0.000000e+00> : vector<8x640xf32>
    %206 = tpu.matmul %205, %13, %cst_90 {dimension_numbers = #tpu.dot_dimension_numbers<[1], [0], [0], [1], [0, 0, 1, 1], [], []>} : vector<8x128xf32>, vector<128x640xf32>, vector<8x640xf32> -> vector<8x640xf32>
    %207 = vector.extract_strided_slice %188 {offsets = [0, 640], sizes = [8, 128], strides = [1, 1]} : vector<8x768xf32> to vector<8x128xf32>
    %208 = vector.extract_strided_slice %206 {offsets = [0, 512], sizes = [8, 128], strides = [1, 1]} : vector<8x640xf32> to vector<8x128xf32>
    %209 = arith.addf %207, %208 : vector<8x128xf32>
    %210 = vector.broadcast %17 : vector<1x128xf32> to vector<8x128xf32>
    %211 = arith.addf %209, %210 : vector<8x128xf32>
    %cst_91 = arith.constant dense<0.000000e+00> : vector<8x1024xf32>
    %212 = tpu.matmul %211, %7, %cst_91 {dimension_numbers = #tpu.dot_dimension_numbers<[1], [0], [0], [1], [0, 0, 1, 1], [], []>} : vector<8x128xf32>, vector<128x1024xf32>, vector<8x1024xf32> -> vector<8x1024xf32>
    %213 = arith.mulf %211, %211 : vector<8x128xf32>
    %cst_92 = arith.constant dense<0.000000e+00> : vector<8xf32>
    %214 = vector.multi_reduction <add>, %213, %cst_92 [1] : vector<8x128xf32> to vector<8xf32>
    %215 = vector.shape_cast %214 : vector<8xf32> to vector<8x1xf32>
    %cst_93 = arith.constant 1.000000e-16 : f32
    %216 = vector.broadcast %cst_93 : f32 to vector<8x1xf32>
    %217 = arith.maximumf %215, %216 : vector<8x1xf32>
    %218 = math.rsqrt %217 : vector<8x1xf32>
    %219 = vector.broadcast %218 : vector<8x1xf32> to vector<8x1024xf32>
    %220 = arith.mulf %212, %219 : vector<8x1024xf32>
    %221 = arith.mulf %220, %8 : vector<8x1024xf32>
    %222 = arith.addf %221, %9 : vector<8x1024xf32>
    %c5_i32_94 = arith.constant 5 : i32
    %223 = arith.muli %arg0, %c5_i32_94 : i32
    %c1_i32_95 = arith.constant 1 : i32
    %224 = arith.addi %223, %c1_i32_95 : i32
    %c5_i32_96 = arith.constant 5 : i32
    %225 = arith.cmpi slt, %224, %c5_i32_96 : i32
    %c0_97 = arith.constant 0 : index
    %c0_98 = arith.constant 0 : index
    %226 = vector.load %arg26[%c0_97, %c0_98] : memref<8x1024xf32, #tpu.memory_space<vmem>>, vector<8x1024xf32>
    %cst_99 = arith.constant -4.000000e+00 : f32
    %227 = vector.broadcast %cst_99 : f32 to vector<8x1024xf32>
    %228 = arith.select %225, %222, %227 : vector<8x1024xf32>
    %229 = arith.maximumf %226, %228 : vector<8x1024xf32>
    %c0_100 = arith.constant 0 : index
    %c0_101 = arith.constant 0 : index
    %230 = vector.load %arg26[%c0_100, %c0_101] : memref<8x1024xf32, #tpu.memory_space<vmem>>, vector<8x1024xf32>
    tpu.vector_store %arg26[%c0_100, %c0_101], %229 {strides = array<i32>} : memref<8x1024xf32, #tpu.memory_space<vmem>>, vector<8x1024xf32>,
    %231 = vector.extract_strided_slice %188 {offsets = [0, 0], sizes = [8, 512], strides = [1, 1]} : vector<8x768xf32> to vector<8x512xf32>
    %232 = vector.extract_strided_slice %206 {offsets = [0, 0], sizes = [8, 512], strides = [1, 1]} : vector<8x640xf32> to vector<8x512xf32>
    %233 = arith.addf %231, %232 : vector<8x512xf32>
    %234 = vector.extract_strided_slice %156 {offsets = [0, 0], sizes = [8, 512], strides = [1, 1]} : vector<8x640xf32> to vector<8x512xf32>
    %235 = arith.addf %233, %234 : vector<8x512xf32>
    %236 = vector.broadcast %18 : vector<1x512xf32> to vector<8x512xf32>
    %237 = arith.addf %235, %236 : vector<8x512xf32>
    %238 = vector.extract_strided_slice %237 {offsets = [0, 0], sizes = [8, 128], strides = [1, 1]} : vector<8x512xf32> to vector<8x128xf32>
    %239 = arith.negf %238 : vector<8x128xf32>
    %240 = math.exp %239 : vector<8x128xf32>
    %cst_102 = arith.constant 1.000000e+00 : f32
    %241 = vector.broadcast %cst_102 : f32 to vector<8x128xf32>
    %242 = arith.addf %241, %240 : vector<8x128xf32>
    %243 = arith.divf %241, %242 : vector<8x128xf32>
    %244 = vector.extract_strided_slice %237 {offsets = [0, 128], sizes = [8, 128], strides = [1, 1]} : vector<8x512xf32> to vector<8x128xf32>
    %245 = arith.negf %244 : vector<8x128xf32>
    %246 = math.exp %245 : vector<8x128xf32>
    %cst_103 = arith.constant 1.000000e+00 : f32
    %247 = vector.broadcast %cst_103 : f32 to vector<8x128xf32>
    %248 = arith.addf %247, %246 : vector<8x128xf32>
    %249 = arith.divf %247, %248 : vector<8x128xf32>
    %250 = vector.extract_strided_slice %237 {offsets = [0, 256], sizes = [8, 128], strides = [1, 1]} : vector<8x512xf32> to vector<8x128xf32>
    %251 = math.tanh %250 : vector<8x128xf32>
    %252 = vector.extract_strided_slice %237 {offsets = [0, 384], sizes = [8, 128], strides = [1, 1]} : vector<8x512xf32> to vector<8x128xf32>
    %253 = arith.negf %252 : vector<8x128xf32>
    %254 = math.exp %253 : vector<8x128xf32>
    %cst_104 = arith.constant 1.000000e+00 : f32
    %255 = vector.broadcast %cst_104 : f32 to vector<8x128xf32>
    %256 = arith.addf %255, %254 : vector<8x128xf32>
    %257 = arith.divf %255, %256 : vector<8x128xf32>
    %258 = arith.mulf %249, %153 : vector<8x128xf32>
    %259 = arith.mulf %243, %251 : vector<8x128xf32>
    %260 = arith.addf %258, %259 : vector<8x128xf32>
    %261 = math.tanh %260 : vector<8x128xf32>
    %262 = arith.mulf %257, %261 : vector<8x128xf32>
    %cst_105 = arith.constant dense<0.000000e+00> : vector<8x640xf32>
    %263 = tpu.matmul %262, %10, %cst_105 {dimension_numbers = #tpu.dot_dimension_numbers<[1], [0], [0], [1], [0, 0, 1, 1], [], []>} : vector<8x128xf32>, vector<128x640xf32>, vector<8x640xf32> -> vector<8x640xf32>
    %264 = vector.extract_strided_slice %263 {offsets = [0, 512], sizes = [8, 128], strides = [1, 1]} : vector<8x640xf32> to vector<8x128xf32>
    %265 = vector.broadcast %14 : vector<1x128xf32> to vector<8x128xf32>
    %266 = arith.addf %264, %265 : vector<8x128xf32>
    %cst_106 = arith.constant 0.000000e+00 : f32
    %267 = vector.broadcast %cst_106 : f32 to vector<8x128xf32>
    %268 = arith.maximumf %266, %267 : vector<8x128xf32>
    %c0_107 = arith.constant 0 : index
    %c0_108 = arith.constant 0 : index
    %269 = vector.load %arg25[%c0_107, %c0_108] : memref<8x128xf32, #tpu.memory_space<vmem>>, vector<8x128xf32>
    %cst_109 = arith.constant dense<0.000000e+00> : vector<8x128xf32>
    %270 = tpu.matmul %268, %11, %cst_109 {dimension_numbers = #tpu.dot_dimension_numbers<[1], [0], [0], [1], [0, 0, 1, 1], [], []>} : vector<8x128xf32>, vector<128x128xf32>, vector<8x128xf32> -> vector<8x128xf32>
    %271 = vector.broadcast %15 : vector<1x128xf32> to vector<8x128xf32>
    %272 = arith.addf %270, %271 : vector<8x128xf32>
    %273 = arith.addf %272, %269 : vector<8x128xf32>
    %c2 = arith.constant 2 : index
    %c0_110 = arith.constant 0 : index
    %c0_111 = arith.constant 0 : index
    %274 = vector.load %arg21[%c2, %c0_110, %c0_111] : memref<5x8x128xf32, #tpu.memory_space<vmem>>, vector<1x8x128xf32>
    %275 = vector.shape_cast %274 : vector<1x8x128xf32> to vector<8x128xf32>
    %276 = vector.shape_cast %273 : vector<8x128xf32> to vector<1x8x128xf32>
    tpu.vector_store %arg21[%c2, %c0_110, %c0_111], %276 {strides = array<i32>} : memref<5x8x128xf32, #tpu.memory_space<vmem>>, vector<1x8x128xf32>,
    %cst_112 = arith.constant dense<0xFF800000> : vector<8xf32>
    %277 = vector.multi_reduction <maximumf>, %273, %cst_112 [1] : vector<8x128xf32> to vector<8xf32>
    %278 = vector.shape_cast %277 : vector<8xf32> to vector<8x1xf32>
    %279 = vector.broadcast %278 : vector<8x1xf32> to vector<8x128xf32>
    %280 = arith.cmpf oeq, %273, %279 : vector<8x128xf32>
    %c128_i32_113 = arith.constant 128 : i32
    %281 = vector.broadcast %c128_i32_113 : i32 to vector<8x128xi32>
    %282 = arith.select %280, %19, %281 : vector<8x128xi1>, vector<8x128xi32>
    %cst_114 = arith.constant dense<2147483647> : vector<8xi32>
    %283 = vector.multi_reduction <minsi>, %282, %cst_114 [1] : vector<8x128xi32> to vector<8xi32>
    %284 = vector.shape_cast %283 : vector<8xi32> to vector<8x1xi32>
    %285 = vector.broadcast %284 : vector<8x1xi32> to vector<8x128xi32>
    %286 = arith.cmpi eq, %19, %285 : vector<8x128xi32>
    %287 = arith.extui %286 : vector<8x128xi1> to vector<8x128xi32>
    %288 = arith.sitofp %287 : vector<8x128xi32> to vector<8x128xf32>
    %cst_115 = arith.constant 0.000000e+00 : f32
    %289 = vector.broadcast %cst_115 : f32 to vector<8x128xf32>
    %290 = arith.cmpf ogt, %288, %289 : vector<8x128xf32>
    %291 = arith.andi %290, %21 : vector<8x128xi1>
    %cst_116 = arith.constant -1.000000e+07 : f32
    %292 = vector.broadcast %cst_116 : f32 to vector<8x128xf32>
    %293 = arith.select %291, %292, %269 : vector<8x128xi1>, vector<8x128xf32>
    %c0_117 = arith.constant 0 : index
    %c0_118 = arith.constant 0 : index
    %294 = vector.load %arg25[%c0_117, %c0_118] : memref<8x128xf32, #tpu.memory_space<vmem>>, vector<8x128xf32>
    tpu.vector_store %arg25[%c0_117, %c0_118], %293 {strides = array<i32>} : memref<8x128xf32, #tpu.memory_space<vmem>>, vector<8x128xf32>,
    %cst_119 = arith.constant dense<0.000000e+00> : vector<8x768xf32>
    %295 = tpu.matmul %288, %12, %cst_119 {dimension_numbers = #tpu.dot_dimension_numbers<[1], [0], [0], [1], [0, 0, 1, 1], [], []>} : vector<8x128xf32>, vector<128x768xf32>, vector<8x768xf32> -> vector<8x768xf32>
    %296 = vector.extract_strided_slice %295 {offsets = [0, 512], sizes = [8, 128], strides = [1, 1]} : vector<8x768xf32> to vector<8x128xf32>
    %297 = vector.broadcast %16 : vector<1x128xf32> to vector<8x128xf32>
    %298 = arith.addf %296, %297 : vector<8x128xf32>
    %cst_120 = arith.constant dense<0.000000e+00> : vector<8x1024xf32>
    %299 = tpu.matmul %298, %4, %cst_120 {dimension_numbers = #tpu.dot_dimension_numbers<[1], [0], [0], [1], [0, 0, 1, 1], [], []>} : vector<8x128xf32>, vector<128x1024xf32>, vector<8x1024xf32> -> vector<8x1024xf32>
    %300 = arith.addf %299, %6 : vector<8x1024xf32>
    %cst_121 = arith.constant dense<0xFF800000> : vector<8xf32>
    %301 = vector.multi_reduction <maximumf>, %300, %cst_121 [1] : vector<8x1024xf32> to vector<8xf32>
    %302 = vector.shape_cast %301 : vector<8xf32> to vector<8x1xf32>
    %303 = vector.broadcast %302 : vector<8x1xf32> to vector<8x1024xf32>
    %304 = arith.subf %300, %303 : vector<8x1024xf32>
    %305 = math.exp %304 : vector<8x1024xf32>
    %cst_122 = arith.constant dense<0.000000e+00> : vector<8xf32>
    %306 = vector.multi_reduction <add>, %305, %cst_122 [1] : vector<8x1024xf32> to vector<8xf32>
    %307 = vector.shape_cast %306 : vector<8xf32> to vector<8x1xf32>
    %308 = tpu.reciprocal %307 {approx = true} : vector<8x1xf32> -> vector<8x1xf32>
    %309 = vector.broadcast %308 : vector<8x1xf32> to vector<8x1024xf32>
    %310 = arith.mulf %305, %309 : vector<8x1024xf32>
    %cst_123 = arith.constant dense<0.000000e+00> : vector<8x128xf32>
    %311 = tpu.matmul %310, %5, %cst_123 {dimension_numbers = #tpu.dot_dimension_numbers<[1], [0], [0], [1], [0, 0, 1, 1], [], []>} : vector<8x1024xf32>, vector<1024x128xf32>, vector<8x128xf32> -> vector<8x128xf32>
    %312 = arith.addf %3, %311 : vector<8x128xf32>
    %cst_124 = arith.constant dense<0.000000e+00> : vector<8x640xf32>
    %313 = tpu.matmul %312, %13, %cst_124 {dimension_numbers = #tpu.dot_dimension_numbers<[1], [0], [0], [1], [0, 0, 1, 1], [], []>} : vector<8x128xf32>, vector<128x640xf32>, vector<8x640xf32> -> vector<8x640xf32>
    %314 = vector.extract_strided_slice %295 {offsets = [0, 640], sizes = [8, 128], strides = [1, 1]} : vector<8x768xf32> to vector<8x128xf32>
    %315 = vector.extract_strided_slice %313 {offsets = [0, 512], sizes = [8, 128], strides = [1, 1]} : vector<8x640xf32> to vector<8x128xf32>
    %316 = arith.addf %314, %315 : vector<8x128xf32>
    %317 = vector.broadcast %17 : vector<1x128xf32> to vector<8x128xf32>
    %318 = arith.addf %316, %317 : vector<8x128xf32>
    %cst_125 = arith.constant dense<0.000000e+00> : vector<8x1024xf32>
    %319 = tpu.matmul %318, %7, %cst_125 {dimension_numbers = #tpu.dot_dimension_numbers<[1], [0], [0], [1], [0, 0, 1, 1], [], []>} : vector<8x128xf32>, vector<128x1024xf32>, vector<8x1024xf32> -> vector<8x1024xf32>
    %320 = arith.mulf %318, %318 : vector<8x128xf32>
    %cst_126 = arith.constant dense<0.000000e+00> : vector<8xf32>
    %321 = vector.multi_reduction <add>, %320, %cst_126 [1] : vector<8x128xf32> to vector<8xf32>
    %322 = vector.shape_cast %321 : vector<8xf32> to vector<8x1xf32>
    %cst_127 = arith.constant 1.000000e-16 : f32
    %323 = vector.broadcast %cst_127 : f32 to vector<8x1xf32>
    %324 = arith.maximumf %322, %323 : vector<8x1xf32>
    %325 = math.rsqrt %324 : vector<8x1xf32>
    %326 = vector.broadcast %325 : vector<8x1xf32> to vector<8x1024xf32>
    %327 = arith.mulf %319, %326 : vector<8x1024xf32>
    %328 = arith.mulf %327, %8 : vector<8x1024xf32>
    %329 = arith.addf %328, %9 : vector<8x1024xf32>
    %c5_i32_128 = arith.constant 5 : i32
    %330 = arith.muli %arg0, %c5_i32_128 : i32
    %c2_i32 = arith.constant 2 : i32
    %331 = arith.addi %330, %c2_i32 : i32
    %c5_i32_129 = arith.constant 5 : i32
    %332 = arith.cmpi slt, %331, %c5_i32_129 : i32
    %c0_130 = arith.constant 0 : index
    %c0_131 = arith.constant 0 : index
    %333 = vector.load %arg26[%c0_130, %c0_131] : memref<8x1024xf32, #tpu.memory_space<vmem>>, vector<8x1024xf32>
    %cst_132 = arith.constant -4.000000e+00 : f32
    %334 = vector.broadcast %cst_132 : f32 to vector<8x1024xf32>
    %335 = arith.select %332, %329, %334 : vector<8x1024xf32>
    %336 = arith.maximumf %333, %335 : vector<8x1024xf32>
    %c0_133 = arith.constant 0 : index
    %c0_134 = arith.constant 0 : index
    %337 = vector.load %arg26[%c0_133, %c0_134] : memref<8x1024xf32, #tpu.memory_space<vmem>>, vector<8x1024xf32>
    tpu.vector_store %arg26[%c0_133, %c0_134], %336 {strides = array<i32>} : memref<8x1024xf32, #tpu.memory_space<vmem>>, vector<8x1024xf32>,
    %338 = vector.extract_strided_slice %295 {offsets = [0, 0], sizes = [8, 512], strides = [1, 1]} : vector<8x768xf32> to vector<8x512xf32>
    %339 = vector.extract_strided_slice %313 {offsets = [0, 0], sizes = [8, 512], strides = [1, 1]} : vector<8x640xf32> to vector<8x512xf32>
    %340 = arith.addf %338, %339 : vector<8x512xf32>
    %341 = vector.extract_strided_slice %263 {offsets = [0, 0], sizes = [8, 512], strides = [1, 1]} : vector<8x640xf32> to vector<8x512xf32>
    %342 = arith.addf %340, %341 : vector<8x512xf32>
    %343 = vector.broadcast %18 : vector<1x512xf32> to vector<8x512xf32>
    %344 = arith.addf %342, %343 : vector<8x512xf32>
    %345 = vector.extract_strided_slice %344 {offsets = [0, 0], sizes = [8, 128], strides = [1, 1]} : vector<8x512xf32> to vector<8x128xf32>
    %346 = arith.negf %345 : vector<8x128xf32>
    %347 = math.exp %346 : vector<8x128xf32>
    %cst_135 = arith.constant 1.000000e+00 : f32
    %348 = vector.broadcast %cst_135 : f32 to vector<8x128xf32>
    %349 = arith.addf %348, %347 : vector<8x128xf32>
    %350 = arith.divf %348, %349 : vector<8x128xf32>
    %351 = vector.extract_strided_slice %344 {offsets = [0, 128], sizes = [8, 128], strides = [1, 1]} : vector<8x512xf32> to vector<8x128xf32>
    %352 = arith.negf %351 : vector<8x128xf32>
    %353 = math.exp %352 : vector<8x128xf32>
    %cst_136 = arith.constant 1.000000e+00 : f32
    %354 = vector.broadcast %cst_136 : f32 to vector<8x128xf32>
    %355 = arith.addf %354, %353 : vector<8x128xf32>
    %356 = arith.divf %354, %355 : vector<8x128xf32>
    %357 = vector.extract_strided_slice %344 {offsets = [0, 256], sizes = [8, 128], strides = [1, 1]} : vector<8x512xf32> to vector<8x128xf32>
    %358 = math.tanh %357 : vector<8x128xf32>
    %359 = vector.extract_strided_slice %344 {offsets = [0, 384], sizes = [8, 128], strides = [1, 1]} : vector<8x512xf32> to vector<8x128xf32>
    %360 = arith.negf %359 : vector<8x128xf32>
    %361 = math.exp %360 : vector<8x128xf32>
    %cst_137 = arith.constant 1.000000e+00 : f32
    %362 = vector.broadcast %cst_137 : f32 to vector<8x128xf32>
    %363 = arith.addf %362, %361 : vector<8x128xf32>
    %364 = arith.divf %362, %363 : vector<8x128xf32>
    %365 = arith.mulf %356, %260 : vector<8x128xf32>
    %366 = arith.mulf %350, %358 : vector<8x128xf32>
    %367 = arith.addf %365, %366 : vector<8x128xf32>
    %368 = math.tanh %367 : vector<8x128xf32>
    %369 = arith.mulf %364, %368 : vector<8x128xf32>
    %cst_138 = arith.constant dense<0.000000e+00> : vector<8x640xf32>
    %370 = tpu.matmul %369, %10, %cst_138 {dimension_numbers = #tpu.dot_dimension_numbers<[1], [0], [0], [1], [0, 0, 1, 1], [], []>} : vector<8x128xf32>, vector<128x640xf32>, vector<8x640xf32> -> vector<8x640xf32>
    %371 = vector.extract_strided_slice %370 {offsets = [0, 512], sizes = [8, 128], strides = [1, 1]} : vector<8x640xf32> to vector<8x128xf32>
    %372 = vector.broadcast %14 : vector<1x128xf32> to vector<8x128xf32>
    %373 = arith.addf %371, %372 : vector<8x128xf32>
    %cst_139 = arith.constant 0.000000e+00 : f32
    %374 = vector.broadcast %cst_139 : f32 to vector<8x128xf32>
    %375 = arith.maximumf %373, %374 : vector<8x128xf32>
    %c0_140 = arith.constant 0 : index
    %c0_141 = arith.constant 0 : index
    %376 = vector.load %arg25[%c0_140, %c0_141] : memref<8x128xf32, #tpu.memory_space<vmem>>, vector<8x128xf32>
    %cst_142 = arith.constant dense<0.000000e+00> : vector<8x128xf32>
    %377 = tpu.matmul %375, %11, %cst_142 {dimension_numbers = #tpu.dot_dimension_numbers<[1], [0], [0], [1], [0, 0, 1, 1], [], []>} : vector<8x128xf32>, vector<128x128xf32>, vector<8x128xf32> -> vector<8x128xf32>
    %378 = vector.broadcast %15 : vector<1x128xf32> to vector<8x128xf32>
    %379 = arith.addf %377, %378 : vector<8x128xf32>
    %380 = arith.addf %379, %376 : vector<8x128xf32>
    %c3 = arith.constant 3 : index
    %c0_143 = arith.constant 0 : index
    %c0_144 = arith.constant 0 : index
    %381 = vector.load %arg21[%c3, %c0_143, %c0_144] : memref<5x8x128xf32, #tpu.memory_space<vmem>>, vector<1x8x128xf32>
    %382 = vector.shape_cast %381 : vector<1x8x128xf32> to vector<8x128xf32>
    %383 = vector.shape_cast %380 : vector<8x128xf32> to vector<1x8x128xf32>
    tpu.vector_store %arg21[%c3, %c0_143, %c0_144], %383 {strides = array<i32>} : memref<5x8x128xf32, #tpu.memory_space<vmem>>, vector<1x8x128xf32>,
    %cst_145 = arith.constant dense<0xFF800000> : vector<8xf32>
    %384 = vector.multi_reduction <maximumf>, %380, %cst_145 [1] : vector<8x128xf32> to vector<8xf32>
    %385 = vector.shape_cast %384 : vector<8xf32> to vector<8x1xf32>
    %386 = vector.broadcast %385 : vector<8x1xf32> to vector<8x128xf32>
    %387 = arith.cmpf oeq, %380, %386 : vector<8x128xf32>
    %c128_i32_146 = arith.constant 128 : i32
    %388 = vector.broadcast %c128_i32_146 : i32 to vector<8x128xi32>
    %389 = arith.select %387, %19, %388 : vector<8x128xi1>, vector<8x128xi32>
    %cst_147 = arith.constant dense<2147483647> : vector<8xi32>
    %390 = vector.multi_reduction <minsi>, %389, %cst_147 [1] : vector<8x128xi32> to vector<8xi32>
    %391 = vector.shape_cast %390 : vector<8xi32> to vector<8x1xi32>
    %392 = vector.broadcast %391 : vector<8x1xi32> to vector<8x128xi32>
    %393 = arith.cmpi eq, %19, %392 : vector<8x128xi32>
    %394 = arith.extui %393 : vector<8x128xi1> to vector<8x128xi32>
    %395 = arith.sitofp %394 : vector<8x128xi32> to vector<8x128xf32>
    %cst_148 = arith.constant 0.000000e+00 : f32
    %396 = vector.broadcast %cst_148 : f32 to vector<8x128xf32>
    %397 = arith.cmpf ogt, %395, %396 : vector<8x128xf32>
    %398 = arith.andi %397, %21 : vector<8x128xi1>
    %cst_149 = arith.constant -1.000000e+07 : f32
    %399 = vector.broadcast %cst_149 : f32 to vector<8x128xf32>
    %400 = arith.select %398, %399, %376 : vector<8x128xi1>, vector<8x128xf32>
    %c0_150 = arith.constant 0 : index
    %c0_151 = arith.constant 0 : index
    %401 = vector.load %arg25[%c0_150, %c0_151] : memref<8x128xf32, #tpu.memory_space<vmem>>, vector<8x128xf32>
    tpu.vector_store %arg25[%c0_150, %c0_151], %400 {strides = array<i32>} : memref<8x128xf32, #tpu.memory_space<vmem>>, vector<8x128xf32>,
    %cst_152 = arith.constant dense<0.000000e+00> : vector<8x768xf32>
    %402 = tpu.matmul %395, %12, %cst_152 {dimension_numbers = #tpu.dot_dimension_numbers<[1], [0], [0], [1], [0, 0, 1, 1], [], []>} : vector<8x128xf32>, vector<128x768xf32>, vector<8x768xf32> -> vector<8x768xf32>
    %403 = vector.extract_strided_slice %402 {offsets = [0, 512], sizes = [8, 128], strides = [1, 1]} : vector<8x768xf32> to vector<8x128xf32>
    %404 = vector.broadcast %16 : vector<1x128xf32> to vector<8x128xf32>
    %405 = arith.addf %403, %404 : vector<8x128xf32>
    %cst_153 = arith.constant dense<0.000000e+00> : vector<8x1024xf32>
    %406 = tpu.matmul %405, %4, %cst_153 {dimension_numbers = #tpu.dot_dimension_numbers<[1], [0], [0], [1], [0, 0, 1, 1], [], []>} : vector<8x128xf32>, vector<128x1024xf32>, vector<8x1024xf32> -> vector<8x1024xf32>
    %407 = arith.addf %406, %6 : vector<8x1024xf32>
    %cst_154 = arith.constant dense<0xFF800000> : vector<8xf32>
    %408 = vector.multi_reduction <maximumf>, %407, %cst_154 [1] : vector<8x1024xf32> to vector<8xf32>
    %409 = vector.shape_cast %408 : vector<8xf32> to vector<8x1xf32>
    %410 = vector.broadcast %409 : vector<8x1xf32> to vector<8x1024xf32>
    %411 = arith.subf %407, %410 : vector<8x1024xf32>
    %412 = math.exp %411 : vector<8x1024xf32>
    %cst_155 = arith.constant dense<0.000000e+00> : vector<8xf32>
    %413 = vector.multi_reduction <add>, %412, %cst_155 [1] : vector<8x1024xf32> to vector<8xf32>
    %414 = vector.shape_cast %413 : vector<8xf32> to vector<8x1xf32>
    %415 = tpu.reciprocal %414 {approx = true} : vector<8x1xf32> -> vector<8x1xf32>
    %416 = vector.broadcast %415 : vector<8x1xf32> to vector<8x1024xf32>
    %417 = arith.mulf %412, %416 : vector<8x1024xf32>
    %cst_156 = arith.constant dense<0.000000e+00> : vector<8x128xf32>
    %418 = tpu.matmul %417, %5, %cst_156 {dimension_numbers = #tpu.dot_dimension_numbers<[1], [0], [0], [1], [0, 0, 1, 1], [], []>} : vector<8x1024xf32>, vector<1024x128xf32>, vector<8x128xf32> -> vector<8x128xf32>
    %419 = arith.addf %3, %418 : vector<8x128xf32>
    %cst_157 = arith.constant dense<0.000000e+00> : vector<8x640xf32>
    %420 = tpu.matmul %419, %13, %cst_157 {dimension_numbers = #tpu.dot_dimension_numbers<[1], [0], [0], [1], [0, 0, 1, 1], [], []>} : vector<8x128xf32>, vector<128x640xf32>, vector<8x640xf32> -> vector<8x640xf32>
    %421 = vector.extract_strided_slice %402 {offsets = [0, 640], sizes = [8, 128], strides = [1, 1]} : vector<8x768xf32> to vector<8x128xf32>
    %422 = vector.extract_strided_slice %420 {offsets = [0, 512], sizes = [8, 128], strides = [1, 1]} : vector<8x640xf32> to vector<8x128xf32>
    %423 = arith.addf %421, %422 : vector<8x128xf32>
    %424 = vector.broadcast %17 : vector<1x128xf32> to vector<8x128xf32>
    %425 = arith.addf %423, %424 : vector<8x128xf32>
    %cst_158 = arith.constant dense<0.000000e+00> : vector<8x1024xf32>
    %426 = tpu.matmul %425, %7, %cst_158 {dimension_numbers = #tpu.dot_dimension_numbers<[1], [0], [0], [1], [0, 0, 1, 1], [], []>} : vector<8x128xf32>, vector<128x1024xf32>, vector<8x1024xf32> -> vector<8x1024xf32>
    %427 = arith.mulf %425, %425 : vector<8x128xf32>
    %cst_159 = arith.constant dense<0.000000e+00> : vector<8xf32>
    %428 = vector.multi_reduction <add>, %427, %cst_159 [1] : vector<8x128xf32> to vector<8xf32>
    %429 = vector.shape_cast %428 : vector<8xf32> to vector<8x1xf32>
    %cst_160 = arith.constant 1.000000e-16 : f32
    %430 = vector.broadcast %cst_160 : f32 to vector<8x1xf32>
    %431 = arith.maximumf %429, %430 : vector<8x1xf32>
    %432 = math.rsqrt %431 : vector<8x1xf32>
    %433 = vector.broadcast %432 : vector<8x1xf32> to vector<8x1024xf32>
    %434 = arith.mulf %426, %433 : vector<8x1024xf32>
    %435 = arith.mulf %434, %8 : vector<8x1024xf32>
    %436 = arith.addf %435, %9 : vector<8x1024xf32>
    %c5_i32_161 = arith.constant 5 : i32
    %437 = arith.muli %arg0, %c5_i32_161 : i32
    %c3_i32 = arith.constant 3 : i32
    %438 = arith.addi %437, %c3_i32 : i32
    %c5_i32_162 = arith.constant 5 : i32
    %439 = arith.cmpi slt, %438, %c5_i32_162 : i32
    %c0_163 = arith.constant 0 : index
    %c0_164 = arith.constant 0 : index
    %440 = vector.load %arg26[%c0_163, %c0_164] : memref<8x1024xf32, #tpu.memory_space<vmem>>, vector<8x1024xf32>
    %cst_165 = arith.constant -4.000000e+00 : f32
    %441 = vector.broadcast %cst_165 : f32 to vector<8x1024xf32>
    %442 = arith.select %439, %436, %441 : vector<8x1024xf32>
    %443 = arith.maximumf %440, %442 : vector<8x1024xf32>
    %c0_166 = arith.constant 0 : index
    %c0_167 = arith.constant 0 : index
    %444 = vector.load %arg26[%c0_166, %c0_167] : memref<8x1024xf32, #tpu.memory_space<vmem>>, vector<8x1024xf32>
    tpu.vector_store %arg26[%c0_166, %c0_167], %443 {strides = array<i32>} : memref<8x1024xf32, #tpu.memory_space<vmem>>, vector<8x1024xf32>,
    %445 = vector.extract_strided_slice %402 {offsets = [0, 0], sizes = [8, 512], strides = [1, 1]} : vector<8x768xf32> to vector<8x512xf32>
    %446 = vector.extract_strided_slice %420 {offsets = [0, 0], sizes = [8, 512], strides = [1, 1]} : vector<8x640xf32> to vector<8x512xf32>
    %447 = arith.addf %445, %446 : vector<8x512xf32>
    %448 = vector.extract_strided_slice %370 {offsets = [0, 0], sizes = [8, 512], strides = [1, 1]} : vector<8x640xf32> to vector<8x512xf32>
    %449 = arith.addf %447, %448 : vector<8x512xf32>
    %450 = vector.broadcast %18 : vector<1x512xf32> to vector<8x512xf32>
    %451 = arith.addf %449, %450 : vector<8x512xf32>
    %452 = vector.extract_strided_slice %451 {offsets = [0, 0], sizes = [8, 128], strides = [1, 1]} : vector<8x512xf32> to vector<8x128xf32>
    %453 = arith.negf %452 : vector<8x128xf32>
    %454 = math.exp %453 : vector<8x128xf32>
    %cst_168 = arith.constant 1.000000e+00 : f32
    %455 = vector.broadcast %cst_168 : f32 to vector<8x128xf32>
    %456 = arith.addf %455, %454 : vector<8x128xf32>
    %457 = arith.divf %455, %456 : vector<8x128xf32>
    %458 = vector.extract_strided_slice %451 {offsets = [0, 128], sizes = [8, 128], strides = [1, 1]} : vector<8x512xf32> to vector<8x128xf32>
    %459 = arith.negf %458 : vector<8x128xf32>
    %460 = math.exp %459 : vector<8x128xf32>
    %cst_169 = arith.constant 1.000000e+00 : f32
    %461 = vector.broadcast %cst_169 : f32 to vector<8x128xf32>
    %462 = arith.addf %461, %460 : vector<8x128xf32>
    %463 = arith.divf %461, %462 : vector<8x128xf32>
    %464 = vector.extract_strided_slice %451 {offsets = [0, 256], sizes = [8, 128], strides = [1, 1]} : vector<8x512xf32> to vector<8x128xf32>
    %465 = math.tanh %464 : vector<8x128xf32>
    %466 = vector.extract_strided_slice %451 {offsets = [0, 384], sizes = [8, 128], strides = [1, 1]} : vector<8x512xf32> to vector<8x128xf32>
    %467 = arith.negf %466 : vector<8x128xf32>
    %468 = math.exp %467 : vector<8x128xf32>
    %cst_170 = arith.constant 1.000000e+00 : f32
    %469 = vector.broadcast %cst_170 : f32 to vector<8x128xf32>
    %470 = arith.addf %469, %468 : vector<8x128xf32>
    %471 = arith.divf %469, %470 : vector<8x128xf32>
    %472 = arith.mulf %463, %367 : vector<8x128xf32>
    %473 = arith.mulf %457, %465 : vector<8x128xf32>
    %474 = arith.addf %472, %473 : vector<8x128xf32>
    %475 = math.tanh %474 : vector<8x128xf32>
    %476 = arith.mulf %471, %475 : vector<8x128xf32>
    %cst_171 = arith.constant dense<0.000000e+00> : vector<8x640xf32>
    %477 = tpu.matmul %476, %10, %cst_171 {dimension_numbers = #tpu.dot_dimension_numbers<[1], [0], [0], [1], [0, 0, 1, 1], [], []>} : vector<8x128xf32>, vector<128x640xf32>, vector<8x640xf32> -> vector<8x640xf32>
    %478 = vector.extract_strided_slice %477 {offsets = [0, 512], sizes = [8, 128], strides = [1, 1]} : vector<8x640xf32> to vector<8x128xf32>
    %479 = vector.broadcast %14 : vector<1x128xf32> to vector<8x128xf32>
    %480 = arith.addf %478, %479 : vector<8x128xf32>
    %cst_172 = arith.constant 0.000000e+00 : f32
    %481 = vector.broadcast %cst_172 : f32 to vector<8x128xf32>
    %482 = arith.maximumf %480, %481 : vector<8x128xf32>
    %c0_173 = arith.constant 0 : index
    %c0_174 = arith.constant 0 : index
    %483 = vector.load %arg25[%c0_173, %c0_174] : memref<8x128xf32, #tpu.memory_space<vmem>>, vector<8x128xf32>
    %cst_175 = arith.constant dense<0.000000e+00> : vector<8x128xf32>
    %484 = tpu.matmul %482, %11, %cst_175 {dimension_numbers = #tpu.dot_dimension_numbers<[1], [0], [0], [1], [0, 0, 1, 1], [], []>} : vector<8x128xf32>, vector<128x128xf32>, vector<8x128xf32> -> vector<8x128xf32>
    %485 = vector.broadcast %15 : vector<1x128xf32> to vector<8x128xf32>
    %486 = arith.addf %484, %485 : vector<8x128xf32>
    %487 = arith.addf %486, %483 : vector<8x128xf32>
    %c4 = arith.constant 4 : index
    %c0_176 = arith.constant 0 : index
    %c0_177 = arith.constant 0 : index
    %488 = vector.load %arg21[%c4, %c0_176, %c0_177] : memref<5x8x128xf32, #tpu.memory_space<vmem>>, vector<1x8x128xf32>
    %489 = vector.shape_cast %488 : vector<1x8x128xf32> to vector<8x128xf32>
    %490 = vector.shape_cast %487 : vector<8x128xf32> to vector<1x8x128xf32>
    tpu.vector_store %arg21[%c4, %c0_176, %c0_177], %490 {strides = array<i32>} : memref<5x8x128xf32, #tpu.memory_space<vmem>>, vector<1x8x128xf32>,
    %cst_178 = arith.constant dense<0xFF800000> : vector<8xf32>
    %491 = vector.multi_reduction <maximumf>, %487, %cst_178 [1] : vector<8x128xf32> to vector<8xf32>
    %492 = vector.shape_cast %491 : vector<8xf32> to vector<8x1xf32>
    %493 = vector.broadcast %492 : vector<8x1xf32> to vector<8x128xf32>
    %494 = arith.cmpf oeq, %487, %493 : vector<8x128xf32>
    %c128_i32_179 = arith.constant 128 : i32
    %495 = vector.broadcast %c128_i32_179 : i32 to vector<8x128xi32>
    %496 = arith.select %494, %19, %495 : vector<8x128xi1>, vector<8x128xi32>
    %cst_180 = arith.constant dense<2147483647> : vector<8xi32>
    %497 = vector.multi_reduction <minsi>, %496, %cst_180 [1] : vector<8x128xi32> to vector<8xi32>
    %498 = vector.shape_cast %497 : vector<8xi32> to vector<8x1xi32>
    %499 = vector.broadcast %498 : vector<8x1xi32> to vector<8x128xi32>
    %500 = arith.cmpi eq, %19, %499 : vector<8x128xi32>
    %501 = arith.extui %500 : vector<8x128xi1> to vector<8x128xi32>
    %502 = arith.sitofp %501 : vector<8x128xi32> to vector<8x128xf32>
    %cst_181 = arith.constant 0.000000e+00 : f32
    %503 = vector.broadcast %cst_181 : f32 to vector<8x128xf32>
    %504 = arith.cmpf ogt, %502, %503 : vector<8x128xf32>
    %505 = arith.andi %504, %21 : vector<8x128xi1>
    %cst_182 = arith.constant -1.000000e+07 : f32
    %506 = vector.broadcast %cst_182 : f32 to vector<8x128xf32>
    %507 = arith.select %505, %506, %483 : vector<8x128xi1>, vector<8x128xf32>
    %c0_183 = arith.constant 0 : index
    %c0_184 = arith.constant 0 : index
    %508 = vector.load %arg25[%c0_183, %c0_184] : memref<8x128xf32, #tpu.memory_space<vmem>>, vector<8x128xf32>
    tpu.vector_store %arg25[%c0_183, %c0_184], %507 {strides = array<i32>} : memref<8x128xf32, #tpu.memory_space<vmem>>, vector<8x128xf32>,
    %cst_185 = arith.constant dense<0.000000e+00> : vector<8x768xf32>
    %509 = tpu.matmul %502, %12, %cst_185 {dimension_numbers = #tpu.dot_dimension_numbers<[1], [0], [0], [1], [0, 0, 1, 1], [], []>} : vector<8x128xf32>, vector<128x768xf32>, vector<8x768xf32> -> vector<8x768xf32>
    %510 = vector.extract_strided_slice %509 {offsets = [0, 512], sizes = [8, 128], strides = [1, 1]} : vector<8x768xf32> to vector<8x128xf32>
    %511 = vector.broadcast %16 : vector<1x128xf32> to vector<8x128xf32>
    %512 = arith.addf %510, %511 : vector<8x128xf32>
    %cst_186 = arith.constant dense<0.000000e+00> : vector<8x1024xf32>
    %513 = tpu.matmul %512, %4, %cst_186 {dimension_numbers = #tpu.dot_dimension_numbers<[1], [0], [0], [1], [0, 0, 1, 1], [], []>} : vector<8x128xf32>, vector<128x1024xf32>, vector<8x1024xf32> -> vector<8x1024xf32>
    %514 = arith.addf %513, %6 : vector<8x1024xf32>
    %cst_187 = arith.constant dense<0xFF800000> : vector<8xf32>
    %515 = vector.multi_reduction <maximumf>, %514, %cst_187 [1] : vector<8x1024xf32> to vector<8xf32>
    %516 = vector.shape_cast %515 : vector<8xf32> to vector<8x1xf32>
    %517 = vector.broadcast %516 : vector<8x1xf32> to vector<8x1024xf32>
    %518 = arith.subf %514, %517 : vector<8x1024xf32>
    %519 = math.exp %518 : vector<8x1024xf32>
    %cst_188 = arith.constant dense<0.000000e+00> : vector<8xf32>
    %520 = vector.multi_reduction <add>, %519, %cst_188 [1] : vector<8x1024xf32> to vector<8xf32>
    %521 = vector.shape_cast %520 : vector<8xf32> to vector<8x1xf32>
    %522 = tpu.reciprocal %521 {approx = true} : vector<8x1xf32> -> vector<8x1xf32>
    %523 = vector.broadcast %522 : vector<8x1xf32> to vector<8x1024xf32>
    %524 = arith.mulf %519, %523 : vector<8x1024xf32>
    %cst_189 = arith.constant dense<0.000000e+00> : vector<8x128xf32>
    %525 = tpu.matmul %524, %5, %cst_189 {dimension_numbers = #tpu.dot_dimension_numbers<[1], [0], [0], [1], [0, 0, 1, 1], [], []>} : vector<8x1024xf32>, vector<1024x128xf32>, vector<8x128xf32> -> vector<8x128xf32>
    %526 = arith.addf %3, %525 : vector<8x128xf32>
    %cst_190 = arith.constant dense<0.000000e+00> : vector<8x640xf32>
    %527 = tpu.matmul %526, %13, %cst_190 {dimension_numbers = #tpu.dot_dimension_numbers<[1], [0], [0], [1], [0, 0, 1, 1], [], []>} : vector<8x128xf32>, vector<128x640xf32>, vector<8x640xf32> -> vector<8x640xf32>
    %528 = vector.extract_strided_slice %509 {offsets = [0, 640], sizes = [8, 128], strides = [1, 1]} : vector<8x768xf32> to vector<8x128xf32>
    %529 = vector.extract_strided_slice %527 {offsets = [0, 512], sizes = [8, 128], strides = [1, 1]} : vector<8x640xf32> to vector<8x128xf32>
    %530 = arith.addf %528, %529 : vector<8x128xf32>
    %531 = vector.broadcast %17 : vector<1x128xf32> to vector<8x128xf32>
    %532 = arith.addf %530, %531 : vector<8x128xf32>
    %cst_191 = arith.constant dense<0.000000e+00> : vector<8x1024xf32>
    %533 = tpu.matmul %532, %7, %cst_191 {dimension_numbers = #tpu.dot_dimension_numbers<[1], [0], [0], [1], [0, 0, 1, 1], [], []>} : vector<8x128xf32>, vector<128x1024xf32>, vector<8x1024xf32> -> vector<8x1024xf32>
    %534 = arith.mulf %532, %532 : vector<8x128xf32>
    %cst_192 = arith.constant dense<0.000000e+00> : vector<8xf32>
    %535 = vector.multi_reduction <add>, %534, %cst_192 [1] : vector<8x128xf32> to vector<8xf32>
    %536 = vector.shape_cast %535 : vector<8xf32> to vector<8x1xf32>
    %cst_193 = arith.constant 1.000000e-16 : f32
    %537 = vector.broadcast %cst_193 : f32 to vector<8x1xf32>
    %538 = arith.maximumf %536, %537 : vector<8x1xf32>
    %539 = math.rsqrt %538 : vector<8x1xf32>
    %540 = vector.broadcast %539 : vector<8x1xf32> to vector<8x1024xf32>
    %541 = arith.mulf %533, %540 : vector<8x1024xf32>
    %542 = arith.mulf %541, %8 : vector<8x1024xf32>
    %543 = arith.addf %542, %9 : vector<8x1024xf32>
    %c5_i32_194 = arith.constant 5 : i32
    %544 = arith.muli %arg0, %c5_i32_194 : i32
    %c4_i32 = arith.constant 4 : i32
    %545 = arith.addi %544, %c4_i32 : i32
    %c5_i32_195 = arith.constant 5 : i32
    %546 = arith.cmpi slt, %545, %c5_i32_195 : i32
    %c0_196 = arith.constant 0 : index
    %c0_197 = arith.constant 0 : index
    %547 = vector.load %arg26[%c0_196, %c0_197] : memref<8x1024xf32, #tpu.memory_space<vmem>>, vector<8x1024xf32>
    %cst_198 = arith.constant -4.000000e+00 : f32
    %548 = vector.broadcast %cst_198 : f32 to vector<8x1024xf32>
    %549 = arith.select %546, %543, %548 : vector<8x1024xf32>
    %550 = arith.maximumf %547, %549 : vector<8x1024xf32>
    %c0_199 = arith.constant 0 : index
    %c0_200 = arith.constant 0 : index
    %551 = vector.load %arg26[%c0_199, %c0_200] : memref<8x1024xf32, #tpu.memory_space<vmem>>, vector<8x1024xf32>
    tpu.vector_store %arg26[%c0_199, %c0_200], %550 {strides = array<i32>} : memref<8x1024xf32, #tpu.memory_space<vmem>>, vector<8x1024xf32>,
    %552 = vector.extract_strided_slice %509 {offsets = [0, 0], sizes = [8, 512], strides = [1, 1]} : vector<8x768xf32> to vector<8x512xf32>
    %553 = vector.extract_strided_slice %527 {offsets = [0, 0], sizes = [8, 512], strides = [1, 1]} : vector<8x640xf32> to vector<8x512xf32>
    %554 = arith.addf %552, %553 : vector<8x512xf32>
    %555 = vector.extract_strided_slice %477 {offsets = [0, 0], sizes = [8, 512], strides = [1, 1]} : vector<8x640xf32> to vector<8x512xf32>
    %556 = arith.addf %554, %555 : vector<8x512xf32>
    %557 = vector.broadcast %18 : vector<1x512xf32> to vector<8x512xf32>
    %558 = arith.addf %556, %557 : vector<8x512xf32>
    %c0_201 = arith.constant 0 : index
    %c0_202 = arith.constant 0 : index
    %559 = vector.load %arg23[%c0_201, %c0_202] : memref<8x512xf32, #tpu.memory_space<vmem>>, vector<8x512xf32>
    tpu.vector_store %arg23[%c0_201, %c0_202], %558 {strides = array<i32>} : memref<8x512xf32, #tpu.memory_space<vmem>>, vector<8x512xf32>,
    %c0_203 = arith.constant 0 : index
    %c0_204 = arith.constant 0 : index
    %560 = vector.load %arg24[%c0_203, %c0_204] : memref<8x128xf32, #tpu.memory_space<vmem>>, vector<8x128xf32>
    tpu.vector_store %arg24[%c0_203, %c0_204], %474 {strides = array<i32>} : memref<8x128xf32, #tpu.memory_space<vmem>>, vector<8x128xf32>,
    %c0_i32_205 = arith.constant 0 : i32
    %561 = arith.cmpi eq, %arg0, %c0_i32_205 : i32
    %562 = arith.extui %561 : i1 to i32
    %c0_i32_206 = arith.constant 0 : i32
    %563 = arith.cmpi ne, %562, %c0_i32_206 : i32
    scf.if %563 {
      %c0_207 = arith.constant 0 : index
      %c0_208 = arith.constant 0 : index
      %564 = vector.load %arg26[%c0_207, %c0_208] : memref<8x1024xf32, #tpu.memory_space<vmem>>, vector<8x1024xf32>
      %565 = vector.extract_strided_slice %564 {offsets = [0, 0], sizes = [8, 128], strides = [1, 1]} : vector<8x1024xf32> to vector<8x128xf32>
      %566 = vector.extract_strided_slice %564 {offsets = [0, 128], sizes = [8, 128], strides = [1, 1]} : vector<8x1024xf32> to vector<8x128xf32>
      %567 = arith.maximumf %565, %566 : vector<8x128xf32>
      %568 = vector.extract_strided_slice %564 {offsets = [0, 256], sizes = [8, 128], strides = [1, 1]} : vector<8x1024xf32> to vector<8x128xf32>
      %569 = arith.maximumf %567, %568 : vector<8x128xf32>
      %570 = vector.extract_strided_slice %564 {offsets = [0, 384], sizes = [8, 128], strides = [1, 1]} : vector<8x1024xf32> to vector<8x128xf32>
      %571 = arith.maximumf %569, %570 : vector<8x128xf32>
      %572 = vector.extract_strided_slice %564 {offsets = [0, 512], sizes = [8, 128], strides = [1, 1]} : vector<8x1024xf32> to vector<8x128xf32>
      %573 = arith.maximumf %571, %572 : vector<8x128xf32>
      %574 = vector.extract_strided_slice %564 {offsets = [0, 640], sizes = [8, 128], strides = [1, 1]} : vector<8x1024xf32> to vector<8x128xf32>
      %575 = arith.maximumf %573, %574 : vector<8x128xf32>
      %576 = vector.extract_strided_slice %564 {offsets = [0, 768], sizes = [8, 128], strides = [1, 1]} : vector<8x1024xf32> to vector<8x128xf32>
      %577 = arith.maximumf %575, %576 : vector<8x128xf32>
      %578 = vector.extract_strided_slice %564 {offsets = [0, 896], sizes = [8, 128], strides = [1, 1]} : vector<8x1024xf32> to vector<8x128xf32>
      %579 = arith.maximumf %577, %578 : vector<8x128xf32>
      %c0_209 = arith.constant 0 : index
      %c0_210 = arith.constant 0 : index
      %580 = vector.load %arg11[%c0_209, %c0_210] : memref<8x128xf32, #tpu.memory_space<vmem>>, vector<8x128xf32>
      %cst_211 = arith.constant 0.000000e+00 : f32
      %581 = vector.broadcast %cst_211 : f32 to vector<8x128xf32>
      %582 = arith.cmpf ogt, %580, %581 : vector<8x128xf32>
      %cst_212 = arith.constant -1.000000e+00 : f32
      %583 = vector.broadcast %cst_212 : f32 to vector<8x128xf32>
      %584 = arith.select %582, %579, %583 : vector<8x128xi1>, vector<8x128xf32>
      %c0_213 = arith.constant 0 : index
      %c0_214 = arith.constant 0 : index
      %585 = vector.load %arg22[%c0_213, %c0_214] : memref<8x128xf32, #tpu.memory_space<vmem>>, vector<8x128xf32>
      tpu.vector_store %arg22[%c0_213, %c0_214], %584 {strides = array<i32>} : memref<8x128xf32, #tpu.memory_space<vmem>>, vector<8x128xf32>,
    } else {
    }
    return
  }
  func.func @transform_0(%arg0: i32) -> (i32, i32) {
    %c0_i32 = arith.constant 0 : i32
    %c0_i32_0 = arith.constant 0 : i32
    %c0_i32_1 = arith.constant 0 : i32
    return %c0_i32, %c0_i32_0 : i32, i32
  }
  func.func @transform_1(%arg0: i32) -> (i32, i32) {
    %c0_i32 = arith.constant 0 : i32
    %c0_i32_0 = arith.constant 0 : i32
    %c0_i32_1 = arith.constant 0 : i32
    return %c0_i32, %c0_i32_0 : i32, i32
  }
  func.func @transform_2(%arg0: i32) -> (i32, i32) {
    %c0_i32 = arith.constant 0 : i32
    %c0_i32_0 = arith.constant 0 : i32
    %c0_i32_1 = arith.constant 0 : i32
    return %c0_i32, %c0_i32_0 : i32, i32
  }
  func.func @transform_3(%arg0: i32) -> (i32, i32) {
    %c0_i32 = arith.constant 0 : i32
    %c0_i32_0 = arith.constant 0 : i32
    %c0_i32_1 = arith.constant 0 : i32
    return %c0_i32, %c0_i32_0 : i32, i32
  }
  func.func @transform_4(%arg0: i32) -> (i32, i32) {
    %c0_i32 = arith.constant 0 : i32
    %c0_i32_0 = arith.constant 0 : i32
    %c0_i32_1 = arith.constant 0 : i32
    return %c0_i32, %c0_i32_0 : i32, i32
  }
  func.func @transform_5(%arg0: i32) -> (i32, i32) {
    %c0_i32 = arith.constant 0 : i32
    %c0_i32_0 = arith.constant 0 : i32
    %c0_i32_1 = arith.constant 0 : i32
    return %c0_i32, %c0_i32_0 : i32, i32
  }
  func.func @transform_6(%arg0: i32) -> (i32, i32) {
    %c0_i32 = arith.constant 0 : i32
    %c0_i32_0 = arith.constant 0 : i32
    %c0_i32_1 = arith.constant 0 : i32
    return %c0_i32, %c0_i32_0 : i32, i32
  }
  func.func @transform_7(%arg0: i32) -> (i32, i32) {
    %c0_i32 = arith.constant 0 : i32
    %c0_i32_0 = arith.constant 0 : i32
    %c0_i32_1 = arith.constant 0 : i32
    return %c0_i32, %c0_i32_0 : i32, i32
  }
  func.func @transform_8(%arg0: i32) -> (i32, i32) {
    %c0_i32 = arith.constant 0 : i32
    %c0_i32_0 = arith.constant 0 : i32
    %c0_i32_1 = arith.constant 0 : i32
    return %c0_i32, %c0_i32_0 : i32, i32
  }
  func.func @transform_9(%arg0: i32) -> (i32, i32) {
    %c0_i32 = arith.constant 0 : i32
    %c0_i32_0 = arith.constant 0 : i32
    %c0_i32_1 = arith.constant 0 : i32
    return %c0_i32, %c0_i32_0 : i32, i32
  }
  func.func @transform_10(%arg0: i32) -> (i32, i32) {
    %c0_i32 = arith.constant 0 : i32
    %c0_i32_0 = arith.constant 0 : i32
    %c0_i32_1 = arith.constant 0 : i32
    return %c0_i32, %c0_i32_0 : i32, i32
  }
  func.func @transform_11(%arg0: i32) -> (i32, i32) {
    %c0_i32 = arith.constant 0 : i32
    %c0_i32_0 = arith.constant 0 : i32
    %c0_i32_1 = arith.constant 0 : i32
    return %c0_i32, %c0_i32_0 : i32, i32
  }
  func.func @transform_12(%arg0: i32) -> (i32, i32) {
    %c0_i32 = arith.constant 0 : i32
    %c0_i32_0 = arith.constant 0 : i32
    %c0_i32_1 = arith.constant 0 : i32
    return %c0_i32, %c0_i32_0 : i32, i32
  }
  func.func @transform_13(%arg0: i32) -> (i32, i32) {
    %c0_i32 = arith.constant 0 : i32
    %c0_i32_0 = arith.constant 0 : i32
    %c0_i32_1 = arith.constant 0 : i32
    return %c0_i32, %c0_i32_0 : i32, i32
  }
  func.func @transform_14(%arg0: i32) -> (i32, i32) {
    %c0_i32 = arith.constant 0 : i32
    %c0_i32_0 = arith.constant 0 : i32
    %c0_i32_1 = arith.constant 0 : i32
    return %c0_i32, %c0_i32_0 : i32, i32
  }
  func.func @transform_15(%arg0: i32) -> (i32, i32) {
    %c0_i32 = arith.constant 0 : i32
    %c0_i32_0 = arith.constant 0 : i32
    %c0_i32_1 = arith.constant 0 : i32
    return %c0_i32, %c0_i32_0 : i32, i32
  }
  func.func @transform_16(%arg0: i32) -> (i32, i32) {
    %c0_i32 = arith.constant 0 : i32
    %c0_i32_0 = arith.constant 0 : i32
    %c0_i32_1 = arith.constant 0 : i32
    return %c0_i32, %c0_i32_0 : i32, i32
  }
  func.func @transform_17(%arg0: i32) -> (i32, i32) {
    %c0_i32 = arith.constant 0 : i32
    %c0_i32_0 = arith.constant 0 : i32
    %c0_i32_1 = arith.constant 0 : i32
    return %c0_i32, %c0_i32_0 : i32, i32
  }
  func.func @transform_18(%arg0: i32) -> (i32, i32) {
    %c0_i32 = arith.constant 0 : i32
    %c0_i32_0 = arith.constant 0 : i32
    %c0_i32_1 = arith.constant 0 : i32
    return %c0_i32, %c0_i32_0 : i32, i32
  }
  func.func @transform_19(%arg0: i32) -> (i32, i32) {
    %c0_i32 = arith.constant 0 : i32
    %c0_i32_0 = arith.constant 0 : i32
    %c0_i32_1 = arith.constant 0 : i32
    return %c0_i32, %c0_i32_0 : i32, i32
  }
  func.func @transform_20(%arg0: i32) -> (i32, i32, i32) {
    %c0_i32 = arith.constant 0 : i32
    %c0_i32_0 = arith.constant 0 : i32
    %c0_i32_1 = arith.constant 0 : i32
    return %arg0, %c0_i32, %c0_i32_0 : i32, i32, i32
  }
  func.func @transform_21(%arg0: i32) -> (i32, i32) {
    %c0_i32 = arith.constant 0 : i32
    %c0_i32_0 = arith.constant 0 : i32
    %c0_i32_1 = arith.constant 0 : i32
    return %c0_i32, %c0_i32_0 : i32, i32
  }
}

</mosaic_0001>

<bundles_post_ra>
// kernel: tpu_custom_call.1
= control target key start
LH: loop header
LB: loop body
LE: loop exit
PB: predicated region body
PF: predicated region fallthrough
CT: control target
= control target key end

     0   :  { %s18954_s0 = inlined_call_operand.hbm [shape: f32[8,512], index: 0, kind: input, shape index: {}]   ;;  %s18955_s1 = inlined_call_operand.hbm [shape: f32[8,128], index: 1, kind: input, shape index: {}]   ;;  %s18956_s2 = inlined_call_operand.hbm [shape: f32[8,128], index: 2, kind: input, shape index: {}]   ;;  %s18957_s3 = inlined_call_operand.vmem [shape: f32[8,128], index: 3, kind: input, shape index: {}]   ;;  %s18958_s4 = inlined_call_operand.hbm [shape: f32[128,1024], index: 4, kind: input, shape index: {}]   ;;  %s18959_s5 = inlined_call_operand.hbm [shape: f32[1024,128], index: 5, kind: input, shape index: {}]   ;;  %s18960_s6 = inlined_call_operand.hbm [shape: f32[8,1024], index: 6, kind: input, shape index: {}]   ;;  %s18961_s7 = inlined_call_operand.hbm [shape: f32[128,1024], index: 7, kind: input, shape index: {}]   ;;  %s18962_s8 = inlined_call_operand.hbm [shape: f32[8,1024], index: 8, kind: input, shape index: {}]   ;;  %s18963_s9 = inlined_call_operand.hbm [shape: f32[8,1024], index: 9, kind: input, shape index: {}]   ;;  %s18964_s10 = inlined_call_operand.vmem [shape: f32[8,128], index: 10, kind: input, shape index: {}]   ;;  %s18965_s11 = inlined_call_operand.hbm [shape: f32[128,640], index: 11, kind: input, shape index: {}]   ;;  %s18966_s12 = inlined_call_operand.vmem [shape: f32[1,128], index: 12, kind: input, shape index: {}]   ;;  %s18967_s13 = inlined_call_operand.hbm [shape: f32[128,128], index: 13, kind: input, shape index: {}]   ;;  %s18968_s14 = inlined_call_operand.vmem [shape: f32[1,128], index: 14, kind: input, shape index: {}]   ;;  %s18969_s15 = inlined_call_operand.hbm [shape: f32[128,768], index: 15, kind: input, shape index: {}]   ;;  %s18970_s16 = inlined_call_operand.vmem [shape: f32[1,128], index: 16, kind: input, shape index: {}]   ;;  %s18971_s17 = inlined_call_operand.hbm [shape: f32[128,640], index: 17, kind: input, shape index: {}]   ;;  %s18972_s18 = inlined_call_operand.vmem [shape: f32[1,128], index: 18, kind: input, shape index: {}]   ;;  %s18973_s19 = inlined_call_operand.vmem [shape: f32[1,512], index: 19, kind: input, shape index: {}]   ;;  %s18974_s20 = inlined_call_operand.hbm [shape: f32[5,8,128], index: 20, kind: output, shape index: {0}]   ;;  %s18975_s21 = inlined_call_operand.hbm [shape: f32[8,128], index: 21, kind: output, shape index: {1}]  }
   0x1   :  { %19694 = sst [smem:[#allocation384_spill]] %s18954_s0 }
   0x2   :  { %19695 = sst [smem:[#allocation385_spill]] %s18955_s1 }
   0x3   :  { %19696 = sst [smem:[#allocation386_spill]] %s18956_s2 }
   0x4   :  { %19697 = sst [smem:[#allocation387_spill]] %s18957_s3 }
   0x5   :  { %19698 = sst [smem:[#allocation388_spill]] %s18958_s4 }
   0x6   :  { %19699 = sst [smem:[#allocation389_spill]] %s18959_s5 }
   0x7   :  { %19700 = sst [smem:[#allocation390_spill]] %s18964_s10 }
   0x8   :  { %19701 = sst [smem:[#allocation391_spill]] %s18975_s21 }
   0x9   :  { %27 = vsyncpa [#allocation7], 0 }
   0xa   :  { %28 = vsyncpa [#allocation10], 0 }
   0xb   :  { %29 = vsyncpa [#allocation13], 0 }
   0xc   :  { %30 = vsyncpa [#allocation16], 0 }
   0xd   :  { %31 = vsyncpa [#allocation19], 0 }
   0xe   :  { %32 = vsyncpa [#allocation22], 0 }
   0xf   :  { %33 = vsyncpa [#allocation25], 0 }
  0x10   :  { %34 = vsyncpa [#allocation8], 0 }
  0x11   :  { %35 = vsyncpa [#allocation29], 0  ;;  %s15335_s2 = smov [#allocation9]   ;;  %s15336_s26 = smov [#allocation12]  }
  0x12   :  { %s52_s25 = sshll.u32 %s15335_s2, 4  ;;  %s73_s27 = sshll.u32 %s15336_s26, 4  ;;  %s53_s25 = int_to_ptr.vmem [resolvable:$true] %s52_s25  ;;  %s15472_s27 = int_to_ptr.vmem [resolvable:$true] %s73_s27 }
  0x13   :  { %s19702_s29 = sld [smem:[#allocation385_spill]] }
  0x19   :  { %s14987_s0 = scalar_lea.hbm %s19702_s29, 128 }
  0x1a   :  { %p14988_p0 = scmp.ne.s32.totalorder %s19702_s29, %s14987_s0  ;;  %p14991_p1 = scmp.lt.u32.totalorder %s14987_s0, %s19702_s29 }
  0x1c   :  { %p14993_p2 = pnand %p14991_p1, %p14988_p0 }
  0x1e   :  { %14996 = shalt.err (!%p14993_p2)
}
  0x1f   :  { %s14997_s23 = scalar_lea.vmem %s53_s25, 128  ;;  %p15002_p4 = scmp.lt.s32.totalorder %s53_s25, %s53_s25 }
  0x20   :  { %p14998_p3 = scmp.ne.s32.totalorder %s53_s25, %s14997_s23  ;;  %p15003_p5 = scmp.lt.s32.totalorder %s14997_s23, %s14997_s23 }
  0x22   :  { %p15004_p6 = por %p15003_p5, %p15002_p4 }
  0x24   :  { %p15005_p7 = pnand %p15004_p6, %p14998_p3 }
  0x26   :  { %15008 = shalt.err (!%p15005_p7)
}
  0x27   :  { %55 = dma.hbm_to_vmem [thread:$0]  %s19702_s29, 128, %s53_s25, [#allocation10]  }
  0x28   :  { %s19703_s3 = sld [smem:[#allocation388_spill]] }
  0x2e   :  { %s15009_s28 = scalar_lea.hbm %s19703_s3, 16384 }
  0x2f   :  { %p15010_p8 = scmp.ne.s32.totalorder %s19703_s3, %s15009_s28  ;;  %p15013_p9 = scmp.lt.u32.totalorder %s15009_s28, %s19703_s3 }
  0x31   :  { %p15015_p10 = pnand %p15013_p9, %p15010_p8 }
  0x33   :  { %15018 = shalt.err (!%p15015_p10)
}
  0x34   :  { %s15019_s22 = scalar_lea.vmem %s15472_s27, 16384  ;;  %p15024_p12 = scmp.lt.s32.totalorder %s15472_s27, %s15472_s27 }
  0x35   :  { %p15020_p11 = scmp.ne.s32.totalorder %s15472_s27, %s15019_s22  ;;  %p15025_p13 = scmp.lt.s32.totalorder %s15019_s22, %s15019_s22 }
  0x37   :  { %p15026_p0 = por %p15025_p13, %p15024_p12 }
  0x39   :  { %p15027_p1 = pnand %p15026_p0, %p15020_p11 }
  0x3b   :  { %15030 = shalt.err (!%p15027_p1)
}
  0x3c   :  { %s15337_s25 = smov 1024   ;;  %s15338_s29 = smov 64  }
  0x3d   :  { %79 = dma.hbm_to_vmem [thread:$0]  %s19703_s3, 16384, %s15472_s27, [#allocation13], %s15337_s25, %s15337_s25, %s15338_s29  }
  0x3e   :  { %s15339_s24 = smov [#allocation15]   ;;  %s15340_s26 = smov [#allocation18]  }
  0x3f   :  { %s98_s2 = sshll.u32 %s15339_s24, 4  ;;  %s120_s28 = sshll.u32 %s15340_s26, 4  ;;  %s99_s2 = int_to_ptr.vmem [resolvable:$true] %s98_s2  ;;  %s121_s28 = int_to_ptr.vmem [resolvable:$true] %s120_s28 }
  0x40   :  { %s15031_s0 = scalar_lea.hbm %s18960_s6, 1024 }
  0x41   :  { %p15032_p2 = scmp.ne.s32.totalorder %s18960_s6, %s15031_s0  ;;  %p15035_p3 = scmp.lt.u32.totalorder %s15031_s0, %s18960_s6 }
  0x43   :  { %p15037_p4 = pnand %p15035_p3, %p15032_p2 }
  0x45   :  { %15040 = shalt.err (!%p15037_p4)
}
  0x46   :  { %s15041_s27 = scalar_lea.vmem %s99_s2, 1024  ;;  %p15046_p6 = scmp.lt.s32.totalorder %s99_s2, %s99_s2 }
  0x47   :  { %p15042_p5 = scmp.ne.s32.totalorder %s99_s2, %s15041_s27  ;;  %p15047_p7 = scmp.lt.s32.totalorder %s15041_s27, %s15041_s27 }
  0x49   :  { %p15048_p8 = por %p15047_p7, %p15046_p6 }
  0x4b   :  { %p15049_p9 = pnand %p15048_p8, %p15042_p5 }
  0x4d   :  { %15052 = shalt.err (!%p15049_p9)
}
  0x4e   :  { %101 = dma.hbm_to_vmem [thread:$0]  %s18960_s6, 1024, %s99_s2, [#allocation16]  }
  0x4f   :  { %s15053_s26 = scalar_lea.hbm %s18962_s8, 1024 }
  0x50   :  { %p15054_p10 = scmp.ne.s32.totalorder %s18962_s8, %s15053_s26  ;;  %p15057_p11 = scmp.lt.u32.totalorder %s15053_s26, %s18962_s8 }
  0x52   :  { %p15059_p12 = pnand %p15057_p11, %p15054_p10 }
  0x54   :  { %15062 = shalt.err (!%p15059_p12)
}
  0x55   :  { %s15063_s0 = scalar_lea.vmem %s121_s28, 1024  ;;  %p15068_p0 = scmp.lt.s32.totalorder %s121_s28, %s121_s28 }
  0x56   :  { %p15064_p13 = scmp.ne.s32.totalorder %s121_s28, %s15063_s0  ;;  %p15069_p1 = scmp.lt.s32.totalorder %s15063_s0, %s15063_s0 }
  0x58   :  { %p15070_p2 = por %p15069_p1, %p15068_p0 }
  0x5a   :  { %p15071_p3 = pnand %p15070_p2, %p15064_p13 }
  0x5c   :  { %15074 = shalt.err (!%p15071_p3)
}
  0x5d   :  { %123 = dma.hbm_to_vmem [thread:$0]  %s18962_s8, 1024, %s121_s28, [#allocation19]  }
  0x5e   :  { %s15341_s5 = smov [#allocation21]   ;;  %s15075_s23 = scalar_lea.hbm %s18965_s11, 10240 }
  0x5f   :  { %s141_s22 = sshll.u32 %s15341_s5, 4  ;;  %p15076_p4 = scmp.ne.s32.totalorder %s18965_s11, %s15075_s23  ;;  %s142_s22 = int_to_ptr.vmem [resolvable:$true] %s141_s22 }
  0x60   :  { %p15079_p5 = scmp.lt.u32.totalorder %s15075_s23, %s18965_s11 }
  0x62   :  { %p15081_p6 = pnand %p15079_p5, %p15076_p4 }
  0x64   :  { %15084 = shalt.err (!%p15081_p6)
}
  0x65   :  { %s15085_s10 = scalar_lea.vmem %s142_s22, 10240  ;;  %p15090_p8 = scmp.lt.s32.totalorder %s142_s22, %s142_s22 }
  0x66   :  { %p15086_p7 = scmp.ne.s32.totalorder %s142_s22, %s15085_s10  ;;  %p15091_p9 = scmp.lt.s32.totalorder %s15085_s10, %s15085_s10 }
  0x68   :  { %p15092_p10 = por %p15091_p9, %p15090_p8 }
  0x6a   :  { %p15093_p11 = pnand %p15092_p10, %p15086_p7 }
  0x6c   :  { %15096 = shalt.err (!%p15093_p11)
}
  0x6d   :  { %s18983_s8 = smov 640   ;;  %s15343_s28 = smov 40  }
  0x6e   :  { %147 = dma.hbm_to_vmem [thread:$0]  %s18965_s11, 10240, %s142_s22, [#allocation22], %s18983_s8, %s18983_s8, %s15343_s28  }
  0x6f   :  { %s15344_s0 = smov [#allocation24]   ;;  %s15097_s27 = scalar_lea.hbm %s18969_s15, 12288 }
  0x70   :  { %s169_s6 = sshll.u32 %s15344_s0, 4  ;;  %p15098_p12 = scmp.ne.s32.totalorder %s18969_s15, %s15097_s27  ;;  %s170_s6 = int_to_ptr.vmem [resolvable:$true] %s169_s6 }
  0x71   :  { %p15101_p13 = scmp.lt.u32.totalorder %s15097_s27, %s18969_s15 }
  0x73   :  { %p15103_p0 = pnand %p15101_p13, %p15098_p12 }
  0x75   :  { %15106 = shalt.err (!%p15103_p0)
}
  0x76   :  { %s15107_s26 = scalar_lea.vmem %s170_s6, 12288  ;;  %p15112_p2 = scmp.lt.s32.totalorder %s170_s6, %s170_s6 }
  0x77   :  { %p15108_p1 = scmp.ne.s32.totalorder %s170_s6, %s15107_s26  ;;  %p15113_p3 = scmp.lt.s32.totalorder %s15107_s26, %s15107_s26 }
  0x79   :  { %p15114_p4 = por %p15113_p3, %p15112_p2 }
  0x7b   :  { %p15115_p5 = pnand %p15114_p4, %p15108_p1 }
  0x7d   :  { %15118 = shalt.err (!%p15115_p5)
}
  0x7e   :  { %s15345_s11 = smov 768   ;;  %s15346_s22 = smov 48  }
  0x7f   :  { %175 = dma.hbm_to_vmem [thread:$0]  %s18969_s15, 12288, %s170_s6, [#allocation25], %s15345_s11, %s15345_s11, %s15346_s22  }
  0x80   :  { %s15347_s21 = smov [#allocation6]   ;;  %s15348_s0 = smov [#allocation11]  }
  0x81   :  { %s42_s30 = sshll.u32 %s15347_s21, 4  ;;  %s62_s2 = sshll.u32 %s15348_s0, 4  ;;  %s43_s30 = int_to_ptr.vmem [resolvable:$true] %s42_s30  ;;  %s63_s2 = int_to_ptr.vmem [resolvable:$true] %s62_s2 }
  0x82   :  { %s19704_s3 = sld [smem:[#allocation384_spill]] }
  0x88   :  { %s15119_s23 = scalar_lea.hbm %s19704_s3, 512 }
  0x89   :  { %p15120_p6 = scmp.ne.s32.totalorder %s19704_s3, %s15119_s23  ;;  %p15123_p7 = scmp.lt.u32.totalorder %s15119_s23, %s19704_s3 }
  0x8b   :  { %p15125_p8 = pnand %p15123_p7, %p15120_p6 }
  0x8d   :  { %15128 = shalt.err (!%p15125_p8)
}
  0x8e   :  { %s15129_s15 = scalar_lea.vmem %s43_s30, 512  ;;  %p15134_p10 = scmp.lt.s32.totalorder %s43_s30, %s43_s30 }
  0x8f   :  { %p15130_p9 = scmp.ne.s32.totalorder %s43_s30, %s15129_s15  ;;  %p15135_p11 = scmp.lt.s32.totalorder %s15129_s15, %s15129_s15 }
  0x91   :  { %p15136_p12 = por %p15135_p11, %p15134_p10 }
  0x93   :  { %p15137_p13 = pnand %p15136_p12, %p15130_p9 }
  0x95   :  { %15140 = shalt.err (!%p15137_p13)
}
  0x96   :  { %45 = dma.hbm_to_vmem [thread:$0]  %s19704_s3, 512, %s43_s30, [#allocation7]  }
  0x97   :  { %s19705_s10 = sld [smem:[#allocation386_spill]] }
  0x9d   :  { %s15141_s21 = scalar_lea.hbm %s19705_s10, 128 }
  0x9e   :  { %p15142_p0 = scmp.ne.s32.totalorder %s19705_s10, %s15141_s21  ;;  %p15145_p1 = scmp.lt.u32.totalorder %s15141_s21, %s19705_s10 }
  0xa0   :  { %p15147_p2 = pnand %p15145_p1, %p15142_p0 }
  0xa2   :  { %15150 = shalt.err (!%p15147_p2)
}
  0xa3   :  { %s15151_s23 = scalar_lea.vmem %s63_s2, 128  ;;  %p15156_p4 = scmp.lt.s32.totalorder %s63_s2, %s63_s2 }
  0xa4   :  { %p15152_p3 = scmp.ne.s32.totalorder %s63_s2, %s15151_s23  ;;  %p15157_p5 = scmp.lt.s32.totalorder %s15151_s23, %s15151_s23 }
  0xa6   :  { %p15158_p6 = por %p15157_p5, %p15156_p4 }
  0xa8   :  { %p15159_p7 = pnand %p15158_p6, %p15152_p3 }
  0xaa   :  { %15162 = shalt.err (!%p15159_p7)
}
  0xab   :  { %65 = dma.hbm_to_vmem [thread:$0]  %s19705_s10, 128, %s63_s2, [#allocation10]  }
  0xac   :  { %s15349_s1 = smov [#allocation14]   ;;  %s19706_s6 = sld [smem:[#allocation389_spill]] }
  0xad   :  { %s85_s24 = sshll.u32 %s15349_s1, 4  ;;  %s86_s24 = int_to_ptr.vmem [resolvable:$true] %s85_s24 }
  0xb2   :  { %s15163_s11 = scalar_lea.hbm %s19706_s6, 16384 }
  0xb3   :  { %p15164_p8 = scmp.ne.s32.totalorder %s19706_s6, %s15163_s11  ;;  %p15167_p9 = scmp.lt.u32.totalorder %s15163_s11, %s19706_s6 }
  0xb5   :  { %p15169_p10 = pnand %p15167_p9, %p15164_p8 }
  0xb7   :  { %15172 = shalt.err (!%p15169_p10)
}
  0xb8   :  { %s15173_s8 = scalar_lea.vmem %s86_s24, 16384  ;;  %p15178_p12 = scmp.lt.s32.totalorder %s86_s24, %s86_s24 }
  0xb9   :  { %p15174_p11 = scmp.ne.s32.totalorder %s86_s24, %s15173_s8  ;;  %p15179_p13 = scmp.lt.s32.totalorder %s15173_s8, %s15173_s8 }
  0xbb   :  { %p15180_p0 = por %p15179_p13, %p15178_p12 }
  0xbd   :  { %p15181_p1 = pnand %p15180_p0, %p15174_p11 }
  0xbf   :  { %15184 = shalt.err (!%p15181_p1)
}
  0xc0   :  { %s15350_s2 = smov 128   ;;  %s15351_s10 = smov 8  }
  0xc1   :  { %91 = dma.hbm_to_vmem [thread:$0]  %s19706_s6, 16384, %s86_s24, [#allocation13], %s15350_s2, %s15350_s2, %s15351_s10  }
  0xc2   :  { %s15352_s23 = smov [#allocation17]   ;;  %s15353_s3 = smov [#allocation20]  }
  0xc3   :  { %s107_s30 = sshll.u32 %s15352_s23, 4  ;;  %s130_s1 = sshll.u32 %s15353_s3, 4  ;;  %s108_s30 = int_to_ptr.vmem [resolvable:$true] %s107_s30  ;;  %s131_s1 = int_to_ptr.vmem [resolvable:$true] %s130_s1 }
  0xc4   :  { %s15185_s11 = scalar_lea.hbm %s18961_s7, 16384 }
  0xc5   :  { %p15186_p2 = scmp.ne.s32.totalorder %s18961_s7, %s15185_s11  ;;  %p15189_p3 = scmp.lt.u32.totalorder %s15185_s11, %s18961_s7 }
  0xc7   :  { %p15191_p4 = pnand %p15189_p3, %p15186_p2 }
  0xc9   :  { %15194 = shalt.err (!%p15191_p4)
}
  0xca   :  { %s15195_s24 = scalar_lea.vmem %s108_s30, 16384  ;;  %p15200_p6 = scmp.lt.s32.totalorder %s108_s30, %s108_s30 }
  0xcb   :  { %p15196_p5 = scmp.ne.s32.totalorder %s108_s30, %s15195_s24  ;;  %p15201_p7 = scmp.lt.s32.totalorder %s15195_s24, %s15195_s24 }
  0xcd   :  { %p15202_p8 = por %p15201_p7, %p15200_p6 }
  0xcf   :  { %p15203_p9 = pnand %p15202_p8, %p15196_p5 }
  0xd1   :  { %15206 = shalt.err (!%p15203_p9)
}
  0xd2   :  { %113 = dma.hbm_to_vmem [thread:$0]  %s18961_s7, 16384, %s108_s30, [#allocation16], %s15337_s25, %s15337_s25, %s15338_s29  }
  0xd3   :  { %s15207_s23 = scalar_lea.hbm %s18963_s9, 1024 }
  0xd4   :  { %p15208_p10 = scmp.ne.s32.totalorder %s18963_s9, %s15207_s23  ;;  %p15211_p11 = scmp.lt.u32.totalorder %s15207_s23, %s18963_s9 }
  0xd6   :  { %p15213_p12 = pnand %p15211_p11, %p15208_p10 }
  0xd8   :  { %15216 = shalt.err (!%p15213_p12)
}
  0xd9   :  { %s15217_s22 = scalar_lea.vmem %s131_s1, 1024  ;;  %p15222_p0 = scmp.lt.s32.totalorder %s131_s1, %s131_s1 }
  0xda   :  { %p15218_p13 = scmp.ne.s32.totalorder %s131_s1, %s15217_s22  ;;  %p15223_p1 = scmp.lt.s32.totalorder %s15217_s22, %s15217_s22 }
  0xdc   :  { %p15224_p2 = por %p15223_p1, %p15222_p0 }
  0xde   :  { %p15225_p3 = pnand %p15224_p2, %p15218_p13 }
  0xe0   :  { %15228 = shalt.err (!%p15225_p3)
}
  0xe1   :  { %133 = dma.hbm_to_vmem [thread:$0]  %s18963_s9, 1024, %s131_s1, [#allocation19]  }
  0xe2   :  { %s15354_s29 = smov [#allocation23]   ;;  %s15355_s4 = smov [#allocation26]  }
  0xe3   :  { %s155_s30 = sshll.u32 %s15354_s29, 4  ;;  %s183_s21 = sshll.u32 %s15355_s4, 4  ;;  %s156_s30 = int_to_ptr.vmem [resolvable:$true] %s155_s30  ;;  %s184_s21 = int_to_ptr.vmem [resolvable:$true] %s183_s21 }
  0xe4   :  { %s15229_s6 = scalar_lea.hbm %s18967_s13, 2048 }
  0xe5   :  { %p15230_p4 = scmp.ne.s32.totalorder %s18967_s13, %s15229_s6  ;;  %p15233_p5 = scmp.lt.u32.totalorder %s15229_s6, %s18967_s13 }
  0xe7   :  { %p15235_p6 = pnand %p15233_p5, %p15230_p4 }
  0xe9   :  { %15238 = shalt.err (!%p15235_p6)
}
  0xea   :  { %s15239_s9 = scalar_lea.vmem %s156_s30, 2048  ;;  %p15244_p8 = scmp.lt.s32.totalorder %s156_s30, %s156_s30 }
  0xeb   :  { %p15240_p7 = scmp.ne.s32.totalorder %s156_s30, %s15239_s9  ;;  %p15245_p9 = scmp.lt.s32.totalorder %s15239_s9, %s15239_s9 }
  0xed   :  { %p15246_p10 = por %p15245_p9, %p15244_p8 }
  0xef   :  { %p15247_p11 = pnand %p15246_p10, %p15240_p7 }
  0xf1   :  { %15250 = shalt.err (!%p15247_p11)
}
  0xf2   :  { %161 = dma.hbm_to_vmem [thread:$0]  %s18967_s13, 2048, %s156_s30, [#allocation22], %s15350_s2, %s15350_s2, %s15351_s10  }
  0xf3   :  { %s15251_s11 = scalar_lea.hbm %s18971_s17, 10240 }
  0xf4   :  { %p15252_p12 = scmp.ne.s32.totalorder %s18971_s17, %s15251_s11  ;;  %p15255_p13 = scmp.lt.u32.totalorder %s15251_s11, %s18971_s17 }
  0xf6   :  { %p15257_p0 = pnand %p15255_p13, %p15252_p12 }
  0xf8   :  { %15260 = shalt.err (!%p15257_p0)
}
  0xf9   :  { %s15261_s4 = scalar_lea.vmem %s184_s21, 10240  ;;  %p15266_p2 = scmp.lt.s32.totalorder %s184_s21, %s184_s21 }
  0xfa   :  { %p15262_p1 = scmp.ne.s32.totalorder %s184_s21, %s15261_s4  ;;  %p15267_p3 = scmp.lt.s32.totalorder %s15261_s4, %s15261_s4 }
  0xfc   :  { %p15268_p4 = por %p15267_p3, %p15266_p2 }
  0xfe   :  { %p15269_p5 = pnand %p15268_p4, %p15262_p1 }
 0x100   :  { %15272 = shalt.err (!%p15269_p5)
}
 0x101   :  { %s19707_s13 = smov 640  }
 0x102   :  { %189 = dma.hbm_to_vmem [thread:$0]  %s18971_s17, 10240, %s184_s21, [#allocation25], %s19707_s13, %s19707_s13, %s15343_s28  }
 0x103   :  { %15317 = dma.done.wait [#allocation7], 512  }
 0x104   :  { %15318 = vsyncadd [#allocation7], 4294966784 }
 0x105   :  { %15319 = dma.done.wait [#allocation10], 256  }
 0x106   :  { %15320 = vsyncadd [#allocation10], 4294967040 }
 0x107   :  { %15321 = dma.done.wait [#allocation13], 32768  }
 0x108   :  { %15322 = vsyncadd [#allocation13], 4294934528 }
 0x109   :  { %15323 = dma.done.wait [#allocation16], 17408  }
 0x10a   :  { %15324 = vsyncadd [#allocation16], 4294949888 }
 0x10b   :  { %15325 = dma.done.wait [#allocation19], 2048  }
 0x10c   :  { %15326 = vsyncadd [#allocation19], 4294965248 }
 0x10d   :  { %15327 = dma.done.wait [#allocation22], 12288  }
 0x10e   :  { %15328 = vsyncadd [#allocation22], 4294955008 }
 0x10f   :  { %15329 = dma.done.wait [#allocation25], 22528  }
 0x110   :  { %15330 = vsyncadd [#allocation25], 4294944768  ;;  %v18987_v0 = vmov 0.0   ;;  %v668_v1 = vld [vmem:[#allocation21 + $0x8] sm:$0xff]  ;;  %v673_v2 = vld [vmem:[#allocation21 + $0x30] sm:$0xff]  ;;  %vm15358_vm0 = vmmov 0  }
 0x111   :  { %1040 = vmatprep.mubr.f32.mxu0 %v18987_v0  ;;  %1111 = vmatprep.mubr.f32.mxu1 %v18987_v0  ;;  %v667_v3 = vld [vmem:[#allocation21] sm:$0xff]  ;;  %v15655_v4 = vpack.c.bf16 %v673_v2, %v668_v1  ;;  %v672_v5 = vld [vmem:[#allocation21 + $0x28] sm:$0xff]  ;;  %v678_v6 = vld [vmem:[#allocation21 + $0x58] sm:$0xff]  ;;  %s19969_s23 = sld [smem:[#allocation387_spill]] }
 0x112   :  { %v683_v7 = vld [vmem:[#allocation21 + $0x80] sm:$0xff]  ;;  %v15657_v8 = vpack.c.bf16 %v672_v5, %v667_v3  ;;  %v677_v10 = vld [vmem:[#allocation21 + $0x50] sm:$0xff]  ;;  %v682_v11 = vld [vmem:[#allocation21 + $0x78] sm:$0xff] }
 0x113   :  { %19708 = vst [vmem:[#allocation39_spill] sm:$0xff] %v15655_v4  ;;  %v15659_v9 = vpack.c.bf16 %v683_v7, %v678_v6  ;;  %v688_v12 = vld [vmem:[#allocation21 + $0xa8] sm:$0xff]  ;;  %11295 = vmatprep.subr.bf16.mxu0 %v15655_v4  ;;  %v693_v13 = vld [vmem:[#allocation21 + $0xd0] sm:$0xff]  ;;  %v15663_v14 = vpack.c.bf16 %v682_v11, %v677_v10  ;;  %v687_v16 = vld [vmem:[#allocation21 + $0xa0] sm:$0xff] }
 0x114   :  { %19709 = vst [vmem:[#allocation40_spill] sm:$0xff] %v15657_v8  ;;  %11297 = vmatpush1.bf16.msra.mxu0 %v15657_v8  ;;  %v15666_v15 = vpack.c.bf16 %v693_v13, %v688_v12  ;;  %v692_v17 = vld [vmem:[#allocation21 + $0xc8] sm:$0xff]  ;;  %v698_v18 = vld [vmem:[#allocation21 + $0xf8] sm:$0xff]  ;;  %v703_v19 = vld [vmem:[#allocation21 + $0x120] sm:$0xff] }
 0x115   :  { %19710 = vst [vmem:[#allocation41_spill] sm:$0xff] %v15659_v9  ;;  %19711 = vst [vmem:[#allocation42_spill] sm:$0xff] %v15663_v14  ;;  %11299 = vmatprep.subr.bf16.mxu0 %v15659_v9  ;;  %v15669_v20 = vpack.c.bf16 %v692_v17, %v687_v16  ;;  %v15672_v21 = vpack.c.bf16 %v703_v19, %v698_v18  ;;  %v697_v22 = vld [vmem:[#allocation21 + $0xf0] sm:$0xff]  ;;  %v702_v23 = vld [vmem:[#allocation21 + $0x118] sm:$0xff] }
 0x116   :  { %19712 = vst [vmem:[#allocation43_spill] sm:$0xff] %v15666_v15  ;;  %v708_v24 = vld [vmem:[#allocation21 + $0x148] sm:$0xff]  ;;  %v713_v25 = vld [vmem:[#allocation21 + $0x170] sm:$0xff]  ;;  %v238_v27 = vld [vmem:[#allocation6 + $0x8] sm:$0xff]  ;;  %v15675_v29 = vpack.c.bf16 %v702_v23, %v697_v22 }
 0x117   :  { %19713 = vst [vmem:[#allocation44_spill] sm:$0xff] %v15669_v20  ;;  %19714 = vst [vmem:[#allocation45_spill] sm:$0xff] %v15672_v21  ;;  %v237_v26 = vld [vmem:[#allocation6] sm:$0xff]  ;;  %v9776_v30 = vmul.f32 -1.442695, %v238_v27  ;;  %v15678_v31 = vpack.c.bf16 %v713_v25, %v708_v24  ;;  %v707_v32 = vld [vmem:[#allocation21 + $0x140] sm:$0xff] }
 0x118   :  { %11301 = vmatpush1.bf16.msra.mxu0 %v15663_v14  ;;  %v9775_v28 = vmul.f32 -1.442695, %v237_v26  ;;  %19715 = vst [vmem:[#allocation46_spill] sm:$0xff] %v15675_v29  ;;  %v712_v33 = vld [vmem:[#allocation21 + $0x168] sm:$0xff]  ;;  %v718_v34 = vld [vmem:[#allocation21 + $0x198] sm:$0xff]  ;;  %v723_v35 = vld [vmem:[#allocation21 + $0x1c0] sm:$0xff] }
 0x119   :  { %11303 = vmatprep.subr.bf16.mxu0 %v15666_v15  ;;  %19716 = vst [vmem:[#allocation47_spill] sm:$0xff] %v15678_v31  ;;  %v15681_v36 = vpack.c.bf16 %v712_v33, %v707_v32  ;;  %v717_v37 = vld [vmem:[#allocation21 + $0x190] sm:$0xff]  ;;  %v240_v38 = vld [vmem:[#allocation6 + $0x18] sm:$0xff]  ;;  %v15684_v39 = vpack.c.bf16 %v723_v35, %v718_v34  ;;  %v722_v40 = vld [vmem:[#allocation21 + $0x1b8] sm:$0xff] }
 0x11a   :  { %14754 = vpow2.f32 %v9775_v28  ;;  %v728_v41 = vld [vmem:[#allocation21 + $0x1e8] sm:$0xff]  ;;  %v733_v42 = vld [vmem:[#allocation21 + $0x210] sm:$0xff]  ;;  %v670_v43 = vld [vmem:[#allocation21 + $0x18] sm:$0xff]  ;;  %v9777_v47 = vmul.f32 -1.442695, %v240_v38  ;;  %v15689_v52 = vpack.c.bf16 %v722_v40, %v717_v37  ;;  %v18985_v40 = vmov 0.0|0.0  }
 0x11b   :  { %14756 = vpow2.f32 %v9776_v30  ;;  %19717 = vst [vmem:[#allocation48_spill] sm:$0xff] %v15681_v36  ;;  %19718 = vst [vmem:[#allocation49_spill] sm:$0xff] %v15684_v39  ;;  %v675_v44 = vld [vmem:[#allocation21 + $0x40] sm:$0xff]  ;;  %v669_v45 = vld [vmem:[#allocation21 + $0x10] sm:$0xff]  ;;  %v15696_v58 = vpack.c.bf16 %v733_v42, %v728_v41 }
 0x11c   :  { %11305 = vmatpush1.bf16.msra.mxu0 %v15669_v20  ;;  %v727_v46 = vld [vmem:[#allocation21 + $0x1e0] sm:$0xff]  ;;  %v15686_v48 = vpack.c.bf16 %v675_v44, %v670_v43  ;;  %v674_v49 = vld [vmem:[#allocation21 + $0x38] sm:$0xff]  ;;  %v680_v50 = vld [vmem:[#allocation21 + $0x68] sm:$0xff]  ;;  %19720 = vst [vmem:[#allocation51_spill] sm:$0xff] %v15689_v52  ;;  %14758 = vpow2.f32 %v9777_v47 }
 0x11d   :  { %11307 = vmatprep.subr.bf16.mxu0 %v15672_v21  ;;  %v685_v51 = vld [vmem:[#allocation21 + $0x90] sm:$0xff]  ;;  %v15691_v53 = vpack.c.bf16 %v674_v49, %v669_v45  ;;  %v679_v55 = vld [vmem:[#allocation21 + $0x60] sm:$0xff]  ;;  %v684_v56 = vld [vmem:[#allocation21 + $0x88] sm:$0xff]  ;;  %19723 = vst [vmem:[#allocation54_spill] sm:$0xff] %v15696_v58 }
 0x11e   :  { %19719 = vst [vmem:[#allocation50_spill] sm:$0xff] %v15686_v48  ;;  %v15693_v54 = vpack.c.bf16 %v685_v51, %v680_v50  ;;  %v690_v57 = vld [vmem:[#allocation21 + $0xb8] sm:$0xff]  ;;  %v732_v59 = vld [vmem:[#allocation21 + $0x208] sm:$0xff]  ;;  %v239_v60 = vld [vmem:[#allocation6 + $0x10] sm:$0xff]  ;;  %11327 = vmatprep.subr.bf16.mxu1 %v15686_v48  ;;  %v15700_v1 = vpack.c.bf16 %v684_v56, %v679_v55 }
 0x11f   :  { %19721 = vst [vmem:[#allocation52_spill] sm:$0xff] %v15691_v53  ;;  %v695_v61 = vld [vmem:[#allocation21 + $0xe0] sm:$0xff]  ;;  %v738_v62 = vld [vmem:[#allocation21 + $0x238] sm:$0xff]  ;;  %11329 = vmatpush1.bf16.msra.mxu1 %v15691_v53  ;;  %v689_v5 = vld [vmem:[#allocation21 + $0xb0] sm:$0xff]  ;;  %v15706_v10 = vpack.c.bf16 %v732_v59, %v727_v46  ;;  %14760 = vtanh.f32 %v239_v60 }
 0x120   :  { %11309 = vmatpush1.bf16.msra.mxu0 %v15675_v29  ;;  %19722 = vst [vmem:[#allocation53_spill] sm:$0xff] %v15693_v54  ;;  %v743_v63 = vld [vmem:[#allocation21 + $0x260] sm:$0xff]  ;;  %19724 = vst [vmem:[#allocation55_spill] sm:$0xff] %v15700_v1  ;;  %11331 = vmatprep.subr.bf16.mxu1 %v15693_v54  ;;  %v15703_v3 = vpack.c.bf16 %v695_v61, %v690_v57  ;;  %v694_v6 = vld [vmem:[#allocation21 + $0xd8] sm:$0xff] }
 0x121   :  { %11311 = vmatprep.subr.bf16.mxu0 %v15678_v31  ;;  %19726 = vst [vmem:[#allocation57_spill] sm:$0xff] %v15706_v10  ;;  %v700_v12 = vld [vmem:[#allocation21 + $0x108] sm:$0xff]  ;;  %v705_v13 = vld [vmem:[#allocation21 + $0x130] sm:$0xff]  ;;  %v15709_v16 = vpack.c.bf16 %v743_v63, %v738_v62  ;;  %v742_v18 = vld [vmem:[#allocation21 + $0x258] sm:$0xff]  ;;  %v15712_v22 = vpack.c.bf16 %v694_v6, %v689_v5 }
 0x122   :  { %19725 = vst [vmem:[#allocation56_spill] sm:$0xff] %v15703_v3  ;;  %v737_v17 = vld [vmem:[#allocation21 + $0x230] sm:$0xff]  ;;  %v15715_v23 = vpack.c.bf16 %v705_v13, %v700_v12  ;;  %v699_v24 = vld [vmem:[#allocation21 + $0x100] sm:$0xff]  ;;  %v704_v25 = vld [vmem:[#allocation21 + $0x128] sm:$0xff] }
 0x123   :  { %19727 = vst [vmem:[#allocation58_spill] sm:$0xff] %v15709_v16  ;;  %11333 = vmatpush1.bf16.msra.mxu1 %v15700_v1  ;;  %19728 = vst [vmem:[#allocation59_spill] sm:$0xff] %v15712_v22  ;;  %v15718_v26 = vpack.c.bf16 %v742_v18, %v737_v17  ;;  %v710_v27 = vld [vmem:[#allocation21 + $0x158] sm:$0xff]  ;;  %v715_v28 = vld [vmem:[#allocation21 + $0x180] sm:$0xff]  ;;  %v15722_v30 = vpack.c.bf16 %v704_v25, %v699_v24 }
 0x124   :  { %11313 = vmatpush1.bf16.msra.mxu0 %v15681_v36  ;;  %v14755_v2 = vpop.eup %14754  ;;  %11335 = vmatprep.subr.bf16.mxu1 %v15703_v3  ;;  %19729 = vst [vmem:[#allocation60_spill] sm:$0xff] %v15715_v23  ;;  %v15725_v32 = vpack.c.bf16 %v715_v28, %v710_v27  ;;  %v709_v33 = vld [vmem:[#allocation21 + $0x150] sm:$0xff]  ;;  %v714_v34 = vld [vmem:[#allocation21 + $0x178] sm:$0xff]  ;;  %v720_v35 = vld [vmem:[#allocation21 + $0x1a8] sm:$0xff] }
 0x125   :  { %11315 = vmatprep.subr.bf16.mxu0 %v15684_v39  ;;  %v14757_v7 = vpop.eup %14756  ;;  %v955_v11 = vadd.f32 1.0, %v14755_v2  ;;  %19730 = vst [vmem:[#allocation61_spill] sm:$0xff] %v15718_v26  ;;  %19731 = vst [vmem:[#allocation62_spill] sm:$0xff] %v15722_v30  ;;  %v725_v37 = vld [vmem:[#allocation21 + $0x1d0] sm:$0xff]  ;;  %v15730_v42 = vpack.c.bf16 %v714_v34, %v709_v33  ;;  %v719_v45 = vld [vmem:[#allocation21 + $0x1a0] sm:$0xff] }
 0x126   :  { %v961_v19 = vadd.f32 1.0, %v14757_v7  ;;  %19732 = vst [vmem:[#allocation63_spill] sm:$0xff] %v15725_v32  ;;  %v14759_v38 = vpop.eup %14758  ;;  %v245_v43 = vld [vmem:[#allocation9] sm:$0xff]  ;;  %v15733_v44 = vpack.c.bf16 %v725_v37, %v720_v35  ;;  %v724_v46 = vld [vmem:[#allocation21 + $0x1c8] sm:$0xff]  ;;  %v730_v50 = vld [vmem:[#allocation21 + $0x1f8] sm:$0xff] }
 0x127   :  { %14762 = vrcp.f32 %v955_v11  ;;  %11337 = vmatpush1.bf16.msra.mxu1 %v15712_v22  ;;  %19733 = vst [vmem:[#allocation64_spill] sm:$0xff] %v15730_v42  ;;  %v968_v49 = vadd.f32 1.0, %v14759_v38  ;;  %v735_v51 = vld [vmem:[#allocation21 + $0x220] sm:$0xff]  ;;  %v15736_v59 = vpack.c.bf16 %v724_v46, %v719_v45  ;;  %v729_v61 = vld [vmem:[#allocation21 + $0x1f0] sm:$0xff]  ;;  %v734_v62 = vld [vmem:[#allocation21 + $0x218] sm:$0xff] }
 0x128   :  { %11317 = vmatpush1.bf16.msra.mxu0 %v15689_v52  ;;  %14764 = vrcp.f32 %v961_v19  ;;  %11339 = vmatprep.subr.bf16.mxu1 %v15715_v23  ;;  %19734 = vst [vmem:[#allocation65_spill] sm:$0xff] %v15733_v44  ;;  %v15739_v60 = vpack.c.bf16 %v735_v51, %v730_v50  ;;  %v740_v2 = vld [vmem:[#allocation21 + $0x248] sm:$0xff]  ;;  %v745_v5 = vld [vmem:[#allocation21 + $0x270] sm:$0xff]  ;;  %v15745_v6 = vpack.c.bf16 %v734_v62, %v729_v61  ;;  %v739_v11 = vld [vmem:[#allocation21 + $0x240] sm:$0xff] }
 0x129   :  { %11319 = vmatprep.subr.bf16.mxu0 %v15696_v58  ;;  %v14761_v41 = vpop.eup %14760  ;;  %19735 = vst [vmem:[#allocation66_spill] sm:$0xff] %v15736_v59  ;;  %14766 = vrcp.f32 %v968_v49  ;;  %v15748_v7 = vpack.c.bf16 %v745_v5, %v740_v2  ;;  %v744_v12 = vld [vmem:[#allocation21 + $0x268] sm:$0xff]  ;;  %v671_v17 = vld [vmem:[#allocation21 + $0x20] sm:$0xff]  ;;  %v681_v34 = vld [vmem:[#allocation21 + $0x70] sm:$0xff] }
 0x12a   :  { %19736 = vst [vmem:[#allocation67_spill] sm:$0xff] %v15739_v60  ;;  %19737 = vst [vmem:[#allocation68_spill] sm:$0xff] %v15745_v6  ;;  %v15751_v13 = vpack.c.bf16 %v744_v12, %v739_v11  ;;  %v676_v18 = vld [vmem:[#allocation21 + $0x48] sm:$0xff]  ;;  %v747_v24 = vld [vmem:[#allocation23] sm:$0xff] }
 0x12b   :  { %11341 = vmatpush1.bf16.msra.mxu1 %v15722_v30  ;;  %19738 = vst [vmem:[#allocation69_spill] sm:$0xff] %v15748_v7  ;;  %v748_v25 = vld [vmem:[#allocation23 + $0x8] sm:$0xff]  ;;  %v15756_v28 = vpack.c.bf16 %v676_v18, %v671_v17  ;;  %v686_v35 = vld [vmem:[#allocation21 + $0x98] sm:$0xff]  ;;  %v749_v38 = vld [vmem:[#allocation23 + $0x10] sm:$0xff] }
 0x12c   :  { %11321 = vmatpush1.bf16.msra.mxu0 %v15706_v10  ;;  %11343 = vmatprep.subr.bf16.mxu1 %v15725_v32  ;;  %19739 = vst [vmem:[#allocation70_spill] sm:$0xff] %v15751_v13  ;;  %v15760_v37 = vpack.c.bf16 %v748_v25, %v747_v24  ;;  %v691_v45 = vld [vmem:[#allocation21 + $0xc0] sm:$0xff]  ;;  %v696_v46 = vld [vmem:[#allocation21 + $0xe8] sm:$0xff]  ;;  %v753_v61 = vld [vmem:[#allocation23 + $0x30] sm:$0xff] }
 0x12d   :  { %11323 = vmatprep.subr.bf16.mxu0 %v15709_v16  ;;  %19740 = vst [vmem:[#allocation71_spill] sm:$0xff] %v15756_v28  ;;  %v751_v49 = vld [vmem:[#allocation23 + $0x20] sm:$0xff]  ;;  %v752_v50 = vld [vmem:[#allocation23 + $0x28] sm:$0xff]  ;;  %v15777_v51 = vpack.c.bf16 %v696_v46, %v691_v45  ;;  %v754_v62 = vld [vmem:[#allocation23 + $0x38] sm:$0xff] }
 0x12e   :  { %19741 = vst [vmem:[#allocation72_spill] sm:$0xff] %v15760_v37  ;;  %v711_v5 = vld [vmem:[#allocation21 + $0x160] sm:$0xff]  ;;  %v716_v11 = vld [vmem:[#allocation21 + $0x188] sm:$0xff]  ;;  %v15789_v12 = vpack.c.bf16 %v754_v62, %v753_v61  ;;  %v721_v24 = vld [vmem:[#allocation21 + $0x1b0] sm:$0xff] }
 0x12f   :  { %11345 = vmatpush1.bf16.msra.mxu1 %v15730_v42  ;;  %19744 = vst [vmem:[#allocation75_spill] sm:$0xff] %v15777_v51  ;;  %v755_v17 = vld [vmem:[#allocation23 + $0x40] sm:$0xff]  ;;  %v756_v18 = vld [vmem:[#allocation23 + $0x48] sm:$0xff]  ;;  %v726_v25 = vld [vmem:[#allocation21 + $0x1d8] sm:$0xff] }
 0x130   :  { %11325 = vmatpush1.bf16.msra.mxu0 %v15718_v26  ;;  %11347 = vmatprep.subr.bf16.mxu1 %v15733_v44  ;;  %19747 = vst [vmem:[#allocation78_spill] sm:$0xff] %v15789_v12  ;;  %v736_v45 = vld [vmem:[#allocation21 + $0x228] sm:$0xff]  ;;  %v746_v61 = vld [vmem:[#allocation21 + $0x278] sm:$0xff] }
 0x131   :  { %11358 = vmatprep.subr.bf16.mxu0 %v18985_v40  ;;  %v14763_v47 = vpop.eup %14762 }
 0x132   :  { %v14765_v55 = vpop.eup %14764  ;;  %v972_v56 = vmul.f32 %v14763_v47, %v14761_v41  ;;  %v750_v41 = vld [vmem:[#allocation23 + $0x18] sm:$0xff] }
 0x133   :  { %v971_v57 = vmul.f32 %v14765_v55, %v245_v43  ;;  %11349 = vmatpush1.bf16.msra.mxu1 %v15736_v59  ;;  %v14767_v19 = vpop.eup %14766  ;;  %v15765_v43 = vpack.c.bf16 %v686_v35, %v681_v34  ;;  %v15771_v47 = vpack.c.bf16 %v750_v41, %v749_v38  ;;  %v701_v55 = vld [vmem:[#allocation21 + $0x110] sm:$0xff]  ;;  %v758_v35 = vld [vmem:[#allocation23 + $0x58] sm:$0xff]  ;;  %v15801_v38 = vpack.c.bf16 %v726_v25, %v721_v24  ;;  %v731_v41 = vld [vmem:[#allocation21 + $0x200] sm:$0xff] }
 0x134   :  { %11351 = vmatprep.subr.bf16.mxu1 %v15739_v60  ;;  %v757_v34 = vld [vmem:[#allocation23 + $0x50] sm:$0xff] }
 0x135   :  { %v15741_v63 = vadd.f32 %v972_v56, %v971_v57  ;;  %19742 = vst [vmem:[#allocation73_spill] sm:$0xff] %v15765_v43  ;;  %19743 = vst [vmem:[#allocation74_spill] sm:$0xff] %v15771_v47  ;;  %v706_v56 = vld [vmem:[#allocation21 + $0x138] sm:$0xff]  ;;  %v15781_v57 = vpack.c.bf16 %v752_v50, %v751_v49  ;;  %v15805_v46 = vpack.c.bf16 %v758_v35, %v757_v34  ;;  %v759_v49 = vld [vmem:[#allocation23 + $0x60] sm:$0xff] }
 0x136   :  { %v15785_v2 = vpack.c.bf16 %v706_v56, %v701_v55  ;;  %19750 = vst [vmem:[#allocation81_spill] sm:$0xff] %v15801_v38  ;;  %v760_v50 = vld [vmem:[#allocation23 + $0x68] sm:$0xff]  ;;  %v15809_v55 = vpack.c.bf16 %v736_v45, %v731_v41  ;;  %v741_v56 = vld [vmem:[#allocation21 + $0x250] sm:$0xff]  ;;  %v247_v45 = vld [vmem:[#allocation11] sm:$0xff] }
 0x137   :  { %14768 = vtanh.f32 %v15741_v63  ;;  %11353 = vmatpush1.bf16.msra.mxu1 %v15745_v6  ;;  %19745 = vst [vmem:[#allocation76_spill] sm:$0xff] %v15781_v57  ;;  %19751 = vst [vmem:[#allocation82_spill] sm:$0xff] %v15805_v46  ;;  %v15813_v62 = vpack.c.bf16 %v760_v50, %v759_v49  ;;  %v9778_v24 = vld [vmem:[%s18966_s12] ss:$0 sm:$0xff] }
 0x138   :  { %11355 = vmatprep.subr.bf16.mxu1 %v15748_v7  ;;  %19746 = vst [vmem:[#allocation77_spill] sm:$0xff] %v15785_v2  ;;  %19752 = vst [vmem:[#allocation83_spill] sm:$0xff] %v15809_v55 }
 0x139   :  { %19753 = vst [vmem:[#allocation84_spill] sm:$0xff] %v15813_v62 }
 0x13b   :  { %11357 = vmatpush1.bf16.msra.mxu1 %v15751_v13 }
 0x13c   :  { %11382 = vmatprep.subr.bf16.mxu1 %v18985_v40 }
 0x141   :  { %v14769_v27 = vpop.eup %14768 }
 0x142   :  { %v15758_v33 = vmul.f32 %v14769_v27, %v14767_v19  ;;  %v15793_v19 = vpack.c.bf16 %v716_v11, %v711_v5  ;;  %v15797_v27 = vpack.c.bf16 %v756_v18, %v755_v17  ;;  %v15817_v5 = vpack.c.bf16 %v746_v61, %v741_v56  ;;  %v761_v11 = vld [vmem:[#allocation23 + $0x70] sm:$0xff]  ;;  %v762_v17 = vld [vmem:[#allocation23 + $0x78] sm:$0xff] }
 0x143   :  { %v15825_v18 = vpack.c.bf16 %v762_v17, %v761_v11  ;;  %v18984_v11 = vlaneseq }
 0x144   :  { %1041 = vmatmul.mubr.f32.vlgmr.msra.gmra.mrb[0].mxu0 %v15758_v33  ;;  %1112 = vmatmul.mubr.f32.vlgmr.msra.gmra.mrb[0].mxu1 %v15758_v33  ;;  %19748 = vst [vmem:[#allocation79_spill] sm:$0xff] %v15793_v19  ;;  %19749 = vst [vmem:[#allocation80_spill] sm:$0xff] %v15797_v27 }
 0x145   :  { %11360 = vmatpush3.bf16.msra.mxu0 %v15756_v28  ;;  %10801 = vmatprep.mubr.msk.f32.mxu0 %vm15358_vm0, %v18987_v0  ;;  %19754 = vst [vmem:[#allocation85_spill] sm:$0xff] %v15817_v5  ;;  %19755 = vst [vmem:[#allocation86_spill] sm:$0xff] %v15825_v18  ;;  %v15836_v17 = vand.u32 127, %v18984_v11  ;;  %v772_v11 = vld [vmem:[#allocation24 + $0x48] sm:$0xff] }
 0x146   :  { %11361 = vmatprep.subr.bf16.mxu0 %v18985_v40  ;;  %11384 = vmatpush3.bf16.msra.mxu1 %v15760_v37  ;;  %v443_v37 = vld [vmem:[#allocation14 + $0x1c0] sm:$0xff]  ;;  %v444_v28 = vld [vmem:[#allocation14 + $0x1c8] sm:$0xff] }
 0x147   :  { %11385 = vmatprep.subr.bf16.mxu1 %v18985_v40  ;;  %10836 = vmatprep.mubr.msk.f32.mxu1 %vm15358_vm0, %v18987_v0  ;;  %19756 = vst [vmem:[#allocation87_spill] sm:$0xff] %v15836_v17 }
 0x149   :  { %11363 = vmatpush3.bf16.msra.mxu0 %v15765_v43  ;;  %v405_v43 = vld [vmem:[#allocation14 + $0x90] sm:$0xff] }
 0x14a   :  { %11364 = vmatprep.subr.bf16.mxu0 %v18985_v40  ;;  %11387 = vmatpush3.bf16.msra.mxu1 %v15771_v47  ;;  %v420_v47 = vld [vmem:[#allocation14 + $0x108] sm:$0xff] }
 0x14b   :  { %11388 = vmatprep.subr.bf16.mxu1 %v18985_v40 }
 0x14d   :  { %11366 = vmatpush3.bf16.msra.mxu0 %v15777_v51  ;;  %v419_v51 = vld [vmem:[#allocation14 + $0x100] sm:$0xff] }
 0x14e   :  { %11367 = vmatprep.subr.bf16.mxu0 %v18985_v40  ;;  %11390 = vmatpush3.bf16.msra.mxu1 %v15781_v57 }
 0x14f   :  { %11391 = vmatprep.subr.bf16.mxu1 %v18985_v40 }
 0x151   :  { %11369 = vmatpush3.bf16.msra.mxu0 %v15785_v2  ;;  %v306_v2 = vld [vmem:[#allocation12 + $0x178] sm:$0xff] }
 0x152   :  { %11370 = vmatprep.subr.bf16.mxu0 %v18985_v40  ;;  %11393 = vmatpush3.bf16.msra.mxu1 %v15789_v12  ;;  %v832_v12 = vld [vmem:[#allocation24 + $0x228] sm:$0xff] }
 0x153   :  { %11394 = vmatprep.subr.bf16.mxu1 %v18985_v40 }
 0x155   :  { %11372 = vmatpush3.bf16.msra.mxu0 %v15793_v19  ;;  %v826_v19 = vld [vmem:[#allocation24 + $0x1f8] sm:$0xff] }
 0x156   :  { %11373 = vmatprep.subr.bf16.mxu0 %v18985_v40  ;;  %11396 = vmatpush3.bf16.msra.mxu1 %v15797_v27  ;;  %v808_v27 = vld [vmem:[#allocation24 + $0x168] sm:$0xff] }
 0x157   :  { %11397 = vmatprep.subr.bf16.mxu1 %v18985_v40 }
 0x159   :  { %11375 = vmatpush3.bf16.msra.mxu0 %v15801_v38  ;;  %v795_v38 = vld [vmem:[#allocation24 + $0x100] sm:$0xff] }
 0x15a   :  { %11376 = vmatprep.subr.bf16.mxu0 %v18985_v40  ;;  %11399 = vmatpush3.bf16.msra.mxu1 %v15805_v46 }
 0x15b   :  { %11400 = vmatprep.subr.bf16.mxu1 %v18985_v40 }
 0x15d   :  { %11378 = vmatpush3.bf16.msra.mxu0 %v15809_v55  ;;  %v781_v55 = vld [vmem:[#allocation24 + $0x90] sm:$0xff] }
 0x15e   :  { %11379 = vmatprep.subr.bf16.mxu0 %v18985_v40  ;;  %11402 = vmatpush3.bf16.msra.mxu1 %v15813_v62  ;;  %v775_v62 = vld [vmem:[#allocation24 + $0x60] sm:$0xff] }
 0x15f   :  { %11403 = vmatprep.subr.bf16.mxu1 %v18985_v40 }
 0x161   :  { %11381 = vmatpush3.bf16.msra.mxu0 %v15817_v5  ;;  %v782_v5 = vld [vmem:[#allocation24 + $0x98] sm:$0xff] }
 0x162   :  { %11405 = vmatpush3.bf16.msra.mxu1 %v15825_v18  ;;  %v776_v18 = vld [vmem:[#allocation24 + $0x68] sm:$0xff] }
 0x164   :  { %10802 = vmatmul.mubr.f32.vlgmr.msra.gmra.mrb[2].mxu0 %v15758_v33  ;;  %v9779_v33 = vld [vmem:[%s18968_s14] ss:$0 sm:$0xff] }
 0x165   :  { %1364 = vmatprep.mubr.f32.mxu0 %v18987_v0 }
 0x237   :  { %v1184_v25 = vpop.f32.mrb[2].mxu0 }
 0x238   :  { %v1194_v34 = vadd.f32 %v9778_v24, %v1184_v25  ;;  %v10803_v35 = vpop.f32.mrb[3].mxu0 }
 0x23a   :  { %v1195_v41 = vmax.f32 %v1194_v34, 0.0 }
 0x23c   :  { %10837 = vmatmul.mubr.f32.vlgmr.msra.gmra.mrb[2].mxu1 %v1195_v41  ;;  %v764_v41 = vld [vmem:[#allocation24 + $0x8] sm:$0xff] }
 0x23d   :  { %1435 = vmatprep.mubr.f32.mxu1 %v18987_v0  ;;  %v771_v0 = vld [vmem:[#allocation24 + $0x40] sm:$0xff] }
 0x30f   :  { %v1269_v49 = vpop.f32.mrb[2].mxu1 }
 0x310   :  { %v1270_v50 = vadd.f32 %v9779_v33, %v1269_v49  ;;  %v10838_v56 = vpop.f32.mrb[3].mxu1  ;;  %v770_v33 = vld [vmem:[#allocation24 + $0x38] sm:$0xff] }
 0x311   :  { %v15845_v49 = vpack.c.bf16 %v770_v33, %v764_v41  ;;  %v766_v56 = vld [vmem:[#allocation24 + $0x18] sm:$0xff]  ;;  %v15856_v41 = vpack.c.bf16 %v782_v5, %v776_v18  ;;  %v15858_v33 = vpack.c.bf16 %v781_v55, %v775_v62  ;;  %v787_v5 = vld [vmem:[#allocation24 + $0xc0] sm:$0xff]  ;;  %v793_v18 = vld [vmem:[#allocation24 + $0xf0] sm:$0xff] }
 0x312   :  { %v1273_v61 = vadd.f32 %v1270_v50, %v247_v45  ;;  %v763_v45 = vld [vmem:[#allocation24] sm:$0xff]  ;;  %v769_v50 = vld [vmem:[#allocation24 + $0x30] sm:$0xff]  ;;  %v790_v55 = vld [vmem:[#allocation24 + $0xd8] sm:$0xff] }
 0x313   :  { %19757 = vst [vmem:[#allocation88_spill] sm:$0xff] %v15845_v49  ;;  %v15847_v40 = vpack.c.bf16 %v769_v50, %v763_v45  ;;  %11407 = vmatprep.subr.bf16.mxu0 %v15845_v49  ;;  %19761 = vst [vmem:[#allocation92_spill] sm:$0xff] %v15856_v41  ;;  %v784_v45 = vld [vmem:[#allocation24 + $0xa8] sm:$0xff]  ;;  %v777_v50 = vld [vmem:[#allocation24 + $0x70] sm:$0xff] }
 0x314   :  { %1274 = vst [vmem:[#allocation27] sm:$0xff] %v1273_v61  ;;  %1275 = vmax.xlane.f32.xlu0 %v1273_v61  ;;  %19762 = vst [vmem:[#allocation93_spill] sm:$0xff] %v15858_v33  ;;  %v794_v49 = vld [vmem:[#allocation24 + $0xf8] sm:$0xff]  ;;  %v796_v62 = vld [vmem:[#allocation24 + $0x108] sm:$0xff] }
 0x315   :  { %19758 = vst [vmem:[#allocation89_spill] sm:$0xff] %v15847_v40  ;;  %11409 = vmatpush1.bf16.msra.mxu0 %v15847_v40 }
 0x316   :  { %11411 = vmatprep.subr.bf16.mxu0 %v15856_v41  ;;  %v806_v41 = vld [vmem:[#allocation24 + $0x158] sm:$0xff] }
 0x319   :  { %11413 = vmatpush1.bf16.msra.mxu0 %v15858_v33  ;;  %v818_v33 = vld [vmem:[#allocation24 + $0x1b8] sm:$0xff] }
 0x3a1   :  { %v1276_v24 = vpop.xlane.xlu0 %1275 }
 0x3a2   :  { %vm1277_vm1 = vcmp.eq.f32.partialorder %v1273_v61, %v1276_v24  ;;  %v15849_v61 = vpack.c.bf16 %v772_v11, %v766_v56  ;;  %v765_v24 = vld [vmem:[#allocation24 + $0x10] sm:$0xff]  ;;  %v778_v11 = vld [vmem:[#allocation24 + $0x78] sm:$0xff] }
 0x3a3   :  { %v15839_v25 = vsel %vm1277_vm1, %v15836_v17, 128  ;;  %v15861_v56 = vpack.c.bf16 %v784_v45, %v778_v11  ;;  %v15870_v11 = vpack.c.bf16 %v793_v18, %v787_v5  ;;  %v15872_v45 = vpack.c.bf16 %v796_v62, %v790_v55  ;;  %v801_v18 = vld [vmem:[#allocation24 + $0x130] sm:$0xff]  ;;  %v807_v55 = vld [vmem:[#allocation24 + $0x160] sm:$0xff]  ;;  %v812_v62 = vld [vmem:[#allocation24 + $0x188] sm:$0xff] }
 0x3a4   :  { %v1280_v34 = vshra.s32 %v15839_v25, 16  ;;  %19759 = vst [vmem:[#allocation90_spill] sm:$0xff] %v15849_v61  ;;  %11439 = vmatprep.subr.bf16.mxu1 %v15849_v61  ;;  %v789_v61 = vld [vmem:[#allocation24 + $0xd0] sm:$0xff] }
 0x3a5   :  { %19763 = vst [vmem:[#allocation94_spill] sm:$0xff] %v15861_v56  ;;  %19766 = vst [vmem:[#allocation97_spill] sm:$0xff] %v15870_v11 }
 0x3a6   :  { %v15842_v35 = vcvt.s32.f32 %v1280_v34  ;;  %v15852_v34 = vpack.c.bf16 %v771_v0, %v765_v24  ;;  %v783_v0 = vld [vmem:[#allocation24 + $0xa0] sm:$0xff]  ;;  %v788_v24 = vld [vmem:[#allocation24 + $0xc8] sm:$0xff]  ;;  %19767 = vst [vmem:[#allocation98_spill] sm:$0xff] %v15872_v45 }
 0x3a7   :  { %v15864_v46 = vpack.c.bf16 %v783_v0, %v777_v50  ;;  %v15866_v40 = vpack.c.bf16 %v794_v49, %v788_v24  ;;  %v799_v50 = vld [vmem:[#allocation24 + $0x120] sm:$0xff]  ;;  %v15876_v49 = vpack.c.bf16 %v795_v38, %v789_v61  ;;  %v805_v24 = vld [vmem:[#allocation24 + $0x150] sm:$0xff]  ;;  %v820_v38 = vld [vmem:[#allocation24 + $0x1c8] sm:$0xff]  ;;  %v15888_v61 = vpack.c.bf16 %v807_v55, %v801_v18 }
 0x3a8   :  { %1283 = vmin.xlane.f32.xlu0 %v15842_v35  ;;  %19760 = vst [vmem:[#allocation91_spill] sm:$0xff] %v15852_v34  ;;  %11441 = vmatpush1.bf16.msra.mxu1 %v15852_v34  ;;  %v800_v34 = vld [vmem:[#allocation24 + $0x128] sm:$0xff]  ;;  %v823_v55 = vld [vmem:[#allocation24 + $0x1e0] sm:$0xff] }
 0x3a9   :  { %19764 = vst [vmem:[#allocation95_spill] sm:$0xff] %v15864_v46  ;;  %19765 = vst [vmem:[#allocation96_spill] sm:$0xff] %v15866_v40  ;;  %11443 = vmatprep.subr.bf16.mxu1 %v15861_v56  ;;  %11415 = vmatprep.subr.bf16.mxu0 %v15866_v40  ;;  %v15878_v0 = vpack.c.bf16 %v806_v41, %v800_v34  ;;  %v802_v56 = vld [vmem:[#allocation24 + $0x138] sm:$0xff]  ;;  %v15890_v34 = vpack.c.bf16 %v818_v33, %v812_v62  ;;  %v817_v41 = vld [vmem:[#allocation24 + $0x1b0] sm:$0xff] }
 0x3aa   :  { %19768 = vst [vmem:[#allocation99_spill] sm:$0xff] %v15876_v49  ;;  %v15881_v5 = vpack.c.bf16 %v808_v27, %v802_v56  ;;  %11417 = vmatpush1.bf16.msra.mxu0 %v15870_v11  ;;  %v814_v40 = vld [vmem:[#allocation24 + $0x198] sm:$0xff]  ;;  %19772 = vst [vmem:[#allocation103_spill] sm:$0xff] %v15888_v61  ;;  %v811_v27 = vld [vmem:[#allocation24 + $0x180] sm:$0xff] }
 0x3ab   :  { %19769 = vst [vmem:[#allocation100_spill] sm:$0xff] %v15878_v0  ;;  %11419 = vmatprep.subr.bf16.mxu0 %v15878_v0  ;;  %19773 = vst [vmem:[#allocation104_spill] sm:$0xff] %v15890_v34  ;;  %v813_v56 = vld [vmem:[#allocation24 + $0x190] sm:$0xff]  ;;  %v819_v11 = vld [vmem:[#allocation24 + $0x1c0] sm:$0xff] }
 0x3ac   :  { %11445 = vmatpush1.bf16.msra.mxu1 %v15864_v46  ;;  %19770 = vst [vmem:[#allocation101_spill] sm:$0xff] %v15881_v5  ;;  %v15884_v46 = vpack.c.bf16 %v805_v24, %v799_v50  ;;  %v824_v50 = vld [vmem:[#allocation24 + $0x1e8] sm:$0xff]  ;;  %v830_v24 = vld [vmem:[#allocation24 + $0x218] sm:$0xff]  ;;  %v15900_v33 = vpack.c.bf16 %v819_v11, %v813_v56  ;;  %v825_v62 = vld [vmem:[#allocation24 + $0x1f0] sm:$0xff] }
 0x3ad   :  { %11447 = vmatprep.subr.bf16.mxu1 %v15872_v45  ;;  %v15893_v45 = vpack.c.bf16 %v820_v38, %v814_v40  ;;  %v15902_v18 = vpack.c.bf16 %v830_v24, %v824_v50  ;;  %v829_v40 = vld [vmem:[#allocation24 + $0x210] sm:$0xff]  ;;  %v15905_v38 = vpack.c.bf16 %v832_v12, %v826_v19  ;;  %v836_v0 = vld [vmem:[#allocation24 + $0x248] sm:$0xff]  ;;  %v835_v50 = vld [vmem:[#allocation24 + $0x240] sm:$0xff] }
 0x3ae   :  { %19771 = vst [vmem:[#allocation102_spill] sm:$0xff] %v15884_v46  ;;  %11421 = vmatpush1.bf16.msra.mxu0 %v15884_v46  ;;  %19776 = vst [vmem:[#allocation107_spill] sm:$0xff] %v15900_v33  ;;  %v842_v46 = vld [vmem:[#allocation24 + $0x278] sm:$0xff]  ;;  %v841_v12 = vld [vmem:[#allocation24 + $0x270] sm:$0xff] }
 0x3af   :  { %19774 = vst [vmem:[#allocation105_spill] sm:$0xff] %v15893_v45  ;;  %11423 = vmatprep.subr.bf16.mxu0 %v15890_v34  ;;  %19777 = vst [vmem:[#allocation108_spill] sm:$0xff] %v15902_v18  ;;  %v15914_v56 = vpack.c.bf16 %v842_v46, %v836_v0  ;;  %v837_v24 = vld [vmem:[#allocation24 + $0x250] sm:$0xff]  ;;  %v1279_v46 = vand.u32 65535, %v15839_v25  ;;  %v307_v34 = vld [vmem:[#allocation12 + $0x180] sm:$0xff] }
 0x3b0   :  { %11449 = vmatpush1.bf16.msra.mxu1 %v15876_v49  ;;  %v15896_v49 = vpack.c.bf16 %v817_v41, %v811_v27  ;;  %19778 = vst [vmem:[#allocation109_spill] sm:$0xff] %v15905_v38  ;;  %v838_v27 = vld [vmem:[#allocation24 + $0x258] sm:$0xff]  ;;  %v844_v41 = vld [vmem:[#allocation24 + $0x288] sm:$0xff] }
 0x3b1   :  { %11451 = vmatprep.subr.bf16.mxu1 %v15881_v5  ;;  %v831_v5 = vld [vmem:[#allocation24 + $0x220] sm:$0xff]  ;;  %19781 = vst [vmem:[#allocation112_spill] sm:$0xff] %v15914_v56  ;;  %v15917_v19 = vpack.c.bf16 %v844_v41, %v838_v27  ;;  %v848_v27 = vld [vmem:[#allocation24 + $0x2a8] sm:$0xff]  ;;  %v854_v41 = vld [vmem:[#allocation24 + $0x2d8] sm:$0xff] }
 0x3b2   :  { %19775 = vst [vmem:[#allocation106_spill] sm:$0xff] %v15896_v49  ;;  %11425 = vmatpush1.bf16.msra.mxu0 %v15896_v49  ;;  %v15912_v11 = vpack.c.bf16 %v831_v5, %v825_v62  ;;  %v19073_v49 = vmov 1.0  }
 0x3b3   :  { %11427 = vmatprep.subr.bf16.mxu0 %v15902_v18  ;;  %19782 = vst [vmem:[#allocation113_spill] sm:$0xff] %v15917_v19  ;;  %v283_v18 = vld [vmem:[#allocation12 + $0xc0] sm:$0xff] }
 0x3b4   :  { %11453 = vmatpush1.bf16.msra.mxu1 %v15888_v61  ;;  %v15908_v61 = vpack.c.bf16 %v829_v40, %v823_v55  ;;  %19780 = vst [vmem:[#allocation111_spill] sm:$0xff] %v15912_v11  ;;  %v15920_v55 = vpack.c.bf16 %v841_v12, %v835_v50  ;;  %v1281_v40 = vcvt.s32.f32 %v1279_v46  ;;  %v15931_v50 = vpack.c.bf16 %v854_v41, %v848_v27  ;;  %v853_v12 = vld [vmem:[#allocation24 + $0x2d0] sm:$0xff]  ;;  %v260_v27 = vld [vmem:[#allocation12 + $0x8] sm:$0xff] }
 0x3b5   :  { %11455 = vmatprep.subr.bf16.mxu1 %v15893_v45  ;;  %v843_v45 = vld [vmem:[#allocation24 + $0x280] sm:$0xff]  ;;  %v268_v41 = vld [vmem:[#allocation12 + $0x48] sm:$0xff] }
 0x3b6   :  { %19779 = vst [vmem:[#allocation110_spill] sm:$0xff] %v15908_v61  ;;  %11429 = vmatpush1.bf16.msra.mxu0 %v15908_v61  ;;  %19783 = vst [vmem:[#allocation114_spill] sm:$0xff] %v15920_v55  ;;  %v15924_v5 = vpack.c.bf16 %v843_v45, %v837_v24  ;;  %v847_v45 = vld [vmem:[#allocation24 + $0x2a0] sm:$0xff]  ;;  %v850_v24 = vld [vmem:[#allocation24 + $0x2b8] sm:$0xff] }
 0x3b7   :  { %11431 = vmatprep.subr.bf16.mxu0 %v15914_v56  ;;  %19785 = vst [vmem:[#allocation116_spill] sm:$0xff] %v15931_v50  ;;  %v275_v61 = vld [vmem:[#allocation12 + $0x80] sm:$0xff] }
 0x3b8   :  { %11457 = vmatpush1.bf16.msra.mxu1 %v15900_v33  ;;  %19784 = vst [vmem:[#allocation115_spill] sm:$0xff] %v15924_v5 }
 0x3b9   :  { %11459 = vmatprep.subr.bf16.mxu1 %v15905_v38  ;;  %v849_v38 = vld [vmem:[#allocation24 + $0x2b0] sm:$0xff] }
 0x3ba   :  { %11433 = vmatpush1.bf16.msra.mxu0 %v15920_v55 }
 0x3bb   :  { %11435 = vmatprep.subr.bf16.mxu0 %v15931_v50  ;;  %v276_v50 = vld [vmem:[#allocation12 + $0x88] sm:$0xff] }
 0x3bc   :  { %11461 = vmatpush1.bf16.msra.mxu1 %v15912_v11  ;;  %v856_v11 = vld [vmem:[#allocation24 + $0x2e8] sm:$0xff] }
 0x3bd   :  { %11463 = vmatprep.subr.bf16.mxu1 %v15917_v19  ;;  %v15933_v19 = vpack.c.bf16 %v853_v12, %v847_v45  ;;  %v15936_v25 = vpack.c.bf16 %v856_v11, %v850_v24  ;;  %v15946_v45 = vpack.c.bf16 %v268_v41, %v260_v27  ;;  %v773_v12 = vld [vmem:[#allocation24 + $0x50] sm:$0xff]  ;;  %v780_v24 = vld [vmem:[#allocation24 + $0x88] sm:$0xff]  ;;  %v779_v41 = vld [vmem:[#allocation24 + $0x80] sm:$0xff] }
 0x3bf   :  { %19786 = vst [vmem:[#allocation117_spill] sm:$0xff] %v15933_v19  ;;  %19787 = vst [vmem:[#allocation118_spill] sm:$0xff] %v15936_v25  ;;  %11437 = vmatpush1.bf16.msra.mxu0 %v15933_v19 }
 0x3c0   :  { %11465 = vmatpush1.bf16.msra.mxu1 %v15924_v5  ;;  %v855_v5 = vld [vmem:[#allocation24 + $0x2e0] sm:$0xff]  ;;  %19790 = vst [vmem:[#allocation121_spill] sm:$0xff] %v15946_v45 }
 0x3c1   :  { %v15938_v46 = vpack.c.bf16 %v855_v5, %v849_v38  ;;  %11467 = vmatprep.subr.bf16.mxu1 %v15936_v25  ;;  %v767_v5 = vld [vmem:[#allocation24 + $0x20] sm:$0xff]  ;;  %v786_v25 = vld [vmem:[#allocation24 + $0xb8] sm:$0xff] }
 0x3c2   :  { %v15953_v27 = vpack.c.bf16 %v786_v25, %v780_v24  ;;  %v804_v24 = vld [vmem:[#allocation24 + $0x148] sm:$0xff] }
 0x3c3   :  { %19788 = vst [vmem:[#allocation119_spill] sm:$0xff] %v15938_v46 }
 0x3c4   :  { %11469 = vmatpush1.bf16.msra.mxu1 %v15938_v46  ;;  %v284_v46 = vld [vmem:[#allocation12 + $0xc8] sm:$0xff]  ;;  %19793 = vst [vmem:[#allocation124_spill] sm:$0xff] %v15953_v27 }
 0x3c5   :  { %11503 = vmatprep.subr.bf16.mxu1 %v15946_v45  ;;  %v785_v45 = vld [vmem:[#allocation24 + $0xb0] sm:$0xff] }
 0x3c6   :  { %v15970_v25 = vpack.c.bf16 %v785_v45, %v779_v41  ;;  %v291_v45 = vld [vmem:[#allocation12 + $0x100] sm:$0xff] }
 0x3c7   :  { %v299_v41 = vld [vmem:[#allocation12 + $0x140] sm:$0xff] }
 0x3c8   :  { %19796 = vst [vmem:[#allocation127_spill] sm:$0xff] %v15970_v25 }
 0x435   :  { %v1284_v0 = vpop.xlane.xlu0 %1283 }
 0x436   :  { %vm1285_vm2 = vcmp.eq.f32.partialorder %v15842_v35, %v1284_v0  ;;  %v768_v35 = vld [vmem:[#allocation24 + $0x28] sm:$0xff]  ;;  %v1290_v38 = vcvt.f32.s32 %v1284_v0 }
 0x437   :  { %v1286_v62 = vsel %vm1285_vm2, %v1281_v40, inf  ;;  %v774_v40 = vld [vmem:[#allocation24 + $0x58] sm:$0xff]  ;;  %v792_v0 = vld [vmem:[#allocation24 + $0xe8] sm:$0xff] }
 0x438   :  { %1287 = vmin.xlane.f32.xlu1 %v1286_v62  ;;  %v15942_v62 = vpack.c.bf16 %v774_v40, %v768_v35  ;;  %v1291_v33 = vshll.u32 %v1290_v38, 16  ;;  %v259_v35 = vld [vmem:[#allocation12] sm:$0xff]  ;;  %v798_v38 = vld [vmem:[#allocation24 + $0x118] sm:$0xff] }
 0x439   :  { %v267_v40 = vld [vmem:[#allocation12 + $0x40] sm:$0xff] }
 0x43a   :  { %19789 = vst [vmem:[#allocation120_spill] sm:$0xff] %v15942_v62  ;;  %11471 = vmatprep.subr.bf16.mxu0 %v15942_v62  ;;  %v15951_v62 = vpack.c.bf16 %v773_v12, %v767_v5  ;;  %v15955_v56 = vpack.c.bf16 %v267_v40, %v259_v35  ;;  %v791_v5 = vld [vmem:[#allocation24 + $0xe0] sm:$0xff]  ;;  %v797_v12 = vld [vmem:[#allocation24 + $0x110] sm:$0xff]  ;;  %v15977_v35 = vpack.c.bf16 %v283_v18, %v275_v61  ;;  %v810_v40 = vld [vmem:[#allocation24 + $0x178] sm:$0xff] }
 0x43b   :  { %v803_v61 = vld [vmem:[#allocation24 + $0x140] sm:$0xff]  ;;  %v809_v18 = vld [vmem:[#allocation24 + $0x170] sm:$0xff] }
 0x43c   :  { %19792 = vst [vmem:[#allocation123_spill] sm:$0xff] %v15951_v62  ;;  %19794 = vst [vmem:[#allocation125_spill] sm:$0xff] %v15955_v56 }
 0x43d   :  { %19799 = vst [vmem:[#allocation129_spill] sm:$0xff] %v15977_v35 }
 0x4c5   :  { %v1288_v11 = vpop.xlane.xlu1 %1287 }
 0x4c6   :  { %v1289_v19 = vcvt.f32.s32 %v1288_v11  ;;  %v15959_v11 = vpack.c.bf16 %v284_v46, %v276_v50  ;;  %v19797_v50 = vmov 0.0   ;;  %v15974_v46 = vpack.c.bf16 %v798_v38, %v792_v0 }
 0x4c7   :  { %v15984_v0 = vpack.c.bf16 %v797_v12, %v791_v5  ;;  %v15987_v38 = vpack.c.bf16 %v810_v40, %v804_v24  ;;  %v324_v5 = vld [vmem:[#allocation12 + $0x208] sm:$0xff]  ;;  %v15996_v24 = vpack.c.bf16 %v809_v18, %v803_v61 }
 0x4c8   :  { %v15949_v55 = vadd.s32 %v1291_v33, %v1289_v19  ;;  %19795 = vst [vmem:[#allocation126_spill] sm:$0xff] %v15959_v11  ;;  %v292_v33 = vld [vmem:[#allocation12 + $0x108] sm:$0xff]  ;;  %19798 = vst [vmem:[#allocation128_spill] sm:$0xff] %v15974_v46 }
 0x4c9   :  { %v300_v19 = vld [vmem:[#allocation12 + $0x148] sm:$0xff]  ;;  %19801 = vst [vmem:[#allocation131_spill] sm:$0xff] %v15984_v0  ;;  %19802 = vst [vmem:[#allocation132_spill] sm:$0xff] %v15987_v38 }
 0x4ca   :  { %19791 = vst [vmem:[#allocation122_spill] sm:$0xff] %v15949_v55  ;;  %vm1293_vm3 = vcmp.eq.s32.totalorder %v15836_v17, %v15949_v55  ;;  %v332_v12 = vld [vmem:[#allocation12 + $0x248] sm:$0xff]  ;;  %19805 = vst [vmem:[#allocation135_spill] sm:$0xff] %v15996_v24  ;;  %v298_v17 = vld [vmem:[#allocation12 + $0x138] sm:$0xff] }
 0x4cb   :  { %9781 = vmatmul.mubr.msk.f32.vlgmr.msra.gmra.mrb[0].mxu0 %vm1293_vm3, %v19073_v49  ;;  %9782 = vmatmul.mubr.msk.f32.vlgmr.msra.gmra.mrb[0].mxu1 %vm1293_vm3, %v19073_v49  ;;  %v15980_v49 = vpack.c.bf16 %v300_v19, %v292_v33  ;;  %v15990_v33 = vpack.c.bf16 %v299_v41, %v291_v45  ;;  %v822_v19 = vld [vmem:[#allocation24 + $0x1d8] sm:$0xff]  ;;  %v821_v45 = vld [vmem:[#allocation24 + $0x1d0] sm:$0xff]  ;;  %v828_v41 = vld [vmem:[#allocation24 + $0x208] sm:$0xff] }
 0x4cc   :  { %11473 = vmatpush1.bf16.msra.mxu0 %v15951_v62  ;;  %1506 = vmatprep.mubr.f32.mxu0 %v19797_v50  ;;  %v308_v62 = vld [vmem:[#allocation12 + $0x188] sm:$0xff] }
 0x4cd   :  { %11475 = vmatprep.subr.bf16.mxu0 %v15953_v27  ;;  %11505 = vmatpush1.bf16.msra.mxu1 %v15955_v56  ;;  %19800 = vst [vmem:[#allocation130_spill] sm:$0xff] %v15980_v49  ;;  %v316_v27 = vld [vmem:[#allocation12 + $0x1c8] sm:$0xff]  ;;  %19803 = vst [vmem:[#allocation133_spill] sm:$0xff] %v15990_v33 }
 0x4ce   :  { %11507 = vmatprep.subr.bf16.mxu1 %v15959_v11  ;;  %1584 = vmatprep.mubr.f32.mxu1 %v19797_v50  ;;  %v816_v56 = vld [vmem:[#allocation24 + $0x1a8] sm:$0xff]  ;;  %v15993_v11 = vpack.c.bf16 %v316_v27, %v308_v62  ;;  %v834_v62 = vld [vmem:[#allocation24 + $0x238] sm:$0xff]  ;;  %v16005_v27 = vpack.c.bf16 %v332_v12, %v324_v5 }
 0x4cf   :  { %v15999_v40 = vpack.c.bf16 %v822_v19, %v816_v56  ;;  %v340_v61 = vld [vmem:[#allocation12 + $0x288] sm:$0xff]  ;;  %v16011_v19 = vpack.c.bf16 %v834_v62, %v828_v41  ;;  %v846_v5 = vld [vmem:[#allocation24 + $0x298] sm:$0xff] }
 0x4d0   :  { %11477 = vmatpush1.bf16.msra.mxu0 %v15970_v25  ;;  %19804 = vst [vmem:[#allocation134_spill] sm:$0xff] %v15993_v11  ;;  %v315_v25 = vld [vmem:[#allocation12 + $0x1c0] sm:$0xff]  ;;  %19808 = vst [vmem:[#allocation138_spill] sm:$0xff] %v16005_v27  ;;  %v348_v18 = vld [vmem:[#allocation12 + $0x2c8] sm:$0xff] }
 0x4d1   :  { %11479 = vmatprep.subr.bf16.mxu0 %v15974_v46  ;;  %11509 = vmatpush1.bf16.msra.mxu1 %v15977_v35  ;;  %19806 = vst [vmem:[#allocation136_spill] sm:$0xff] %v15999_v40  ;;  %v815_v35 = vld [vmem:[#allocation24 + $0x1a0] sm:$0xff]  ;;  %19810 = vst [vmem:[#allocation140_spill] sm:$0xff] %v16011_v19  ;;  %v16017_v12 = vpack.c.bf16 %v348_v18, %v340_v61  ;;  %v858_v61 = vld [vmem:[#allocation24 + $0x2f8] sm:$0xff] }
 0x4d2   :  { %11511 = vmatprep.subr.bf16.mxu1 %v15980_v49  ;;  %v16002_v49 = vpack.c.bf16 %v315_v25, %v307_v34  ;;  %v323_v46 = vld [vmem:[#allocation12 + $0x200] sm:$0xff]  ;;  %v16008_v56 = vpack.c.bf16 %v821_v45, %v815_v35  ;;  %v833_v34 = vld [vmem:[#allocation24 + $0x230] sm:$0xff]  ;;  %v840_v25 = vld [vmem:[#allocation24 + $0x268] sm:$0xff] }
 0x4d3   :  { %19812 = vst [vmem:[#allocation142_spill] sm:$0xff] %v16017_v12  ;;  %v356_v35 = vld [vmem:[#allocation12 + $0x308] sm:$0xff]  ;;  %v16023_v62 = vpack.c.bf16 %v846_v5, %v840_v25 }
 0x4d4   :  { %11481 = vmatpush1.bf16.msra.mxu0 %v15984_v0  ;;  %19807 = vst [vmem:[#allocation137_spill] sm:$0xff] %v16002_v49  ;;  %v331_v0 = vld [vmem:[#allocation12 + $0x240] sm:$0xff]  ;;  %19809 = vst [vmem:[#allocation139_spill] sm:$0xff] %v16008_v56  ;;  %v364_v45 = vld [vmem:[#allocation12 + $0x348] sm:$0xff] }
 0x4d5   :  { %11483 = vmatprep.subr.bf16.mxu0 %v15987_v38  ;;  %11513 = vmatpush1.bf16.msra.mxu1 %v15990_v33  ;;  %v827_v33 = vld [vmem:[#allocation24 + $0x200] sm:$0xff]  ;;  %19814 = vst [vmem:[#allocation144_spill] sm:$0xff] %v16023_v62  ;;  %v16029_v18 = vpack.c.bf16 %v364_v45, %v356_v35  ;;  %v270_v35 = vld [vmem:[#allocation12 + $0x58] sm:$0xff]  ;;  %v304_v55 = vld [vmem:[#allocation12 + $0x168] sm:$0xff] }
 0x4d6   :  { %11515 = vmatprep.subr.bf16.mxu1 %v15993_v11  ;;  %v16014_v11 = vpack.c.bf16 %v331_v0, %v323_v46  ;;  %v339_v38 = vld [vmem:[#allocation12 + $0x280] sm:$0xff]  ;;  %v16020_v41 = vpack.c.bf16 %v833_v34, %v827_v33  ;;  %v845_v46 = vld [vmem:[#allocation24 + $0x290] sm:$0xff]  ;;  %v852_v0 = vld [vmem:[#allocation24 + $0x2c8] sm:$0xff] }
 0x4d7   :  { %19816 = vst [vmem:[#allocation146_spill] sm:$0xff] %v16029_v18  ;;  %v372_v33 = vld [vmem:[#allocation12 + $0x388] sm:$0xff]  ;;  %v16035_v5 = vpack.c.bf16 %v858_v61, %v852_v0  ;;  %v261_v0 = vld [vmem:[#allocation12 + $0x10] sm:$0xff] }
 0x4d8   :  { %11485 = vmatpush1.bf16.msra.mxu0 %v15996_v24  ;;  %19811 = vst [vmem:[#allocation141_spill] sm:$0xff] %v16014_v11  ;;  %v347_v24 = vld [vmem:[#allocation12 + $0x2c0] sm:$0xff]  ;;  %19813 = vst [vmem:[#allocation143_spill] sm:$0xff] %v16020_v41  ;;  %v380_v34 = vld [vmem:[#allocation12 + $0x3c8] sm:$0xff] }
 0x4d9   :  { %11487 = vmatprep.subr.bf16.mxu0 %v15999_v40  ;;  %11517 = vmatpush1.bf16.msra.mxu1 %v16002_v49  ;;  %v839_v49 = vld [vmem:[#allocation24 + $0x260] sm:$0xff]  ;;  %19818 = vst [vmem:[#allocation148_spill] sm:$0xff] %v16035_v5  ;;  %v16041_v45 = vpack.c.bf16 %v380_v34, %v372_v33  ;;  %v269_v61 = vld [vmem:[#allocation12 + $0x50] sm:$0xff] }
 0x4da   :  { %11519 = vmatprep.subr.bf16.mxu1 %v16005_v27  ;;  %v16026_v27 = vpack.c.bf16 %v347_v24, %v339_v38  ;;  %v355_v40 = vld [vmem:[#allocation12 + $0x300] sm:$0xff]  ;;  %v16032_v25 = vpack.c.bf16 %v845_v46, %v839_v49  ;;  %v857_v38 = vld [vmem:[#allocation24 + $0x2f0] sm:$0xff]  ;;  %v262_v24 = vld [vmem:[#allocation12 + $0x18] sm:$0xff]  ;;  %v16054_v33 = vpack.c.bf16 %v269_v61, %v261_v0 }
 0x4db   :  { %19820 = vst [vmem:[#allocation150_spill] sm:$0xff] %v16041_v45  ;;  %v16047_v46 = vpack.c.bf16 %v270_v35, %v262_v24  ;;  %v277_v34 = vld [vmem:[#allocation12 + $0x90] sm:$0xff]  ;;  %v294_v24 = vld [vmem:[#allocation12 + $0x118] sm:$0xff] }
 0x4dc   :  { %11489 = vmatpush1.bf16.msra.mxu0 %v16008_v56  ;;  %19815 = vst [vmem:[#allocation145_spill] sm:$0xff] %v16026_v27  ;;  %v363_v56 = vld [vmem:[#allocation12 + $0x340] sm:$0xff]  ;;  %19817 = vst [vmem:[#allocation147_spill] sm:$0xff] %v16032_v25  ;;  %v302_v35 = vld [vmem:[#allocation12 + $0x158] sm:$0xff] }
 0x4dd   :  { %11491 = vmatprep.subr.bf16.mxu0 %v16011_v19  ;;  %11521 = vmatpush1.bf16.msra.mxu1 %v16014_v11  ;;  %v851_v11 = vld [vmem:[#allocation24 + $0x2c0] sm:$0xff]  ;;  %19822 = vst [vmem:[#allocation152_spill] sm:$0xff] %v16047_v46  ;;  %19824 = vst [vmem:[#allocation154_spill] sm:$0xff] %v16054_v33  ;;  %v293_v0 = vld [vmem:[#allocation12 + $0x110] sm:$0xff] }
 0x4de   :  { %11523 = vmatprep.subr.bf16.mxu1 %v16017_v12  ;;  %v16038_v12 = vpack.c.bf16 %v363_v56, %v355_v40  ;;  %v371_v19 = vld [vmem:[#allocation12 + $0x380] sm:$0xff]  ;;  %v16044_v49 = vpack.c.bf16 %v857_v38, %v851_v11  ;;  %v278_v56 = vld [vmem:[#allocation12 + $0x98] sm:$0xff]  ;;  %v285_v38 = vld [vmem:[#allocation12 + $0xd0] sm:$0xff] }
 0x4df   :  { %v301_v61 = vld [vmem:[#allocation12 + $0x150] sm:$0xff] }
 0x4e0   :  { %11493 = vmatpush1.bf16.msra.mxu0 %v16020_v41  ;;  %19819 = vst [vmem:[#allocation149_spill] sm:$0xff] %v16038_v12  ;;  %v379_v41 = vld [vmem:[#allocation12 + $0x3c0] sm:$0xff]  ;;  %19821 = vst [vmem:[#allocation151_spill] sm:$0xff] %v16044_v49 }
 0x4e1   :  { %11495 = vmatprep.subr.bf16.mxu0 %v16023_v62  ;;  %11525 = vmatpush1.bf16.msra.mxu1 %v16026_v27  ;;  %v16050_v40 = vpack.c.bf16 %v379_v41, %v371_v19  ;;  %v19826_v19 = vmov 1.0   ;;  %v16065_v41 = vpack.c.bf16 %v285_v38, %v277_v34  ;;  %v309_v34 = vld [vmem:[#allocation12 + $0x190] sm:$0xff] }
 0x4e2   :  { %11527 = vmatprep.subr.bf16.mxu1 %v16029_v18  ;;  %v286_v18 = vld [vmem:[#allocation12 + $0xd8] sm:$0xff]  ;;  %v317_v38 = vld [vmem:[#allocation12 + $0x1d0] sm:$0xff] }
 0x4e3   :  { %19823 = vst [vmem:[#allocation153_spill] sm:$0xff] %v16050_v40  ;;  %v16057_v11 = vpack.c.bf16 %v286_v18, %v278_v56  ;;  %19827 = vst [vmem:[#allocation156_spill] sm:$0xff] %v16065_v41  ;;  %v16069_v18 = vpack.c.bf16 %v302_v35, %v294_v24  ;;  %v310_v56 = vld [vmem:[#allocation12 + $0x198] sm:$0xff]  ;;  %v16078_v24 = vpack.c.bf16 %v317_v38, %v309_v34  ;;  %v281_v27 = vld [vmem:[#allocation12 + $0xb0] sm:$0xff] }
 0x4e4   :  { %11497 = vmatpush1.bf16.msra.mxu0 %v16032_v25  ;;  %v358_v34 = vld [vmem:[#allocation12 + $0x318] sm:$0xff]  ;;  %v289_v62 = vld [vmem:[#allocation12 + $0xf0] sm:$0xff] }
 0x4e5   :  { %11499 = vmatprep.subr.bf16.mxu0 %v16035_v5  ;;  %11529 = vmatpush1.bf16.msra.mxu1 %v16038_v12  ;;  %19825 = vst [vmem:[#allocation155_spill] sm:$0xff] %v16057_v11  ;;  %19828 = vst [vmem:[#allocation157_spill] sm:$0xff] %v16069_v18  ;;  %v366_v38 = vld [vmem:[#allocation12 + $0x358] sm:$0xff] }
 0x4e6   :  { %11531 = vmatprep.subr.bf16.mxu1 %v16041_v45  ;;  %v334_v45 = vld [vmem:[#allocation12 + $0x258] sm:$0xff]  ;;  %19831 = vst [vmem:[#allocation160_spill] sm:$0xff] %v16078_v24 }
 0x4e8   :  { %11501 = vmatpush1.bf16.msra.mxu0 %v16044_v49 }
 0x4e9   :  { %11535 = vmatprep.subr.bf16.mxu0 %v16047_v46  ;;  %11533 = vmatpush1.bf16.msra.mxu1 %v16050_v40  ;;  %v318_v40 = vld [vmem:[#allocation12 + $0x1d8] sm:$0xff]  ;;  %v16072_v46 = vpack.c.bf16 %v301_v61, %v293_v0 }
 0x4ea   :  { %v16075_v49 = vpack.c.bf16 %v318_v40, %v310_v56  ;;  %v342_v0 = vld [vmem:[#allocation12 + $0x298] sm:$0xff] }
 0x4eb   :  { %9783 = vmatmul.mubr.msk.f32.vlgmr.msra.gmra.mrb[4].mxu0 %vm1293_vm3, %v19826_v19  ;;  %19829 = vst [vmem:[#allocation158_spill] sm:$0xff] %v16072_v46  ;;  %v350_v61 = vld [vmem:[#allocation12 + $0x2d8] sm:$0xff]  ;;  %v296_v19 = vld [vmem:[#allocation12 + $0x128] sm:$0xff] }
 0x4ec   :  { %11537 = vmatpush1.bf16.msra.mxu0 %v16054_v33  ;;  %1655 = vmatprep.mubr.f32.mxu0 %v19797_v50  ;;  %19830 = vst [vmem:[#allocation159_spill] sm:$0xff] %v16075_v49  ;;  %v326_v33 = vld [vmem:[#allocation12 + $0x218] sm:$0xff]  ;;  %v16087_v56 = vpack.c.bf16 %v350_v61, %v342_v0 }
 0x4ed   :  { %11539 = vmatprep.subr.bf16.mxu0 %v16057_v11  ;;  %v16081_v35 = vpack.c.bf16 %v334_v45, %v326_v33  ;;  %v325_v11 = vld [vmem:[#allocation12 + $0x210] sm:$0xff]  ;;  %v16093_v33 = vpack.c.bf16 %v366_v38, %v358_v34  ;;  %v272_v34 = vld [vmem:[#allocation12 + $0x68] sm:$0xff]  ;;  %v266_v38 = vld [vmem:[#allocation12 + $0x38] sm:$0xff] }
 0x4ee   :  { %19834 = vst [vmem:[#allocation163_spill] sm:$0xff] %v16087_v56 }
 0x4ef   :  { %19832 = vst [vmem:[#allocation161_spill] sm:$0xff] %v16081_v35  ;;  %19836 = vst [vmem:[#allocation165_spill] sm:$0xff] %v16093_v33 }
 0x4f0   :  { %11541 = vmatpush1.bf16.msra.mxu0 %v16065_v41  ;;  %v333_v41 = vld [vmem:[#allocation12 + $0x250] sm:$0xff] }
 0x4f1   :  { %11543 = vmatprep.subr.bf16.mxu0 %v16069_v18  ;;  %v16084_v40 = vpack.c.bf16 %v333_v41, %v325_v11  ;;  %v341_v18 = vld [vmem:[#allocation12 + $0x290] sm:$0xff]  ;;  %v374_v11 = vld [vmem:[#allocation12 + $0x398] sm:$0xff] }
 0x4f2   :  { %v382_v41 = vld [vmem:[#allocation12 + $0x3d8] sm:$0xff] }
 0x4f3   :  { %19833 = vst [vmem:[#allocation162_spill] sm:$0xff] %v16084_v40  ;;  %v16099_v61 = vpack.c.bf16 %v382_v41, %v374_v11  ;;  %v271_v11 = vld [vmem:[#allocation12 + $0x60] sm:$0xff]  ;;  %v265_v41 = vld [vmem:[#allocation12 + $0x30] sm:$0xff] }
 0x4f4   :  { %11545 = vmatpush1.bf16.msra.mxu0 %v16072_v46  ;;  %v349_v46 = vld [vmem:[#allocation12 + $0x2d0] sm:$0xff] }
 0x4f5   :  { %11547 = vmatprep.subr.bf16.mxu0 %v16075_v49  ;;  %v16090_v45 = vpack.c.bf16 %v349_v46, %v341_v18  ;;  %v357_v49 = vld [vmem:[#allocation12 + $0x310] sm:$0xff]  ;;  %19838 = vst [vmem:[#allocation167_spill] sm:$0xff] %v16099_v61  ;;  %v264_v18 = vld [vmem:[#allocation12 + $0x28] sm:$0xff] }
 0x4f7   :  { %19835 = vst [vmem:[#allocation164_spill] sm:$0xff] %v16090_v45 }
 0x4f8   :  { %11549 = vmatpush1.bf16.msra.mxu0 %v16078_v24  ;;  %v365_v24 = vld [vmem:[#allocation12 + $0x350] sm:$0xff] }
 0x4f9   :  { %11551 = vmatprep.subr.bf16.mxu0 %v16081_v35  ;;  %v16096_v0 = vpack.c.bf16 %v365_v24, %v357_v49  ;;  %v373_v35 = vld [vmem:[#allocation12 + $0x390] sm:$0xff]  ;;  %v274_v49 = vld [vmem:[#allocation12 + $0x78] sm:$0xff] }
 0x4fa   :  { %v16108_v24 = vpack.c.bf16 %v274_v49, %v266_v38  ;;  %v279_v49 = vld [vmem:[#allocation12 + $0xa0] sm:$0xff] }
 0x4fb   :  { %19837 = vst [vmem:[#allocation166_spill] sm:$0xff] %v16096_v0 }
 0x4fc   :  { %11553 = vmatpush1.bf16.msra.mxu0 %v16084_v40  ;;  %v381_v40 = vld [vmem:[#allocation12 + $0x3d0] sm:$0xff]  ;;  %19841 = vst [vmem:[#allocation170_spill] sm:$0xff] %v16108_v24 }
 0x4fd   :  { %11555 = vmatprep.subr.bf16.mxu0 %v16087_v56  ;;  %v16102_v46 = vpack.c.bf16 %v381_v40, %v373_v35  ;;  %v9784_v35 = vld [vmem:[%s18970_s16] ss:$0 sm:$0xff]  ;;  %v263_v40 = vld [vmem:[#allocation12 + $0x20] sm:$0xff] }
 0x4fe   :  { %v16115_v56 = vpack.c.bf16 %v271_v11, %v263_v40  ;;  %v16139_v40 = vpack.c.bf16 %v306_v2, %v298_v17  ;;  %v297_v11 = vld [vmem:[#allocation12 + $0x130] sm:$0xff]  ;;  %v311_v2 = vld [vmem:[#allocation12 + $0x1a0] sm:$0xff] }
 0x4ff   :  { %19839 = vst [vmem:[#allocation168_spill] sm:$0xff] %v16102_v46  ;;  %v319_v17 = vld [vmem:[#allocation12 + $0x1e0] sm:$0xff] }
 0x500   :  { %11557 = vmatpush1.bf16.msra.mxu0 %v16090_v45  ;;  %v16106_v45 = vpack.c.bf16 %v272_v34, %v264_v18  ;;  %v290_v18 = vld [vmem:[#allocation12 + $0xf8] sm:$0xff]  ;;  %19842 = vst [vmem:[#allocation171_spill] sm:$0xff] %v16115_v56  ;;  %19849 = vst [vmem:[#allocation178_spill] sm:$0xff] %v16139_v40 }
 0x501   :  { %11559 = vmatprep.subr.bf16.mxu0 %v16093_v33  ;;  %v282_v33 = vld [vmem:[#allocation12 + $0xb8] sm:$0xff] }
 0x502   :  { %19840 = vst [vmem:[#allocation169_spill] sm:$0xff] %v16106_v45  ;;  %11567 = vmatprep.subr.bf16.mxu1 %v16106_v45  ;;  %v287_v45 = vld [vmem:[#allocation12 + $0xe0] sm:$0xff]  ;;  %v16125_v25 = vpack.c.bf16 %v290_v18, %v282_v33  ;;  %v312_v18 = vld [vmem:[#allocation12 + $0x1a8] sm:$0xff] }
 0x503   :  { %v295_v33 = vld [vmem:[#allocation12 + $0x120] sm:$0xff] }
 0x504   :  { %11561 = vmatpush1.bf16.msra.mxu0 %v16096_v0  ;;  %v288_v0 = vld [vmem:[#allocation12 + $0xe8] sm:$0xff]  ;;  %19845 = vst [vmem:[#allocation174_spill] sm:$0xff] %v16125_v25 }
 0x505   :  { %11563 = vmatprep.subr.bf16.mxu0 %v16099_v61  ;;  %v280_v61 = vld [vmem:[#allocation12 + $0xa8] sm:$0xff] }
 0x506   :  { %v16123_v5 = vpack.c.bf16 %v288_v0, %v280_v61  ;;  %v16133_v0 = vpack.c.bf16 %v289_v62, %v281_v27  ;;  %v303_v61 = vld [vmem:[#allocation12 + $0x160] sm:$0xff] }
 0x507   :  { %v16145_v27 = vpack.c.bf16 %v303_v61, %v295_v33  ;;  %v16157_v33 = vpack.c.bf16 %v319_v17, %v311_v2 }
 0x508   :  { %11565 = vmatpush1.bf16.msra.mxu0 %v16102_v46  ;;  %v273_v46 = vld [vmem:[#allocation12 + $0x70] sm:$0xff]  ;;  %19844 = vst [vmem:[#allocation173_spill] sm:$0xff] %v16123_v5  ;;  %19847 = vst [vmem:[#allocation176_spill] sm:$0xff] %v16133_v0 }
 0x509   :  { %11599 = vmatprep.subr.bf16.mxu0 %v16108_v24  ;;  %v16117_v38 = vpack.c.bf16 %v273_v46, %v265_v41  ;;  %v16131_v46 = vpack.c.bf16 %v287_v45, %v279_v49  ;;  %v305_v41 = vld [vmem:[#allocation12 + $0x170] sm:$0xff]  ;;  %19850 = vst [vmem:[#allocation179_spill] sm:$0xff] %v16145_v27  ;;  %19854 = vst [vmem:[#allocation183_spill] sm:$0xff] %v16157_v33 }
 0x50a   :  { %v313_v45 = vld [vmem:[#allocation12 + $0x1b0] sm:$0xff] }
 0x50b   :  { %19843 = vst [vmem:[#allocation172_spill] sm:$0xff] %v16117_v38  ;;  %19846 = vst [vmem:[#allocation175_spill] sm:$0xff] %v16131_v46  ;;  %v321_v49 = vld [vmem:[#allocation12 + $0x1f0] sm:$0xff] }
 0x50c   :  { %v16159_v61 = vpack.c.bf16 %v321_v49, %v313_v45  ;;  %v343_v45 = vld [vmem:[#allocation12 + $0x2a0] sm:$0xff] }
 0x50d   :  { %v351_v49 = vld [vmem:[#allocation12 + $0x2e0] sm:$0xff] }
 0x50e   :  { %19855 = vst [vmem:[#allocation184_spill] sm:$0xff] %v16159_v61 }
 0x5be   :  { %v1508_v34 = vpop.f32.mrb[4].mxu0 }
 0x5bf   :  { %v16119_v24 = vadd.f32 %v9784_v35, %v1508_v34  ;;  %v16121_v12 = vpop.f32.mrb[5].mxu0  ;;  %v16137_v35 = vpack.c.bf16 %v304_v55, %v296_v19  ;;  %v320_v34 = vld [vmem:[#allocation12 + $0x1e8] sm:$0xff]  ;;  %v16147_v55 = vpack.c.bf16 %v305_v41, %v297_v11  ;;  %v327_v11 = vld [vmem:[#allocation12 + $0x220] sm:$0xff] }
 0x5c0   :  { %v16151_v62 = vpack.c.bf16 %v320_v34, %v312_v18  ;;  %v335_v41 = vld [vmem:[#allocation12 + $0x260] sm:$0xff]  ;;  %v329_v18 = vld [vmem:[#allocation12 + $0x230] sm:$0xff] }
 0x5c1   :  { %1585 = vmatmul.mubr.f32.vlgmr.msra.gmra.mrb[4].mxu1 %v16119_v24  ;;  %1656 = vmatmul.mubr.f32.vlgmr.msra.gmra.mrb[6].mxu0 %v16119_v24  ;;  %19848 = vst [vmem:[#allocation177_spill] sm:$0xff] %v16137_v35  ;;  %19851 = vst [vmem:[#allocation180_spill] sm:$0xff] %v16147_v55  ;;  %v337_v34 = vld [vmem:[#allocation12 + $0x270] sm:$0xff]  ;;  %v16169_v2 = vpack.c.bf16 %v335_v41, %v327_v11  ;;  %v16181_v11 = vpack.c.bf16 %v351_v49, %v343_v45 }
 0x5c2   :  { %11569 = vmatpush1.bf16.msra.mxu1 %v16115_v56  ;;  %11601 = vmatpush1.bf16.msra.mxu0 %v16117_v38  ;;  %v314_v56 = vld [vmem:[#allocation12 + $0x1b8] sm:$0xff]  ;;  %19852 = vst [vmem:[#allocation181_spill] sm:$0xff] %v16151_v62  ;;  %v16171_v17 = vpack.c.bf16 %v337_v34, %v329_v18  ;;  %v359_v18 = vld [vmem:[#allocation12 + $0x320] sm:$0xff] }
 0x5c3   :  { %11571 = vmatprep.subr.bf16.mxu1 %v16123_v5  ;;  %11603 = vmatprep.subr.bf16.mxu0 %v16125_v25  ;;  %v322_v38 = vld [vmem:[#allocation12 + $0x1f8] sm:$0xff]  ;;  %v328_v25 = vld [vmem:[#allocation12 + $0x228] sm:$0xff]  ;;  %19858 = vst [vmem:[#allocation187_spill] sm:$0xff] %v16169_v2  ;;  %19862 = vst [vmem:[#allocation191_spill] sm:$0xff] %v16181_v11 }
 0x5c4   :  { %1726 = vmatprep.mubr.f32.mxu1 %v19797_v50  ;;  %1797 = vmatprep.mubr.f32.mxu0 %v19797_v50  ;;  %v16153_v19 = vpack.c.bf16 %v322_v38, %v314_v56  ;;  %v330_v5 = vld [vmem:[#allocation12 + $0x238] sm:$0xff]  ;;  %19859 = vst [vmem:[#allocation188_spill] sm:$0xff] %v16171_v17  ;;  %v367_v34 = vld [vmem:[#allocation12 + $0x360] sm:$0xff] }
 0x5c5   :  { %v16193_v45 = vpack.c.bf16 %v367_v34, %v359_v18 }
 0x5c6   :  { %11573 = vmatpush1.bf16.msra.mxu1 %v16131_v46  ;;  %11605 = vmatpush1.bf16.msra.mxu0 %v16133_v0  ;;  %19853 = vst [vmem:[#allocation182_spill] sm:$0xff] %v16153_v19  ;;  %v336_v46 = vld [vmem:[#allocation12 + $0x268] sm:$0xff]  ;;  %v338_v0 = vld [vmem:[#allocation12 + $0x278] sm:$0xff] }
 0x5c7   :  { %11575 = vmatprep.subr.bf16.mxu1 %v16137_v35  ;;  %11607 = vmatprep.subr.bf16.mxu0 %v16139_v40  ;;  %v16163_v56 = vpack.c.bf16 %v336_v46, %v328_v25  ;;  %v16165_v38 = vpack.c.bf16 %v338_v0, %v330_v5  ;;  %v344_v40 = vld [vmem:[#allocation12 + $0x2a8] sm:$0xff]  ;;  %v346_v35 = vld [vmem:[#allocation12 + $0x2b8] sm:$0xff]  ;;  %v345_v46 = vld [vmem:[#allocation12 + $0x2b0] sm:$0xff]  ;;  %19866 = vst [vmem:[#allocation195_spill] sm:$0xff] %v16193_v45 }
 0x5c8   :  { %v353_v0 = vld [vmem:[#allocation12 + $0x2f0] sm:$0xff] }
 0x5c9   :  { %19856 = vst [vmem:[#allocation185_spill] sm:$0xff] %v16163_v56  ;;  %19857 = vst [vmem:[#allocation186_spill] sm:$0xff] %v16165_v38  ;;  %v16183_v41 = vpack.c.bf16 %v353_v0, %v345_v46  ;;  %v375_v46 = vld [vmem:[#allocation12 + $0x3a0] sm:$0xff]  ;;  %v385_v0 = vld [vmem:[#allocation12 + $0x3f0] sm:$0xff] }
 0x5ca   :  { %11577 = vmatpush1.bf16.msra.mxu1 %v16145_v27  ;;  %11609 = vmatpush1.bf16.msra.mxu0 %v16147_v55  ;;  %v352_v27 = vld [vmem:[#allocation12 + $0x2e8] sm:$0xff]  ;;  %v354_v55 = vld [vmem:[#allocation12 + $0x2f8] sm:$0xff] }
 0x5cb   :  { %11579 = vmatprep.subr.bf16.mxu1 %v16151_v62  ;;  %11611 = vmatprep.subr.bf16.mxu0 %v16153_v19  ;;  %v16175_v25 = vpack.c.bf16 %v352_v27, %v344_v40  ;;  %v16177_v5 = vpack.c.bf16 %v354_v55, %v346_v35  ;;  %v360_v19 = vld [vmem:[#allocation12 + $0x328] sm:$0xff]  ;;  %v362_v62 = vld [vmem:[#allocation12 + $0x338] sm:$0xff]  ;;  %19863 = vst [vmem:[#allocation192_spill] sm:$0xff] %v16183_v41  ;;  %v361_v27 = vld [vmem:[#allocation12 + $0x330] sm:$0xff] }
 0x5cc   :  { %v369_v55 = vld [vmem:[#allocation12 + $0x370] sm:$0xff] }
 0x5cd   :  { %19860 = vst [vmem:[#allocation189_spill] sm:$0xff] %v16175_v25  ;;  %19861 = vst [vmem:[#allocation190_spill] sm:$0xff] %v16177_v5  ;;  %v16195_v49 = vpack.c.bf16 %v369_v55, %v361_v27  ;;  %v515_v27 = vld [vmem:[#allocation15] sm:$0xff]  ;;  %v517_v55 = vld [vmem:[#allocation15 + $0x10] sm:$0xff] }
 0x5ce   :  { %11581 = vmatpush1.bf16.msra.mxu1 %v16157_v33  ;;  %11613 = vmatpush1.bf16.msra.mxu0 %v16159_v61  ;;  %v368_v33 = vld [vmem:[#allocation12 + $0x368] sm:$0xff]  ;;  %v370_v61 = vld [vmem:[#allocation12 + $0x378] sm:$0xff] }
 0x5cf   :  { %11583 = vmatprep.subr.bf16.mxu1 %v16163_v56  ;;  %11615 = vmatprep.subr.bf16.mxu0 %v16165_v38  ;;  %v16187_v35 = vpack.c.bf16 %v368_v33, %v360_v19  ;;  %v16189_v40 = vpack.c.bf16 %v370_v61, %v362_v62  ;;  %v376_v38 = vld [vmem:[#allocation12 + $0x3a8] sm:$0xff]  ;;  %v378_v56 = vld [vmem:[#allocation12 + $0x3b8] sm:$0xff]  ;;  %19867 = vst [vmem:[#allocation196_spill] sm:$0xff] %v16195_v49  ;;  %v383_v33 = vld [vmem:[#allocation12 + $0x3e0] sm:$0xff] }
 0x5d0   :  { %v377_v61 = vld [vmem:[#allocation12 + $0x3b0] sm:$0xff]  ;;  %v16205_v18 = vpack.c.bf16 %v383_v33, %v375_v46  ;;  %v516_v46 = vld [vmem:[#allocation15 + $0x8] sm:$0xff]  ;;  %v519_v33 = vld [vmem:[#allocation15 + $0x20] sm:$0xff] }
 0x5d1   :  { %19864 = vst [vmem:[#allocation193_spill] sm:$0xff] %v16187_v35  ;;  %19865 = vst [vmem:[#allocation194_spill] sm:$0xff] %v16189_v40  ;;  %v16207_v34 = vpack.c.bf16 %v385_v0, %v377_v61  ;;  %v521_v61 = vld [vmem:[#allocation15 + $0x30] sm:$0xff]  ;;  %v518_v0 = vld [vmem:[#allocation15 + $0x18] sm:$0xff] }
 0x5d2   :  { %11585 = vmatpush1.bf16.msra.mxu1 %v16169_v2  ;;  %11617 = vmatpush1.bf16.msra.mxu0 %v16171_v17  ;;  %v384_v2 = vld [vmem:[#allocation12 + $0x3e8] sm:$0xff]  ;;  %v386_v17 = vld [vmem:[#allocation12 + $0x3f8] sm:$0xff]  ;;  %19870 = vst [vmem:[#allocation199_spill] sm:$0xff] %v16205_v18 }
 0x5d3   :  { %11587 = vmatprep.subr.bf16.mxu1 %v16175_v25  ;;  %11619 = vmatprep.subr.bf16.mxu0 %v16177_v5  ;;  %v16199_v62 = vpack.c.bf16 %v384_v2, %v376_v38  ;;  %v16201_v19 = vpack.c.bf16 %v386_v17, %v378_v56  ;;  %19871 = vst [vmem:[#allocation200_spill] sm:$0xff] %v16207_v34 }
 0x5d5   :  { %19868 = vst [vmem:[#allocation197_spill] sm:$0xff] %v16199_v62  ;;  %19869 = vst [vmem:[#allocation198_spill] sm:$0xff] %v16201_v19 }
 0x5d6   :  { %11589 = vmatpush1.bf16.msra.mxu1 %v16181_v11  ;;  %11621 = vmatpush1.bf16.msra.mxu0 %v16183_v41 }
 0x5d7   :  { %11591 = vmatprep.subr.bf16.mxu1 %v16187_v35  ;;  %11623 = vmatprep.subr.bf16.mxu0 %v16189_v40 }
 0x5da   :  { %11593 = vmatpush1.bf16.msra.mxu1 %v16193_v45  ;;  %11625 = vmatpush1.bf16.msra.mxu0 %v16195_v49 }
 0x5db   :  { %11595 = vmatprep.subr.bf16.mxu1 %v16199_v62  ;;  %11627 = vmatprep.subr.bf16.mxu0 %v16201_v19  ;;  %v520_v62 = vld [vmem:[#allocation15 + $0x28] sm:$0xff]  ;;  %v522_v19 = vld [vmem:[#allocation15 + $0x38] sm:$0xff] }
 0x5de   :  { %11597 = vmatpush1.bf16.msra.mxu1 %v16205_v18  ;;  %11629 = vmatpush1.bf16.msra.mxu0 %v16207_v34 }
 0x5e1   :  { %1727 = vmatmul.mubr.f32.vlgmr.msra.gmra.mrb[6].mxu1 %v16119_v24  ;;  %1798 = vmatmul.mubr.f32.vlgmr.msra.gmra.mrb[8].mxu0 %v16119_v24 }
 0x694   :  { %v1586_v56 = vpop.f32.mrb[4].mxu1  ;;  %v1657_v38 = vpop.f32.mrb[6].mxu0 }
 0x695   :  { %v1588_v2 = vpop.f32.mrb[5].mxu1  ;;  %v1659_v17 = vpop.f32.mrb[7].mxu0  ;;  %v16215_v45 = vadd.f32 %v1586_v56, %v515_v27  ;;  %v16217_v34 = vadd.f32 %v1657_v38, %v517_v55  ;;  %v436_v55 = vld [vmem:[#allocation14 + $0x188] sm:$0xff] }
 0x696   :  { %v16223_v11 = vadd.f32 %v1588_v2, %v516_v46  ;;  %v16225_v5 = vadd.f32 %v1659_v17, %v518_v0  ;;  %v387_v46 = vld [vmem:[#allocation14] sm:$0xff] }
 0x6b4   :  { %v1728_v49 = vpop.f32.mrb[6].mxu1  ;;  %v1799_v18 = vpop.f32.mrb[8].mxu0 }
 0x6b5   :  { %v16219_v40 = vadd.f32 %v1728_v49, %v519_v33  ;;  %v16221_v24 = vadd.f32 %v1799_v18, %v521_v61  ;;  %v1730_v35 = vpop.f32.mrb[7].mxu1  ;;  %v1801_v41 = vpop.f32.mrb[9].mxu0  ;;  %v388_v33 = vld [vmem:[#allocation14 + $0x8] sm:$0xff] }
 0x6b6   :  { %v16227_v25 = vadd.f32 %v1730_v35, %v520_v62  ;;  %v16229_v57 = vadd.f32 %v1801_v41, %v522_v19  ;;  %v403_v35 = vld [vmem:[#allocation14 + $0x80] sm:$0xff]  ;;  %v404_v62 = vld [vmem:[#allocation14 + $0x88] sm:$0xff]  ;;  %v16243_v0 = vpack.c.bf16 %v388_v33, %v387_v46 }
 0x6b7   :  { %v1804_v56 = vmax.f32 %v16215_v45, %v16219_v40  ;;  %v1806_v38 = vmax.f32 %v16217_v34, %v16221_v24  ;;  %v435_v41 = vld [vmem:[#allocation14 + $0x180] sm:$0xff]  ;;  %v16239_v19 = vpack.c.bf16 %v404_v62, %v403_v35  ;;  %v390_v35 = vld [vmem:[#allocation14 + $0x18] sm:$0xff]  ;;  %v421_v62 = vld [vmem:[#allocation14 + $0x110] sm:$0xff] }
 0x6b8   :  { %v1805_v49 = vmax.f32 %v16223_v11, %v16227_v25  ;;  %v1807_v18 = vmax.f32 %v16225_v5, %v16229_v57  ;;  %v16241_v61 = vpack.c.bf16 %v436_v55, %v435_v41  ;;  %19874 = vst [vmem:[#allocation203_spill] sm:$0xff] %v16243_v0  ;;  %v408_v55 = vld [vmem:[#allocation14 + $0xa8] sm:$0xff]  ;;  %v439_v33 = vld [vmem:[#allocation14 + $0x1a0] sm:$0xff] }
 0x6b9   :  { %19872 = vst [vmem:[#allocation201_spill] sm:$0xff] %v16239_v19  ;;  %11631 = vmatprep.subr.bf16.mxu1 %v16239_v19  ;;  %v441_v19 = vld [vmem:[#allocation14 + $0x1b0] sm:$0xff] }
 0x6ba   :  { %v1808_v2 = vmax.f32 %v1804_v56, %v1805_v49  ;;  %v1809_v27 = vmax.f32 %v1806_v38, %v1807_v18  ;;  %19873 = vst [vmem:[#allocation202_spill] sm:$0xff] %v16241_v61  ;;  %v16246_v56 = vpack.c.bf16 %v420_v47, %v419_v51  ;;  %v406_v38 = vld [vmem:[#allocation14 + $0x98] sm:$0xff]  ;;  %v437_v49 = vld [vmem:[#allocation14 + $0x190] sm:$0xff]  ;;  %11663 = vmatprep.subr.bf16.mxu0 %v16241_v61  ;;  %v407_v51 = vld [vmem:[#allocation14 + $0xa0] sm:$0xff] }
 0x6bb   :  { %v438_v18 = vld [vmem:[#allocation14 + $0x198] sm:$0xff]  ;;  %11633 = vmatpush3.bf16.msra.mxu1 %v16243_v0  ;;  %v392_v0 = vld [vmem:[#allocation14 + $0x28] sm:$0xff]  ;;  %v409_v61 = vld [vmem:[#allocation14 + $0xb0] sm:$0xff] }
 0x6bc   :  { %v1810_v17 = vmax.f32 %v1808_v2, %v1809_v27  ;;  %19875 = vst [vmem:[#allocation204_spill] sm:$0xff] %v16246_v56  ;;  %v16250_v2 = vpack.c.bf16 %v406_v38, %v405_v43  ;;  %v16252_v27 = vpack.c.bf16 %v438_v18, %v437_v49  ;;  %11665 = vmatpush3.bf16.msra.mxu0 %v16246_v56  ;;  %v422_v47 = vld [vmem:[#allocation14 + $0x118] sm:$0xff]  ;;  %v440_v38 = vld [vmem:[#allocation14 + $0x1a8] sm:$0xff]  ;;  %v391_v49 = vld [vmem:[#allocation14 + $0x20] sm:$0xff] }
 0x6bd   :  { %v16259_v46 = vpack.c.bf16 %v422_v47, %v421_v62  ;;  %v16261_v43 = vpack.c.bf16 %v408_v55, %v407_v51  ;;  %v16263_v18 = vpack.c.bf16 %v440_v38, %v439_v33  ;;  %v423_v56 = vld [vmem:[#allocation14 + $0x120] sm:$0xff]  ;;  %v442_v51 = vld [vmem:[#allocation14 + $0x1b8] sm:$0xff]  ;;  %v393_v55 = vld [vmem:[#allocation14 + $0x30] sm:$0xff] }
 0x6be   :  { %1811 = vmax.xlane.f32.xlu1 %v1810_v17  ;;  %19876 = vst [vmem:[#allocation205_spill] sm:$0xff] %v16250_v2  ;;  %19877 = vst [vmem:[#allocation206_spill] sm:$0xff] %v16252_v27  ;;  %v389_v17 = vld [vmem:[#allocation14 + $0x10] sm:$0xff]  ;;  %11635 = vmatprep.subr.bf16.mxu1 %v16250_v2  ;;  %v410_v2 = vld [vmem:[#allocation14 + $0xb8] sm:$0xff]  ;;  %v16275_v38 = vpack.c.bf16 %v442_v51, %v441_v19 }
 0x6bf   :  { %v16255_v41 = vpack.c.bf16 %v390_v35, %v389_v17  ;;  %11667 = vmatprep.subr.bf16.mxu0 %v16252_v27  ;;  %19879 = vst [vmem:[#allocation208_spill] sm:$0xff] %v16259_v46  ;;  %19880 = vst [vmem:[#allocation209_spill] sm:$0xff] %v16261_v43  ;;  %v424_v17 = vld [vmem:[#allocation14 + $0x128] sm:$0xff]  ;;  %v16266_v35 = vpack.c.bf16 %v392_v0, %v391_v49  ;;  %v16272_v47 = vpack.c.bf16 %v410_v2, %v409_v61  ;;  %v394_v33 = vld [vmem:[#allocation14 + $0x38] sm:$0xff] }
 0x6c0   :  { %19881 = vst [vmem:[#allocation210_spill] sm:$0xff] %v16263_v18  ;;  %11669 = vmatpush3.bf16.msra.mxu0 %v16259_v46  ;;  %v16270_v62 = vpack.c.bf16 %v424_v17, %v423_v56  ;;  %19885 = vst [vmem:[#allocation214_spill] sm:$0xff] %v16275_v38  ;;  %v425_v0 = vld [vmem:[#allocation14 + $0x130] sm:$0xff]  ;;  %v426_v49 = vld [vmem:[#allocation14 + $0x138] sm:$0xff]  ;;  %v16287_v17 = vpack.c.bf16 %v444_v28, %v443_v37 }
 0x6c1   :  { %19878 = vst [vmem:[#allocation207_spill] sm:$0xff] %v16255_v41  ;;  %11637 = vmatpush3.bf16.msra.mxu1 %v16255_v41  ;;  %19882 = vst [vmem:[#allocation211_spill] sm:$0xff] %v16266_v35  ;;  %11671 = vmatprep.subr.bf16.mxu0 %v16263_v18  ;;  %v411_v41 = vld [vmem:[#allocation14 + $0xc0] sm:$0xff]  ;;  %v412_v27 = vld [vmem:[#allocation14 + $0xc8] sm:$0xff]  ;;  %v16282_v61 = vpack.c.bf16 %v426_v49, %v425_v0 }
 0x6c2   :  { %11639 = vmatprep.subr.bf16.mxu1 %v16261_v43  ;;  %19883 = vst [vmem:[#allocation212_spill] sm:$0xff] %v16270_v62  ;;  %19884 = vst [vmem:[#allocation213_spill] sm:$0xff] %v16272_v47  ;;  %v16278_v43 = vpack.c.bf16 %v394_v33, %v393_v55  ;;  %v16284_v56 = vpack.c.bf16 %v412_v27, %v411_v41  ;;  %v395_v19 = vld [vmem:[#allocation14 + $0x40] sm:$0xff]  ;;  %v396_v2 = vld [vmem:[#allocation14 + $0x48] sm:$0xff] }
 0x6c3   :  { %19887 = vst [vmem:[#allocation216_spill] sm:$0xff] %v16282_v61  ;;  %19889 = vst [vmem:[#allocation218_spill] sm:$0xff] %v16287_v17  ;;  %v427_v51 = vld [vmem:[#allocation14 + $0x140] sm:$0xff]  ;;  %v428_v18 = vld [vmem:[#allocation14 + $0x148] sm:$0xff]  ;;  %v16290_v55 = vpack.c.bf16 %v396_v2, %v395_v19 }
 0x6c4   :  { %19886 = vst [vmem:[#allocation215_spill] sm:$0xff] %v16278_v43  ;;  %11673 = vmatpush3.bf16.msra.mxu0 %v16270_v62  ;;  %19888 = vst [vmem:[#allocation217_spill] sm:$0xff] %v16284_v56  ;;  %v16294_v33 = vpack.c.bf16 %v428_v18, %v427_v51  ;;  %v503_v62 = vld [vmem:[#allocation14 + $0x3a0] sm:$0xff]  ;;  %v570_v46 = vld [vmem:[#allocation17 + $0x178] sm:$0xff] }
 0x6c5   :  { %11641 = vmatpush3.bf16.msra.mxu1 %v16266_v35  ;;  %11675 = vmatprep.subr.bf16.mxu0 %v16275_v38  ;;  %19890 = vst [vmem:[#allocation219_spill] sm:$0xff] %v16290_v55  ;;  %v402_v38 = vld [vmem:[#allocation14 + $0x78] sm:$0xff] }
 0x6c6   :  { %11643 = vmatprep.subr.bf16.mxu1 %v16272_v47  ;;  %19891 = vst [vmem:[#allocation220_spill] sm:$0xff] %v16294_v33  ;;  %v562_v35 = vld [vmem:[#allocation17 + $0x138] sm:$0xff] }
 0x6c8   :  { %11677 = vmatpush3.bf16.msra.mxu0 %v16282_v61 }
 0x6c9   :  { %11645 = vmatpush3.bf16.msra.mxu1 %v16278_v43  ;;  %11679 = vmatprep.subr.bf16.mxu0 %v16287_v17  ;;  %v429_v17 = vld [vmem:[#allocation14 + $0x150] sm:$0xff]  ;;  %v448_v43 = vld [vmem:[#allocation14 + $0x1e8] sm:$0xff] }
 0x6ca   :  { %11647 = vmatprep.subr.bf16.mxu1 %v16284_v56  ;;  %v430_v56 = vld [vmem:[#allocation14 + $0x158] sm:$0xff] }
 0x6cb   :  { %v16338_v61 = vpack.c.bf16 %v430_v56, %v429_v17  ;;  %v432_v56 = vld [vmem:[#allocation14 + $0x168] sm:$0xff]  ;;  %v417_v17 = vld [vmem:[#allocation14 + $0xf0] sm:$0xff] }
 0x6cc   :  { %11681 = vmatpush3.bf16.msra.mxu0 %v16294_v33 }
 0x6cd   :  { %11649 = vmatpush3.bf16.msra.mxu1 %v16290_v55  ;;  %19895 = vst [vmem:[#allocation224_spill] sm:$0xff] %v16338_v61 }
 0x74b   :  { %v1812_v28 = vpop.xlane.xlu1 %1811 }
 0x74c   :  { %v1813_v37 = vsub.f32 %v16215_v45, %v1812_v28  ;;  %v1814_v27 = vsub.f32 %v16223_v11, %v1812_v28  ;;  %v1815_v41 = vsub.f32 %v16217_v34, %v1812_v28  ;;  %v1816_v0 = vsub.f32 %v16225_v5, %v1812_v28 }
 0x74d   :  { %v1817_v18 = vsub.f32 %v16219_v40, %v1812_v28  ;;  %v1818_v55 = vsub.f32 %v16227_v25, %v1812_v28  ;;  %v1819_v33 = vsub.f32 %v16221_v24, %v1812_v28  ;;  %v1820_v11 = vsub.f32 %v16229_v57, %v1812_v28 }
 0x74e   :  { %v1821_v49 = vmul.f32 1.442695, %v1813_v37  ;;  %v1823_v19 = vmul.f32 1.442695, %v1814_v27  ;;  %v1825_v2 = vmul.f32 1.442695, %v1815_v41 }
 0x74f   :  { %v1827_v51 = vmul.f32 1.442695, %v1816_v0  ;;  %v1829_v45 = vmul.f32 1.442695, %v1817_v18  ;;  %v1831_v34 = vmul.f32 1.442695, %v1818_v55 }
 0x750   :  { %14770 = vpow2.f32 %v1821_v49  ;;  %v1833_v5 = vmul.f32 1.442695, %v1819_v33  ;;  %v1835_v37 = vmul.f32 1.442695, %v1820_v11  ;;  %v414_v11 = vld [vmem:[#allocation14 + $0xd8] sm:$0xff] }
 0x751   :  { %14772 = vpow2.f32 %v1823_v19 }
 0x752   :  { %14774 = vpow2.f32 %v1825_v2 }
 0x753   :  { %14776 = vpow2.f32 %v1827_v51 }
 0x754   :  { %14778 = vpow2.f32 %v1829_v45  ;;  %v413_v45 = vld [vmem:[#allocation14 + $0xd0] sm:$0xff] }
 0x755   :  { %14780 = vpow2.f32 %v1831_v34  ;;  %v445_v34 = vld [vmem:[#allocation14 + $0x1d0] sm:$0xff] }
 0x756   :  { %14782 = vpow2.f32 %v1833_v5  ;;  %v16331_v5 = vpack.c.bf16 %v414_v11, %v413_v45 }
 0x757   :  { %14784 = vpow2.f32 %v1835_v37  ;;  %v446_v37 = vld [vmem:[#allocation14 + $0x1d8] sm:$0xff] }
 0x758   :  { %19892 = vst [vmem:[#allocation221_spill] sm:$0xff] %v16331_v5  ;;  %11651 = vmatprep.subr.bf16.mxu1 %v16331_v5  ;;  %v418_v5 = vld [vmem:[#allocation14 + $0xf8] sm:$0xff] }
 0x75a   :  { %v16307_v27 = vpop.eup %14770 }
 0x75b   :  { %v16309_v40 = vpop.eup %14772 }
 0x75c   :  { %v1837_v25 = vadd.f32 %v16309_v40, %v16307_v27  ;;  %v16313_v41 = vpop.eup %14774 }
 0x75d   :  { %v16316_v57 = vpop.eup %14776 }
 0x75e   :  { %v1838_v24 = vadd.f32 %v16313_v41, %v1837_v25  ;;  %v16319_v33 = vpop.eup %14778  ;;  %v397_v25 = vld [vmem:[#allocation14 + $0x50] sm:$0xff] }
 0x75f   :  { %v16322_v0 = vpop.eup %14780 }
 0x760   :  { %v1839_v55 = vadd.f32 %v16316_v57, %v1838_v24  ;;  %v16325_v19 = vpop.eup %14782  ;;  %v398_v24 = vld [vmem:[#allocation14 + $0x58] sm:$0xff] }
 0x761   :  { %v16328_v18 = vpop.eup %14784 }
 0x762   :  { %v1840_v28 = vadd.f32 %v16319_v33, %v1839_v55  ;;  %v16333_v55 = vpack.c.bf16 %v446_v37, %v445_v34  ;;  %v399_v34 = vld [vmem:[#allocation14 + $0x60] sm:$0xff]  ;;  %v400_v37 = vld [vmem:[#allocation14 + $0x68] sm:$0xff] }
 0x764   :  { %v1841_v49 = vadd.f32 %v16322_v0, %v1840_v28  ;;  %19893 = vst [vmem:[#allocation222_spill] sm:$0xff] %v16333_v55  ;;  %v16335_v28 = vpack.c.bf16 %v398_v24, %v397_v25  ;;  %11683 = vmatprep.subr.bf16.mxu0 %v16333_v55  ;;  %v431_v25 = vld [vmem:[#allocation14 + $0x160] sm:$0xff]  ;;  %v16347_v24 = vpack.c.bf16 %v400_v37, %v399_v34  ;;  %v434_v34 = vld [vmem:[#allocation14 + $0x178] sm:$0xff] }
 0x765   :  { %11685 = vmatpush3.bf16.msra.mxu0 %v16338_v61  ;;  %v16351_v55 = vpack.c.bf16 %v432_v56, %v431_v25  ;;  %v433_v61 = vld [vmem:[#allocation14 + $0x170] sm:$0xff]  ;;  %v468_v56 = vld [vmem:[#allocation14 + $0x288] sm:$0xff] }
 0x766   :  { %v1842_v2 = vadd.f32 %v16325_v19, %v1841_v49  ;;  %19894 = vst [vmem:[#allocation223_spill] sm:$0xff] %v16335_v28  ;;  %v415_v49 = vld [vmem:[#allocation14 + $0xe0] sm:$0xff]  ;;  %11653 = vmatpush3.bf16.msra.mxu1 %v16335_v28  ;;  %19898 = vst [vmem:[#allocation227_spill] sm:$0xff] %v16347_v24  ;;  %v16362_v25 = vpack.c.bf16 %v434_v34, %v433_v61  ;;  %v452_v34 = vld [vmem:[#allocation14 + $0x208] sm:$0xff] }
 0x767   :  { %19899 = vst [vmem:[#allocation228_spill] sm:$0xff] %v16351_v55 }
 0x768   :  { %v1843_v51 = vadd.f32 %v16328_v18, %v1842_v2  ;;  %v416_v2 = vld [vmem:[#allocation14 + $0xe8] sm:$0xff]  ;;  %19903 = vst [vmem:[#allocation232_spill] sm:$0xff] %v16362_v25 }
 0x769   :  { %v16342_v45 = vpack.c.bf16 %v416_v2, %v415_v49  ;;  %v16353_v49 = vpack.c.bf16 %v418_v5, %v417_v17  ;;  %v450_v2 = vld [vmem:[#allocation14 + $0x1f8] sm:$0xff]  ;;  %v467_v5 = vld [vmem:[#allocation14 + $0x280] sm:$0xff] }
 0x76a   :  { %1844 = vadd.xlane.f32.xlu0 %v1843_v51  ;;  %v447_v51 = vld [vmem:[#allocation14 + $0x1e0] sm:$0xff] }
 0x76b   :  { %19896 = vst [vmem:[#allocation225_spill] sm:$0xff] %v16342_v45  ;;  %v16344_v11 = vpack.c.bf16 %v448_v43, %v447_v51  ;;  %11655 = vmatprep.subr.bf16.mxu1 %v16342_v45  ;;  %19900 = vst [vmem:[#allocation229_spill] sm:$0xff] %v16353_v49  ;;  %v449_v43 = vld [vmem:[#allocation14 + $0x1f0] sm:$0xff]  ;;  %v499_v17 = vld [vmem:[#allocation14 + $0x380] sm:$0xff] }
 0x76c   :  { %v401_v51 = vld [vmem:[#allocation14 + $0x70] sm:$0xff]  ;;  %v16355_v28 = vpack.c.bf16 %v450_v2, %v449_v43  ;;  %11657 = vmatpush3.bf16.msra.mxu1 %v16347_v24  ;;  %v16367_v43 = vpack.c.bf16 %v468_v56, %v467_v5  ;;  %v500_v2 = vld [vmem:[#allocation14 + $0x388] sm:$0xff]  ;;  %v470_v56 = vld [vmem:[#allocation14 + $0x298] sm:$0xff] }
 0x76d   :  { %19897 = vst [vmem:[#allocation226_spill] sm:$0xff] %v16344_v11  ;;  %11687 = vmatprep.subr.bf16.mxu0 %v16344_v11  ;;  %v16358_v37 = vpack.c.bf16 %v402_v38, %v401_v51  ;;  %11659 = vmatprep.subr.bf16.mxu1 %v16353_v49  ;;  %v16369_v38 = vpack.c.bf16 %v500_v2, %v499_v17  ;;  %v451_v51 = vld [vmem:[#allocation14 + $0x200] sm:$0xff]  ;;  %v469_v49 = vld [vmem:[#allocation14 + $0x290] sm:$0xff]  ;;  %v502_v2 = vld [vmem:[#allocation14 + $0x398] sm:$0xff] }
 0x76e   :  { %19901 = vst [vmem:[#allocation230_spill] sm:$0xff] %v16355_v28  ;;  %11689 = vmatpush3.bf16.msra.mxu0 %v16351_v55  ;;  %19904 = vst [vmem:[#allocation233_spill] sm:$0xff] %v16367_v43  ;;  %v16375_v55 = vpack.c.bf16 %v452_v34, %v451_v51  ;;  %v501_v17 = vld [vmem:[#allocation14 + $0x390] sm:$0xff]  ;;  %v454_v51 = vld [vmem:[#allocation14 + $0x218] sm:$0xff]  ;;  %v16387_v45 = vpack.c.bf16 %v470_v56, %v469_v49 }
 0x76f   :  { %19902 = vst [vmem:[#allocation231_spill] sm:$0xff] %v16358_v37  ;;  %11691 = vmatprep.subr.bf16.mxu0 %v16355_v28  ;;  %19905 = vst [vmem:[#allocation234_spill] sm:$0xff] %v16369_v38  ;;  %v483_v28 = vld [vmem:[#allocation14 + $0x300] sm:$0xff]  ;;  %v453_v11 = vld [vmem:[#allocation14 + $0x210] sm:$0xff]  ;;  %v16389_v47 = vpack.c.bf16 %v502_v2, %v501_v17 }
 0x770   :  { %11661 = vmatpush3.bf16.msra.mxu1 %v16358_v37  ;;  %v484_v37 = vld [vmem:[#allocation14 + $0x308] sm:$0xff]  ;;  %19906 = vst [vmem:[#allocation235_spill] sm:$0xff] %v16375_v55  ;;  %v485_v34 = vld [vmem:[#allocation14 + $0x310] sm:$0xff]  ;;  %19908 = vst [vmem:[#allocation237_spill] sm:$0xff] %v16387_v45 }
 0x771   :  { %11695 = vmatprep.subr.bf16.mxu1 %v16367_v43  ;;  %v16377_v5 = vpack.c.bf16 %v484_v37, %v483_v28  ;;  %v486_v28 = vld [vmem:[#allocation14 + $0x318] sm:$0xff]  ;;  %v471_v37 = vld [vmem:[#allocation14 + $0x2a0] sm:$0xff]  ;;  %19909 = vst [vmem:[#allocation238_spill] sm:$0xff] %v16389_v47  ;;  %v456_v17 = vld [vmem:[#allocation14 + $0x228] sm:$0xff] }
 0x772   :  { %11693 = vmatpush3.bf16.msra.mxu0 %v16362_v25  ;;  %v16399_v49 = vpack.c.bf16 %v486_v28, %v485_v34  ;;  %v455_v56 = vld [vmem:[#allocation14 + $0x220] sm:$0xff]  ;;  %v488_v2 = vld [vmem:[#allocation14 + $0x328] sm:$0xff] }
 0x773   :  { %11727 = vmatprep.subr.bf16.mxu0 %v16369_v38  ;;  %19907 = vst [vmem:[#allocation236_spill] sm:$0xff] %v16377_v5  ;;  %v16409_v34 = vpack.c.bf16 %v456_v17, %v455_v56 }
 0x774   :  { %19911 = vst [vmem:[#allocation240_spill] sm:$0xff] %v16399_v49 }
 0x775   :  { %19914 = vst [vmem:[#allocation243_spill] sm:$0xff] %v16409_v34 }
 0x7f7   :  { %v1845_v61 = vpop.xlane.xlu0 %1844 }
 0x7f8   :  { %14786 = vrcp.f32 %v1845_v61 }
 0x802   :  { %v16373_v25 = vpop.eup %14786 }
 0x803   :  { %v1848_v43 = vmul.f32 %v16373_v25, %v16309_v40  ;;  %v1850_v61 = vmul.f32 %v16373_v25, %v16316_v57  ;;  %v1847_v38 = vmul.f32 %v16373_v25, %v16307_v27  ;;  %v1849_v24 = vmul.f32 %v16373_v25, %v16313_v41  ;;  %v472_v40 = vld [vmem:[#allocation14 + $0x2a8] sm:$0xff] }
 0x804   :  { %v504_v57 = vld [vmem:[#allocation14 + $0x3a8] sm:$0xff]  ;;  %v1852_v27 = vmul.f32 %v16373_v25, %v16322_v0  ;;  %v1854_v41 = vmul.f32 %v16373_v25, %v16328_v18  ;;  %v487_v0 = vld [vmem:[#allocation14 + $0x320] sm:$0xff]  ;;  %v474_v18 = vld [vmem:[#allocation14 + $0x2b8] sm:$0xff] }
 0x805   :  { %1919 = vmatprep.mubr.f32.mxu1 %v1848_v43  ;;  %1989 = vmatprep.mubr.f32.mxu0 %v1850_v61  ;;  %v16397_v43 = vpack.c.bf16 %v454_v51, %v453_v11  ;;  %v473_v61 = vld [vmem:[#allocation14 + $0x2b0] sm:$0xff]  ;;  %v506_v51 = vld [vmem:[#allocation14 + $0x3b8] sm:$0xff]  ;;  %v16411_v28 = vpack.c.bf16 %v488_v2, %v487_v0  ;;  %v459_v0 = vld [vmem:[#allocation14 + $0x240] sm:$0xff] }
 0x806   :  { %1920 = vmatmul.mubr.f32.vlgmr.msra.gmra.mrb[8].mxu1 %v1847_v38  ;;  %1990 = vmatmul.mubr.f32.vlgmr.msra.gmra.mrb[10].mxu0 %v1849_v24  ;;  %v16401_v38 = vpack.c.bf16 %v472_v40, %v471_v37  ;;  %v16403_v24 = vpack.c.bf16 %v504_v57, %v503_v62  ;;  %v505_v11 = vld [vmem:[#allocation14 + $0x3b0] sm:$0xff]  ;;  %v458_v37 = vld [vmem:[#allocation14 + $0x238] sm:$0xff]  ;;  %v16415_v40 = vpack.c.bf16 %v474_v18, %v473_v61  ;;  %v460_v2 = vld [vmem:[#allocation14 + $0x248] sm:$0xff] }
 0x807   :  { %11697 = vmatpush3.bf16.msra.mxu1 %v16375_v55  ;;  %11729 = vmatpush3.bf16.msra.mxu0 %v16377_v5  ;;  %19910 = vst [vmem:[#allocation239_spill] sm:$0xff] %v16397_v43  ;;  %19915 = vst [vmem:[#allocation244_spill] sm:$0xff] %v16411_v28  ;;  %v457_v62 = vld [vmem:[#allocation14 + $0x230] sm:$0xff]  ;;  %v16417_v57 = vpack.c.bf16 %v506_v51, %v505_v11  ;;  %v491_v11 = vld [vmem:[#allocation14 + $0x340] sm:$0xff] }
 0x808   :  { %2059 = vmatprep.mubr.f32.mxu1 %v1852_v27  ;;  %2129 = vmatprep.mubr.f32.mxu0 %v1854_v41  ;;  %19912 = vst [vmem:[#allocation241_spill] sm:$0xff] %v16401_v38  ;;  %19913 = vst [vmem:[#allocation242_spill] sm:$0xff] %v16403_v24  ;;  %v489_v27 = vld [vmem:[#allocation14 + $0x330] sm:$0xff]  ;;  %v490_v41 = vld [vmem:[#allocation14 + $0x338] sm:$0xff]  ;;  %v16421_v56 = vpack.c.bf16 %v458_v37, %v457_v62  ;;  %v16433_v62 = vpack.c.bf16 %v460_v2, %v459_v0 }
 0x809   :  { %11699 = vmatprep.subr.bf16.mxu1 %v16387_v45  ;;  %11731 = vmatprep.subr.bf16.mxu0 %v16389_v47  ;;  %19916 = vst [vmem:[#allocation245_spill] sm:$0xff] %v16415_v40  ;;  %19917 = vst [vmem:[#allocation246_spill] sm:$0xff] %v16417_v57  ;;  %v475_v47 = vld [vmem:[#allocation14 + $0x2c0] sm:$0xff]  ;;  %v16423_v17 = vpack.c.bf16 %v490_v41, %v489_v27  ;;  %v492_v51 = vld [vmem:[#allocation14 + $0x348] sm:$0xff] }
 0x80a   :  { %v507_v45 = vld [vmem:[#allocation14 + $0x3c0] sm:$0xff]  ;;  %19918 = vst [vmem:[#allocation247_spill] sm:$0xff] %v16421_v56  ;;  %19922 = vst [vmem:[#allocation251_spill] sm:$0xff] %v16433_v62  ;;  %v16435_v37 = vpack.c.bf16 %v492_v51, %v491_v11  ;;  %v461_v27 = vld [vmem:[#allocation14 + $0x250] sm:$0xff] }
 0x80b   :  { %11701 = vmatpush3.bf16.msra.mxu1 %v16397_v43  ;;  %11733 = vmatpush3.bf16.msra.mxu0 %v16399_v49  ;;  %v476_v43 = vld [vmem:[#allocation14 + $0x2c8] sm:$0xff]  ;;  %19919 = vst [vmem:[#allocation248_spill] sm:$0xff] %v16423_v17  ;;  %v462_v41 = vld [vmem:[#allocation14 + $0x258] sm:$0xff]  ;;  %v463_v11 = vld [vmem:[#allocation14 + $0x260] sm:$0xff] }
 0x80c   :  { %11703 = vmatprep.subr.bf16.mxu1 %v16401_v38  ;;  %11735 = vmatprep.subr.bf16.mxu0 %v16403_v24  ;;  %v508_v49 = vld [vmem:[#allocation14 + $0x3c8] sm:$0xff]  ;;  %v16427_v61 = vpack.c.bf16 %v476_v43, %v475_v47  ;;  %v477_v24 = vld [vmem:[#allocation14 + $0x2d0] sm:$0xff]  ;;  %19923 = vst [vmem:[#allocation252_spill] sm:$0xff] %v16435_v37  ;;  %v16445_v0 = vpack.c.bf16 %v462_v41, %v461_v27 }
 0x80d   :  { %v16429_v18 = vpack.c.bf16 %v508_v49, %v507_v45  ;;  %v509_v38 = vld [vmem:[#allocation14 + $0x3d0] sm:$0xff]  ;;  %v494_v49 = vld [vmem:[#allocation14 + $0x358] sm:$0xff]  ;;  %v464_v51 = vld [vmem:[#allocation14 + $0x268] sm:$0xff] }
 0x80e   :  { %19920 = vst [vmem:[#allocation249_spill] sm:$0xff] %v16427_v61  ;;  %v493_v43 = vld [vmem:[#allocation14 + $0x350] sm:$0xff]  ;;  %19926 = vst [vmem:[#allocation255_spill] sm:$0xff] %v16445_v0  ;;  %v16457_v27 = vpack.c.bf16 %v464_v51, %v463_v11  ;;  %v560_v5 = vld [vmem:[#allocation17 + $0x128] sm:$0xff] }
 0x80f   :  { %11705 = vmatpush3.bf16.msra.mxu1 %v16409_v34  ;;  %11737 = vmatpush3.bf16.msra.mxu0 %v16411_v28  ;;  %19921 = vst [vmem:[#allocation250_spill] sm:$0xff] %v16429_v18  ;;  %v478_v34 = vld [vmem:[#allocation14 + $0x2d8] sm:$0xff]  ;;  %v16447_v2 = vpack.c.bf16 %v494_v49, %v493_v43  ;;  %v465_v43 = vld [vmem:[#allocation14 + $0x270] sm:$0xff]  ;;  %v568_v55 = vld [vmem:[#allocation17 + $0x168] sm:$0xff] }
 0x810   :  { %11707 = vmatprep.subr.bf16.mxu1 %v16415_v40  ;;  %11739 = vmatprep.subr.bf16.mxu0 %v16417_v57  ;;  %v510_v28 = vld [vmem:[#allocation14 + $0x3d8] sm:$0xff]  ;;  %v16439_v47 = vpack.c.bf16 %v478_v34, %v477_v24  ;;  %v479_v57 = vld [vmem:[#allocation14 + $0x2e0] sm:$0xff]  ;;  %19930 = vst [vmem:[#allocation259_spill] sm:$0xff] %v16457_v27 }
 0x811   :  { %v16441_v45 = vpack.c.bf16 %v510_v28, %v509_v38  ;;  %v511_v40 = vld [vmem:[#allocation14 + $0x3e0] sm:$0xff]  ;;  %19927 = vst [vmem:[#allocation256_spill] sm:$0xff] %v16447_v2  ;;  %v496_v28 = vld [vmem:[#allocation14 + $0x368] sm:$0xff]  ;;  %v498_v49 = vld [vmem:[#allocation14 + $0x378] sm:$0xff] }
 0x812   :  { %19924 = vst [vmem:[#allocation253_spill] sm:$0xff] %v16439_v47  ;;  %v495_v34 = vld [vmem:[#allocation14 + $0x360] sm:$0xff] }
 0x813   :  { %11709 = vmatpush3.bf16.msra.mxu1 %v16421_v56  ;;  %11741 = vmatpush3.bf16.msra.mxu0 %v16423_v17  ;;  %19925 = vst [vmem:[#allocation254_spill] sm:$0xff] %v16441_v45  ;;  %v480_v56 = vld [vmem:[#allocation14 + $0x2e8] sm:$0xff]  ;;  %v16459_v41 = vpack.c.bf16 %v496_v28, %v495_v34 }
 0x814   :  { %11711 = vmatprep.subr.bf16.mxu1 %v16427_v61  ;;  %11743 = vmatprep.subr.bf16.mxu0 %v16429_v18  ;;  %v512_v17 = vld [vmem:[#allocation14 + $0x3e8] sm:$0xff]  ;;  %v16451_v38 = vpack.c.bf16 %v480_v56, %v479_v57  ;;  %v481_v18 = vld [vmem:[#allocation14 + $0x2f0] sm:$0xff]  ;;  %v466_v56 = vld [vmem:[#allocation14 + $0x278] sm:$0xff] }
 0x815   :  { %v16453_v24 = vpack.c.bf16 %v512_v17, %v511_v40  ;;  %v513_v61 = vld [vmem:[#allocation14 + $0x3f0] sm:$0xff]  ;;  %19931 = vst [vmem:[#allocation260_spill] sm:$0xff] %v16459_v41  ;;  %v16469_v11 = vpack.c.bf16 %v466_v56, %v465_v43  ;;  %v860_v34 = vld [vmem:[#allocation26 + $0x8] sm:$0xff] }
 0x816   :  { %19928 = vst [vmem:[#allocation257_spill] sm:$0xff] %v16451_v38  ;;  %v497_v17 = vld [vmem:[#allocation14 + $0x370] sm:$0xff] }
 0x817   :  { %11713 = vmatpush3.bf16.msra.mxu1 %v16433_v62  ;;  %11745 = vmatpush3.bf16.msra.mxu0 %v16435_v37  ;;  %19929 = vst [vmem:[#allocation258_spill] sm:$0xff] %v16453_v24  ;;  %v482_v62 = vld [vmem:[#allocation14 + $0x2f8] sm:$0xff]  ;;  %19934 = vst [vmem:[#allocation263_spill] sm:$0xff] %v16469_v11  ;;  %v16471_v51 = vpack.c.bf16 %v498_v49, %v497_v17  ;;  %v865_v43 = vld [vmem:[#allocation26 + $0x30] sm:$0xff] }
 0x818   :  { %11715 = vmatprep.subr.bf16.mxu1 %v16439_v47  ;;  %11747 = vmatprep.subr.bf16.mxu0 %v16441_v45  ;;  %v514_v37 = vld [vmem:[#allocation14 + $0x3f8] sm:$0xff]  ;;  %v16463_v40 = vpack.c.bf16 %v482_v62, %v481_v18  ;;  %v1853_v18 = vmul.f32 %v16373_v25, %v16325_v19  ;;  %v861_v56 = vld [vmem:[#allocation26 + $0x10] sm:$0xff]  ;;  %v16485_v49 = vpack.c.bf16 %v865_v43, %v860_v34  ;;  %v864_v19 = vld [vmem:[#allocation26 + $0x28] sm:$0xff] }
 0x819   :  { %v16465_v57 = vpack.c.bf16 %v514_v37, %v513_v61  ;;  %19935 = vst [vmem:[#allocation264_spill] sm:$0xff] %v16471_v51  ;;  %v1851_v61 = vmul.f32 %v16373_v25, %v16319_v33  ;;  %v862_v62 = vld [vmem:[#allocation26 + $0x18] sm:$0xff]  ;;  %v867_v37 = vld [vmem:[#allocation26 + $0x40] sm:$0xff]  ;;  %v872_v25 = vld [vmem:[#allocation26 + $0x68] sm:$0xff] }
 0x81a   :  { %19932 = vst [vmem:[#allocation261_spill] sm:$0xff] %v16463_v40  ;;  %v16483_v28 = vpack.c.bf16 %v867_v37, %v862_v62  ;;  %v866_v17 = vld [vmem:[#allocation26 + $0x38] sm:$0xff]  ;;  %19937 = vst [vmem:[#allocation266_spill] sm:$0xff] %v16485_v49  ;;  %v871_v34 = vld [vmem:[#allocation26 + $0x60] sm:$0xff] }
 0x81b   :  { %11717 = vmatpush3.bf16.msra.mxu1 %v16445_v0  ;;  %11749 = vmatpush3.bf16.msra.mxu0 %v16447_v2  ;;  %19933 = vst [vmem:[#allocation262_spill] sm:$0xff] %v16465_v57  ;;  %v16487_v33 = vpack.c.bf16 %v866_v17, %v861_v56  ;;  %v876_v43 = vld [vmem:[#allocation26 + $0x88] sm:$0xff]  ;;  %v869_v56 = vld [vmem:[#allocation26 + $0x50] sm:$0xff]  ;;  %v551_v2 = vld [vmem:[#allocation17 + $0xe0] sm:$0xff] }
 0x81c   :  { %11719 = vmatprep.subr.bf16.mxu1 %v16451_v38  ;;  %11751 = vmatprep.subr.bf16.mxu0 %v16453_v24  ;;  %19936 = vst [vmem:[#allocation265_spill] sm:$0xff] %v16483_v28  ;;  %v16499_v17 = vpack.c.bf16 %v876_v43, %v871_v34  ;;  %v884_v34 = vld [vmem:[#allocation26 + $0xc8] sm:$0xff]  ;;  %v905_v38 = vld [vmem:[#allocation26 + $0x170] sm:$0xff] }
 0x81d   :  { %19938 = vst [vmem:[#allocation267_spill] sm:$0xff] %v16487_v33  ;;  %v900_v24 = vld [vmem:[#allocation26 + $0x148] sm:$0xff] }
 0x81e   :  { %19942 = vst [vmem:[#allocation271_spill] sm:$0xff] %v16499_v17 }
 0x81f   :  { %11721 = vmatpush3.bf16.msra.mxu1 %v16457_v27  ;;  %11753 = vmatpush3.bf16.msra.mxu0 %v16459_v41  ;;  %v892_v41 = vld [vmem:[#allocation26 + $0x108] sm:$0xff]  ;;  %v890_v27 = vld [vmem:[#allocation26 + $0xf8] sm:$0xff] }
 0x820   :  { %11723 = vmatprep.subr.bf16.mxu1 %v16463_v40  ;;  %11755 = vmatprep.subr.bf16.mxu0 %v16465_v57  ;;  %v875_v57 = vld [vmem:[#allocation26 + $0x80] sm:$0xff]  ;;  %v886_v40 = vld [vmem:[#allocation26 + $0xd8] sm:$0xff] }
 0x823   :  { %11725 = vmatpush3.bf16.msra.mxu1 %v16469_v11  ;;  %11757 = vmatpush3.bf16.msra.mxu0 %v16471_v51  ;;  %v859_v51 = vld [vmem:[#allocation26] sm:$0xff]  ;;  %v870_v11 = vld [vmem:[#allocation26 + $0x58] sm:$0xff] }
 0x824   :  { %11791 = vmatprep.subr.bf16.mxu1 %v16483_v28  ;;  %11759 = vmatprep.subr.bf16.mxu0 %v16485_v49  ;;  %v16496_v37 = vpack.c.bf16 %v875_v57, %v870_v11  ;;  %v887_v28 = vld [vmem:[#allocation26 + $0xe0] sm:$0xff]  ;;  %v880_v57 = vld [vmem:[#allocation26 + $0xa8] sm:$0xff]  ;;  %v885_v11 = vld [vmem:[#allocation26 + $0xd0] sm:$0xff] }
 0x826   :  { %2060 = vmatmul.mubr.f32.vlgmr.msra.gmra.mrb[10].mxu1 %v1851_v61  ;;  %2130 = vmatmul.mubr.f32.vlgmr.msra.gmra.mrb[12].mxu0 %v1853_v18  ;;  %v16490_v61 = vpack.c.bf16 %v864_v19, %v859_v51  ;;  %v877_v18 = vld [vmem:[#allocation26 + $0x90] sm:$0xff]  ;;  %19941 = vst [vmem:[#allocation270_spill] sm:$0xff] %v16496_v37  ;;  %v874_v51 = vld [vmem:[#allocation26 + $0x78] sm:$0xff] }
 0x827   :  { %2200 = vmatprep.mubr.f32.mxu0 %v19797_v50  ;;  %2271 = vmatprep.mubr.f32.mxu1 %v19797_v50  ;;  %v16494_v62 = vpack.c.bf16 %v877_v18, %v872_v25  ;;  %v882_v19 = vld [vmem:[#allocation26 + $0xb8] sm:$0xff]  ;;  %v16503_v49 = vpack.c.bf16 %v874_v51, %v869_v56  ;;  %v881_v18 = vld [vmem:[#allocation26 + $0xb0] sm:$0xff]  ;;  %v895_v51 = vld [vmem:[#allocation26 + $0x120] sm:$0xff] }
 0x828   :  { %19939 = vst [vmem:[#allocation268_spill] sm:$0xff] %v16490_v61  ;;  %11793 = vmatpush1.bf16.msra.mxu1 %v16487_v33  ;;  %11761 = vmatpush1.bf16.msra.mxu0 %v16490_v61  ;;  %v16505_v25 = vpack.c.bf16 %v887_v28, %v882_v19  ;;  %v16507_v33 = vpack.c.bf16 %v885_v11, %v880_v57  ;;  %v879_v61 = vld [vmem:[#allocation26 + $0xa0] sm:$0xff]  ;;  %v896_v57 = vld [vmem:[#allocation26 + $0x128] sm:$0xff] }
 0x829   :  { %19940 = vst [vmem:[#allocation269_spill] sm:$0xff] %v16494_v62  ;;  %11795 = vmatprep.subr.bf16.mxu1 %v16494_v62  ;;  %11763 = vmatprep.subr.bf16.mxu0 %v16496_v37  ;;  %19943 = vst [vmem:[#allocation272_spill] sm:$0xff] %v16503_v49  ;;  %v16510_v43 = vpack.c.bf16 %v886_v40, %v881_v18  ;;  %v897_v62 = vld [vmem:[#allocation26 + $0x130] sm:$0xff]  ;;  %v16514_v28 = vpack.c.bf16 %v884_v34, %v879_v61  ;;  %v891_v19 = vld [vmem:[#allocation26 + $0x100] sm:$0xff] }
 0x82a   :  { %19944 = vst [vmem:[#allocation273_spill] sm:$0xff] %v16505_v25  ;;  %19945 = vst [vmem:[#allocation274_spill] sm:$0xff] %v16507_v33  ;;  %v16516_v56 = vpack.c.bf16 %v897_v62, %v892_v41  ;;  %v16519_v11 = vpack.c.bf16 %v895_v51, %v890_v27  ;;  %v889_v40 = vld [vmem:[#allocation26 + $0xf0] sm:$0xff]  ;;  %v894_v18 = vld [vmem:[#allocation26 + $0x118] sm:$0xff]  ;;  %v16531_v51 = vpack.c.bf16 %v905_v38, %v900_v24 }
 0x82b   :  { %19946 = vst [vmem:[#allocation275_spill] sm:$0xff] %v16510_v43  ;;  %19947 = vst [vmem:[#allocation276_spill] sm:$0xff] %v16514_v28  ;;  %v907_v37 = vld [vmem:[#allocation26 + $0x180] sm:$0xff]  ;;  %v16526_v41 = vpack.c.bf16 %v894_v18, %v889_v40  ;;  %v901_v27 = vld [vmem:[#allocation26 + $0x150] sm:$0xff] }
 0x82c   :  { %11797 = vmatpush1.bf16.msra.mxu1 %v16499_v17  ;;  %11765 = vmatpush1.bf16.msra.mxu0 %v16503_v49  ;;  %19948 = vst [vmem:[#allocation277_spill] sm:$0xff] %v16516_v56  ;;  %19949 = vst [vmem:[#allocation278_spill] sm:$0xff] %v16519_v11  ;;  %v902_v17 = vld [vmem:[#allocation26 + $0x158] sm:$0xff]  ;;  %v899_v34 = vld [vmem:[#allocation26 + $0x140] sm:$0xff] }
 0x82d   :  { %11799 = vmatprep.subr.bf16.mxu1 %v16505_v25  ;;  %11767 = vmatprep.subr.bf16.mxu0 %v16507_v33  ;;  %v16522_v25 = vpack.c.bf16 %v896_v57, %v891_v19  ;;  %19951 = vst [vmem:[#allocation280_spill] sm:$0xff] %v16526_v41  ;;  %v16528_v61 = vpack.c.bf16 %v907_v37, %v902_v17  ;;  %v906_v62 = vld [vmem:[#allocation26 + $0x178] sm:$0xff]  ;;  %19953 = vst [vmem:[#allocation282_spill] sm:$0xff] %v16531_v51  ;;  %v904_v33 = vld [vmem:[#allocation26 + $0x168] sm:$0xff] }
 0x82e   :  { %v912_v49 = vld [vmem:[#allocation26 + $0x1a8] sm:$0xff]  ;;  %v910_v19 = vld [vmem:[#allocation26 + $0x198] sm:$0xff]  ;;  %v915_v57 = vld [vmem:[#allocation26 + $0x1c0] sm:$0xff]  ;;  %v16538_v37 = vpack.c.bf16 %v904_v33, %v899_v34 }
 0x82f   :  { %19950 = vst [vmem:[#allocation279_spill] sm:$0xff] %v16522_v25  ;;  %19952 = vst [vmem:[#allocation281_spill] sm:$0xff] %v16528_v61  ;;  %v911_v40 = vld [vmem:[#allocation26 + $0x1a0] sm:$0xff]  ;;  %v916_v38 = vld [vmem:[#allocation26 + $0x1c8] sm:$0xff]  ;;  %v16543_v24 = vpack.c.bf16 %v915_v57, %v910_v19 }
 0x830   :  { %11801 = vmatpush1.bf16.msra.mxu1 %v16510_v43  ;;  %11769 = vmatpush1.bf16.msra.mxu0 %v16514_v28  ;;  %v917_v43 = vld [vmem:[#allocation26 + $0x1d0] sm:$0xff]  ;;  %v16534_v28 = vpack.c.bf16 %v906_v62, %v901_v27  ;;  %19955 = vst [vmem:[#allocation284_spill] sm:$0xff] %v16538_v37  ;;  %v16546_v27 = vpack.c.bf16 %v916_v38, %v911_v40  ;;  %v920_v34 = vld [vmem:[#allocation26 + $0x1e8] sm:$0xff]  ;;  %v926_v38 = vld [vmem:[#allocation26 + $0x218] sm:$0xff] }
 0x831   :  { %11803 = vmatprep.subr.bf16.mxu1 %v16516_v56  ;;  %11771 = vmatprep.subr.bf16.mxu0 %v16519_v11  ;;  %v16540_v17 = vpack.c.bf16 %v917_v43, %v912_v49  ;;  %19957 = vst [vmem:[#allocation286_spill] sm:$0xff] %v16543_v24  ;;  %v909_v18 = vld [vmem:[#allocation26 + $0x190] sm:$0xff]  ;;  %v914_v11 = vld [vmem:[#allocation26 + $0x1b8] sm:$0xff]  ;;  %v927_v43 = vld [vmem:[#allocation26 + $0x220] sm:$0xff] }
 0x832   :  { %19954 = vst [vmem:[#allocation283_spill] sm:$0xff] %v16534_v28  ;;  %19958 = vst [vmem:[#allocation287_spill] sm:$0xff] %v16546_v27  ;;  %v16550_v33 = vpack.c.bf16 %v914_v11, %v909_v18  ;;  %v922_v49 = vld [vmem:[#allocation26 + $0x1f8] sm:$0xff]  ;;  %v925_v19 = vld [vmem:[#allocation26 + $0x210] sm:$0xff] }
 0x833   :  { %19956 = vst [vmem:[#allocation285_spill] sm:$0xff] %v16540_v17  ;;  %v16555_v62 = vpack.c.bf16 %v927_v43, %v922_v49  ;;  %v16557_v57 = vpack.c.bf16 %v925_v19, %v920_v34  ;;  %v921_v40 = vld [vmem:[#allocation26 + $0x1f0] sm:$0xff]  ;;  %v924_v18 = vld [vmem:[#allocation26 + $0x208] sm:$0xff]  ;;  %v930_v43 = vld [vmem:[#allocation26 + $0x238] sm:$0xff] }
 0x834   :  { %11805 = vmatpush1.bf16.msra.mxu1 %v16522_v25  ;;  %11773 = vmatpush1.bf16.msra.mxu0 %v16526_v41  ;;  %19959 = vst [vmem:[#allocation288_spill] sm:$0xff] %v16550_v33  ;;  %v16560_v11 = vpack.c.bf16 %v926_v38, %v921_v40  ;;  %v935_v34 = vld [vmem:[#allocation26 + $0x260] sm:$0xff]  ;;  %v936_v40 = vld [vmem:[#allocation26 + $0x268] sm:$0xff]  ;;  %v929_v38 = vld [vmem:[#allocation26 + $0x230] sm:$0xff] }
 0x835   :  { %11807 = vmatprep.subr.bf16.mxu1 %v16528_v61  ;;  %11775 = vmatprep.subr.bf16.mxu0 %v16531_v51  ;;  %19960 = vst [vmem:[#allocation289_spill] sm:$0xff] %v16555_v62  ;;  %19961 = vst [vmem:[#allocation290_spill] sm:$0xff] %v16557_v57  ;;  %v931_v19 = vld [vmem:[#allocation26 + $0x240] sm:$0xff] }
 0x836   :  { %19962 = vst [vmem:[#allocation291_spill] sm:$0xff] %v16560_v11  ;;  %v863_v61 = vld [vmem:[#allocation26 + $0x20] sm:$0xff] }
 0x838   :  { %11809 = vmatpush1.bf16.msra.mxu1 %v16534_v28  ;;  %11777 = vmatpush1.bf16.msra.mxu0 %v16538_v37  ;;  %v919_v37 = vld [vmem:[#allocation26 + $0x1e0] sm:$0xff] }
 0x839   :  { %11811 = vmatprep.subr.bf16.mxu1 %v16540_v17  ;;  %11779 = vmatprep.subr.bf16.mxu0 %v16543_v24  ;;  %v937_v24 = vld [vmem:[#allocation26 + $0x270] sm:$0xff]  ;;  %v16569_v17 = vpack.c.bf16 %v935_v34, %v930_v43 }
 0x83b   :  { %19965 = vst [vmem:[#allocation294_spill] sm:$0xff] %v16569_v17 }
 0x83c   :  { %11813 = vmatpush1.bf16.msra.mxu1 %v16546_v27  ;;  %11781 = vmatpush1.bf16.msra.mxu0 %v16550_v33  ;;  %v16563_v27 = vpack.c.bf16 %v924_v18, %v919_v37  ;;  %v932_v33 = vld [vmem:[#allocation26 + $0x248] sm:$0xff]  ;;  %v16572_v37 = vpack.c.bf16 %v936_v40, %v931_v19 }
 0x83d   :  { %11815 = vmatprep.subr.bf16.mxu1 %v16555_v62  ;;  %11783 = vmatprep.subr.bf16.mxu0 %v16557_v57  ;;  %v16566_v49 = vpack.c.bf16 %v937_v24, %v932_v33  ;;  %v934_v62 = vld [vmem:[#allocation26 + $0x258] sm:$0xff]  ;;  %v19968_v24 = vmov 0.0|0.0  }
 0x83e   :  { %19963 = vst [vmem:[#allocation292_spill] sm:$0xff] %v16563_v27  ;;  %19966 = vst [vmem:[#allocation295_spill] sm:$0xff] %v16572_v37  ;;  %v16574_v18 = vpack.c.bf16 %v934_v62, %v929_v38 }
 0x83f   :  { %19964 = vst [vmem:[#allocation293_spill] sm:$0xff] %v16566_v49 }
 0x840   :  { %11817 = vmatpush1.bf16.msra.mxu1 %v16560_v11  ;;  %11785 = vmatpush1.bf16.msra.mxu0 %v16563_v27  ;;  %19967 = vst [vmem:[#allocation296_spill] sm:$0xff] %v16574_v18 }
 0x841   :  { %11819 = vmatprep.subr.bf16.mxu1 %v16566_v49  ;;  %11787 = vmatprep.subr.bf16.mxu0 %v16569_v17 }
 0x844   :  { %11821 = vmatpush1.bf16.msra.mxu1 %v16572_v37  ;;  %11789 = vmatpush1.bf16.msra.mxu0 %v16574_v18  ;;  %v868_v37 = vld [vmem:[#allocation26 + $0x48] sm:$0xff]  ;;  %v258_v18 = vld [vmem:[%s19969_s23] sm:$0xff] }
 0x845   :  { %11822 = vmatprep.subr.bf16.mxu1 %v19968_v24  ;;  %v16583_v25 = vpack.c.bf16 %v868_v37, %v863_v61  ;;  %v893_v61 = vld [vmem:[#allocation26 + $0x110] sm:$0xff]  ;;  %v908_v37 = vld [vmem:[#allocation26 + $0x188] sm:$0xff] }
 0x847   :  { %19970 = vst [vmem:[#allocation297_spill] sm:$0xff] %v16583_v25 }
 0x8d9   :  { %v9880_v33 = vpop.f32.mrb[8].mxu1  ;;  %v9915_v43 = vpop.f32.mrb[10].mxu0 }
 0x8da   :  { %v9881_v34 = vpop.f32.mrb[9].mxu1  ;;  %v9916_v27 = vpop.f32.mrb[11].mxu0 }
 0x8db   :  { %v9882_v11 = vadd.f32 %v9881_v34, %v9880_v33  ;;  %v9917_v57 = vadd.f32 %v9916_v27, %v9915_v43  ;;  %v873_v33 = vld [vmem:[#allocation26 + $0x70] sm:$0xff]  ;;  %v878_v27 = vld [vmem:[#allocation26 + $0x98] sm:$0xff] }
 0x8dc   :  { %v913_v43 = vld [vmem:[#allocation26 + $0x1b0] sm:$0xff]  ;;  %v918_v34 = vld [vmem:[#allocation26 + $0x1d8] sm:$0xff] }
 0x8dd   :  { %v1992_v28 = vadd.f32 %v9917_v57, %v9882_v11  ;;  %v16586_v57 = vpack.c.bf16 %v878_v27, %v873_v33  ;;  %v888_v11 = vld [vmem:[#allocation26 + $0xe8] sm:$0xff]  ;;  %v933_v33 = vld [vmem:[#allocation26 + $0x250] sm:$0xff]  ;;  %v938_v27 = vld [vmem:[#allocation26 + $0x278] sm:$0xff] }
 0x8df   :  { %19971 = vst [vmem:[#allocation298_spill] sm:$0xff] %v16586_v57 }
 0x8f9   :  { %v9950_v49 = vpop.f32.mrb[10].mxu1  ;;  %v9985_v19 = vpop.f32.mrb[12].mxu0 }
 0x8fa   :  { %v9951_v40 = vpop.f32.mrb[11].mxu1  ;;  %v9986_v62 = vpop.f32.mrb[13].mxu0 }
 0x8fb   :  { %v9952_v38 = vadd.f32 %v9951_v40, %v9950_v49  ;;  %v9987_v51 = vadd.f32 %v9986_v62, %v9985_v19  ;;  %v903_v49 = vld [vmem:[#allocation26 + $0x160] sm:$0xff]  ;;  %v16605_v19 = vpack.c.bf16 %v918_v34, %v913_v43  ;;  %v928_v62 = vld [vmem:[#allocation26 + $0x228] sm:$0xff] }
 0x8fc   :  { %v923_v40 = vld [vmem:[#allocation26 + $0x200] sm:$0xff] }
 0x8fd   :  { %v2062_v17 = vadd.f32 %v9952_v38, %v1992_v28  ;;  %v883_v28 = vld [vmem:[#allocation26 + $0xc0] sm:$0xff]  ;;  %19975 = vst [vmem:[#allocation302_spill] sm:$0xff] %v16605_v19  ;;  %v16609_v38 = vpack.c.bf16 %v928_v62, %v923_v40 }
 0x8fe   :  { %v523_v43 = vld [vmem:[#allocation17] sm:$0xff] }
 0x8ff   :  { %v2132_v41 = vadd.f32 %v9987_v51, %v2062_v17  ;;  %v898_v51 = vld [vmem:[#allocation26 + $0x138] sm:$0xff]  ;;  %19976 = vst [vmem:[#allocation303_spill] sm:$0xff] %v16609_v38  ;;  %v531_v34 = vld [vmem:[#allocation17 + $0x40] sm:$0xff] }
 0x900   :  { %v16597_v17 = vpack.c.bf16 %v898_v51, %v893_v61  ;;  %v532_v61 = vld [vmem:[#allocation17 + $0x48] sm:$0xff]  ;;  %v526_v51 = vld [vmem:[#allocation17 + $0x18] sm:$0xff]  ;;  %v16622_v62 = vpack.c.bf16 %v531_v34, %v523_v43  ;;  %v547_v43 = vld [vmem:[#allocation17 + $0xc0] sm:$0xff] }
 0x901   :  { %v2135_v56 = vadd.f32 %v2132_v41, %v258_v18  ;;  %v16593_v41 = vpack.c.bf16 %v888_v11, %v883_v28  ;;  %v16601_v18 = vpack.c.bf16 %v908_v37, %v903_v49  ;;  %v16613_v28 = vpack.c.bf16 %v938_v27, %v933_v33  ;;  %v524_v11 = vld [vmem:[#allocation17 + $0x8] sm:$0xff]  ;;  %v534_v37 = vld [vmem:[#allocation17 + $0x58] sm:$0xff]  ;;  %v525_v33 = vld [vmem:[#allocation17 + $0x10] sm:$0xff] }
 0x902   :  { %19973 = vst [vmem:[#allocation300_spill] sm:$0xff] %v16597_v17  ;;  %v16618_v49 = vpack.c.bf16 %v532_v61, %v524_v11  ;;  %v16620_v40 = vpack.c.bf16 %v534_v37, %v526_v51  ;;  %19980 = vst [vmem:[#allocation307_spill] sm:$0xff] %v16622_v62  ;;  %v533_v27 = vld [vmem:[#allocation17 + $0x50] sm:$0xff]  ;;  %v548_v11 = vld [vmem:[#allocation17 + $0xc8] sm:$0xff] }
 0x903   :  { %2201 = vmatmul.mubr.f32.vlgmr.msra.gmra.mrb[0].mxu0 %v2135_v56  ;;  %2272 = vmatmul.mubr.f32.vlgmr.msra.gmra.mrb[0].mxu1 %v2135_v56  ;;  %19972 = vst [vmem:[#allocation299_spill] sm:$0xff] %v16593_v41  ;;  %19974 = vst [vmem:[#allocation301_spill] sm:$0xff] %v16601_v18  ;;  %v542_v61 = vld [vmem:[#allocation17 + $0x98] sm:$0xff]  ;;  %v539_v37 = vld [vmem:[#allocation17 + $0x80] sm:$0xff] }
 0x904   :  { %11824 = vmatpush3.bf16.msra.mxu1 %v16583_v25  ;;  %10871 = vmatprep.mubr.msk.f32.mxu1 %vm15358_vm0, %v19797_v50  ;;  %19977 = vst [vmem:[#allocation304_spill] sm:$0xff] %v16613_v28  ;;  %19978 = vst [vmem:[#allocation305_spill] sm:$0xff] %v16618_v49  ;;  %v550_v51 = vld [vmem:[#allocation17 + $0xd8] sm:$0xff]  ;;  %v544_v25 = vld [vmem:[#allocation17 + $0xa8] sm:$0xff] }
 0x905   :  { %11825 = vmatprep.subr.bf16.mxu1 %v19968_v24  ;;  %2420 = vmatprep.mubr.f32.mxu0 %v19797_v50  ;;  %19979 = vst [vmem:[#allocation306_spill] sm:$0xff] %v16620_v40  ;;  %v16632_v34 = vpack.c.bf16 %v550_v51, %v542_v61  ;;  %v566_v61 = vld [vmem:[#allocation17 + $0x158] sm:$0xff]  ;;  %v555_v51 = vld [vmem:[#allocation17 + $0x100] sm:$0xff] }
 0x906   :  { %11847 = vmatprep.subr.bf16.mxu0 %v16618_v49 }
 0x907   :  { %11849 = vmatpush1.bf16.msra.mxu0 %v16622_v62  ;;  %19983 = vst [vmem:[#allocation310_spill] sm:$0xff] %v16632_v34 }
 0x908   :  { %11827 = vmatpush3.bf16.msra.mxu1 %v16586_v57  ;;  %v530_v57 = vld [vmem:[#allocation17 + $0x38] sm:$0xff] }
 0x909   :  { %11828 = vmatprep.subr.bf16.mxu1 %v19968_v24 }
 0x90c   :  { %11830 = vmatpush3.bf16.msra.mxu1 %v16593_v41 }
 0x90d   :  { %11831 = vmatprep.subr.bf16.mxu1 %v19968_v24 }
 0x910   :  { %11833 = vmatpush3.bf16.msra.mxu1 %v16597_v17 }
 0x911   :  { %11834 = vmatprep.subr.bf16.mxu1 %v19968_v24 }
 0x914   :  { %11836 = vmatpush3.bf16.msra.mxu1 %v16601_v18 }
 0x915   :  { %11837 = vmatprep.subr.bf16.mxu1 %v19968_v24 }
 0x918   :  { %11839 = vmatpush3.bf16.msra.mxu1 %v16605_v19  ;;  %v16634_v19 = vpack.c.bf16 %v547_v43, %v539_v37  ;;  %v563_v37 = vld [vmem:[#allocation17 + $0x140] sm:$0xff] }
 0x919   :  { %11840 = vmatprep.subr.bf16.mxu1 %v19968_v24  ;;  %v16646_v17 = vpack.c.bf16 %v563_v37, %v555_v51  ;;  %v579_v51 = vld [vmem:[#allocation17 + $0x1c0] sm:$0xff] }
 0x91a   :  { %19984 = vst [vmem:[#allocation311_spill] sm:$0xff] %v16634_v19 }
 0x91b   :  { %19988 = vst [vmem:[#allocation315_spill] sm:$0xff] %v16646_v17 }
 0x91c   :  { %11842 = vmatpush3.bf16.msra.mxu1 %v16609_v38 }
 0x91d   :  { %11843 = vmatprep.subr.bf16.mxu1 %v19968_v24 }
 0x920   :  { %11845 = vmatpush3.bf16.msra.mxu1 %v16613_v28  ;;  %v16625_v28 = vpack.c.bf16 %v533_v27, %v525_v33  ;;  %v541_v33 = vld [vmem:[#allocation17 + $0x90] sm:$0xff] }
 0x921   :  { %11879 = vmatprep.subr.bf16.mxu1 %v16620_v40  ;;  %v549_v27 = vld [vmem:[#allocation17 + $0xd0] sm:$0xff] }
 0x922   :  { %19981 = vst [vmem:[#allocation308_spill] sm:$0xff] %v16625_v28  ;;  %v16637_v40 = vpack.c.bf16 %v549_v27, %v541_v33  ;;  %v557_v33 = vld [vmem:[#allocation17 + $0x110] sm:$0xff] }
 0x923   :  { %10872 = vmatmul.mubr.f32.vlgmr.msra.gmra.mrb[12].mxu1 %v2135_v56  ;;  %v540_v56 = vld [vmem:[#allocation17 + $0x88] sm:$0xff]  ;;  %v565_v27 = vld [vmem:[#allocation17 + $0x150] sm:$0xff] }
 0x924   :  { %2491 = vmatprep.mubr.f32.mxu1 %v19797_v50  ;;  %11881 = vmatpush1.bf16.msra.mxu1 %v16625_v28  ;;  %v16630_v38 = vpack.c.bf16 %v548_v11, %v540_v56  ;;  %19985 = vst [vmem:[#allocation312_spill] sm:$0xff] %v16637_v40  ;;  %v556_v28 = vld [vmem:[#allocation17 + $0x108] sm:$0xff]  ;;  %v558_v11 = vld [vmem:[#allocation17 + $0x118] sm:$0xff] }
 0x925   :  { %11883 = vmatprep.subr.bf16.mxu1 %v16632_v34  ;;  %v564_v56 = vld [vmem:[#allocation17 + $0x148] sm:$0xff]  ;;  %v16644_v43 = vpack.c.bf16 %v566_v61, %v558_v11  ;;  %v16649_v34 = vpack.c.bf16 %v565_v27, %v557_v33  ;;  %v582_v11 = vld [vmem:[#allocation17 + $0x1d8] sm:$0xff]  ;;  %v571_v61 = vld [vmem:[#allocation17 + $0x180] sm:$0xff] }
 0x926   :  { %19982 = vst [vmem:[#allocation309_spill] sm:$0xff] %v16630_v38  ;;  %11851 = vmatprep.subr.bf16.mxu0 %v16630_v38  ;;  %v16642_v18 = vpack.c.bf16 %v564_v56, %v556_v28  ;;  %v580_v28 = vld [vmem:[#allocation17 + $0x1c8] sm:$0xff]  ;;  %v574_v56 = vld [vmem:[#allocation17 + $0x198] sm:$0xff]  ;;  %v573_v33 = vld [vmem:[#allocation17 + $0x190] sm:$0xff] }
 0x927   :  { %11853 = vmatpush1.bf16.msra.mxu0 %v16634_v19  ;;  %19987 = vst [vmem:[#allocation314_spill] sm:$0xff] %v16644_v43  ;;  %19989 = vst [vmem:[#allocation316_spill] sm:$0xff] %v16649_v34  ;;  %v16656_v37 = vpack.c.bf16 %v582_v11, %v574_v56  ;;  %v16658_v19 = vpack.c.bf16 %v579_v51, %v571_v61  ;;  %v581_v27 = vld [vmem:[#allocation17 + $0x1d0] sm:$0xff]  ;;  %v598_v56 = vld [vmem:[#allocation17 + $0x258] sm:$0xff] }
 0x928   :  { %11885 = vmatpush1.bf16.msra.mxu1 %v16637_v40  ;;  %19986 = vst [vmem:[#allocation313_spill] sm:$0xff] %v16642_v18  ;;  %11855 = vmatprep.subr.bf16.mxu0 %v16642_v18  ;;  %v572_v40 = vld [vmem:[#allocation17 + $0x188] sm:$0xff]  ;;  %v587_v11 = vld [vmem:[#allocation17 + $0x200] sm:$0xff]  ;;  %v538_v38 = vld [vmem:[#allocation17 + $0x78] sm:$0xff] }
 0x929   :  { %11887 = vmatprep.subr.bf16.mxu1 %v16644_v43  ;;  %v16654_v41 = vpack.c.bf16 %v580_v28, %v572_v40  ;;  %19991 = vst [vmem:[#allocation318_spill] sm:$0xff] %v16656_v37  ;;  %19992 = vst [vmem:[#allocation319_spill] sm:$0xff] %v16658_v19  ;;  %v16661_v43 = vpack.c.bf16 %v581_v27, %v573_v33  ;;  %v596_v40 = vld [vmem:[#allocation17 + $0x248] sm:$0xff]  ;;  %v590_v28 = vld [vmem:[#allocation17 + $0x218] sm:$0xff] }
 0x92a   :  { %v595_v61 = vld [vmem:[#allocation17 + $0x240] sm:$0xff]  ;;  %v16668_v51 = vpack.c.bf16 %v598_v56, %v590_v28  ;;  %v589_v33 = vld [vmem:[#allocation17 + $0x210] sm:$0xff]  ;;  %v614_v28 = vld [vmem:[#allocation17 + $0x2d8] sm:$0xff] }
 0x92b   :  { %11857 = vmatpush1.bf16.msra.mxu0 %v16646_v17  ;;  %19990 = vst [vmem:[#allocation317_spill] sm:$0xff] %v16654_v41  ;;  %19993 = vst [vmem:[#allocation320_spill] sm:$0xff] %v16661_v43  ;;  %v16670_v18 = vpack.c.bf16 %v595_v61, %v587_v11  ;;  %v597_v27 = vld [vmem:[#allocation17 + $0x250] sm:$0xff]  ;;  %v603_v56 = vld [vmem:[#allocation17 + $0x280] sm:$0xff] }
 0x92c   :  { %11889 = vmatpush1.bf16.msra.mxu1 %v16649_v34  ;;  %11859 = vmatprep.subr.bf16.mxu0 %v16654_v41  ;;  %v588_v34 = vld [vmem:[#allocation17 + $0x208] sm:$0xff]  ;;  %19995 = vst [vmem:[#allocation322_spill] sm:$0xff] %v16668_v51  ;;  %v611_v11 = vld [vmem:[#allocation17 + $0x2c0] sm:$0xff] }
 0x92d   :  { %11891 = vmatprep.subr.bf16.mxu1 %v16656_v37  ;;  %v16666_v17 = vpack.c.bf16 %v596_v40, %v588_v34  ;;  %19996 = vst [vmem:[#allocation323_spill] sm:$0xff] %v16670_v18  ;;  %v16673_v37 = vpack.c.bf16 %v597_v27, %v589_v33  ;;  %v612_v34 = vld [vmem:[#allocation17 + $0x2c8] sm:$0xff]  ;;  %v606_v40 = vld [vmem:[#allocation17 + $0x298] sm:$0xff]  ;;  %v16682_v41 = vpack.c.bf16 %v611_v11, %v603_v56  ;;  %v605_v33 = vld [vmem:[#allocation17 + $0x290] sm:$0xff] }
 0x92e   :  { %v16680_v61 = vpack.c.bf16 %v614_v28, %v606_v40  ;;  %v613_v27 = vld [vmem:[#allocation17 + $0x2d0] sm:$0xff]  ;;  %v630_v40 = vld [vmem:[#allocation17 + $0x358] sm:$0xff]  ;;  %v619_v28 = vld [vmem:[#allocation17 + $0x300] sm:$0xff] }
 0x92f   :  { %11861 = vmatpush1.bf16.msra.mxu0 %v16658_v19  ;;  %19994 = vst [vmem:[#allocation321_spill] sm:$0xff] %v16666_v17  ;;  %19997 = vst [vmem:[#allocation324_spill] sm:$0xff] %v16673_v37  ;;  %v627_v56 = vld [vmem:[#allocation17 + $0x340] sm:$0xff] }
 0x930   :  { %11893 = vmatpush1.bf16.msra.mxu1 %v16661_v43  ;;  %11863 = vmatprep.subr.bf16.mxu0 %v16666_v17  ;;  %v604_v43 = vld [vmem:[#allocation17 + $0x288] sm:$0xff]  ;;  %19999 = vst [vmem:[#allocation326_spill] sm:$0xff] %v16680_v61  ;;  %20000 = vst [vmem:[#allocation327_spill] sm:$0xff] %v16682_v41  ;;  %v16694_v17 = vpack.c.bf16 %v627_v56, %v619_v28  ;;  %v643_v28 = vld [vmem:[#allocation17 + $0x3c0] sm:$0xff] }
 0x931   :  { %11895 = vmatprep.subr.bf16.mxu1 %v16668_v51  ;;  %v16678_v19 = vpack.c.bf16 %v612_v34, %v604_v43  ;;  %v16685_v51 = vpack.c.bf16 %v613_v27, %v605_v33  ;;  %v628_v43 = vld [vmem:[#allocation17 + $0x348] sm:$0xff]  ;;  %v622_v34 = vld [vmem:[#allocation17 + $0x318] sm:$0xff]  ;;  %v621_v33 = vld [vmem:[#allocation17 + $0x310] sm:$0xff] }
 0x932   :  { %v16692_v11 = vpack.c.bf16 %v630_v40, %v622_v34  ;;  %20004 = vst [vmem:[#allocation331_spill] sm:$0xff] %v16694_v17  ;;  %v629_v27 = vld [vmem:[#allocation17 + $0x350] sm:$0xff]  ;;  %v646_v34 = vld [vmem:[#allocation17 + $0x3d8] sm:$0xff]  ;;  %v635_v40 = vld [vmem:[#allocation17 + $0x380] sm:$0xff] }
 0x933   :  { %11865 = vmatpush1.bf16.msra.mxu0 %v16670_v18  ;;  %19998 = vst [vmem:[#allocation325_spill] sm:$0xff] %v16678_v19  ;;  %20001 = vst [vmem:[#allocation328_spill] sm:$0xff] %v16685_v51 }
 0x934   :  { %11897 = vmatpush1.bf16.msra.mxu1 %v16673_v37  ;;  %11867 = vmatprep.subr.bf16.mxu0 %v16678_v19  ;;  %v620_v37 = vld [vmem:[#allocation17 + $0x308] sm:$0xff]  ;;  %20003 = vst [vmem:[#allocation330_spill] sm:$0xff] %v16692_v11  ;;  %v16706_v19 = vpack.c.bf16 %v643_v28, %v635_v40  ;;  %v16727_v28 = vld [vmem:[%s18973_s19] sm:$0xf] }
 0x935   :  { %11899 = vmatprep.subr.bf16.mxu1 %v16680_v61  ;;  %v16690_v18 = vpack.c.bf16 %v628_v43, %v620_v37  ;;  %v16697_v61 = vpack.c.bf16 %v629_v27, %v621_v33  ;;  %v644_v37 = vld [vmem:[#allocation17 + $0x3c8] sm:$0xff]  ;;  %v638_v43 = vld [vmem:[#allocation17 + $0x398] sm:$0xff]  ;;  %v637_v33 = vld [vmem:[#allocation17 + $0x390] sm:$0xff] }
 0x936   :  { %v16704_v56 = vpack.c.bf16 %v646_v34, %v638_v43  ;;  %20008 = vst [vmem:[#allocation335_spill] sm:$0xff] %v16706_v19  ;;  %v645_v27 = vld [vmem:[#allocation17 + $0x3d0] sm:$0xff]  ;;  %v20012_v43 = vlaneseq }
 0x937   :  { %11869 = vmatpush1.bf16.msra.mxu0 %v16682_v41  ;;  %20002 = vst [vmem:[#allocation329_spill] sm:$0xff] %v16690_v18  ;;  %20005 = vst [vmem:[#allocation332_spill] sm:$0xff] %v16697_v61 }
 0x938   :  { %11901 = vmatpush1.bf16.msra.mxu1 %v16685_v51  ;;  %11871 = vmatprep.subr.bf16.mxu0 %v16690_v18  ;;  %v636_v51 = vld [vmem:[#allocation17 + $0x388] sm:$0xff]  ;;  %20007 = vst [vmem:[#allocation334_spill] sm:$0xff] %v16704_v56  ;;  %v16721_v34 = vshrl.u32 %v20012_v43, 7 }
 0x939   :  { %11903 = vmatprep.subr.bf16.mxu1 %v16692_v11  ;;  %v16702_v41 = vpack.c.bf16 %v644_v37, %v636_v51  ;;  %v528_v18 = vld [vmem:[#allocation17 + $0x28] sm:$0xff]  ;;  %v16709_v11 = vpack.c.bf16 %v645_v27, %v637_v33  ;;  %v16715_v37 = vpack.c.bf16 %v538_v38, %v530_v57 }
 0x93a   :  { %v2717_v40 = vsub.s32 0, %v16721_v34 }
 0x93b   :  { %11873 = vmatpush1.bf16.msra.mxu0 %v16694_v17  ;;  %20006 = vst [vmem:[#allocation333_spill] sm:$0xff] %v16702_v41  ;;  %20009 = vst [vmem:[#allocation336_spill] sm:$0xff] %v16709_v11  ;;  %v536_v17 = vld [vmem:[#allocation17 + $0x68] sm:$0xff] }
 0x93c   :  { %11905 = vmatpush1.bf16.msra.mxu1 %v16697_v61  ;;  %11875 = vmatprep.subr.bf16.mxu0 %v16702_v41  ;;  %v16713_v51 = vpack.c.bf16 %v536_v17, %v528_v18  ;;  %20011 = vst [vmem:[#allocation338_spill] sm:$0xff] %v16715_v37  ;;  %v2721_v17 = vsub.s32 1, %v16721_v34  ;;  %v16731_v57 = vrot.slane %v16727_v28, %v2717_v40 }
 0x93d   :  { %11907 = vmatprep.subr.bf16.mxu1 %v16704_v56 }
 0x93e   :  { %20010 = vst [vmem:[#allocation337_spill] sm:$0xff] %v16713_v51  ;;  %20013 = vst [vmem:[#allocation339_spill] sm:$0xff] %v16731_v57  ;;  %v16734_v18 = vrot.slane %v16727_v28, %v2721_v17 }
 0x93f   :  { %11877 = vmatpush1.bf16.msra.mxu0 %v16706_v19 }
 0x940   :  { %11909 = vmatpush1.bf16.msra.mxu1 %v16709_v11  ;;  %11911 = vmatprep.subr.bf16.mxu0 %v16713_v51  ;;  %20014 = vst [vmem:[#allocation340_spill] sm:$0xff] %v16734_v18  ;;  %v2725_v51 = vsub.s32 2, %v16721_v34 }
 0x941   :  { %11943 = vmatprep.subr.bf16.mxu1 %v16715_v37 }
 0x942   :  { %v16742_v40 = vrot.slane %v16727_v28, %v2725_v51  ;;  %v527_v51 = vld [vmem:[#allocation17 + $0x20] sm:$0xff] }
 0x944   :  { %20015 = vst [vmem:[#allocation341_spill] sm:$0xff] %v16742_v40 }
 0x9d6   :  { %v2202_v38 = vpop.f32.mrb[0].mxu0  ;;  %v2273_v33 = vpop.f32.mrb[0].mxu1 }
 0x9d7   :  { %v2735_v27 = vadd.f32 %v16731_v57, %v2202_v38  ;;  %v2204_v43 = vpop.f32.mrb[1].mxu0  ;;  %v16737_v37 = vpop.f32.mrb[1].mxu1  ;;  %v2737_v17 = vadd.f32 %v16742_v40, %v2273_v33  ;;  %v529_v33 = vld [vmem:[#allocation17 + $0x30] sm:$0xff] }
 0x9d8   :  { %v2736_v11 = vadd.f32 %v16734_v18, %v2204_v43  ;;  %v535_v18 = vld [vmem:[#allocation17 + $0x60] sm:$0xff]  ;;  %v537_v40 = vld [vmem:[#allocation17 + $0x70] sm:$0xff] }
 0x9d9   :  { %v9786_v56 = vmul.f32 -1.442695, %v2735_v27 }
 0x9da   :  { %v9787_v61 = vmul.f32 -1.442695, %v2736_v11 }
 0x9db   :  { %14788 = vpow2.f32 %v9786_v56 }
 0x9dc   :  { %14790 = vpow2.f32 %v9787_v61  ;;  %v9785_v61 = vld [vmem:[%s18972_s18] ss:$0 sm:$0xff] }
 0x9dd   :  { %14792 = vtanh.f32 %v2737_v17  ;;  %v546_v17 = vld [vmem:[#allocation17 + $0xb8] sm:$0xff] }
 0x9e5   :  { %v14789_v19 = vpop.eup %14788 }
 0x9e6   :  { %v14791_v41 = vpop.eup %14790  ;;  %v2742_v62 = vadd.f32 1.0, %v14789_v19 }
 0x9e7   :  { %v2748_v38 = vadd.f32 1.0, %v14791_v41  ;;  %v14793_v57 = vpop.eup %14792 }
 0x9e8   :  { %14794 = vrcp.f32 %v2742_v62  ;;  %v552_v62 = vld [vmem:[#allocation17 + $0xe8] sm:$0xff] }
 0x9e9   :  { %14796 = vrcp.f32 %v2748_v38  ;;  %v554_v38 = vld [vmem:[#allocation17 + $0xf8] sm:$0xff]  ;;  %v16758_v45 = vpack.c.bf16 %v552_v62, %v544_v25  ;;  %v584_v62 = vld [vmem:[#allocation17 + $0x1e8] sm:$0xff] }
 0x9ea   :  { %v16760_v47 = vpack.c.bf16 %v554_v38, %v546_v17  ;;  %v578_v17 = vld [vmem:[#allocation17 + $0x1b8] sm:$0xff] }
 0x9eb   :  { %20019 = vst [vmem:[#allocation345_spill] sm:$0xff] %v16758_v45  ;;  %v586_v38 = vld [vmem:[#allocation17 + $0x1f8] sm:$0xff] }
 0x9ec   :  { %20020 = vst [vmem:[#allocation346_spill] sm:$0xff] %v16760_v47 }
 0x9f2   :  { %v14795_v43 = vpop.eup %14794 }
 0x9f3   :  { %v14797_v27 = vpop.eup %14796  ;;  %v2759_v11 = vmul.f32 %v14795_v43, %v14793_v57  ;;  %v16752_v43 = vpack.c.bf16 %v535_v18, %v527_v51  ;;  %v567_v18 = vld [vmem:[#allocation17 + $0x160] sm:$0xff]  ;;  %v561_v51 = vld [vmem:[#allocation17 + $0x130] sm:$0xff] }
 0x9f4   :  { %v2758_v56 = vmul.f32 %v14797_v27, %v15741_v63  ;;  %v16754_v63 = vpack.c.bf16 %v537_v40, %v529_v33  ;;  %v543_v27 = vld [vmem:[#allocation17 + $0xa0] sm:$0xff]  ;;  %v16772_v40 = vpack.c.bf16 %v568_v55, %v560_v5  ;;  %v569_v33 = vld [vmem:[#allocation17 + $0x170] sm:$0xff] }
 0x9f5   :  { %20016 = vst [vmem:[#allocation342_spill] sm:$0xff] %v16752_v43  ;;  %v16782_v55 = vpack.c.bf16 %v569_v33, %v561_v51  ;;  %v591_v51 = vld [vmem:[#allocation17 + $0x220] sm:$0xff] }
 0x9f6   :  { %v16749_v19 = vadd.f32 %v2759_v11, %v2758_v56  ;;  %v2344_v41 = vpop.f32.mrb[12].mxu1  ;;  %20017 = vst [vmem:[#allocation343_spill] sm:$0xff] %v16754_v63  ;;  %v545_v11 = vld [vmem:[#allocation17 + $0xb0] sm:$0xff]  ;;  %20023 = vst [vmem:[#allocation349_spill] sm:$0xff] %v16772_v40  ;;  %v599_v33 = vld [vmem:[#allocation17 + $0x260] sm:$0xff] }
 0x9f7   :  { %v2348_v49 = vadd.f32 %v2344_v41, %v16121_v12  ;;  %v10873_v57 = vpop.f32.mrb[13].mxu1  ;;  %v553_v56 = vld [vmem:[#allocation17 + $0xf0] sm:$0xff]  ;;  %v16766_v12 = vpack.c.bf16 %v551_v2, %v543_v27  ;;  %v576_v41 = vld [vmem:[#allocation17 + $0x1a8] sm:$0xff]  ;;  %20026 = vst [vmem:[#allocation352_spill] sm:$0xff] %v16782_v55 }
 0x9f8   :  { %v16768_v25 = vpack.c.bf16 %v553_v56, %v545_v11  ;;  %v16786_v5 = vpack.c.bf16 %v584_v62, %v576_v41  ;;  %v16788_v57 = vpack.c.bf16 %v586_v38, %v578_v17  ;;  %v577_v27 = vld [vmem:[#allocation17 + $0x1b0] sm:$0xff]  ;;  %v592_v56 = vld [vmem:[#allocation17 + $0x228] sm:$0xff] }
 0x9f9   :  { %v16756_v0 = vadd.f32 %v9785_v61, %v2348_v49  ;;  %20021 = vst [vmem:[#allocation347_spill] sm:$0xff] %v16766_v12  ;;  %v559_v49 = vld [vmem:[#allocation17 + $0x120] sm:$0xff]  ;;  %v16774_v61 = vpack.c.bf16 %v570_v46, %v562_v35  ;;  %v585_v11 = vld [vmem:[#allocation17 + $0x1f0] sm:$0xff] }
 0x9fa   :  { %20022 = vst [vmem:[#allocation348_spill] sm:$0xff] %v16768_v25  ;;  %v16780_v2 = vpack.c.bf16 %v567_v18, %v559_v49  ;;  %v575_v46 = vld [vmem:[#allocation17 + $0x1a0] sm:$0xff]  ;;  %20027 = vst [vmem:[#allocation353_spill] sm:$0xff] %v16786_v5  ;;  %v16794_v18 = vpack.c.bf16 %v585_v11, %v577_v27  ;;  %v593_v17 = vld [vmem:[#allocation17 + $0x230] sm:$0xff] }
 0x9fb   :  { %20018 = vst [vmem:[#allocation344_spill] sm:$0xff] %v16756_v0  ;;  %2421 = vmatmul.mubr.f32.vlgmr.msra.gmra.mrb[14].mxu0 %v16756_v0  ;;  %2492 = vmatmul.mubr.f32.vlgmr.msra.gmra.mrb[14].mxu1 %v16756_v0  ;;  %20024 = vst [vmem:[#allocation350_spill] sm:$0xff] %v16774_v61  ;;  %v583_v35 = vld [vmem:[#allocation17 + $0x1e0] sm:$0xff]  ;;  %v601_v38 = vld [vmem:[#allocation17 + $0x270] sm:$0xff] }
 0x9fc   :  { %11913 = vmatpush1.bf16.msra.mxu0 %v16752_v43  ;;  %11945 = vmatpush1.bf16.msra.mxu1 %v16754_v63  ;;  %20025 = vst [vmem:[#allocation351_spill] sm:$0xff] %v16780_v2  ;;  %20028 = vst [vmem:[#allocation354_spill] sm:$0xff] %v16788_v57  ;;  %v16792_v49 = vpack.c.bf16 %v583_v35, %v575_v46  ;;  %v16804_v46 = vpack.c.bf16 %v599_v33, %v591_v51  ;;  %v607_v27 = vld [vmem:[#allocation17 + $0x2a0] sm:$0xff] }
 0x9fd   :  { %11915 = vmatprep.subr.bf16.mxu0 %v16758_v45  ;;  %11947 = vmatprep.subr.bf16.mxu1 %v16760_v47  ;;  %v594_v47 = vld [vmem:[#allocation17 + $0x238] sm:$0xff]  ;;  %20030 = vst [vmem:[#allocation356_spill] sm:$0xff] %v16794_v18  ;;  %v16806_v35 = vpack.c.bf16 %v601_v38, %v593_v17  ;;  %v615_v11 = vld [vmem:[#allocation17 + $0x2e0] sm:$0xff] }
 0x9fe   :  { %2562 = vmatprep.mubr.f32.mxu0 %v19797_v50  ;;  %2633 = vmatprep.mubr.f32.mxu1 %v19797_v50  ;;  %20029 = vst [vmem:[#allocation355_spill] sm:$0xff] %v16792_v49  ;;  %20033 = vst [vmem:[#allocation359_spill] sm:$0xff] %v16804_v46  ;;  %v16816_v51 = vpack.c.bf16 %v615_v11, %v607_v27  ;;  %v623_v17 = vld [vmem:[#allocation17 + $0x320] sm:$0xff]  ;;  %v642_v27 = vld [vmem:[#allocation17 + $0x3b8] sm:$0xff] }
 0x9ff   :  { %20034 = vst [vmem:[#allocation360_spill] sm:$0xff] %v16806_v35  ;;  %v631_v38 = vld [vmem:[#allocation17 + $0x360] sm:$0xff]  ;;  %v650_v11 = vld [vmem:[#allocation17 + $0x3f8] sm:$0xff] }
 0xa00   :  { %11917 = vmatpush1.bf16.msra.mxu0 %v16766_v12  ;;  %11949 = vmatpush1.bf16.msra.mxu1 %v16768_v25  ;;  %v600_v12 = vld [vmem:[#allocation17 + $0x268] sm:$0xff]  ;;  %v602_v25 = vld [vmem:[#allocation17 + $0x278] sm:$0xff]  ;;  %20037 = vst [vmem:[#allocation363_spill] sm:$0xff] %v16816_v51 }
 0xa01   :  { %11919 = vmatprep.subr.bf16.mxu0 %v16772_v40  ;;  %11951 = vmatprep.subr.bf16.mxu1 %v16774_v61  ;;  %v16798_v41 = vpack.c.bf16 %v600_v12, %v592_v56  ;;  %v16800_v62 = vpack.c.bf16 %v602_v25, %v594_v47  ;;  %v608_v61 = vld [vmem:[#allocation17 + $0x2a8] sm:$0xff]  ;;  %v610_v40 = vld [vmem:[#allocation17 + $0x2b8] sm:$0xff]  ;;  %v609_v25 = vld [vmem:[#allocation17 + $0x2b0] sm:$0xff] }
 0xa02   :  { %v617_v56 = vld [vmem:[#allocation17 + $0x2f0] sm:$0xff] }
 0xa03   :  { %20031 = vst [vmem:[#allocation357_spill] sm:$0xff] %v16798_v41  ;;  %20032 = vst [vmem:[#allocation358_spill] sm:$0xff] %v16800_v62  ;;  %v16818_v33 = vpack.c.bf16 %v617_v56, %v609_v25  ;;  %v16829_v25 = vpack.c.bf16 %v631_v38, %v623_v17  ;;  %v639_v56 = vld [vmem:[#allocation17 + $0x3a0] sm:$0xff] }
 0xa04   :  { %11921 = vmatpush1.bf16.msra.mxu0 %v16780_v2  ;;  %11953 = vmatpush1.bf16.msra.mxu1 %v16782_v55  ;;  %v616_v2 = vld [vmem:[#allocation17 + $0x2e8] sm:$0xff]  ;;  %v618_v55 = vld [vmem:[#allocation17 + $0x2f8] sm:$0xff] }
 0xa05   :  { %11923 = vmatprep.subr.bf16.mxu0 %v16786_v5  ;;  %11955 = vmatprep.subr.bf16.mxu1 %v16788_v57  ;;  %v16810_v47 = vpack.c.bf16 %v616_v2, %v608_v61  ;;  %v16812_v12 = vpack.c.bf16 %v618_v55, %v610_v40  ;;  %v624_v57 = vld [vmem:[#allocation17 + $0x328] sm:$0xff]  ;;  %v626_v5 = vld [vmem:[#allocation17 + $0x338] sm:$0xff]  ;;  %20038 = vst [vmem:[#allocation364_spill] sm:$0xff] %v16818_v33  ;;  %v2729_v61 = vsub.s32 3, %v16721_v34  ;;  %v625_v55 = vld [vmem:[#allocation17 + $0x330] sm:$0xff] }
 0xa06   :  { %20041 = vst [vmem:[#allocation367_spill] sm:$0xff] %v16829_v25 }
 0xa07   :  { %20035 = vst [vmem:[#allocation361_spill] sm:$0xff] %v16810_v47  ;;  %20036 = vst [vmem:[#allocation362_spill] sm:$0xff] %v16812_v12 }
 0xa08   :  { %11925 = vmatpush1.bf16.msra.mxu0 %v16792_v49  ;;  %11957 = vmatpush1.bf16.msra.mxu1 %v16794_v18  ;;  %v632_v49 = vld [vmem:[#allocation17 + $0x368] sm:$0xff]  ;;  %v634_v18 = vld [vmem:[#allocation17 + $0x378] sm:$0xff] }
 0xa09   :  { %11927 = vmatprep.subr.bf16.mxu0 %v16798_v41  ;;  %11959 = vmatprep.subr.bf16.mxu1 %v16800_v62  ;;  %v16823_v40 = vpack.c.bf16 %v632_v49, %v624_v57  ;;  %v16825_v2 = vpack.c.bf16 %v634_v18, %v626_v5  ;;  %v640_v62 = vld [vmem:[#allocation17 + $0x3a8] sm:$0xff]  ;;  %v16834_v57 = vrot.slane %v16727_v28, %v2729_v61  ;;  %v647_v18 = vld [vmem:[#allocation17 + $0x3e0] sm:$0xff]  ;;  %v20048_v61 = vld [vmem:[#allocation71_spill] sm:$0xff] }
 0xa0a   :  { %v16840_v49 = vpack.c.bf16 %v650_v11, %v642_v27  ;;  %v20050_v27 = vld [vmem:[#allocation73_spill] sm:$0xff]  ;;  %v20051_v11 = vld [vmem:[#allocation74_spill] sm:$0xff] }
 0xa0b   :  { %20039 = vst [vmem:[#allocation365_spill] sm:$0xff] %v16823_v40  ;;  %20040 = vst [vmem:[#allocation366_spill] sm:$0xff] %v16825_v2  ;;  %v2738_v28 = vadd.f32 %v16834_v57, %v16737_v37 }
 0xa0c   :  { %11929 = vmatpush1.bf16.msra.mxu0 %v16804_v46  ;;  %11961 = vmatpush1.bf16.msra.mxu1 %v16806_v35  ;;  %v633_v46 = vld [vmem:[#allocation17 + $0x370] sm:$0xff]  ;;  %v648_v35 = vld [vmem:[#allocation17 + $0x3e8] sm:$0xff]  ;;  %20043 = vst [vmem:[#allocation369_spill] sm:$0xff] %v16834_v57  ;;  %20045 = vst [vmem:[#allocation371_spill] sm:$0xff] %v16840_v49 }
 0xa0d   :  { %11931 = vmatprep.subr.bf16.mxu0 %v16810_v47  ;;  %11963 = vmatprep.subr.bf16.mxu1 %v16812_v12  ;;  %v16831_v34 = vpack.c.bf16 %v633_v46, %v625_v55  ;;  %v16838_v5 = vpack.c.bf16 %v648_v35, %v640_v62  ;;  %v649_v12 = vld [vmem:[#allocation17 + $0x3f0] sm:$0xff]  ;;  %v16844_v46 = vpack.c.bf16 %v647_v18, %v639_v56  ;;  %v9788_v62 = vmul.f32 -1.442695, %v2738_v28  ;;  %v20049_v55 = vld [vmem:[#allocation72_spill] sm:$0xff]  ;;  %v20054_v28 = vld [vmem:[#allocation77_spill] sm:$0xff] }
 0xa0e   :  { %v20052_v56 = vld [vmem:[#allocation75_spill] sm:$0xff]  ;;  %v20053_v18 = vld [vmem:[#allocation76_spill] sm:$0xff] }
 0xa0f   :  { %20042 = vst [vmem:[#allocation368_spill] sm:$0xff] %v16831_v34  ;;  %20044 = vst [vmem:[#allocation370_spill] sm:$0xff] %v16838_v5  ;;  %14798 = vpow2.f32 %v9788_v62  ;;  %v20055_v62 = vld [vmem:[#allocation78_spill] sm:$0xff] }
 0xa10   :  { %11933 = vmatpush1.bf16.msra.mxu0 %v16816_v51  ;;  %11965 = vmatpush1.bf16.msra.mxu1 %v16818_v33  ;;  %v641_v51 = vld [vmem:[#allocation17 + $0x3b0] sm:$0xff]  ;;  %20046 = vst [vmem:[#allocation372_spill] sm:$0xff] %v16844_v46  ;;  %14800 = vtanh.f32 %v16749_v19 }
 0xa11   :  { %11935 = vmatprep.subr.bf16.mxu0 %v16823_v40  ;;  %11967 = vmatprep.subr.bf16.mxu1 %v16825_v2  ;;  %v16846_v17 = vpack.c.bf16 %v649_v12, %v641_v51 }
 0xa13   :  { %20047 = vst [vmem:[#allocation373_spill] sm:$0xff] %v16846_v17 }
 0xa14   :  { %11937 = vmatpush1.bf16.msra.mxu0 %v16829_v25  ;;  %11969 = vmatpush1.bf16.msra.mxu1 %v16831_v34 }
 0xa15   :  { %11939 = vmatprep.subr.bf16.mxu0 %v16838_v5  ;;  %11971 = vmatprep.subr.bf16.mxu1 %v16840_v49 }
 0xa18   :  { %11941 = vmatpush1.bf16.msra.mxu0 %v16844_v46  ;;  %11973 = vmatpush1.bf16.msra.mxu1 %v16846_v17 }
 0xa19   :  { %11975 = vmatprep.subr.bf16.mxu0 %v15655_v4  ;;  %12007 = vmatprep.subr.bf16.mxu1 %v15686_v48  ;;  %v14799_v37 = vpop.eup %14798 }
 0xa1a   :  { %v2755_v35 = vadd.f32 1.0, %v14799_v37  ;;  %v14801_v12 = vpop.eup %14800  ;;  %v20056_v37 = vld [vmem:[#allocation79_spill] sm:$0xff] }
 0xa1b   :  { %2563 = vmatmul.mubr.f32.vlgmr.msra.gmra.mrb[16].mxu0 %v16756_v0  ;;  %2634 = vmatmul.mubr.f32.vlgmr.msra.gmra.mrb[16].mxu1 %v16756_v0  ;;  %v20060_v0 = vld [vmem:[#allocation83_spill] sm:$0xff] }
 0xa1c   :  { %11977 = vmatpush1.bf16.msra.mxu0 %v15657_v8  ;;  %12009 = vmatpush1.bf16.msra.mxu1 %v15691_v53  ;;  %14802 = vrcp.f32 %v2755_v35  ;;  %v20057_v35 = vld [vmem:[#allocation80_spill] sm:$0xff] }
 0xa1d   :  { %11979 = vmatprep.subr.bf16.mxu0 %v15659_v9  ;;  %12011 = vmatprep.subr.bf16.mxu1 %v15693_v54 }
 0xa1e   :  { %2827 = vmatprep.mubr.f32.mxu0 %v19797_v50  ;;  %2898 = vmatprep.mubr.f32.mxu1 %v19797_v50 }
 0xa20   :  { %11981 = vmatpush1.bf16.msra.mxu0 %v15663_v14  ;;  %12013 = vmatpush1.bf16.msra.mxu1 %v15700_v1 }
 0xa21   :  { %11983 = vmatprep.subr.bf16.mxu0 %v15666_v15  ;;  %12015 = vmatprep.subr.bf16.mxu1 %v15703_v3 }
 0xa24   :  { %11985 = vmatpush1.bf16.msra.mxu0 %v15669_v20  ;;  %12017 = vmatpush1.bf16.msra.mxu1 %v15712_v22 }
 0xa25   :  { %11987 = vmatprep.subr.bf16.mxu0 %v15672_v21  ;;  %12019 = vmatprep.subr.bf16.mxu1 %v15715_v23 }
 0xa26   :  { %v14803_v51 = vpop.eup %14802 }
 0xa27   :  { %v2762_v38 = vmul.f32 %v14803_v51, %v14801_v12  ;;  %v20058_v12 = vld [vmem:[#allocation81_spill] sm:$0xff]  ;;  %v20059_v51 = vld [vmem:[#allocation82_spill] sm:$0xff] }
 0xa28   :  { %11989 = vmatpush1.bf16.msra.mxu0 %v15675_v29  ;;  %12021 = vmatpush1.bf16.msra.mxu1 %v15722_v30 }
 0xa29   :  { %11991 = vmatprep.subr.bf16.mxu0 %v15678_v31  ;;  %12023 = vmatprep.subr.bf16.mxu1 %v15725_v32 }
 0xa2c   :  { %11993 = vmatpush1.bf16.msra.mxu0 %v15681_v36  ;;  %12025 = vmatpush1.bf16.msra.mxu1 %v15730_v42 }
 0xa2d   :  { %11995 = vmatprep.subr.bf16.mxu0 %v15684_v39  ;;  %12027 = vmatprep.subr.bf16.mxu1 %v15733_v44 }
 0xa30   :  { %11997 = vmatpush1.bf16.msra.mxu0 %v15689_v52  ;;  %12029 = vmatpush1.bf16.msra.mxu1 %v15736_v59  ;;  %v14945_v52 = vld [vmem:[#allocation15 + $0x38] sm:$0xff] }
 0xa31   :  { %11999 = vmatprep.subr.bf16.mxu0 %v15696_v58  ;;  %12031 = vmatprep.subr.bf16.mxu1 %v15739_v60  ;;  %v14943_v60 = vld [vmem:[#allocation15 + $0x18] sm:$0xff]  ;;  %v14944_v58 = vld [vmem:[#allocation15 + $0x28] sm:$0xff] }
 0xa34   :  { %12001 = vmatpush1.bf16.msra.mxu0 %v15706_v10  ;;  %12033 = vmatpush1.bf16.msra.mxu1 %v15745_v6  ;;  %v14942_v10 = vld [vmem:[#allocation15 + $0x8] sm:$0xff] }
 0xa35   :  { %12003 = vmatprep.subr.bf16.mxu0 %v15709_v16  ;;  %12035 = vmatprep.subr.bf16.mxu1 %v15748_v7  ;;  %v14940_v7 = vld [vmem:[#allocation15 + $0x20] sm:$0xff]  ;;  %v14941_v16 = vld [vmem:[#allocation15 + $0x30] sm:$0xff] }
 0xa38   :  { %12005 = vmatpush1.bf16.msra.mxu0 %v15718_v26  ;;  %12037 = vmatpush1.bf16.msra.mxu1 %v15751_v13 }
 0xa39   :  { %12038 = vmatprep.subr.bf16.mxu0 %v19968_v24  ;;  %12062 = vmatprep.subr.bf16.mxu1 %v19968_v24 }
 0xa3b   :  { %2828 = vmatmul.mubr.f32.vlgmr.msra.gmra.mrb[18].mxu0 %v2762_v38  ;;  %2899 = vmatmul.mubr.f32.vlgmr.msra.gmra.mrb[18].mxu1 %v2762_v38 }
 0xa3c   :  { %12040 = vmatpush3.bf16.msra.mxu0 %v20048_v61  ;;  %10906 = vmatprep.mubr.msk.f32.mxu0 %vm15358_vm0, %v19797_v50 }
 0xa3d   :  { %12041 = vmatprep.subr.bf16.mxu0 %v19968_v24  ;;  %12064 = vmatpush3.bf16.msra.mxu1 %v20049_v55 }
 0xa3e   :  { %12065 = vmatprep.subr.bf16.mxu1 %v19968_v24  ;;  %10941 = vmatprep.mubr.msk.f32.mxu1 %vm15358_vm0, %v19797_v50 }
 0xa40   :  { %12043 = vmatpush3.bf16.msra.mxu0 %v20050_v27  ;;  %v20096_v27 = vld [vmem:[#allocation103_spill] sm:$0xff] }
 0xa41   :  { %12044 = vmatprep.subr.bf16.mxu0 %v19968_v24  ;;  %12067 = vmatpush3.bf16.msra.mxu1 %v20051_v11  ;;  %v20077_v11 = vld [vmem:[#allocation112_spill] sm:$0xff] }
 0xa42   :  { %12068 = vmatprep.subr.bf16.mxu1 %v19968_v24 }
 0xa44   :  { %12046 = vmatpush3.bf16.msra.mxu0 %v20052_v56  ;;  %v20070_v56 = vld [vmem:[#allocation97_spill] sm:$0xff] }
 0xa45   :  { %12047 = vmatprep.subr.bf16.mxu0 %v19968_v24  ;;  %12070 = vmatpush3.bf16.msra.mxu1 %v20053_v18  ;;  %v20068_v18 = vld [vmem:[#allocation93_spill] sm:$0xff] }
 0xa46   :  { %12071 = vmatprep.subr.bf16.mxu1 %v19968_v24 }
 0xa48   :  { %12049 = vmatpush3.bf16.msra.mxu0 %v20054_v28  ;;  %v20064_v28 = vld [vmem:[#allocation88_spill] sm:$0xff] }
 0xa49   :  { %12050 = vmatprep.subr.bf16.mxu0 %v19968_v24  ;;  %12073 = vmatpush3.bf16.msra.mxu1 %v20055_v62  ;;  %v20061_v62 = vld [vmem:[#allocation84_spill] sm:$0xff] }
 0xa4a   :  { %12074 = vmatprep.subr.bf16.mxu1 %v19968_v24 }
 0xa4c   :  { %12052 = vmatpush3.bf16.msra.mxu0 %v20056_v37  ;;  %v20062_v37 = vld [vmem:[#allocation85_spill] sm:$0xff] }
 0xa4d   :  { %12053 = vmatprep.subr.bf16.mxu0 %v19968_v24  ;;  %12076 = vmatpush3.bf16.msra.mxu1 %v20057_v35  ;;  %v20063_v35 = vld [vmem:[#allocation86_spill] sm:$0xff] }
 0xa4e   :  { %12077 = vmatprep.subr.bf16.mxu1 %v19968_v24 }
 0xa50   :  { %12055 = vmatpush3.bf16.msra.mxu0 %v20058_v12  ;;  %v20065_v12 = vld [vmem:[#allocation90_spill] sm:$0xff] }
 0xa51   :  { %12056 = vmatprep.subr.bf16.mxu0 %v19968_v24  ;;  %12079 = vmatpush3.bf16.msra.mxu1 %v20059_v51  ;;  %v20066_v51 = vld [vmem:[#allocation89_spill] sm:$0xff] }
 0xa52   :  { %12080 = vmatprep.subr.bf16.mxu1 %v19968_v24 }
 0xa54   :  { %12058 = vmatpush3.bf16.msra.mxu0 %v20060_v0  ;;  %v20067_v0 = vld [vmem:[#allocation92_spill] sm:$0xff] }
 0xa55   :  { %12059 = vmatprep.subr.bf16.mxu0 %v19968_v24  ;;  %12082 = vmatpush3.bf16.msra.mxu1 %v20061_v62  ;;  %v20069_v62 = vld [vmem:[#allocation96_spill] sm:$0xff] }
 0xa56   :  { %12083 = vmatprep.subr.bf16.mxu1 %v19968_v24 }
 0xa58   :  { %12061 = vmatpush3.bf16.msra.mxu0 %v20062_v37  ;;  %v20071_v37 = vld [vmem:[#allocation100_spill] sm:$0xff] }
 0xa59   :  { %12085 = vmatpush3.bf16.msra.mxu1 %v20063_v35  ;;  %12087 = vmatprep.subr.bf16.mxu0 %v20064_v28  ;;  %v20072_v35 = vld [vmem:[#allocation102_spill] sm:$0xff]  ;;  %v20073_v28 = vld [vmem:[#allocation104_spill] sm:$0xff] }
 0xa5a   :  { %12119 = vmatprep.subr.bf16.mxu1 %v20065_v12  ;;  %v20074_v12 = vld [vmem:[#allocation106_spill] sm:$0xff] }
 0xa5b   :  { %10907 = vmatmul.mubr.f32.vlgmr.msra.gmra.mrb[20].mxu0 %v2762_v38  ;;  %v20075_v38 = vld [vmem:[#allocation108_spill] sm:$0xff] }
 0xa5c   :  { %12089 = vmatpush1.bf16.msra.mxu0 %v20066_v51  ;;  %3140 = vmatprep.mubr.f32.mxu0 %v19797_v50  ;;  %v20076_v51 = vld [vmem:[#allocation110_spill] sm:$0xff] }
 0xa5d   :  { %12091 = vmatprep.subr.bf16.mxu0 %v20067_v0  ;;  %v20078_v0 = vld [vmem:[#allocation114_spill] sm:$0xff] }
 0xa60   :  { %12093 = vmatpush1.bf16.msra.mxu0 %v20068_v18  ;;  %v20079_v18 = vld [vmem:[#allocation116_spill] sm:$0xff] }
 0xa61   :  { %12095 = vmatprep.subr.bf16.mxu0 %v20069_v62  ;;  %v20080_v62 = vld [vmem:[#allocation117_spill] sm:$0xff] }
 0xa64   :  { %12097 = vmatpush1.bf16.msra.mxu0 %v20070_v56  ;;  %v20081_v56 = vld [vmem:[#allocation120_spill] sm:$0xff] }
 0xa65   :  { %12099 = vmatprep.subr.bf16.mxu0 %v20071_v37 }
 0xa68   :  { %12101 = vmatpush1.bf16.msra.mxu0 %v20072_v35 }
 0xa69   :  { %12103 = vmatprep.subr.bf16.mxu0 %v20073_v28 }
 0xa6c   :  { %12105 = vmatpush1.bf16.msra.mxu0 %v20074_v12 }
 0xa6d   :  { %12107 = vmatprep.subr.bf16.mxu0 %v20075_v38 }
 0xa70   :  { %12109 = vmatpush1.bf16.msra.mxu0 %v20076_v51 }
 0xa71   :  { %12111 = vmatprep.subr.bf16.mxu0 %v20077_v11 }
 0xa74   :  { %12113 = vmatpush1.bf16.msra.mxu0 %v20078_v0 }
 0xa75   :  { %12115 = vmatprep.subr.bf16.mxu0 %v20079_v18 }
 0xa78   :  { %12117 = vmatpush1.bf16.msra.mxu0 %v20080_v62 }
 0xa79   :  { %12151 = vmatprep.subr.bf16.mxu0 %v20081_v56  ;;  %v14934_v56 = vld [vmem:[%s18966_s12] ss:$0 sm:$0xff] }
 0xace   :  { %v16946_v37 = vpop.f32.mrb[14].mxu0  ;;  %v16948_v35 = vpop.f32.mrb[14].mxu1 }
 0xacf   :  { %20082 = vst [vmem:[#allocation374_spill] sm:$0xff] %v16946_v37  ;;  %20083 = vst [vmem:[#allocation375_spill] sm:$0xff] %v16948_v35  ;;  %v16950_v28 = vpop.f32.mrb[15].mxu0  ;;  %v16952_v12 = vpop.f32.mrb[15].mxu1 }
 0xad0   :  { %20084 = vst [vmem:[#allocation376_spill] sm:$0xff] %v16950_v28  ;;  %20085 = vst [vmem:[#allocation377_spill] sm:$0xff] %v16952_v12  ;;  %v20090_v28 = vld [vmem:[#allocation91_spill] sm:$0xff]  ;;  %v20095_v12 = vld [vmem:[#allocation101_spill] sm:$0xff] }
 0xaee   :  { %v16954_v38 = vpop.f32.mrb[16].mxu0  ;;  %v16956_v51 = vpop.f32.mrb[16].mxu1 }
 0xaef   :  { %20086 = vst [vmem:[#allocation378_spill] sm:$0xff] %v16954_v38  ;;  %20087 = vst [vmem:[#allocation379_spill] sm:$0xff] %v16956_v51  ;;  %v16958_v11 = vpop.f32.mrb[17].mxu0  ;;  %v16960_v0 = vpop.f32.mrb[17].mxu1  ;;  %v20091_v38 = vld [vmem:[#allocation94_spill] sm:$0xff]  ;;  %v20092_v51 = vld [vmem:[#allocation95_spill] sm:$0xff] }
 0xaf0   :  { %20088 = vst [vmem:[#allocation380_spill] sm:$0xff] %v16958_v11  ;;  %20089 = vst [vmem:[#allocation381_spill] sm:$0xff] %v16960_v0  ;;  %v20093_v11 = vld [vmem:[#allocation98_spill] sm:$0xff]  ;;  %v20094_v0 = vld [vmem:[#allocation99_spill] sm:$0xff] }
 0xb2e   :  { %v2971_v18 = vpop.f32.mrb[20].mxu0 }
 0xb2f   :  { %v2975_v37 = vadd.f32 %v14934_v56, %v2971_v18  ;;  %v10908_v62 = vpop.f32.mrb[21].mxu0  ;;  %v20097_v56 = vld [vmem:[#allocation105_spill] sm:$0xff]  ;;  %v20098_v18 = vld [vmem:[#allocation107_spill] sm:$0xff] }
 0xb30   :  { %v20099_v62 = vld [vmem:[#allocation109_spill] sm:$0xff] }
 0xb31   :  { %v2976_v35 = vmax.f32 %v2975_v37, 0.0  ;;  %v20100_v37 = vld [vmem:[#allocation111_spill] sm:$0xff] }
 0xb33   :  { %10942 = vmatmul.mubr.f32.vlgmr.msra.gmra.mrb[20].mxu1 %v2976_v35  ;;  %v20101_v35 = vld [vmem:[#allocation113_spill] sm:$0xff] }
 0xb34   :  { %12121 = vmatpush1.bf16.msra.mxu1 %v20090_v28  ;;  %3211 = vmatprep.mubr.f32.mxu1 %v19797_v50 }
 0xb35   :  { %12123 = vmatprep.subr.bf16.mxu1 %v20091_v38  ;;  %v20102_v38 = vld [vmem:[#allocation115_spill] sm:$0xff] }
 0xb38   :  { %12125 = vmatpush1.bf16.msra.mxu1 %v20092_v51  ;;  %v20103_v51 = vld [vmem:[#allocation118_spill] sm:$0xff] }
 0xb39   :  { %12127 = vmatprep.subr.bf16.mxu1 %v20093_v11  ;;  %v20104_v11 = vld [vmem:[#allocation119_spill] sm:$0xff] }
 0xb3c   :  { %12129 = vmatpush1.bf16.msra.mxu1 %v20094_v0  ;;  %v20105_v0 = vld [vmem:[#allocation121_spill] sm:$0xff] }
 0xb3d   :  { %12131 = vmatprep.subr.bf16.mxu1 %v20095_v12 }
 0xb40   :  { %12133 = vmatpush1.bf16.msra.mxu1 %v20096_v27  ;;  %v20106_v27 = vld [vmem:[#allocation87_spill] sm:$0xff] }
 0xb41   :  { %12135 = vmatprep.subr.bf16.mxu1 %v20097_v56  ;;  %v9780_v56 = vsel %vm1293_vm3, 1.0, %v19797_v50  ;;  %vm946_vm4 = vcmp.ne.s32.totalorder %v20106_v27, 1 }
 0xb42   :  { %vm1296_vm5 = vcmp.gt.f32.partialorder %v9780_v56, 0.0 }
 0xb43   :  { %vm1297_vm6 = vmand %vm1296_vm5, %vm946_vm4 }
 0xb44   :  { %12137 = vmatpush1.bf16.msra.mxu1 %v20098_v18 }
 0xb45   :  { %12139 = vmatprep.subr.bf16.mxu1 %v20099_v62 }
 0xb48   :  { %12141 = vmatpush1.bf16.msra.mxu1 %v20100_v37  ;;  %v14936_v37 = vld [vmem:[#allocation11] sm:$0xff] }
 0xb49   :  { %12143 = vmatprep.subr.bf16.mxu1 %v20101_v35 }
 0xb4c   :  { %12145 = vmatpush1.bf16.msra.mxu1 %v20102_v38 }
 0xb4d   :  { %12147 = vmatprep.subr.bf16.mxu1 %v20103_v51  ;;  %v14935_v51 = vld [vmem:[%s18968_s14] ss:$0 sm:$0xff] }
 0xb50   :  { %12149 = vmatpush1.bf16.msra.mxu1 %v20104_v11 }
 0xb51   :  { %12183 = vmatprep.subr.bf16.mxu1 %v20105_v0  ;;  %v16992_v0 = vsel %vm1297_vm6, -10000000.0, %v14936_v37 }
 0xb52   :  { %20108 = vst [vmem:[#allocation122_spill] sm:$0xff] %v16992_v0 }
 0xc06   :  { %v3044_v35 = vpop.f32.mrb[20].mxu1 }
 0xc07   :  { %v3045_v38 = vadd.f32 %v14935_v51, %v3044_v35  ;;  %v10943_v11 = vpop.f32.mrb[21].mxu1 }
 0xc09   :  { %v3048_v62 = vadd.f32 %v3045_v38, %v16992_v0 }
 0xc0b   :  { %3050 = vst [vmem:[#allocation27 + $0x8] sm:$0xff] %v3048_v62  ;;  %3051 = vmax.xlane.f32.xlu1 %v3048_v62 }
 0xc98   :  { %v3052_v12 = vpop.xlane.xlu1 %3051 }
 0xc99   :  { %vm3053_vm7 = vcmp.eq.f32.partialorder %v3048_v62, %v3052_v12  ;;  %v20110_v62 = vmov 1.0   ;;  %v20117_v12 = vld [vmem:[#allocation129_spill] sm:$0xff] }
 0xc9a   :  { %v3054_v56 = vsel %vm3053_vm7, %v20106_v27, 128 }
 0xc9b   :  { %v3056_v18 = vshra.s32 %v3054_v56, 16  ;;  %v3055_v55 = vand.u32 65535, %v3054_v56  ;;  %v20118_v56 = vld [vmem:[#allocation130_spill] sm:$0xff] }
 0xc9d   :  { %v3058_v28 = vcvt.s32.f32 %v3056_v18  ;;  %v3057_v13 = vcvt.s32.f32 %v3055_v55  ;;  %v20114_v55 = vld [vmem:[#allocation126_spill] sm:$0xff]  ;;  %v20116_v18 = vld [vmem:[#allocation128_spill] sm:$0xff] }
 0xc9f   :  { %3059 = vmin.xlane.f32.xlu0 %v3058_v28 }
 0xd2c   :  { %v3060_v61 = vpop.xlane.xlu0 %3059 }
 0xd2d   :  { %vm3061_vm8 = vcmp.eq.f32.partialorder %v3058_v28, %v3060_v61  ;;  %v3066_v11 = vcvt.f32.s32 %v3060_v61  ;;  %v20112_v61 = vld [vmem:[#allocation124_spill] sm:$0xff]  ;;  %v20115_v28 = vld [vmem:[#allocation127_spill] sm:$0xff] }
 0xd2e   :  { %v3062_v51 = vsel %vm3061_vm8, %v3057_v13, inf  ;;  %v20111_v13 = vld [vmem:[#allocation123_spill] sm:$0xff] }
 0xd2f   :  { %3063 = vmin.xlane.f32.xlu1 %v3062_v51  ;;  %v3067_v35 = vshll.u32 %v3066_v11, 16  ;;  %v20119_v51 = vld [vmem:[#allocation131_spill] sm:$0xff]  ;;  %v20120_v11 = vld [vmem:[#allocation132_spill] sm:$0xff] }
 0xdbc   :  { %v3064_v37 = vpop.xlane.xlu1 %3063 }
 0xdbd   :  { %v3065_v26 = vcvt.f32.s32 %v3064_v37  ;;  %v20121_v37 = vld [vmem:[#allocation133_spill] sm:$0xff] }
 0xdbf   :  { %v16996_v38 = vadd.s32 %v3067_v35, %v3065_v26  ;;  %v20113_v26 = vld [vmem:[#allocation125_spill] sm:$0xff]  ;;  %v20122_v35 = vld [vmem:[#allocation134_spill] sm:$0xff] }
 0xdc1   :  { %20109 = vst [vmem:[#allocation382_spill] sm:$0xff] %v16996_v38  ;;  %vm3069_vm9 = vcmp.eq.s32.totalorder %v20106_v27, %v16996_v38  ;;  %v14938_v38 = vld [vmem:[#allocation15] sm:$0xff]  ;;  %v14939_v27 = vld [vmem:[#allocation15 + $0x10] sm:$0xff] }
 0xdc2   :  { %9790 = vmatmul.mubr.msk.f32.vlgmr.msra.gmra.mrb[18].mxu0 %vm3069_vm9, %v20110_v62  ;;  %9791 = vmatmul.mubr.msk.f32.vlgmr.msra.gmra.mrb[18].mxu1 %vm3069_vm9, %v20110_v62 }
 0xdc3   :  { %12153 = vmatpush1.bf16.msra.mxu0 %v20111_v13  ;;  %3282 = vmatprep.mubr.f32.mxu0 %v19797_v50  ;;  %v20172_v13 = vld [vmem:[#allocation184_spill] sm:$0xff] }
 0xdc4   :  { %12155 = vmatprep.subr.bf16.mxu0 %v20112_v61  ;;  %12185 = vmatpush1.bf16.msra.mxu1 %v20113_v26  ;;  %v20123_v26 = vld [vmem:[#allocation135_spill] sm:$0xff]  ;;  %v20125_v61 = vld [vmem:[#allocation137_spill] sm:$0xff] }
 0xdc5   :  { %12187 = vmatprep.subr.bf16.mxu1 %v20114_v55  ;;  %3354 = vmatprep.mubr.f32.mxu1 %v19797_v50  ;;  %v20124_v55 = vld [vmem:[#allocation136_spill] sm:$0xff] }
 0xdc7   :  { %12157 = vmatpush1.bf16.msra.mxu0 %v20115_v28  ;;  %v20126_v28 = vld [vmem:[#allocation138_spill] sm:$0xff] }
 0xdc8   :  { %12159 = vmatprep.subr.bf16.mxu0 %v20116_v18  ;;  %12189 = vmatpush1.bf16.msra.mxu1 %v20117_v12  ;;  %v20127_v18 = vld [vmem:[#allocation139_spill] sm:$0xff]  ;;  %v20128_v12 = vld [vmem:[#allocation140_spill] sm:$0xff] }
 0xdc9   :  { %12191 = vmatprep.subr.bf16.mxu1 %v20118_v56  ;;  %v20129_v56 = vld [vmem:[#allocation141_spill] sm:$0xff] }
 0xdcb   :  { %12161 = vmatpush1.bf16.msra.mxu0 %v20119_v51  ;;  %v20130_v51 = vld [vmem:[#allocation142_spill] sm:$0xff] }
 0xdcc   :  { %12163 = vmatprep.subr.bf16.mxu0 %v20120_v11  ;;  %12193 = vmatpush1.bf16.msra.mxu1 %v20121_v37  ;;  %v20131_v11 = vld [vmem:[#allocation143_spill] sm:$0xff]  ;;  %v20132_v37 = vld [vmem:[#allocation144_spill] sm:$0xff] }
 0xdcd   :  { %12195 = vmatprep.subr.bf16.mxu1 %v20122_v35  ;;  %v20133_v35 = vld [vmem:[#allocation145_spill] sm:$0xff] }
 0xdcf   :  { %12165 = vmatpush1.bf16.msra.mxu0 %v20123_v26  ;;  %v20134_v26 = vld [vmem:[#allocation146_spill] sm:$0xff] }
 0xdd0   :  { %12167 = vmatprep.subr.bf16.mxu0 %v20124_v55  ;;  %12197 = vmatpush1.bf16.msra.mxu1 %v20125_v61  ;;  %v20135_v55 = vld [vmem:[#allocation147_spill] sm:$0xff]  ;;  %v20136_v61 = vld [vmem:[#allocation148_spill] sm:$0xff] }
 0xdd1   :  { %12199 = vmatprep.subr.bf16.mxu1 %v20126_v28  ;;  %v20137_v28 = vld [vmem:[#allocation149_spill] sm:$0xff] }
 0xdd3   :  { %12169 = vmatpush1.bf16.msra.mxu0 %v20127_v18  ;;  %v20138_v18 = vld [vmem:[#allocation150_spill] sm:$0xff] }
 0xdd4   :  { %12171 = vmatprep.subr.bf16.mxu0 %v20128_v12  ;;  %12201 = vmatpush1.bf16.msra.mxu1 %v20129_v56  ;;  %v20139_v12 = vld [vmem:[#allocation151_spill] sm:$0xff]  ;;  %v20140_v56 = vld [vmem:[#allocation152_spill] sm:$0xff] }
 0xdd5   :  { %12203 = vmatprep.subr.bf16.mxu1 %v20130_v51  ;;  %v20141_v51 = vld [vmem:[#allocation153_spill] sm:$0xff] }
 0xdd7   :  { %12173 = vmatpush1.bf16.msra.mxu0 %v20131_v11  ;;  %v20142_v11 = vld [vmem:[#allocation169_spill] sm:$0xff] }
 0xdd8   :  { %12175 = vmatprep.subr.bf16.mxu0 %v20132_v37  ;;  %12205 = vmatpush1.bf16.msra.mxu1 %v20133_v35  ;;  %v20152_v35 = vld [vmem:[#allocation163_spill] sm:$0xff]  ;;  %v20154_v37 = vld [vmem:[#allocation165_spill] sm:$0xff] }
 0xdd9   :  { %12207 = vmatprep.subr.bf16.mxu1 %v20134_v26  ;;  %v20151_v26 = vld [vmem:[#allocation162_spill] sm:$0xff] }
 0xddb   :  { %12177 = vmatpush1.bf16.msra.mxu0 %v20135_v55  ;;  %v20143_v55 = vld [vmem:[#allocation154_spill] sm:$0xff] }
 0xddc   :  { %12179 = vmatprep.subr.bf16.mxu0 %v20136_v61  ;;  %12209 = vmatpush1.bf16.msra.mxu1 %v20137_v28  ;;  %v20144_v28 = vld [vmem:[#allocation155_spill] sm:$0xff]  ;;  %v20150_v61 = vld [vmem:[#allocation161_spill] sm:$0xff] }
 0xddd   :  { %12211 = vmatprep.subr.bf16.mxu1 %v20138_v18  ;;  %v20145_v18 = vld [vmem:[#allocation156_spill] sm:$0xff] }
 0xddf   :  { %12181 = vmatpush1.bf16.msra.mxu0 %v20139_v12  ;;  %v20146_v12 = vld [vmem:[#allocation157_spill] sm:$0xff] }
 0xde0   :  { %12215 = vmatprep.subr.bf16.mxu0 %v20140_v56  ;;  %12213 = vmatpush1.bf16.msra.mxu1 %v20141_v51  ;;  %v20147_v56 = vld [vmem:[#allocation158_spill] sm:$0xff]  ;;  %v20148_v51 = vld [vmem:[#allocation159_spill] sm:$0xff] }
 0xde1   :  { %12247 = vmatprep.subr.bf16.mxu1 %v20142_v11  ;;  %v20149_v11 = vld [vmem:[#allocation160_spill] sm:$0xff] }
 0xde2   :  { %9792 = vmatmul.mubr.msk.f32.vlgmr.msra.gmra.mrb[22].mxu0 %vm3069_vm9, %v20110_v62  ;;  %v20173_v62 = vld [vmem:[#allocation185_spill] sm:$0xff] }
 0xde3   :  { %12217 = vmatpush1.bf16.msra.mxu0 %v20143_v55  ;;  %3425 = vmatprep.mubr.f32.mxu0 %v19797_v50  ;;  %v20153_v55 = vld [vmem:[#allocation164_spill] sm:$0xff] }
 0xde4   :  { %12219 = vmatprep.subr.bf16.mxu0 %v20144_v28  ;;  %v20155_v28 = vld [vmem:[#allocation166_spill] sm:$0xff] }
 0xde7   :  { %12221 = vmatpush1.bf16.msra.mxu0 %v20145_v18  ;;  %v20156_v18 = vld [vmem:[#allocation167_spill] sm:$0xff] }
 0xde8   :  { %12223 = vmatprep.subr.bf16.mxu0 %v20146_v12  ;;  %v20157_v12 = vld [vmem:[#allocation168_spill] sm:$0xff] }
 0xdeb   :  { %12225 = vmatpush1.bf16.msra.mxu0 %v20147_v56  ;;  %v20158_v56 = vld [vmem:[#allocation170_spill] sm:$0xff] }
 0xdec   :  { %12227 = vmatprep.subr.bf16.mxu0 %v20148_v51 }
 0xdef   :  { %12229 = vmatpush1.bf16.msra.mxu0 %v20149_v11 }
 0xdf0   :  { %12231 = vmatprep.subr.bf16.mxu0 %v20150_v61  ;;  %v14937_v61 = vld [vmem:[%s18970_s16] ss:$0 sm:$0xff] }
 0xdf3   :  { %12233 = vmatpush1.bf16.msra.mxu0 %v20151_v26 }
 0xdf4   :  { %12235 = vmatprep.subr.bf16.mxu0 %v20152_v35  ;;  %v20167_v35 = vld [vmem:[#allocation179_spill] sm:$0xff] }
 0xdf7   :  { %12237 = vmatpush1.bf16.msra.mxu0 %v20153_v55  ;;  %v20159_v55 = vld [vmem:[#allocation171_spill] sm:$0xff] }
 0xdf8   :  { %12239 = vmatprep.subr.bf16.mxu0 %v20154_v37  ;;  %v20160_v37 = vld [vmem:[#allocation172_spill] sm:$0xff] }
 0xdfb   :  { %12241 = vmatpush1.bf16.msra.mxu0 %v20155_v28  ;;  %v20161_v28 = vld [vmem:[#allocation173_spill] sm:$0xff] }
 0xdfc   :  { %12243 = vmatprep.subr.bf16.mxu0 %v20156_v18  ;;  %v20162_v18 = vld [vmem:[#allocation174_spill] sm:$0xff] }
 0xdff   :  { %12245 = vmatpush1.bf16.msra.mxu0 %v20157_v12  ;;  %v20164_v12 = vld [vmem:[#allocation176_spill] sm:$0xff] }
 0xe00   :  { %12279 = vmatprep.subr.bf16.mxu0 %v20158_v56  ;;  %v20163_v56 = vld [vmem:[#allocation175_spill] sm:$0xff] }
 0xeb5   :  { %v3284_v51 = vpop.f32.mrb[22].mxu0 }
 0xeb6   :  { %v3289_v26 = vadd.f32 %v14937_v61, %v3284_v51  ;;  %v17066_v11 = vpop.f32.mrb[23].mxu0  ;;  %v20165_v61 = vld [vmem:[#allocation177_spill] sm:$0xff]  ;;  %v20166_v51 = vld [vmem:[#allocation178_spill] sm:$0xff] }
 0xeb8   :  { %3355 = vmatmul.mubr.f32.vlgmr.msra.gmra.mrb[22].mxu1 %v3289_v26  ;;  %3426 = vmatmul.mubr.f32.vlgmr.msra.gmra.mrb[24].mxu0 %v3289_v26 }
 0xeb9   :  { %12249 = vmatpush1.bf16.msra.mxu1 %v20159_v55  ;;  %12281 = vmatpush1.bf16.msra.mxu0 %v20160_v37  ;;  %v20168_v55 = vld [vmem:[#allocation180_spill] sm:$0xff]  ;;  %v20169_v37 = vld [vmem:[#allocation181_spill] sm:$0xff] }
 0xeba   :  { %12251 = vmatprep.subr.bf16.mxu1 %v20161_v28  ;;  %12283 = vmatprep.subr.bf16.mxu0 %v20162_v18  ;;  %v20170_v28 = vld [vmem:[#allocation182_spill] sm:$0xff]  ;;  %v20171_v18 = vld [vmem:[#allocation183_spill] sm:$0xff] }
 0xebb   :  { %3496 = vmatprep.mubr.f32.mxu1 %v19797_v50  ;;  %3567 = vmatprep.mubr.f32.mxu0 %v19797_v50 }
 0xebd   :  { %12253 = vmatpush1.bf16.msra.mxu1 %v20163_v56  ;;  %12285 = vmatpush1.bf16.msra.mxu0 %v20164_v12  ;;  %v20174_v56 = vld [vmem:[#allocation186_spill] sm:$0xff]  ;;  %v20175_v12 = vld [vmem:[#allocation187_spill] sm:$0xff] }
 0xebe   :  { %12255 = vmatprep.subr.bf16.mxu1 %v20165_v61  ;;  %12287 = vmatprep.subr.bf16.mxu0 %v20166_v51  ;;  %v20176_v61 = vld [vmem:[#allocation188_spill] sm:$0xff]  ;;  %v20177_v51 = vld [vmem:[#allocation189_spill] sm:$0xff] }
 0xec1   :  { %12257 = vmatpush1.bf16.msra.mxu1 %v20167_v35  ;;  %12289 = vmatpush1.bf16.msra.mxu0 %v20168_v55  ;;  %v20178_v35 = vld [vmem:[#allocation190_spill] sm:$0xff]  ;;  %v20179_v55 = vld [vmem:[#allocation191_spill] sm:$0xff] }
 0xec2   :  { %12259 = vmatprep.subr.bf16.mxu1 %v20169_v37  ;;  %12291 = vmatprep.subr.bf16.mxu0 %v20170_v28  ;;  %v20180_v37 = vld [vmem:[#allocation192_spill] sm:$0xff]  ;;  %v20181_v28 = vld [vmem:[#allocation193_spill] sm:$0xff] }
 0xec5   :  { %12261 = vmatpush1.bf16.msra.mxu1 %v20171_v18  ;;  %12293 = vmatpush1.bf16.msra.mxu0 %v20172_v13  ;;  %v20182_v18 = vld [vmem:[#allocation194_spill] sm:$0xff]  ;;  %v20183_v13 = vld [vmem:[#allocation195_spill] sm:$0xff] }
 0xec6   :  { %12263 = vmatprep.subr.bf16.mxu1 %v20173_v62  ;;  %12295 = vmatprep.subr.bf16.mxu0 %v20174_v56  ;;  %v20184_v62 = vld [vmem:[#allocation196_spill] sm:$0xff]  ;;  %v20185_v56 = vld [vmem:[#allocation197_spill] sm:$0xff] }
 0xec9   :  { %12265 = vmatpush1.bf16.msra.mxu1 %v20175_v12  ;;  %12297 = vmatpush1.bf16.msra.mxu0 %v20176_v61  ;;  %v20186_v12 = vld [vmem:[#allocation198_spill] sm:$0xff]  ;;  %v20187_v61 = vld [vmem:[#allocation199_spill] sm:$0xff] }
 0xeca   :  { %12267 = vmatprep.subr.bf16.mxu1 %v20177_v51  ;;  %12299 = vmatprep.subr.bf16.mxu0 %v20178_v35  ;;  %v20188_v51 = vld [vmem:[#allocation200_spill] sm:$0xff]  ;;  %v20189_v35 = vld [vmem:[#allocation201_spill] sm:$0xff] }
 0xecd   :  { %12269 = vmatpush1.bf16.msra.mxu1 %v20179_v55  ;;  %12301 = vmatpush1.bf16.msra.mxu0 %v20180_v37  ;;  %v20190_v55 = vld [vmem:[#allocation202_spill] sm:$0xff] }
 0xece   :  { %12271 = vmatprep.subr.bf16.mxu1 %v20181_v28  ;;  %12303 = vmatprep.subr.bf16.mxu0 %v20182_v18  ;;  %v20191_v28 = vld [vmem:[#allocation203_spill] sm:$0xff]  ;;  %v20192_v18 = vld [vmem:[#allocation204_spill] sm:$0xff] }
 0xed1   :  { %12273 = vmatpush1.bf16.msra.mxu1 %v20183_v13  ;;  %12305 = vmatpush1.bf16.msra.mxu0 %v20184_v62  ;;  %v20193_v13 = vld [vmem:[#allocation205_spill] sm:$0xff]  ;;  %v20194_v62 = vld [vmem:[#allocation206_spill] sm:$0xff] }
 0xed2   :  { %12275 = vmatprep.subr.bf16.mxu1 %v20185_v56  ;;  %12307 = vmatprep.subr.bf16.mxu0 %v20186_v12  ;;  %v20195_v56 = vld [vmem:[#allocation207_spill] sm:$0xff]  ;;  %v20196_v12 = vld [vmem:[#allocation208_spill] sm:$0xff] }
 0xed5   :  { %12277 = vmatpush1.bf16.msra.mxu1 %v20187_v61  ;;  %12309 = vmatpush1.bf16.msra.mxu0 %v20188_v51  ;;  %v20197_v61 = vld [vmem:[#allocation209_spill] sm:$0xff]  ;;  %v20198_v51 = vld [vmem:[#allocation210_spill] sm:$0xff] }
 0xed6   :  { %12311 = vmatprep.subr.bf16.mxu1 %v20189_v35  ;;  %12343 = vmatprep.subr.bf16.mxu0 %v20190_v55  ;;  %v20199_v35 = vld [vmem:[#allocation211_spill] sm:$0xff]  ;;  %v20200_v55 = vld [vmem:[#allocation212_spill] sm:$0xff] }
 0xed8   :  { %3497 = vmatmul.mubr.f32.vlgmr.msra.gmra.mrb[24].mxu1 %v3289_v26  ;;  %3568 = vmatmul.mubr.f32.vlgmr.msra.gmra.mrb[26].mxu0 %v3289_v26  ;;  %v20201_v26 = vld [vmem:[#allocation213_spill] sm:$0xff] }
 0xed9   :  { %12313 = vmatpush3.bf16.msra.mxu1 %v20191_v28  ;;  %12345 = vmatpush3.bf16.msra.mxu0 %v20192_v18  ;;  %v20202_v28 = vld [vmem:[#allocation214_spill] sm:$0xff]  ;;  %v20203_v18 = vld [vmem:[#allocation215_spill] sm:$0xff] }
 0xeda   :  { %12315 = vmatprep.subr.bf16.mxu1 %v20193_v13  ;;  %12347 = vmatprep.subr.bf16.mxu0 %v20194_v62  ;;  %v20204_v13 = vld [vmem:[#allocation216_spill] sm:$0xff]  ;;  %v20205_v62 = vld [vmem:[#allocation217_spill] sm:$0xff] }
 0xedd   :  { %12317 = vmatpush3.bf16.msra.mxu1 %v20195_v56  ;;  %12349 = vmatpush3.bf16.msra.mxu0 %v20196_v12  ;;  %v20206_v56 = vld [vmem:[#allocation218_spill] sm:$0xff]  ;;  %v20207_v12 = vld [vmem:[#allocation219_spill] sm:$0xff] }
 0xede   :  { %12319 = vmatprep.subr.bf16.mxu1 %v20197_v61  ;;  %12351 = vmatprep.subr.bf16.mxu0 %v20198_v51  ;;  %v20208_v61 = vld [vmem:[#allocation220_spill] sm:$0xff]  ;;  %v20209_v51 = vld [vmem:[#allocation221_spill] sm:$0xff] }
 0xee1   :  { %12321 = vmatpush3.bf16.msra.mxu1 %v20199_v35  ;;  %12353 = vmatpush3.bf16.msra.mxu0 %v20200_v55  ;;  %v20210_v35 = vld [vmem:[#allocation222_spill] sm:$0xff]  ;;  %v20211_v55 = vld [vmem:[#allocation223_spill] sm:$0xff] }
 0xee2   :  { %12323 = vmatprep.subr.bf16.mxu1 %v20201_v26  ;;  %12355 = vmatprep.subr.bf16.mxu0 %v20202_v28  ;;  %v20212_v26 = vld [vmem:[#allocation224_spill] sm:$0xff]  ;;  %v20213_v28 = vld [vmem:[#allocation225_spill] sm:$0xff] }
 0xee5   :  { %12325 = vmatpush3.bf16.msra.mxu1 %v20203_v18  ;;  %12357 = vmatpush3.bf16.msra.mxu0 %v20204_v13  ;;  %v20214_v18 = vld [vmem:[#allocation226_spill] sm:$0xff]  ;;  %v20215_v13 = vld [vmem:[#allocation227_spill] sm:$0xff] }
 0xee6   :  { %12327 = vmatprep.subr.bf16.mxu1 %v20205_v62  ;;  %12359 = vmatprep.subr.bf16.mxu0 %v20206_v56  ;;  %v20216_v62 = vld [vmem:[#allocation228_spill] sm:$0xff]  ;;  %v20217_v56 = vld [vmem:[#allocation229_spill] sm:$0xff] }
 0xee9   :  { %12329 = vmatpush3.bf16.msra.mxu1 %v20207_v12  ;;  %12361 = vmatpush3.bf16.msra.mxu0 %v20208_v61  ;;  %v20218_v12 = vld [vmem:[#allocation230_spill] sm:$0xff]  ;;  %v20219_v61 = vld [vmem:[#allocation231_spill] sm:$0xff] }
 0xeea   :  { %12331 = vmatprep.subr.bf16.mxu1 %v20209_v51  ;;  %12363 = vmatprep.subr.bf16.mxu0 %v20210_v35  ;;  %v20220_v51 = vld [vmem:[#allocation232_spill] sm:$0xff]  ;;  %v20221_v35 = vld [vmem:[#allocation233_spill] sm:$0xff] }
 0xeed   :  { %12333 = vmatpush3.bf16.msra.mxu1 %v20211_v55  ;;  %12365 = vmatpush3.bf16.msra.mxu0 %v20212_v26  ;;  %v20222_v55 = vld [vmem:[#allocation234_spill] sm:$0xff] }
 0xeee   :  { %12335 = vmatprep.subr.bf16.mxu1 %v20213_v28  ;;  %12367 = vmatprep.subr.bf16.mxu0 %v20214_v18 }
 0xef1   :  { %12337 = vmatpush3.bf16.msra.mxu1 %v20215_v13  ;;  %12369 = vmatpush3.bf16.msra.mxu0 %v20216_v62 }
 0xef2   :  { %12339 = vmatprep.subr.bf16.mxu1 %v20217_v56  ;;  %12371 = vmatprep.subr.bf16.mxu0 %v20218_v12 }
 0xef5   :  { %12341 = vmatpush3.bf16.msra.mxu1 %v20219_v61  ;;  %12373 = vmatpush3.bf16.msra.mxu0 %v20220_v51 }
 0xef6   :  { %12375 = vmatprep.subr.bf16.mxu1 %v20221_v35  ;;  %12407 = vmatprep.subr.bf16.mxu0 %v20222_v55 }
 0xf8b   :  { %v3356_v26 = vpop.f32.mrb[22].mxu1  ;;  %v3427_v28 = vpop.f32.mrb[24].mxu0 }
 0xf8c   :  { %v3358_v37 = vpop.f32.mrb[23].mxu1  ;;  %v3429_v18 = vpop.f32.mrb[25].mxu0  ;;  %v3357_v62 = vadd.f32 %v14938_v38, %v3356_v26  ;;  %v3428_v56 = vadd.f32 %v14939_v27, %v3427_v28 }
 0xf8d   :  { %v3359_v35 = vadd.f32 %v14942_v10, %v3358_v37  ;;  %v3430_v55 = vadd.f32 %v14943_v60, %v3429_v18 }
 0xfab   :  { %v3498_v0 = vpop.f32.mrb[24].mxu1  ;;  %v3569_v13 = vpop.f32.mrb[26].mxu0 }
 0xfac   :  { %v3499_v12 = vadd.f32 %v14940_v7, %v3498_v0  ;;  %v3570_v61 = vadd.f32 %v14941_v16, %v3569_v13  ;;  %v3500_v6 = vpop.f32.mrb[25].mxu1  ;;  %v3571_v51 = vpop.f32.mrb[27].mxu0 }
 0xfad   :  { %v3501_v59 = vadd.f32 %v14944_v58, %v3500_v6  ;;  %v3572_v44 = vadd.f32 %v14945_v52, %v3571_v51 }
 0xfae   :  { %v3574_v39 = vmax.f32 %v3357_v62, %v3499_v12  ;;  %v3576_v42 = vmax.f32 %v3428_v56, %v3570_v61 }
 0xfaf   :  { %v3575_v36 = vmax.f32 %v3359_v35, %v3501_v59  ;;  %v3577_v38 = vmax.f32 %v3430_v55, %v3572_v44 }
 0xfb1   :  { %v3578_v26 = vmax.f32 %v3574_v39, %v3575_v36  ;;  %v3579_v27 = vmax.f32 %v3576_v42, %v3577_v38 }
 0xfb3   :  { %v3580_v28 = vmax.f32 %v3578_v26, %v3579_v27 }
 0xfb5   :  { %3581 = vmax.xlane.f32.xlu0 %v3580_v28 }
0x1042   :  { %v3582_v7 = vpop.xlane.xlu0 %3581 }
0x1043   :  { %v3583_v16 = vsub.f32 %v3357_v62, %v3582_v7  ;;  %v3584_v0 = vsub.f32 %v3359_v35, %v3582_v7  ;;  %v3585_v13 = vsub.f32 %v3428_v56, %v3582_v7  ;;  %v3586_v32 = vsub.f32 %v3430_v55, %v3582_v7 }
0x1044   :  { %v3587_v18 = vsub.f32 %v3499_v12, %v3582_v7  ;;  %v3588_v58 = vsub.f32 %v3501_v59, %v3582_v7  ;;  %v3589_v6 = vsub.f32 %v3570_v61, %v3582_v7  ;;  %v3590_v36 = vsub.f32 %v3572_v44, %v3582_v7 }
0x1045   :  { %v3591_v10 = vmul.f32 1.442695, %v3583_v16  ;;  %v3593_v37 = vmul.f32 1.442695, %v3584_v0  ;;  %v3595_v60 = vmul.f32 1.442695, %v3585_v13 }
0x1046   :  { %v3597_v52 = vmul.f32 1.442695, %v3586_v32  ;;  %v3599_v51 = vmul.f32 1.442695, %v3587_v18  ;;  %v3601_v39 = vmul.f32 1.442695, %v3588_v58 }
0x1047   :  { %14804 = vpow2.f32 %v3591_v10  ;;  %v3603_v42 = vmul.f32 1.442695, %v3589_v6  ;;  %v3605_v62 = vmul.f32 1.442695, %v3590_v36  ;;  %v20224_v36 = vld [vmem:[#allocation236_spill] sm:$0xff] }
0x1048   :  { %14806 = vpow2.f32 %v3593_v37 }
0x1049   :  { %14808 = vpow2.f32 %v3595_v60 }
0x104a   :  { %14810 = vpow2.f32 %v3597_v52 }
0x104b   :  { %14812 = vpow2.f32 %v3599_v51  ;;  %v20223_v51 = vld [vmem:[#allocation235_spill] sm:$0xff] }
0x104c   :  { %14814 = vpow2.f32 %v3601_v39  ;;  %v20225_v39 = vld [vmem:[#allocation237_spill] sm:$0xff] }
0x104d   :  { %14816 = vpow2.f32 %v3603_v42  ;;  %v20226_v42 = vld [vmem:[#allocation238_spill] sm:$0xff] }
0x104e   :  { %14818 = vpow2.f32 %v3605_v62  ;;  %v20227_v62 = vld [vmem:[#allocation239_spill] sm:$0xff] }
0x1051   :  { %v14805_v56 = vpop.eup %14804 }
0x1052   :  { %v14807_v55 = vpop.eup %14806 }
0x1053   :  { %v3607_v35 = vadd.f32 %v14807_v55, %v14805_v56  ;;  %v14809_v38 = vpop.eup %14808 }
0x1054   :  { %v14811_v26 = vpop.eup %14810 }
0x1055   :  { %v3608_v12 = vadd.f32 %v14809_v38, %v3607_v35  ;;  %v14813_v59 = vpop.eup %14812  ;;  %v20230_v35 = vld [vmem:[#allocation242_spill] sm:$0xff] }
0x1056   :  { %v14815_v61 = vpop.eup %14814 }
0x1057   :  { %v3609_v32 = vadd.f32 %v14811_v26, %v3608_v12  ;;  %v14817_v44 = vpop.eup %14816  ;;  %v20232_v12 = vld [vmem:[#allocation244_spill] sm:$0xff] }
0x1058   :  { %v14819_v16 = vpop.eup %14818 }
0x1059   :  { %v3610_v27 = vadd.f32 %v14813_v59, %v3609_v32  ;;  %v20234_v32 = vld [vmem:[#allocation246_spill] sm:$0xff] }
0x105b   :  { %v3611_v28 = vadd.f32 %v14815_v61, %v3610_v27  ;;  %v20235_v27 = vld [vmem:[#allocation247_spill] sm:$0xff] }
0x105d   :  { %v3612_v7 = vadd.f32 %v14817_v44, %v3611_v28  ;;  %v20237_v28 = vld [vmem:[#allocation249_spill] sm:$0xff] }
0x105f   :  { %v3613_v0 = vadd.f32 %v14819_v16, %v3612_v7  ;;  %v20238_v7 = vld [vmem:[#allocation250_spill] sm:$0xff] }
0x1061   :  { %3614 = vadd.xlane.f32.xlu1 %v3613_v0  ;;  %v20240_v0 = vld [vmem:[#allocation252_spill] sm:$0xff] }
0x10ee   :  { %v3615_v13 = vpop.xlane.xlu1 %3614 }
0x10ef   :  { %14820 = vrcp.f32 %v3615_v13  ;;  %v20241_v13 = vld [vmem:[#allocation253_spill] sm:$0xff] }
0x10f9   :  { %v14821_v10 = vpop.eup %14820 }
0x10fa   :  { %v3618_v37 = vmul.f32 %v14821_v10, %v14807_v55  ;;  %v3620_v60 = vmul.f32 %v14821_v10, %v14811_v26  ;;  %v3617_v18 = vmul.f32 %v14821_v10, %v14805_v56  ;;  %v3619_v52 = vmul.f32 %v14821_v10, %v14809_v38  ;;  %v20228_v56 = vld [vmem:[#allocation240_spill] sm:$0xff]  ;;  %v20229_v55 = vld [vmem:[#allocation241_spill] sm:$0xff]  ;;  %v20231_v38 = vld [vmem:[#allocation243_spill] sm:$0xff] }
0x10fb   :  { %v3622_v58 = vmul.f32 %v14821_v10, %v14815_v61  ;;  %v3624_v6 = vmul.f32 %v14821_v10, %v14819_v16  ;;  %v20233_v26 = vld [vmem:[#allocation245_spill] sm:$0xff]  ;;  %v20236_v61 = vld [vmem:[#allocation248_spill] sm:$0xff]  ;;  %v20239_v16 = vld [vmem:[#allocation251_spill] sm:$0xff] }
0x10fc   :  { %3689 = vmatprep.mubr.f32.mxu1 %v3618_v37  ;;  %3759 = vmatprep.mubr.f32.mxu0 %v3620_v60  ;;  %v20242_v37 = vld [vmem:[#allocation254_spill] sm:$0xff]  ;;  %v20243_v60 = vld [vmem:[#allocation255_spill] sm:$0xff] }
0x10fd   :  { %3690 = vmatmul.mubr.f32.vlgmr.msra.gmra.mrb[26].mxu1 %v3617_v18  ;;  %3760 = vmatmul.mubr.f32.vlgmr.msra.gmra.mrb[28].mxu0 %v3619_v52  ;;  %v20244_v18 = vld [vmem:[#allocation256_spill] sm:$0xff]  ;;  %v20245_v52 = vld [vmem:[#allocation257_spill] sm:$0xff] }
0x10fe   :  { %12377 = vmatpush3.bf16.msra.mxu1 %v20223_v51  ;;  %12409 = vmatpush3.bf16.msra.mxu0 %v20224_v36 }
0x10ff   :  { %3829 = vmatprep.mubr.f32.mxu1 %v3622_v58  ;;  %3899 = vmatprep.mubr.f32.mxu0 %v3624_v6  ;;  %v20246_v58 = vld [vmem:[#allocation258_spill] sm:$0xff]  ;;  %v20247_v6 = vld [vmem:[#allocation259_spill] sm:$0xff] }
0x1100   :  { %12379 = vmatprep.subr.bf16.mxu1 %v20225_v39  ;;  %12411 = vmatprep.subr.bf16.mxu0 %v20226_v42 }
0x1102   :  { %12381 = vmatpush3.bf16.msra.mxu1 %v20227_v62  ;;  %12413 = vmatpush3.bf16.msra.mxu0 %v20228_v56 }
0x1103   :  { %12383 = vmatprep.subr.bf16.mxu1 %v20229_v55  ;;  %12415 = vmatprep.subr.bf16.mxu0 %v20230_v35 }
0x1106   :  { %12385 = vmatpush3.bf16.msra.mxu1 %v20231_v38  ;;  %12417 = vmatpush3.bf16.msra.mxu0 %v20232_v12 }
0x1107   :  { %12387 = vmatprep.subr.bf16.mxu1 %v20233_v26  ;;  %12419 = vmatprep.subr.bf16.mxu0 %v20234_v32  ;;  %v20286_v26 = vld [vmem:[#allocation297_spill] sm:$0xff] }
0x110a   :  { %12389 = vmatpush3.bf16.msra.mxu1 %v20235_v27  ;;  %12421 = vmatpush3.bf16.msra.mxu0 %v20236_v61  ;;  %v20253_v61 = vld [vmem:[#allocation265_spill] sm:$0xff] }
0x110b   :  { %12391 = vmatprep.subr.bf16.mxu1 %v20237_v28  ;;  %12423 = vmatprep.subr.bf16.mxu0 %v20238_v7  ;;  %v20248_v28 = vld [vmem:[#allocation260_spill] sm:$0xff]  ;;  %v20249_v7 = vld [vmem:[#allocation261_spill] sm:$0xff] }
0x110e   :  { %12393 = vmatpush3.bf16.msra.mxu1 %v20239_v16  ;;  %12425 = vmatpush3.bf16.msra.mxu0 %v20240_v0  ;;  %v20250_v16 = vld [vmem:[#allocation262_spill] sm:$0xff]  ;;  %v20251_v0 = vld [vmem:[#allocation263_spill] sm:$0xff] }
0x110f   :  { %12395 = vmatprep.subr.bf16.mxu1 %v20241_v13  ;;  %12427 = vmatprep.subr.bf16.mxu0 %v20242_v37  ;;  %v20252_v13 = vld [vmem:[#allocation264_spill] sm:$0xff]  ;;  %v3621_v37 = vmul.f32 %v14821_v10, %v14813_v59  ;;  %v20259_v59 = vld [vmem:[#allocation271_spill] sm:$0xff] }
0x1112   :  { %12397 = vmatpush3.bf16.msra.mxu1 %v20243_v60  ;;  %12429 = vmatpush3.bf16.msra.mxu0 %v20244_v18  ;;  %v3623_v60 = vmul.f32 %v14821_v10, %v14817_v44  ;;  %v20254_v18 = vld [vmem:[#allocation266_spill] sm:$0xff]  ;;  %v20260_v44 = vld [vmem:[#allocation272_spill] sm:$0xff]  ;;  %v20261_v10 = vld [vmem:[#allocation273_spill] sm:$0xff] }
0x1113   :  { %12399 = vmatprep.subr.bf16.mxu1 %v20245_v52  ;;  %12431 = vmatprep.subr.bf16.mxu0 %v20246_v58  ;;  %v20255_v58 = vld [vmem:[#allocation267_spill] sm:$0xff] }
0x1116   :  { %12401 = vmatpush3.bf16.msra.mxu1 %v20247_v6  ;;  %12433 = vmatpush3.bf16.msra.mxu0 %v20248_v28  ;;  %v20256_v6 = vld [vmem:[#allocation268_spill] sm:$0xff]  ;;  %v20257_v28 = vld [vmem:[#allocation269_spill] sm:$0xff] }
0x1117   :  { %12403 = vmatprep.subr.bf16.mxu1 %v20249_v7  ;;  %12435 = vmatprep.subr.bf16.mxu0 %v20250_v16  ;;  %v20258_v7 = vld [vmem:[#allocation270_spill] sm:$0xff] }
0x111a   :  { %12405 = vmatpush3.bf16.msra.mxu1 %v20251_v0  ;;  %12437 = vmatpush3.bf16.msra.mxu0 %v20252_v13 }
0x111b   :  { %12471 = vmatprep.subr.bf16.mxu1 %v20253_v61  ;;  %12439 = vmatprep.subr.bf16.mxu0 %v20254_v18  ;;  %v20268_v18 = vld [vmem:[#allocation280_spill] sm:$0xff]  ;;  %v20269_v61 = vld [vmem:[#allocation281_spill] sm:$0xff] }
0x111d   :  { %3830 = vmatmul.mubr.f32.vlgmr.msra.gmra.mrb[28].mxu1 %v3621_v37  ;;  %3900 = vmatmul.mubr.f32.vlgmr.msra.gmra.mrb[30].mxu0 %v3623_v60  ;;  %v20262_v37 = vld [vmem:[#allocation274_spill] sm:$0xff]  ;;  %v20263_v60 = vld [vmem:[#allocation275_spill] sm:$0xff] }
0x111e   :  { %12473 = vmatpush1.bf16.msra.mxu1 %v20255_v58  ;;  %12441 = vmatpush1.bf16.msra.mxu0 %v20256_v6  ;;  %v20264_v58 = vld [vmem:[#allocation276_spill] sm:$0xff]  ;;  %v20265_v6 = vld [vmem:[#allocation277_spill] sm:$0xff] }
0x111f   :  { %12475 = vmatprep.subr.bf16.mxu1 %v20257_v28  ;;  %12443 = vmatprep.subr.bf16.mxu0 %v20258_v7  ;;  %v20266_v28 = vld [vmem:[#allocation278_spill] sm:$0xff]  ;;  %v20267_v7 = vld [vmem:[#allocation279_spill] sm:$0xff] }
0x1120   :  { %3970 = vmatprep.mubr.f32.mxu0 %v19797_v50  ;;  %4041 = vmatprep.mubr.f32.mxu1 %v19797_v50 }
0x1122   :  { %12477 = vmatpush1.bf16.msra.mxu1 %v20259_v59  ;;  %12445 = vmatpush1.bf16.msra.mxu0 %v20260_v44  ;;  %v20270_v59 = vld [vmem:[#allocation282_spill] sm:$0xff]  ;;  %v20271_v44 = vld [vmem:[#allocation283_spill] sm:$0xff] }
0x1123   :  { %12479 = vmatprep.subr.bf16.mxu1 %v20261_v10  ;;  %12447 = vmatprep.subr.bf16.mxu0 %v20262_v37  ;;  %v20272_v10 = vld [vmem:[#allocation284_spill] sm:$0xff]  ;;  %v20273_v37 = vld [vmem:[#allocation285_spill] sm:$0xff] }
0x1126   :  { %12481 = vmatpush1.bf16.msra.mxu1 %v20263_v60  ;;  %12449 = vmatpush1.bf16.msra.mxu0 %v20264_v58  ;;  %v20274_v60 = vld [vmem:[#allocation286_spill] sm:$0xff]  ;;  %v20275_v58 = vld [vmem:[#allocation287_spill] sm:$0xff] }
0x1127   :  { %12483 = vmatprep.subr.bf16.mxu1 %v20265_v6  ;;  %12451 = vmatprep.subr.bf16.mxu0 %v20266_v28  ;;  %v20276_v6 = vld [vmem:[#allocation288_spill] sm:$0xff]  ;;  %v20277_v28 = vld [vmem:[#allocation289_spill] sm:$0xff] }
0x112a   :  { %12485 = vmatpush1.bf16.msra.mxu1 %v20267_v7  ;;  %12453 = vmatpush1.bf16.msra.mxu0 %v20268_v18  ;;  %v20278_v7 = vld [vmem:[#allocation290_spill] sm:$0xff]  ;;  %v20279_v18 = vld [vmem:[#allocation291_spill] sm:$0xff] }
0x112b   :  { %12487 = vmatprep.subr.bf16.mxu1 %v20269_v61  ;;  %12455 = vmatprep.subr.bf16.mxu0 %v20270_v59  ;;  %v20280_v61 = vld [vmem:[#allocation292_spill] sm:$0xff]  ;;  %v20281_v59 = vld [vmem:[#allocation293_spill] sm:$0xff] }
0x112e   :  { %12489 = vmatpush1.bf16.msra.mxu1 %v20271_v44  ;;  %12457 = vmatpush1.bf16.msra.mxu0 %v20272_v10  ;;  %v20282_v44 = vld [vmem:[#allocation294_spill] sm:$0xff]  ;;  %v20283_v10 = vld [vmem:[#allocation295_spill] sm:$0xff] }
0x112f   :  { %12491 = vmatprep.subr.bf16.mxu1 %v20273_v37  ;;  %12459 = vmatprep.subr.bf16.mxu0 %v20274_v60  ;;  %v20284_v37 = vld [vmem:[#allocation296_spill] sm:$0xff] }
0x1132   :  { %12493 = vmatpush1.bf16.msra.mxu1 %v20275_v58  ;;  %12461 = vmatpush1.bf16.msra.mxu0 %v20276_v6  ;;  %v20285_v58 = vld [vmem:[#allocation305_spill] sm:$0xff] }
0x1133   :  { %12495 = vmatprep.subr.bf16.mxu1 %v20277_v28  ;;  %12463 = vmatprep.subr.bf16.mxu0 %v20278_v7 }
0x1136   :  { %12497 = vmatpush1.bf16.msra.mxu1 %v20279_v18  ;;  %12465 = vmatpush1.bf16.msra.mxu0 %v20280_v61 }
0x1137   :  { %12499 = vmatprep.subr.bf16.mxu1 %v20281_v59  ;;  %12467 = vmatprep.subr.bf16.mxu0 %v20282_v44 }
0x113a   :  { %12501 = vmatpush1.bf16.msra.mxu1 %v20283_v10  ;;  %12469 = vmatpush1.bf16.msra.mxu0 %v20284_v37  ;;  %v14946_v37 = vld [vmem:[%s19969_s23] sm:$0xff] }
0x113b   :  { %12502 = vmatprep.subr.bf16.mxu1 %v19968_v24  ;;  %12527 = vmatprep.subr.bf16.mxu0 %v20285_v58 }
0x11d0   :  { %v10071_v6 = vpop.f32.mrb[26].mxu1  ;;  %v10106_v28 = vpop.f32.mrb[28].mxu0 }
0x11d1   :  { %v10072_v60 = vpop.f32.mrb[27].mxu1  ;;  %v10107_v7 = vpop.f32.mrb[29].mxu0 }
0x11d2   :  { %v10073_v13 = vadd.f32 %v10072_v60, %v10071_v6  ;;  %v10108_v18 = vadd.f32 %v10107_v7, %v10106_v28  ;;  %v20287_v28 = vld [vmem:[#allocation307_spill] sm:$0xff]  ;;  %v20291_v7 = vld [vmem:[#allocation313_spill] sm:$0xff] }
0x11d3   :  { %v20297_v6 = vld [vmem:[#allocation321_spill] sm:$0xff]  ;;  %v20302_v60 = vld [vmem:[#allocation327_spill] sm:$0xff] }
0x11d4   :  { %v3762_v0 = vadd.f32 %v10108_v18, %v10073_v13  ;;  %v20294_v13 = vld [vmem:[#allocation317_spill] sm:$0xff]  ;;  %v20295_v18 = vld [vmem:[#allocation300_spill] sm:$0xff] }
0x11f0   :  { %v10141_v61 = vpop.f32.mrb[28].mxu1  ;;  %v10176_v16 = vpop.f32.mrb[30].mxu0 }
0x11f1   :  { %v10142_v59 = vpop.f32.mrb[29].mxu1  ;;  %v10177_v52 = vpop.f32.mrb[31].mxu0 }
0x11f2   :  { %v10143_v44 = vadd.f32 %v10142_v59, %v10141_v61  ;;  %v10178_v27 = vadd.f32 %v10177_v52, %v10176_v16  ;;  %v20288_v61 = vld [vmem:[#allocation309_spill] sm:$0xff]  ;;  %v20292_v16 = vld [vmem:[#allocation299_spill] sm:$0xff] }
0x11f3   :  { %v20296_v52 = vld [vmem:[#allocation319_spill] sm:$0xff]  ;;  %v20298_v59 = vld [vmem:[#allocation301_spill] sm:$0xff] }
0x11f4   :  { %v3832_v10 = vadd.f32 %v10143_v44, %v3762_v0  ;;  %v20293_v0 = vld [vmem:[#allocation315_spill] sm:$0xff] }
0x11f5   :  { %v20299_v44 = vld [vmem:[#allocation323_spill] sm:$0xff] }
0x11f6   :  { %v3902_v32 = vadd.f32 %v10178_v27, %v3832_v10  ;;  %v20289_v27 = vld [vmem:[#allocation298_spill] sm:$0xff]  ;;  %v20300_v10 = vld [vmem:[#allocation325_spill] sm:$0xff] }
0x11f8   :  { %v3905_v58 = vadd.f32 %v14946_v37, %v3902_v32  ;;  %v20290_v32 = vld [vmem:[#allocation311_spill] sm:$0xff]  ;;  %v20301_v37 = vld [vmem:[#allocation302_spill] sm:$0xff] }
0x11fa   :  { %3971 = vmatmul.mubr.f32.vlgmr.msra.gmra.mrb[18].mxu0 %v3905_v58  ;;  %4042 = vmatmul.mubr.f32.vlgmr.msra.gmra.mrb[18].mxu1 %v3905_v58 }
0x11fb   :  { %12504 = vmatpush3.bf16.msra.mxu1 %v20286_v26  ;;  %10976 = vmatprep.mubr.msk.f32.mxu1 %vm15358_vm0, %v19797_v50 }
0x11fc   :  { %12505 = vmatprep.subr.bf16.mxu1 %v19968_v24  ;;  %12529 = vmatpush1.bf16.msra.mxu0 %v20287_v28 }
0x11fd   :  { %12531 = vmatprep.subr.bf16.mxu0 %v20288_v61  ;;  %4184 = vmatprep.mubr.f32.mxu0 %v19797_v50 }
0x11ff   :  { %12507 = vmatpush3.bf16.msra.mxu1 %v20289_v27 }
0x1200   :  { %12508 = vmatprep.subr.bf16.mxu1 %v19968_v24  ;;  %12533 = vmatpush1.bf16.msra.mxu0 %v20290_v32  ;;  %v20328_v32 = vld [vmem:[#allocation340_spill] sm:$0xff] }
0x1201   :  { %12535 = vmatprep.subr.bf16.mxu0 %v20291_v7 }
0x1203   :  { %12510 = vmatpush3.bf16.msra.mxu1 %v20292_v16  ;;  %v20327_v16 = vld [vmem:[#allocation339_spill] sm:$0xff] }
0x1204   :  { %12511 = vmatprep.subr.bf16.mxu1 %v19968_v24  ;;  %12537 = vmatpush1.bf16.msra.mxu0 %v20293_v0  ;;  %v20322_v0 = vld [vmem:[#allocation330_spill] sm:$0xff] }
0x1205   :  { %12539 = vmatprep.subr.bf16.mxu0 %v20294_v13  ;;  %v20304_v13 = vld [vmem:[#allocation303_spill] sm:$0xff] }
0x1207   :  { %12513 = vmatpush3.bf16.msra.mxu1 %v20295_v18  ;;  %v20303_v18 = vld [vmem:[#allocation329_spill] sm:$0xff] }
0x1208   :  { %12514 = vmatprep.subr.bf16.mxu1 %v19968_v24  ;;  %12541 = vmatpush1.bf16.msra.mxu0 %v20296_v52  ;;  %v20307_v52 = vld [vmem:[#allocation304_spill] sm:$0xff] }
0x1209   :  { %12543 = vmatprep.subr.bf16.mxu0 %v20297_v6  ;;  %v20305_v6 = vld [vmem:[#allocation331_spill] sm:$0xff] }
0x120b   :  { %12516 = vmatpush3.bf16.msra.mxu1 %v20298_v59  ;;  %v20306_v59 = vld [vmem:[#allocation333_spill] sm:$0xff] }
0x120c   :  { %12517 = vmatprep.subr.bf16.mxu1 %v19968_v24  ;;  %12545 = vmatpush1.bf16.msra.mxu0 %v20299_v44  ;;  %v20308_v44 = vld [vmem:[#allocation306_spill] sm:$0xff] }
0x120d   :  { %12547 = vmatprep.subr.bf16.mxu0 %v20300_v10  ;;  %v20309_v10 = vld [vmem:[#allocation335_spill] sm:$0xff] }
0x120f   :  { %12519 = vmatpush3.bf16.msra.mxu1 %v20301_v37  ;;  %v20310_v37 = vld [vmem:[#allocation337_spill] sm:$0xff] }
0x1210   :  { %12520 = vmatprep.subr.bf16.mxu1 %v19968_v24  ;;  %12549 = vmatpush1.bf16.msra.mxu0 %v20302_v60  ;;  %v20311_v60 = vld [vmem:[#allocation308_spill] sm:$0xff] }
0x1211   :  { %12551 = vmatprep.subr.bf16.mxu0 %v20303_v18  ;;  %v20313_v18 = vld [vmem:[#allocation312_spill] sm:$0xff] }
0x1213   :  { %12522 = vmatpush3.bf16.msra.mxu1 %v20304_v13  ;;  %v20312_v13 = vld [vmem:[#allocation310_spill] sm:$0xff] }
0x1214   :  { %12523 = vmatprep.subr.bf16.mxu1 %v19968_v24  ;;  %12553 = vmatpush1.bf16.msra.mxu0 %v20305_v6  ;;  %v20314_v6 = vld [vmem:[#allocation314_spill] sm:$0xff] }
0x1215   :  { %12555 = vmatprep.subr.bf16.mxu0 %v20306_v59  ;;  %v20315_v59 = vld [vmem:[#allocation316_spill] sm:$0xff] }
0x1217   :  { %12525 = vmatpush3.bf16.msra.mxu1 %v20307_v52  ;;  %v20316_v52 = vld [vmem:[#allocation318_spill] sm:$0xff] }
0x1218   :  { %12559 = vmatprep.subr.bf16.mxu1 %v20308_v44  ;;  %12557 = vmatpush1.bf16.msra.mxu0 %v20309_v10  ;;  %v20317_v44 = vld [vmem:[#allocation320_spill] sm:$0xff]  ;;  %v20318_v10 = vld [vmem:[#allocation322_spill] sm:$0xff] }
0x1219   :  { %12591 = vmatprep.subr.bf16.mxu0 %v20310_v37  ;;  %v20319_v37 = vld [vmem:[#allocation324_spill] sm:$0xff] }
0x121a   :  { %10977 = vmatmul.mubr.f32.vlgmr.msra.gmra.mrb[30].mxu1 %v3905_v58  ;;  %v20320_v58 = vld [vmem:[#allocation326_spill] sm:$0xff] }
0x121b   :  { %12561 = vmatpush1.bf16.msra.mxu1 %v20311_v60  ;;  %4255 = vmatprep.mubr.f32.mxu1 %v19797_v50  ;;  %v20321_v60 = vld [vmem:[#allocation328_spill] sm:$0xff] }
0x121c   :  { %12563 = vmatprep.subr.bf16.mxu1 %v20312_v13  ;;  %v20323_v13 = vld [vmem:[#allocation332_spill] sm:$0xff] }
0x121f   :  { %12565 = vmatpush1.bf16.msra.mxu1 %v20313_v18  ;;  %v20324_v18 = vld [vmem:[#allocation334_spill] sm:$0xff] }
0x1220   :  { %12567 = vmatprep.subr.bf16.mxu1 %v20314_v6  ;;  %v20325_v6 = vld [vmem:[#allocation336_spill] sm:$0xff] }
0x1223   :  { %12569 = vmatpush1.bf16.msra.mxu1 %v20315_v59  ;;  %v20326_v59 = vld [vmem:[#allocation338_spill] sm:$0xff] }
0x1224   :  { %12571 = vmatprep.subr.bf16.mxu1 %v20316_v52 }
0x1227   :  { %12573 = vmatpush1.bf16.msra.mxu1 %v20317_v44 }
0x1228   :  { %12575 = vmatprep.subr.bf16.mxu1 %v20318_v10 }
0x122b   :  { %12577 = vmatpush1.bf16.msra.mxu1 %v20319_v37 }
0x122c   :  { %12579 = vmatprep.subr.bf16.mxu1 %v20320_v58 }
0x122f   :  { %12581 = vmatpush1.bf16.msra.mxu1 %v20321_v60 }
0x1230   :  { %12583 = vmatprep.subr.bf16.mxu1 %v20322_v0  ;;  %v20329_v0 = vld [vmem:[#allocation341_spill] sm:$0xff] }
0x1233   :  { %12585 = vmatpush1.bf16.msra.mxu1 %v20323_v13 }
0x1234   :  { %12587 = vmatprep.subr.bf16.mxu1 %v20324_v18 }
0x1237   :  { %12589 = vmatpush1.bf16.msra.mxu1 %v20325_v6 }
0x1238   :  { %12623 = vmatprep.subr.bf16.mxu1 %v20326_v59 }
0x12cd   :  { %v3972_v52 = vpop.f32.mrb[18].mxu0  ;;  %v4043_v44 = vpop.f32.mrb[18].mxu1 }
0x12ce   :  { %v4478_v10 = vadd.f32 %v3972_v52, %v20327_v16  ;;  %v3974_v7 = vpop.f32.mrb[19].mxu0  ;;  %v4045_v37 = vpop.f32.mrb[19].mxu1  ;;  %v4480_v13 = vadd.f32 %v4043_v44, %v20329_v0  ;;  %v20340_v44 = vld [vmem:[#allocation355_spill] sm:$0xff] }
0x12cf   :  { %v4479_v58 = vadd.f32 %v3974_v7, %v20328_v32 }
0x12d0   :  { %v9793_v27 = vmul.f32 -1.442695, %v4478_v10 }
0x12d1   :  { %v9794_v60 = vmul.f32 -1.442695, %v4479_v58  ;;  %v20341_v58 = vld [vmem:[#allocation356_spill] sm:$0xff] }
0x12d2   :  { %14822 = vpow2.f32 %v9793_v27 }
0x12d3   :  { %14824 = vpow2.f32 %v9794_v60 }
0x12d4   :  { %14826 = vtanh.f32 %v4480_v13 }
0x12dc   :  { %v14823_v61 = vpop.eup %14822 }
0x12dd   :  { %v14825_v18 = vpop.eup %14824  ;;  %v4485_v28 = vadd.f32 1.0, %v14823_v61  ;;  %v14947_v61 = vld [vmem:[%s18972_s18] ss:$0 sm:$0xff] }
0x12de   :  { %v4491_v6 = vadd.f32 1.0, %v14825_v18  ;;  %v14827_v59 = vpop.eup %14826  ;;  %v20337_v18 = vld [vmem:[#allocation352_spill] sm:$0xff] }
0x12df   :  { %14828 = vrcp.f32 %v4485_v28  ;;  %v20335_v28 = vld [vmem:[#allocation350_spill] sm:$0xff] }
0x12e0   :  { %14830 = vrcp.f32 %v4491_v6  ;;  %v20338_v6 = vld [vmem:[#allocation353_spill] sm:$0xff] }
0x12e9   :  { %v14829_v26 = vpop.eup %14828 }
0x12ea   :  { %v14831_v52 = vpop.eup %14830  ;;  %v4502_v16 = vmul.f32 %v14829_v26, %v14827_v59  ;;  %v20334_v26 = vld [vmem:[#allocation349_spill] sm:$0xff]  ;;  %v20339_v59 = vld [vmem:[#allocation354_spill] sm:$0xff] }
0x12eb   :  { %v4501_v12 = vmul.f32 %v14831_v52, %v16749_v19  ;;  %v20331_v19 = vld [vmem:[#allocation346_spill] sm:$0xff] }
0x12ec   :  { %v20342_v52 = vld [vmem:[#allocation358_spill] sm:$0xff] }
0x12ed   :  { %v17259_v7 = vadd.f32 %v4502_v16, %v4501_v12  ;;  %v4114_v10 = vpop.f32.mrb[30].mxu1  ;;  %v20333_v12 = vld [vmem:[#allocation348_spill] sm:$0xff]  ;;  %v20336_v16 = vld [vmem:[#allocation351_spill] sm:$0xff] }
0x12ee   :  { %v4118_v27 = vadd.f32 %v4114_v10, %v17066_v11  ;;  %v10978_v60 = vpop.f32.mrb[31].mxu1  ;;  %v20332_v11 = vld [vmem:[#allocation347_spill] sm:$0xff] }
0x12ef   :  { %v20343_v10 = vld [vmem:[#allocation359_spill] sm:$0xff]  ;;  %v20345_v60 = vld [vmem:[#allocation362_spill] sm:$0xff] }
0x12f0   :  { %v17265_v13 = vadd.f32 %v14947_v61, %v4118_v27  ;;  %v20344_v27 = vld [vmem:[#allocation360_spill] sm:$0xff]  ;;  %v20346_v61 = vld [vmem:[#allocation363_spill] sm:$0xff] }
0x12f2   :  { %20330 = vst [vmem:[#allocation235_spill] sm:$0xff] %v17265_v13  ;;  %4185 = vmatmul.mubr.f32.vlgmr.msra.gmra.mrb[32].mxu0 %v17265_v13  ;;  %4256 = vmatmul.mubr.f32.vlgmr.msra.gmra.mrb[32].mxu1 %v17265_v13 }
0x12f3   :  { %12593 = vmatpush1.bf16.msra.mxu0 %v16752_v43  ;;  %12625 = vmatpush1.bf16.msra.mxu1 %v16754_v63 }
0x12f4   :  { %12595 = vmatprep.subr.bf16.mxu0 %v16758_v45  ;;  %12627 = vmatprep.subr.bf16.mxu1 %v20331_v19 }
0x12f5   :  { %4326 = vmatprep.mubr.f32.mxu0 %v19797_v50  ;;  %4397 = vmatprep.mubr.f32.mxu1 %v19797_v50 }
0x12f7   :  { %12597 = vmatpush1.bf16.msra.mxu0 %v20332_v11  ;;  %12629 = vmatpush1.bf16.msra.mxu1 %v20333_v12 }
0x12f8   :  { %12599 = vmatprep.subr.bf16.mxu0 %v20334_v26  ;;  %12631 = vmatprep.subr.bf16.mxu1 %v20335_v28 }
0x12fb   :  { %12601 = vmatpush1.bf16.msra.mxu0 %v20336_v16  ;;  %12633 = vmatpush1.bf16.msra.mxu1 %v20337_v18 }
0x12fc   :  { %12603 = vmatprep.subr.bf16.mxu0 %v20338_v6  ;;  %12635 = vmatprep.subr.bf16.mxu1 %v20339_v59 }
0x12ff   :  { %12605 = vmatpush1.bf16.msra.mxu0 %v20340_v44  ;;  %12637 = vmatpush1.bf16.msra.mxu1 %v20341_v58 }
0x1300   :  { %12607 = vmatprep.subr.bf16.mxu0 %v16798_v41  ;;  %12639 = vmatprep.subr.bf16.mxu1 %v20342_v52 }
0x1303   :  { %12609 = vmatpush1.bf16.msra.mxu0 %v20343_v10  ;;  %12641 = vmatpush1.bf16.msra.mxu1 %v20344_v27  ;;  %v4481_v10 = vadd.f32 %v4045_v37, %v16834_v57 }
0x1304   :  { %12611 = vmatprep.subr.bf16.mxu0 %v16810_v47  ;;  %12643 = vmatprep.subr.bf16.mxu1 %v20345_v60 }
0x1307   :  { %12613 = vmatpush1.bf16.msra.mxu0 %v20346_v61  ;;  %12645 = vmatpush1.bf16.msra.mxu1 %v16818_v33  ;;  %v9795_v61 = vmul.f32 -1.442695, %v4481_v10  ;;  %v20347_v10 = vld [vmem:[#allocation63_spill] sm:$0xff] }
0x1308   :  { %12615 = vmatprep.subr.bf16.mxu0 %v16823_v40  ;;  %12647 = vmatprep.subr.bf16.mxu1 %v16825_v2 }
0x1309   :  { %14832 = vpow2.f32 %v9795_v61 }
0x130a   :  { %14834 = vtanh.f32 %v17259_v7 }
0x130b   :  { %12617 = vmatpush1.bf16.msra.mxu0 %v16829_v25  ;;  %12649 = vmatpush1.bf16.msra.mxu1 %v16831_v34 }
0x130c   :  { %12619 = vmatprep.subr.bf16.mxu0 %v16838_v5  ;;  %12651 = vmatprep.subr.bf16.mxu1 %v16840_v49  ;;  %v14958_v49 = vld [vmem:[#allocation15 + $0x38] sm:$0xff] }
0x130f   :  { %12621 = vmatpush1.bf16.msra.mxu0 %v16844_v46  ;;  %12653 = vmatpush1.bf16.msra.mxu1 %v16846_v17  ;;  %v14957_v17 = vld [vmem:[#allocation15 + $0x28] sm:$0xff] }
0x1310   :  { %12655 = vmatprep.subr.bf16.mxu0 %v15655_v4  ;;  %12687 = vmatprep.subr.bf16.mxu1 %v15686_v48  ;;  %v14955_v48 = vld [vmem:[#allocation15 + $0x8] sm:$0xff]  ;;  %v14956_v4 = vld [vmem:[#allocation15 + $0x18] sm:$0xff] }
0x1312   :  { %4327 = vmatmul.mubr.f32.vlgmr.msra.gmra.mrb[34].mxu0 %v17265_v13  ;;  %4398 = vmatmul.mubr.f32.vlgmr.msra.gmra.mrb[34].mxu1 %v17265_v13  ;;  %v20348_v13 = vld [vmem:[#allocation48_spill] sm:$0xff] }
0x1313   :  { %12657 = vmatpush1.bf16.msra.mxu0 %v15657_v8  ;;  %12689 = vmatpush1.bf16.msra.mxu1 %v15691_v53  ;;  %v14833_v37 = vpop.eup %14832  ;;  %v14954_v53 = vld [vmem:[#allocation15 + $0x30] sm:$0xff] }
0x1314   :  { %12659 = vmatprep.subr.bf16.mxu0 %v15659_v9  ;;  %12691 = vmatprep.subr.bf16.mxu1 %v15693_v54  ;;  %v4498_v61 = vadd.f32 1.0, %v14833_v37  ;;  %v20356_v37 = vld [vmem:[#allocation57_spill] sm:$0xff] }
0x1315   :  { %4570 = vmatprep.mubr.f32.mxu0 %v19797_v50  ;;  %4641 = vmatprep.mubr.f32.mxu1 %v19797_v50  ;;  %v14953_v9 = vld [vmem:[#allocation15 + $0x20] sm:$0xff] }
0x1316   :  { %14836 = vrcp.f32 %v4498_v61  ;;  %v20361_v61 = vld [vmem:[#allocation70_spill] sm:$0xff] }
0x1317   :  { %12661 = vmatpush1.bf16.msra.mxu0 %v15663_v14  ;;  %12693 = vmatpush1.bf16.msra.mxu1 %v15700_v1 }
0x1318   :  { %12663 = vmatprep.subr.bf16.mxu0 %v15666_v15  ;;  %12695 = vmatprep.subr.bf16.mxu1 %v15703_v3  ;;  %v20349_v3 = vld [vmem:[#allocation64_spill] sm:$0xff] }
0x131b   :  { %12665 = vmatpush1.bf16.msra.mxu0 %v15669_v20  ;;  %12697 = vmatpush1.bf16.msra.mxu1 %v15712_v22  ;;  %v20350_v22 = vld [vmem:[#allocation49_spill] sm:$0xff] }
0x131c   :  { %12667 = vmatprep.subr.bf16.mxu0 %v15672_v21  ;;  %12699 = vmatprep.subr.bf16.mxu1 %v15715_v23  ;;  %v20351_v21 = vld [vmem:[#allocation65_spill] sm:$0xff]  ;;  %v20352_v23 = vld [vmem:[#allocation51_spill] sm:$0xff] }
0x131f   :  { %12669 = vmatpush1.bf16.msra.mxu0 %v15675_v29  ;;  %12701 = vmatpush1.bf16.msra.mxu1 %v15722_v30  ;;  %v20353_v29 = vld [vmem:[#allocation66_spill] sm:$0xff] }
0x1320   :  { %12671 = vmatprep.subr.bf16.mxu0 %v15678_v31  ;;  %12703 = vmatprep.subr.bf16.mxu1 %v20347_v10  ;;  %v20354_v30 = vld [vmem:[#allocation54_spill] sm:$0xff]  ;;  %v20355_v31 = vld [vmem:[#allocation67_spill] sm:$0xff]  ;;  %v20359_v10 = vld [vmem:[#allocation69_spill] sm:$0xff] }
0x1323   :  { %12673 = vmatpush1.bf16.msra.mxu0 %v20348_v13  ;;  %12705 = vmatpush1.bf16.msra.mxu1 %v20349_v3  ;;  %v20357_v13 = vld [vmem:[#allocation68_spill] sm:$0xff]  ;;  %v20358_v3 = vld [vmem:[#allocation58_spill] sm:$0xff] }
0x1324   :  { %12675 = vmatprep.subr.bf16.mxu0 %v20350_v22  ;;  %12707 = vmatprep.subr.bf16.mxu1 %v20351_v21  ;;  %v14835_v22 = vpop.eup %14834  ;;  %v20360_v21 = vld [vmem:[#allocation61_spill] sm:$0xff] }
0x1325   :  { %v14837_v20 = vpop.eup %14836 }
0x1327   :  { %12677 = vmatpush1.bf16.msra.mxu0 %v20352_v23  ;;  %12709 = vmatpush1.bf16.msra.mxu1 %v20353_v29  ;;  %v4505_v23 = vmul.f32 %v14837_v20, %v14835_v22  ;;  %v20364_v20 = vld [vmem:[#allocation73_spill] sm:$0xff]  ;;  %v20365_v22 = vld [vmem:[#allocation74_spill] sm:$0xff]  ;;  %v20410_v29 = vld [vmem:[#allocation103_spill] sm:$0xff] }
0x1328   :  { %12679 = vmatprep.subr.bf16.mxu0 %v20354_v30  ;;  %12711 = vmatprep.subr.bf16.mxu1 %v20355_v31  ;;  %v20384_v31 = vld [vmem:[#allocation97_spill] sm:$0xff]  ;;  %v20391_v30 = vld [vmem:[#allocation112_spill] sm:$0xff] }
0x132b   :  { %12681 = vmatpush1.bf16.msra.mxu0 %v20356_v37  ;;  %12713 = vmatpush1.bf16.msra.mxu1 %v20357_v13  ;;  %v20362_v37 = vld [vmem:[#allocation71_spill] sm:$0xff]  ;;  %v20382_v13 = vld [vmem:[#allocation93_spill] sm:$0xff] }
0x132c   :  { %12683 = vmatprep.subr.bf16.mxu0 %v20358_v3  ;;  %12715 = vmatprep.subr.bf16.mxu1 %v20359_v10  ;;  %v20363_v10 = vld [vmem:[#allocation72_spill] sm:$0xff] }
0x132d   :  { %v20378_v3 = vld [vmem:[#allocation88_spill] sm:$0xff] }
0x132f   :  { %12685 = vmatpush1.bf16.msra.mxu0 %v20360_v21  ;;  %12717 = vmatpush1.bf16.msra.mxu1 %v20361_v61  ;;  %v20367_v61 = vld [vmem:[#allocation76_spill] sm:$0xff]  ;;  %v20369_v21 = vld [vmem:[#allocation78_spill] sm:$0xff] }
0x1330   :  { %12718 = vmatprep.subr.bf16.mxu0 %v19968_v24  ;;  %12742 = vmatprep.subr.bf16.mxu1 %v19968_v24 }
0x1332   :  { %4571 = vmatmul.mubr.f32.vlgmr.msra.gmra.mrb[36].mxu0 %v4505_v23  ;;  %4642 = vmatmul.mubr.f32.vlgmr.msra.gmra.mrb[36].mxu1 %v4505_v23 }
0x1333   :  { %12720 = vmatpush3.bf16.msra.mxu0 %v20362_v37  ;;  %11011 = vmatprep.mubr.msk.f32.mxu0 %vm15358_vm0, %v19797_v50  ;;  %v20366_v37 = vld [vmem:[#allocation75_spill] sm:$0xff] }
0x1334   :  { %12721 = vmatprep.subr.bf16.mxu0 %v19968_v24  ;;  %12744 = vmatpush3.bf16.msra.mxu1 %v20363_v10  ;;  %v20368_v10 = vld [vmem:[#allocation77_spill] sm:$0xff] }
0x1335   :  { %12745 = vmatprep.subr.bf16.mxu1 %v19968_v24  ;;  %11046 = vmatprep.mubr.msk.f32.mxu1 %vm15358_vm0, %v19797_v50 }
0x1337   :  { %12723 = vmatpush3.bf16.msra.mxu0 %v20364_v20  ;;  %v20370_v20 = vld [vmem:[#allocation79_spill] sm:$0xff] }
0x1338   :  { %12724 = vmatprep.subr.bf16.mxu0 %v19968_v24  ;;  %12747 = vmatpush3.bf16.msra.mxu1 %v20365_v22  ;;  %v20371_v22 = vld [vmem:[#allocation80_spill] sm:$0xff] }
0x1339   :  { %12748 = vmatprep.subr.bf16.mxu1 %v19968_v24 }
0x133b   :  { %12726 = vmatpush3.bf16.msra.mxu0 %v20366_v37  ;;  %v20372_v37 = vld [vmem:[#allocation81_spill] sm:$0xff] }
0x133c   :  { %12727 = vmatprep.subr.bf16.mxu0 %v19968_v24  ;;  %12750 = vmatpush3.bf16.msra.mxu1 %v20367_v61  ;;  %v20373_v61 = vld [vmem:[#allocation82_spill] sm:$0xff] }
0x133d   :  { %12751 = vmatprep.subr.bf16.mxu1 %v19968_v24 }
0x133f   :  { %12729 = vmatpush3.bf16.msra.mxu0 %v20368_v10  ;;  %v20374_v10 = vld [vmem:[#allocation83_spill] sm:$0xff] }
0x1340   :  { %12730 = vmatprep.subr.bf16.mxu0 %v19968_v24  ;;  %12753 = vmatpush3.bf16.msra.mxu1 %v20369_v21  ;;  %v20375_v21 = vld [vmem:[#allocation84_spill] sm:$0xff] }
0x1341   :  { %12754 = vmatprep.subr.bf16.mxu1 %v19968_v24 }
0x1343   :  { %12732 = vmatpush3.bf16.msra.mxu0 %v20370_v20  ;;  %v20376_v20 = vld [vmem:[#allocation85_spill] sm:$0xff] }
0x1344   :  { %12733 = vmatprep.subr.bf16.mxu0 %v19968_v24  ;;  %12756 = vmatpush3.bf16.msra.mxu1 %v20371_v22  ;;  %v20377_v22 = vld [vmem:[#allocation86_spill] sm:$0xff] }
0x1345   :  { %12757 = vmatprep.subr.bf16.mxu1 %v19968_v24 }
0x1347   :  { %12735 = vmatpush3.bf16.msra.mxu0 %v20372_v37  ;;  %v20379_v37 = vld [vmem:[#allocation90_spill] sm:$0xff] }
0x1348   :  { %12736 = vmatprep.subr.bf16.mxu0 %v19968_v24  ;;  %12759 = vmatpush3.bf16.msra.mxu1 %v20373_v61  ;;  %v20380_v61 = vld [vmem:[#allocation89_spill] sm:$0xff] }
0x1349   :  { %12760 = vmatprep.subr.bf16.mxu1 %v19968_v24 }
0x134b   :  { %12738 = vmatpush3.bf16.msra.mxu0 %v20374_v10  ;;  %v20381_v10 = vld [vmem:[#allocation92_spill] sm:$0xff] }
0x134c   :  { %12739 = vmatprep.subr.bf16.mxu0 %v19968_v24  ;;  %12762 = vmatpush3.bf16.msra.mxu1 %v20375_v21  ;;  %v20383_v21 = vld [vmem:[#allocation96_spill] sm:$0xff] }
0x134d   :  { %12763 = vmatprep.subr.bf16.mxu1 %v19968_v24 }
0x134f   :  { %12741 = vmatpush3.bf16.msra.mxu0 %v20376_v20  ;;  %v20385_v20 = vld [vmem:[#allocation100_spill] sm:$0xff] }
0x1350   :  { %12765 = vmatpush3.bf16.msra.mxu1 %v20377_v22  ;;  %12767 = vmatprep.subr.bf16.mxu0 %v20378_v3  ;;  %v20386_v22 = vld [vmem:[#allocation102_spill] sm:$0xff]  ;;  %v20387_v3 = vld [vmem:[#allocation104_spill] sm:$0xff] }
0x1351   :  { %12799 = vmatprep.subr.bf16.mxu1 %v20379_v37  ;;  %v20388_v37 = vld [vmem:[#allocation106_spill] sm:$0xff] }
0x1352   :  { %11012 = vmatmul.mubr.f32.vlgmr.msra.gmra.mrb[38].mxu0 %v4505_v23  ;;  %v20389_v23 = vld [vmem:[#allocation108_spill] sm:$0xff] }
0x1353   :  { %12769 = vmatpush1.bf16.msra.mxu0 %v20380_v61  ;;  %4883 = vmatprep.mubr.f32.mxu0 %v19797_v50  ;;  %v20390_v61 = vld [vmem:[#allocation110_spill] sm:$0xff] }
0x1354   :  { %12771 = vmatprep.subr.bf16.mxu0 %v20381_v10  ;;  %v20392_v10 = vld [vmem:[#allocation114_spill] sm:$0xff] }
0x1357   :  { %12773 = vmatpush1.bf16.msra.mxu0 %v20382_v13  ;;  %v20393_v13 = vld [vmem:[#allocation116_spill] sm:$0xff] }
0x1358   :  { %12775 = vmatprep.subr.bf16.mxu0 %v20383_v21  ;;  %v20394_v21 = vld [vmem:[#allocation117_spill] sm:$0xff] }
0x135b   :  { %12777 = vmatpush1.bf16.msra.mxu0 %v20384_v31  ;;  %v20395_v31 = vld [vmem:[#allocation120_spill] sm:$0xff] }
0x135c   :  { %12779 = vmatprep.subr.bf16.mxu0 %v20385_v20 }
0x135f   :  { %12781 = vmatpush1.bf16.msra.mxu0 %v20386_v22 }
0x1360   :  { %12783 = vmatprep.subr.bf16.mxu0 %v20387_v3 }
0x1363   :  { %12785 = vmatpush1.bf16.msra.mxu0 %v20388_v37 }
0x1364   :  { %12787 = vmatprep.subr.bf16.mxu0 %v20389_v23 }
0x1367   :  { %12789 = vmatpush1.bf16.msra.mxu0 %v20390_v61 }
0x1368   :  { %12791 = vmatprep.subr.bf16.mxu0 %v20391_v30 }
0x136b   :  { %12793 = vmatpush1.bf16.msra.mxu0 %v20392_v10 }
0x136c   :  { %12795 = vmatprep.subr.bf16.mxu0 %v20393_v13 }
0x136f   :  { %12797 = vmatpush1.bf16.msra.mxu0 %v20394_v21 }
0x1370   :  { %12831 = vmatprep.subr.bf16.mxu0 %v20395_v31  ;;  %v14948_v31 = vld [vmem:[%s18966_s12] ss:$0 sm:$0xff] }
0x13c5   :  { %v17394_v20 = vpop.f32.mrb[32].mxu0  ;;  %v17396_v22 = vpop.f32.mrb[32].mxu1 }
0x13c6   :  { %20396 = vst [vmem:[#allocation236_spill] sm:$0xff] %v17394_v20  ;;  %20397 = vst [vmem:[#allocation237_spill] sm:$0xff] %v17396_v22  ;;  %v17398_v3 = vpop.f32.mrb[33].mxu0  ;;  %v17400_v37 = vpop.f32.mrb[33].mxu1 }
0x13c7   :  { %20398 = vst [vmem:[#allocation238_spill] sm:$0xff] %v17398_v3  ;;  %20399 = vst [vmem:[#allocation239_spill] sm:$0xff] %v17400_v37  ;;  %v20404_v3 = vld [vmem:[#allocation91_spill] sm:$0xff]  ;;  %v20409_v37 = vld [vmem:[#allocation101_spill] sm:$0xff] }
0x13e5   :  { %v17402_v23 = vpop.f32.mrb[34].mxu0  ;;  %v17404_v61 = vpop.f32.mrb[34].mxu1 }
0x13e6   :  { %20400 = vst [vmem:[#allocation240_spill] sm:$0xff] %v17402_v23  ;;  %20401 = vst [vmem:[#allocation241_spill] sm:$0xff] %v17404_v61  ;;  %v17406_v30 = vpop.f32.mrb[35].mxu0  ;;  %v17408_v10 = vpop.f32.mrb[35].mxu1  ;;  %v20405_v23 = vld [vmem:[#allocation94_spill] sm:$0xff]  ;;  %v20406_v61 = vld [vmem:[#allocation95_spill] sm:$0xff] }
0x13e7   :  { %20402 = vst [vmem:[#allocation242_spill] sm:$0xff] %v17406_v30  ;;  %20403 = vst [vmem:[#allocation243_spill] sm:$0xff] %v17408_v10  ;;  %v20407_v30 = vld [vmem:[#allocation98_spill] sm:$0xff]  ;;  %v20408_v10 = vld [vmem:[#allocation99_spill] sm:$0xff] }
0x1425   :  { %v4714_v13 = vpop.f32.mrb[38].mxu0 }
0x1426   :  { %v4718_v20 = vadd.f32 %v14948_v31, %v4714_v13  ;;  %v11013_v21 = vpop.f32.mrb[39].mxu0  ;;  %v20411_v31 = vld [vmem:[#allocation105_spill] sm:$0xff] }
0x1427   :  { %v20412_v21 = vld [vmem:[#allocation107_spill] sm:$0xff]  ;;  %v20413_v13 = vld [vmem:[#allocation109_spill] sm:$0xff] }
0x1428   :  { %v4719_v22 = vmax.f32 %v4718_v20, 0.0  ;;  %v20414_v20 = vld [vmem:[#allocation111_spill] sm:$0xff] }
0x142a   :  { %11047 = vmatmul.mubr.f32.vlgmr.msra.gmra.mrb[38].mxu1 %v4719_v22  ;;  %v20415_v22 = vld [vmem:[#allocation113_spill] sm:$0xff] }
0x142b   :  { %12801 = vmatpush1.bf16.msra.mxu1 %v20404_v3  ;;  %4954 = vmatprep.mubr.f32.mxu1 %v19797_v50 }
0x142c   :  { %12803 = vmatprep.subr.bf16.mxu1 %v20405_v23  ;;  %v20416_v23 = vld [vmem:[#allocation115_spill] sm:$0xff] }
0x142f   :  { %12805 = vmatpush1.bf16.msra.mxu1 %v20406_v61  ;;  %v20417_v61 = vld [vmem:[#allocation118_spill] sm:$0xff] }
0x1430   :  { %12807 = vmatprep.subr.bf16.mxu1 %v20407_v30  ;;  %v20418_v30 = vld [vmem:[#allocation119_spill] sm:$0xff] }
0x1433   :  { %12809 = vmatpush1.bf16.msra.mxu1 %v20408_v10  ;;  %v20419_v10 = vld [vmem:[#allocation121_spill] sm:$0xff] }
0x1434   :  { %12811 = vmatprep.subr.bf16.mxu1 %v20409_v37 }
0x1437   :  { %12813 = vmatpush1.bf16.msra.mxu1 %v20410_v29  ;;  %v20420_v29 = vld [vmem:[#allocation87_spill] sm:$0xff] }
0x1438   :  { %12815 = vmatprep.subr.bf16.mxu1 %v20411_v31  ;;  %v9789_v31 = vsel %vm3069_vm9, 1.0, %v19797_v50 }
0x1439   :  { %vm3072_vm10 = vcmp.gt.f32.partialorder %v9789_v31, 0.0 }
0x143a   :  { %vm3073_vm11 = vmand %vm3072_vm10, %vm946_vm4 }
0x143b   :  { %12817 = vmatpush1.bf16.msra.mxu1 %v20412_v21 }
0x143c   :  { %12819 = vmatprep.subr.bf16.mxu1 %v20413_v13  ;;  %v20422_v13 = vld [vmem:[#allocation122_spill] sm:$0xff] }
0x143f   :  { %12821 = vmatpush1.bf16.msra.mxu1 %v20414_v20 }
0x1440   :  { %12823 = vmatprep.subr.bf16.mxu1 %v20415_v22 }
0x1443   :  { %12825 = vmatpush1.bf16.msra.mxu1 %v20416_v23  ;;  %v14949_v23 = vld [vmem:[%s18968_s14] ss:$0 sm:$0xff] }
0x1444   :  { %12827 = vmatprep.subr.bf16.mxu1 %v20417_v61 }
0x1447   :  { %12829 = vmatpush1.bf16.msra.mxu1 %v20418_v30  ;;  %v17440_v30 = vsel %vm3073_vm11, -10000000.0, %v20422_v13 }
0x1448   :  { %12863 = vmatprep.subr.bf16.mxu1 %v20419_v10  ;;  %20423 = vst [vmem:[#allocation340_spill] sm:$0xff] %v17440_v30 }
0x14fd   :  { %v4787_v20 = vpop.f32.mrb[38].mxu1 }
0x14fe   :  { %v4788_v22 = vadd.f32 %v14949_v23, %v4787_v20  ;;  %v11048_v61 = vpop.f32.mrb[39].mxu1 }
0x1500   :  { %v4791_v10 = vadd.f32 %v4788_v22, %v17440_v30 }
0x1502   :  { %4793 = vst [vmem:[#allocation27 + $0x10] sm:$0xff] %v4791_v10  ;;  %4794 = vmax.xlane.f32.xlu0 %v4791_v10 }
0x158f   :  { %v4795_v37 = vpop.xlane.xlu0 %4794 }
0x1590   :  { %vm4796_vm12 = vcmp.eq.f32.partialorder %v4791_v10, %v4795_v37  ;;  %v20425_v10 = vmov 1.0   ;;  %v20432_v37 = vld [vmem:[#allocation129_spill] sm:$0xff] }
0x1591   :  { %v4797_v31 = vsel %vm4796_vm12, %v20420_v29, 128 }
0x1592   :  { %v4799_v21 = vshra.s32 %v4797_v31, 16  ;;  %v4798_v15 = vand.u32 65535, %v4797_v31  ;;  %v20433_v31 = vld [vmem:[#allocation130_spill] sm:$0xff] }
0x1594   :  { %v4801_v3 = vcvt.s32.f32 %v4799_v21  ;;  %v4800_v14 = vcvt.s32.f32 %v4798_v15  ;;  %v20427_v15 = vld [vmem:[#allocation124_spill] sm:$0xff] }
0x1595   :  { %v20431_v21 = vld [vmem:[#allocation128_spill] sm:$0xff] }
0x1596   :  { %4802 = vmin.xlane.f32.xlu1 %v4801_v3 }
0x1623   :  { %v4803_v1 = vpop.xlane.xlu1 %4802 }
0x1624   :  { %vm4804_vm13 = vcmp.eq.f32.partialorder %v4801_v3, %v4803_v1  ;;  %v4809_v61 = vcvt.f32.s32 %v4803_v1  ;;  %v20429_v1 = vld [vmem:[#allocation126_spill] sm:$0xff]  ;;  %v20430_v3 = vld [vmem:[#allocation127_spill] sm:$0xff] }
0x1625   :  { %v4805_v23 = vsel %vm4804_vm13, %v4800_v14, inf  ;;  %v20426_v14 = vld [vmem:[#allocation123_spill] sm:$0xff] }
0x1626   :  { %4806 = vmin.xlane.f32.xlu0 %v4805_v23  ;;  %v4810_v20 = vshll.u32 %v4809_v61, 16  ;;  %v20434_v23 = vld [vmem:[#allocation131_spill] sm:$0xff]  ;;  %v20435_v61 = vld [vmem:[#allocation132_spill] sm:$0xff] }
0x16b3   :  { %v4807_v13 = vpop.xlane.xlu0 %4806 }
0x16b4   :  { %v4808_v54 = vcvt.f32.s32 %v4807_v13  ;;  %v20436_v13 = vld [vmem:[#allocation133_spill] sm:$0xff] }
0x16b6   :  { %v17444_v22 = vadd.s32 %v4810_v20, %v4808_v54  ;;  %v20428_v54 = vld [vmem:[#allocation125_spill] sm:$0xff]  ;;  %v20437_v20 = vld [vmem:[#allocation134_spill] sm:$0xff] }
0x16b8   :  { %20424 = vst [vmem:[#allocation341_spill] sm:$0xff] %v17444_v22  ;;  %vm4812_vm14 = vcmp.eq.s32.totalorder %v20420_v29, %v17444_v22  ;;  %v14951_v22 = vld [vmem:[#allocation15] sm:$0xff]  ;;  %v14952_v29 = vld [vmem:[#allocation15 + $0x10] sm:$0xff] }
0x16b9   :  { %9797 = vmatmul.mubr.msk.f32.vlgmr.msra.gmra.mrb[36].mxu0 %vm4812_vm14, %v20425_v10  ;;  %9798 = vmatmul.mubr.msk.f32.vlgmr.msra.gmra.mrb[36].mxu1 %vm4812_vm14, %v20425_v10 }
0x16ba   :  { %12833 = vmatpush1.bf16.msra.mxu0 %v20426_v14  ;;  %5025 = vmatprep.mubr.f32.mxu0 %v19797_v50  ;;  %v20487_v14 = vld [vmem:[#allocation184_spill] sm:$0xff] }
0x16bb   :  { %12835 = vmatprep.subr.bf16.mxu0 %v20427_v15  ;;  %12865 = vmatpush1.bf16.msra.mxu1 %v20428_v54  ;;  %v20438_v54 = vld [vmem:[#allocation135_spill] sm:$0xff]  ;;  %v20440_v15 = vld [vmem:[#allocation137_spill] sm:$0xff] }
0x16bc   :  { %12867 = vmatprep.subr.bf16.mxu1 %v20429_v1  ;;  %5097 = vmatprep.mubr.f32.mxu1 %v19797_v50  ;;  %v20439_v1 = vld [vmem:[#allocation136_spill] sm:$0xff] }
0x16be   :  { %12837 = vmatpush1.bf16.msra.mxu0 %v20430_v3  ;;  %v20441_v3 = vld [vmem:[#allocation138_spill] sm:$0xff] }
0x16bf   :  { %12839 = vmatprep.subr.bf16.mxu0 %v20431_v21  ;;  %12869 = vmatpush1.bf16.msra.mxu1 %v20432_v37  ;;  %v20442_v21 = vld [vmem:[#allocation139_spill] sm:$0xff]  ;;  %v20443_v37 = vld [vmem:[#allocation140_spill] sm:$0xff] }
0x16c0   :  { %12871 = vmatprep.subr.bf16.mxu1 %v20433_v31  ;;  %v20444_v31 = vld [vmem:[#allocation141_spill] sm:$0xff] }
0x16c2   :  { %12841 = vmatpush1.bf16.msra.mxu0 %v20434_v23  ;;  %v20445_v23 = vld [vmem:[#allocation142_spill] sm:$0xff] }
0x16c3   :  { %12843 = vmatprep.subr.bf16.mxu0 %v20435_v61  ;;  %12873 = vmatpush1.bf16.msra.mxu1 %v20436_v13  ;;  %v20446_v61 = vld [vmem:[#allocation143_spill] sm:$0xff]  ;;  %v20447_v13 = vld [vmem:[#allocation144_spill] sm:$0xff] }
0x16c4   :  { %12875 = vmatprep.subr.bf16.mxu1 %v20437_v20  ;;  %v20448_v20 = vld [vmem:[#allocation145_spill] sm:$0xff] }
0x16c6   :  { %12845 = vmatpush1.bf16.msra.mxu0 %v20438_v54  ;;  %v20449_v54 = vld [vmem:[#allocation146_spill] sm:$0xff] }
0x16c7   :  { %12847 = vmatprep.subr.bf16.mxu0 %v20439_v1  ;;  %12877 = vmatpush1.bf16.msra.mxu1 %v20440_v15  ;;  %v20450_v1 = vld [vmem:[#allocation147_spill] sm:$0xff]  ;;  %v20451_v15 = vld [vmem:[#allocation148_spill] sm:$0xff] }
0x16c8   :  { %12879 = vmatprep.subr.bf16.mxu1 %v20441_v3  ;;  %v20452_v3 = vld [vmem:[#allocation149_spill] sm:$0xff] }
0x16ca   :  { %12849 = vmatpush1.bf16.msra.mxu0 %v20442_v21  ;;  %v20453_v21 = vld [vmem:[#allocation150_spill] sm:$0xff] }
0x16cb   :  { %12851 = vmatprep.subr.bf16.mxu0 %v20443_v37  ;;  %12881 = vmatpush1.bf16.msra.mxu1 %v20444_v31  ;;  %v20454_v37 = vld [vmem:[#allocation151_spill] sm:$0xff]  ;;  %v20455_v31 = vld [vmem:[#allocation152_spill] sm:$0xff] }
0x16cc   :  { %12883 = vmatprep.subr.bf16.mxu1 %v20445_v23  ;;  %v20456_v23 = vld [vmem:[#allocation153_spill] sm:$0xff] }
0x16ce   :  { %12853 = vmatpush1.bf16.msra.mxu0 %v20446_v61  ;;  %v20457_v61 = vld [vmem:[#allocation169_spill] sm:$0xff] }
0x16cf   :  { %12855 = vmatprep.subr.bf16.mxu0 %v20447_v13  ;;  %12885 = vmatpush1.bf16.msra.mxu1 %v20448_v20  ;;  %v20467_v20 = vld [vmem:[#allocation163_spill] sm:$0xff]  ;;  %v20469_v13 = vld [vmem:[#allocation165_spill] sm:$0xff] }
0x16d0   :  { %12887 = vmatprep.subr.bf16.mxu1 %v20449_v54  ;;  %v20466_v54 = vld [vmem:[#allocation162_spill] sm:$0xff] }
0x16d2   :  { %12857 = vmatpush1.bf16.msra.mxu0 %v20450_v1  ;;  %v20458_v1 = vld [vmem:[#allocation154_spill] sm:$0xff] }
0x16d3   :  { %12859 = vmatprep.subr.bf16.mxu0 %v20451_v15  ;;  %12889 = vmatpush1.bf16.msra.mxu1 %v20452_v3  ;;  %v20459_v3 = vld [vmem:[#allocation155_spill] sm:$0xff]  ;;  %v20465_v15 = vld [vmem:[#allocation161_spill] sm:$0xff] }
0x16d4   :  { %12891 = vmatprep.subr.bf16.mxu1 %v20453_v21  ;;  %v20460_v21 = vld [vmem:[#allocation156_spill] sm:$0xff] }
0x16d6   :  { %12861 = vmatpush1.bf16.msra.mxu0 %v20454_v37  ;;  %v20461_v37 = vld [vmem:[#allocation157_spill] sm:$0xff] }
0x16d7   :  { %12895 = vmatprep.subr.bf16.mxu0 %v20455_v31  ;;  %12893 = vmatpush1.bf16.msra.mxu1 %v20456_v23  ;;  %v20462_v31 = vld [vmem:[#allocation158_spill] sm:$0xff]  ;;  %v20463_v23 = vld [vmem:[#allocation159_spill] sm:$0xff] }
0x16d8   :  { %12927 = vmatprep.subr.bf16.mxu1 %v20457_v61  ;;  %v20464_v61 = vld [vmem:[#allocation160_spill] sm:$0xff] }
0x16d9   :  { %9799 = vmatmul.mubr.msk.f32.vlgmr.msra.gmra.mrb[40].mxu0 %vm4812_vm14, %v20425_v10  ;;  %v20488_v10 = vld [vmem:[#allocation185_spill] sm:$0xff] }
0x16da   :  { %12897 = vmatpush1.bf16.msra.mxu0 %v20458_v1  ;;  %5168 = vmatprep.mubr.f32.mxu0 %v19797_v50  ;;  %v20468_v1 = vld [vmem:[#allocation164_spill] sm:$0xff] }
0x16db   :  { %12899 = vmatprep.subr.bf16.mxu0 %v20459_v3  ;;  %v20470_v3 = vld [vmem:[#allocation166_spill] sm:$0xff] }
0x16de   :  { %12901 = vmatpush1.bf16.msra.mxu0 %v20460_v21  ;;  %v20471_v21 = vld [vmem:[#allocation167_spill] sm:$0xff] }
0x16df   :  { %12903 = vmatprep.subr.bf16.mxu0 %v20461_v37  ;;  %v20472_v37 = vld [vmem:[#allocation168_spill] sm:$0xff] }
0x16e2   :  { %12905 = vmatpush1.bf16.msra.mxu0 %v20462_v31  ;;  %v20473_v31 = vld [vmem:[#allocation170_spill] sm:$0xff] }
0x16e3   :  { %12907 = vmatprep.subr.bf16.mxu0 %v20463_v23 }
0x16e6   :  { %12909 = vmatpush1.bf16.msra.mxu0 %v20464_v61 }
0x16e7   :  { %12911 = vmatprep.subr.bf16.mxu0 %v20465_v15  ;;  %v14950_v15 = vld [vmem:[%s18970_s16] ss:$0 sm:$0xff] }
0x16ea   :  { %12913 = vmatpush1.bf16.msra.mxu0 %v20466_v54 }
0x16eb   :  { %12915 = vmatprep.subr.bf16.mxu0 %v20467_v20  ;;  %v20482_v20 = vld [vmem:[#allocation179_spill] sm:$0xff] }
0x16ee   :  { %12917 = vmatpush1.bf16.msra.mxu0 %v20468_v1  ;;  %v20474_v1 = vld [vmem:[#allocation171_spill] sm:$0xff] }
0x16ef   :  { %12919 = vmatprep.subr.bf16.mxu0 %v20469_v13  ;;  %v20475_v13 = vld [vmem:[#allocation172_spill] sm:$0xff] }
0x16f2   :  { %12921 = vmatpush1.bf16.msra.mxu0 %v20470_v3  ;;  %v20476_v3 = vld [vmem:[#allocation173_spill] sm:$0xff] }
0x16f3   :  { %12923 = vmatprep.subr.bf16.mxu0 %v20471_v21  ;;  %v20477_v21 = vld [vmem:[#allocation174_spill] sm:$0xff] }
0x16f6   :  { %12925 = vmatpush1.bf16.msra.mxu0 %v20472_v37  ;;  %v20479_v37 = vld [vmem:[#allocation176_spill] sm:$0xff] }
0x16f7   :  { %12959 = vmatprep.subr.bf16.mxu0 %v20473_v31  ;;  %v20478_v31 = vld [vmem:[#allocation175_spill] sm:$0xff] }
0x17ac   :  { %v5027_v23 = vpop.f32.mrb[40].mxu0 }
0x17ad   :  { %v5032_v54 = vadd.f32 %v14950_v15, %v5027_v23  ;;  %v17514_v61 = vpop.f32.mrb[41].mxu0  ;;  %v20480_v15 = vld [vmem:[#allocation177_spill] sm:$0xff]  ;;  %v20481_v23 = vld [vmem:[#allocation178_spill] sm:$0xff] }
0x17af   :  { %5098 = vmatmul.mubr.f32.vlgmr.msra.gmra.mrb[40].mxu1 %v5032_v54  ;;  %5169 = vmatmul.mubr.f32.vlgmr.msra.gmra.mrb[42].mxu0 %v5032_v54 }
0x17b0   :  { %12929 = vmatpush1.bf16.msra.mxu1 %v20474_v1  ;;  %12961 = vmatpush1.bf16.msra.mxu0 %v20475_v13  ;;  %v20483_v1 = vld [vmem:[#allocation180_spill] sm:$0xff]  ;;  %v20484_v13 = vld [vmem:[#allocation181_spill] sm:$0xff] }
0x17b1   :  { %12931 = vmatprep.subr.bf16.mxu1 %v20476_v3  ;;  %12963 = vmatprep.subr.bf16.mxu0 %v20477_v21  ;;  %v20485_v3 = vld [vmem:[#allocation182_spill] sm:$0xff]  ;;  %v20486_v21 = vld [vmem:[#allocation183_spill] sm:$0xff] }
0x17b2   :  { %5239 = vmatprep.mubr.f32.mxu1 %v19797_v50  ;;  %5310 = vmatprep.mubr.f32.mxu0 %v19797_v50 }
0x17b4   :  { %12933 = vmatpush1.bf16.msra.mxu1 %v20478_v31  ;;  %12965 = vmatpush1.bf16.msra.mxu0 %v20479_v37  ;;  %v20489_v31 = vld [vmem:[#allocation186_spill] sm:$0xff]  ;;  %v20490_v37 = vld [vmem:[#allocation187_spill] sm:$0xff] }
0x17b5   :  { %12935 = vmatprep.subr.bf16.mxu1 %v20480_v15  ;;  %12967 = vmatprep.subr.bf16.mxu0 %v20481_v23  ;;  %v20491_v15 = vld [vmem:[#allocation188_spill] sm:$0xff]  ;;  %v20492_v23 = vld [vmem:[#allocation189_spill] sm:$0xff] }
0x17b8   :  { %12937 = vmatpush1.bf16.msra.mxu1 %v20482_v20  ;;  %12969 = vmatpush1.bf16.msra.mxu0 %v20483_v1  ;;  %v20493_v20 = vld [vmem:[#allocation190_spill] sm:$0xff]  ;;  %v20494_v1 = vld [vmem:[#allocation191_spill] sm:$0xff] }
0x17b9   :  { %12939 = vmatprep.subr.bf16.mxu1 %v20484_v13  ;;  %12971 = vmatprep.subr.bf16.mxu0 %v20485_v3  ;;  %v20495_v13 = vld [vmem:[#allocation192_spill] sm:$0xff]  ;;  %v20496_v3 = vld [vmem:[#allocation193_spill] sm:$0xff] }
0x17bc   :  { %12941 = vmatpush1.bf16.msra.mxu1 %v20486_v21  ;;  %12973 = vmatpush1.bf16.msra.mxu0 %v20487_v14  ;;  %v20497_v21 = vld [vmem:[#allocation194_spill] sm:$0xff]  ;;  %v20498_v14 = vld [vmem:[#allocation195_spill] sm:$0xff] }
0x17bd   :  { %12943 = vmatprep.subr.bf16.mxu1 %v20488_v10  ;;  %12975 = vmatprep.subr.bf16.mxu0 %v20489_v31  ;;  %v20499_v10 = vld [vmem:[#allocation196_spill] sm:$0xff]  ;;  %v20500_v31 = vld [vmem:[#allocation197_spill] sm:$0xff] }
0x17c0   :  { %12945 = vmatpush1.bf16.msra.mxu1 %v20490_v37  ;;  %12977 = vmatpush1.bf16.msra.mxu0 %v20491_v15  ;;  %v20501_v37 = vld [vmem:[#allocation198_spill] sm:$0xff]  ;;  %v20502_v15 = vld [vmem:[#allocation199_spill] sm:$0xff] }
0x17c1   :  { %12947 = vmatprep.subr.bf16.mxu1 %v20492_v23  ;;  %12979 = vmatprep.subr.bf16.mxu0 %v20493_v20  ;;  %v20503_v23 = vld [vmem:[#allocation200_spill] sm:$0xff]  ;;  %v20504_v20 = vld [vmem:[#allocation201_spill] sm:$0xff] }
0x17c4   :  { %12949 = vmatpush1.bf16.msra.mxu1 %v20494_v1  ;;  %12981 = vmatpush1.bf16.msra.mxu0 %v20495_v13  ;;  %v20505_v1 = vld [vmem:[#allocation202_spill] sm:$0xff] }
0x17c5   :  { %12951 = vmatprep.subr.bf16.mxu1 %v20496_v3  ;;  %12983 = vmatprep.subr.bf16.mxu0 %v20497_v21  ;;  %v20506_v3 = vld [vmem:[#allocation203_spill] sm:$0xff]  ;;  %v20507_v21 = vld [vmem:[#allocation204_spill] sm:$0xff] }
0x17c8   :  { %12953 = vmatpush1.bf16.msra.mxu1 %v20498_v14  ;;  %12985 = vmatpush1.bf16.msra.mxu0 %v20499_v10  ;;  %v20508_v14 = vld [vmem:[#allocation205_spill] sm:$0xff]  ;;  %v20509_v10 = vld [vmem:[#allocation206_spill] sm:$0xff] }
0x17c9   :  { %12955 = vmatprep.subr.bf16.mxu1 %v20500_v31  ;;  %12987 = vmatprep.subr.bf16.mxu0 %v20501_v37  ;;  %v20510_v31 = vld [vmem:[#allocation207_spill] sm:$0xff]  ;;  %v20511_v37 = vld [vmem:[#allocation208_spill] sm:$0xff] }
0x17cc   :  { %12957 = vmatpush1.bf16.msra.mxu1 %v20502_v15  ;;  %12989 = vmatpush1.bf16.msra.mxu0 %v20503_v23  ;;  %v20512_v15 = vld [vmem:[#allocation209_spill] sm:$0xff]  ;;  %v20513_v23 = vld [vmem:[#allocation210_spill] sm:$0xff] }
0x17cd   :  { %12991 = vmatprep.subr.bf16.mxu1 %v20504_v20  ;;  %13023 = vmatprep.subr.bf16.mxu0 %v20505_v1  ;;  %v20514_v20 = vld [vmem:[#allocation211_spill] sm:$0xff]  ;;  %v20515_v1 = vld [vmem:[#allocation212_spill] sm:$0xff] }
0x17cf   :  { %5240 = vmatmul.mubr.f32.vlgmr.msra.gmra.mrb[42].mxu1 %v5032_v54  ;;  %5311 = vmatmul.mubr.f32.vlgmr.msra.gmra.mrb[44].mxu0 %v5032_v54  ;;  %v20516_v54 = vld [vmem:[#allocation213_spill] sm:$0xff] }
0x17d0   :  { %12993 = vmatpush3.bf16.msra.mxu1 %v20506_v3  ;;  %13025 = vmatpush3.bf16.msra.mxu0 %v20507_v21  ;;  %v20517_v3 = vld [vmem:[#allocation214_spill] sm:$0xff]  ;;  %v20518_v21 = vld [vmem:[#allocation215_spill] sm:$0xff] }
0x17d1   :  { %12995 = vmatprep.subr.bf16.mxu1 %v20508_v14  ;;  %13027 = vmatprep.subr.bf16.mxu0 %v20509_v10  ;;  %v20519_v14 = vld [vmem:[#allocation216_spill] sm:$0xff]  ;;  %v20520_v10 = vld [vmem:[#allocation217_spill] sm:$0xff] }
0x17d4   :  { %12997 = vmatpush3.bf16.msra.mxu1 %v20510_v31  ;;  %13029 = vmatpush3.bf16.msra.mxu0 %v20511_v37  ;;  %v20521_v31 = vld [vmem:[#allocation218_spill] sm:$0xff]  ;;  %v20522_v37 = vld [vmem:[#allocation219_spill] sm:$0xff] }
0x17d5   :  { %12999 = vmatprep.subr.bf16.mxu1 %v20512_v15  ;;  %13031 = vmatprep.subr.bf16.mxu0 %v20513_v23  ;;  %v20523_v15 = vld [vmem:[#allocation220_spill] sm:$0xff]  ;;  %v20524_v23 = vld [vmem:[#allocation221_spill] sm:$0xff] }
0x17d8   :  { %13001 = vmatpush3.bf16.msra.mxu1 %v20514_v20  ;;  %13033 = vmatpush3.bf16.msra.mxu0 %v20515_v1  ;;  %v20525_v20 = vld [vmem:[#allocation222_spill] sm:$0xff]  ;;  %v20526_v1 = vld [vmem:[#allocation223_spill] sm:$0xff] }
0x17d9   :  { %13003 = vmatprep.subr.bf16.mxu1 %v20516_v54  ;;  %13035 = vmatprep.subr.bf16.mxu0 %v20517_v3  ;;  %v20527_v54 = vld [vmem:[#allocation224_spill] sm:$0xff]  ;;  %v20528_v3 = vld [vmem:[#allocation225_spill] sm:$0xff] }
0x17dc   :  { %13005 = vmatpush3.bf16.msra.mxu1 %v20518_v21  ;;  %13037 = vmatpush3.bf16.msra.mxu0 %v20519_v14  ;;  %v20529_v21 = vld [vmem:[#allocation226_spill] sm:$0xff]  ;;  %v20530_v14 = vld [vmem:[#allocation227_spill] sm:$0xff] }
0x17dd   :  { %13007 = vmatprep.subr.bf16.mxu1 %v20520_v10  ;;  %13039 = vmatprep.subr.bf16.mxu0 %v20521_v31  ;;  %v20531_v10 = vld [vmem:[#allocation228_spill] sm:$0xff]  ;;  %v20532_v31 = vld [vmem:[#allocation229_spill] sm:$0xff] }
0x17e0   :  { %13009 = vmatpush3.bf16.msra.mxu1 %v20522_v37  ;;  %13041 = vmatpush3.bf16.msra.mxu0 %v20523_v15  ;;  %v20533_v37 = vld [vmem:[#allocation230_spill] sm:$0xff]  ;;  %v20534_v15 = vld [vmem:[#allocation231_spill] sm:$0xff] }
0x17e1   :  { %13011 = vmatprep.subr.bf16.mxu1 %v20524_v23  ;;  %13043 = vmatprep.subr.bf16.mxu0 %v20525_v20  ;;  %v20535_v23 = vld [vmem:[#allocation232_spill] sm:$0xff]  ;;  %v20536_v20 = vld [vmem:[#allocation233_spill] sm:$0xff] }
0x17e4   :  { %13013 = vmatpush3.bf16.msra.mxu1 %v20526_v1  ;;  %13045 = vmatpush3.bf16.msra.mxu0 %v20527_v54  ;;  %v20537_v1 = vld [vmem:[#allocation234_spill] sm:$0xff] }
0x17e5   :  { %13015 = vmatprep.subr.bf16.mxu1 %v20528_v3  ;;  %13047 = vmatprep.subr.bf16.mxu0 %v20529_v21 }
0x17e8   :  { %13017 = vmatpush3.bf16.msra.mxu1 %v20530_v14  ;;  %13049 = vmatpush3.bf16.msra.mxu0 %v20531_v10 }
0x17e9   :  { %13019 = vmatprep.subr.bf16.mxu1 %v20532_v31  ;;  %13051 = vmatprep.subr.bf16.mxu0 %v20533_v37 }
0x17ec   :  { %13021 = vmatpush3.bf16.msra.mxu1 %v20534_v15  ;;  %13053 = vmatpush3.bf16.msra.mxu0 %v20535_v23 }
0x17ed   :  { %13055 = vmatprep.subr.bf16.mxu1 %v20536_v20  ;;  %13087 = vmatprep.subr.bf16.mxu0 %v20537_v1 }
0x1882   :  { %v5099_v54 = vpop.f32.mrb[40].mxu1  ;;  %v5170_v3 = vpop.f32.mrb[42].mxu0 }
0x1883   :  { %v5101_v13 = vpop.f32.mrb[41].mxu1  ;;  %v5172_v21 = vpop.f32.mrb[43].mxu0  ;;  %v5100_v10 = vadd.f32 %v14951_v22, %v5099_v54  ;;  %v5171_v31 = vadd.f32 %v14952_v29, %v5170_v3 }
0x1884   :  { %v5102_v20 = vadd.f32 %v14955_v48, %v5101_v13  ;;  %v5173_v1 = vadd.f32 %v14956_v4, %v5172_v21 }
0x18a2   :  { %v5241_v30 = vpop.f32.mrb[42].mxu1  ;;  %v5312_v14 = vpop.f32.mrb[44].mxu0 }
0x18a3   :  { %v5242_v37 = vadd.f32 %v14953_v9, %v5241_v30  ;;  %v5313_v15 = vadd.f32 %v14954_v53, %v5312_v14  ;;  %v5243_v8 = vpop.f32.mrb[43].mxu1  ;;  %v5314_v23 = vpop.f32.mrb[45].mxu0 }
0x18a4   :  { %v5244_v46 = vadd.f32 %v14957_v17, %v5243_v8  ;;  %v5315_v5 = vadd.f32 %v14958_v49, %v5314_v23 }
0x18a5   :  { %v5317_v57 = vmax.f32 %v5100_v10, %v5242_v37  ;;  %v5319_v34 = vmax.f32 %v5171_v31, %v5313_v15 }
0x18a6   :  { %v5318_v25 = vmax.f32 %v5102_v20, %v5244_v46  ;;  %v5320_v22 = vmax.f32 %v5173_v1, %v5315_v5 }
0x18a8   :  { %v5321_v54 = vmax.f32 %v5317_v57, %v5318_v25  ;;  %v5322_v29 = vmax.f32 %v5319_v34, %v5320_v22 }
0x18aa   :  { %v5323_v3 = vmax.f32 %v5321_v54, %v5322_v29 }
0x18ac   :  { %5324 = vmax.xlane.f32.xlu1 %v5323_v3 }
0x1939   :  { %v5325_v9 = vpop.xlane.xlu1 %5324 }
0x193a   :  { %v5326_v53 = vsub.f32 %v5100_v10, %v5325_v9  ;;  %v5327_v30 = vsub.f32 %v5102_v20, %v5325_v9  ;;  %v5328_v14 = vsub.f32 %v5171_v31, %v5325_v9  ;;  %v5329_v2 = vsub.f32 %v5173_v1, %v5325_v9 }
0x193b   :  { %v5330_v21 = vsub.f32 %v5242_v37, %v5325_v9  ;;  %v5331_v49 = vsub.f32 %v5244_v46, %v5325_v9  ;;  %v5332_v17 = vsub.f32 %v5313_v15, %v5325_v9  ;;  %v5333_v25 = vsub.f32 %v5315_v5, %v5325_v9 }
0x193c   :  { %v5334_v48 = vmul.f32 1.442695, %v5326_v53  ;;  %v5336_v13 = vmul.f32 1.442695, %v5327_v30  ;;  %v5338_v4 = vmul.f32 1.442695, %v5328_v14 }
0x193d   :  { %v5340_v8 = vmul.f32 1.442695, %v5329_v2  ;;  %v5342_v23 = vmul.f32 1.442695, %v5330_v21  ;;  %v5344_v34 = vmul.f32 1.442695, %v5331_v49 }
0x193e   :  { %14838 = vpow2.f32 %v5334_v48  ;;  %v5346_v57 = vmul.f32 1.442695, %v5332_v17  ;;  %v5348_v10 = vmul.f32 1.442695, %v5333_v25  ;;  %v20539_v25 = vld [vmem:[#allocation245_spill] sm:$0xff] }
0x193f   :  { %14840 = vpow2.f32 %v5336_v13 }
0x1940   :  { %14842 = vpow2.f32 %v5338_v4 }
0x1941   :  { %14844 = vpow2.f32 %v5340_v8 }
0x1942   :  { %14846 = vpow2.f32 %v5342_v23  ;;  %v20538_v23 = vld [vmem:[#allocation244_spill] sm:$0xff] }
0x1943   :  { %14848 = vpow2.f32 %v5344_v34  ;;  %v20540_v34 = vld [vmem:[#allocation246_spill] sm:$0xff] }
0x1944   :  { %14850 = vpow2.f32 %v5346_v57  ;;  %v20541_v57 = vld [vmem:[#allocation247_spill] sm:$0xff] }
0x1945   :  { %14852 = vpow2.f32 %v5348_v10  ;;  %v20542_v10 = vld [vmem:[#allocation248_spill] sm:$0xff] }
0x1948   :  { %v14839_v31 = vpop.eup %14838 }
0x1949   :  { %v14841_v1 = vpop.eup %14840 }
0x194a   :  { %v5350_v20 = vadd.f32 %v14841_v1, %v14839_v31  ;;  %v14843_v22 = vpop.eup %14842 }
0x194b   :  { %v14845_v54 = vpop.eup %14844 }
0x194c   :  { %v5351_v37 = vadd.f32 %v14843_v22, %v5350_v20  ;;  %v14847_v46 = vpop.eup %14846  ;;  %v20545_v20 = vld [vmem:[#allocation251_spill] sm:$0xff] }
0x194d   :  { %v14849_v15 = vpop.eup %14848 }
0x194e   :  { %v5352_v2 = vadd.f32 %v14845_v54, %v5351_v37  ;;  %v14851_v5 = vpop.eup %14850  ;;  %v20547_v37 = vld [vmem:[#allocation253_spill] sm:$0xff] }
0x194f   :  { %v14853_v53 = vpop.eup %14852 }
0x1950   :  { %v5353_v29 = vadd.f32 %v14847_v46, %v5352_v2  ;;  %v20549_v2 = vld [vmem:[#allocation255_spill] sm:$0xff] }
0x1952   :  { %v5354_v3 = vadd.f32 %v14849_v15, %v5353_v29  ;;  %v20550_v29 = vld [vmem:[#allocation256_spill] sm:$0xff] }
0x1954   :  { %v5355_v9 = vadd.f32 %v14851_v5, %v5354_v3  ;;  %v20552_v3 = vld [vmem:[#allocation258_spill] sm:$0xff] }
0x1956   :  { %v5356_v30 = vadd.f32 %v14853_v53, %v5355_v9  ;;  %v20553_v9 = vld [vmem:[#allocation259_spill] sm:$0xff] }
0x1958   :  { %5357 = vadd.xlane.f32.xlu0 %v5356_v30  ;;  %v20555_v30 = vld [vmem:[#allocation261_spill] sm:$0xff] }
0x19e5   :  { %v5358_v14 = vpop.xlane.xlu0 %5357 }
0x19e6   :  { %14854 = vrcp.f32 %v5358_v14  ;;  %v20556_v14 = vld [vmem:[#allocation262_spill] sm:$0xff] }
0x19f0   :  { %v14855_v48 = vpop.eup %14854 }
0x19f1   :  { %v5361_v13 = vmul.f32 %v14855_v48, %v14841_v1  ;;  %v5363_v4 = vmul.f32 %v14855_v48, %v14845_v54  ;;  %v5360_v21 = vmul.f32 %v14855_v48, %v14839_v31  ;;  %v5362_v8 = vmul.f32 %v14855_v48, %v14843_v22  ;;  %v20543_v31 = vld [vmem:[#allocation249_spill] sm:$0xff]  ;;  %v20544_v1 = vld [vmem:[#allocation250_spill] sm:$0xff]  ;;  %v20546_v22 = vld [vmem:[#allocation252_spill] sm:$0xff] }
0x19f2   :  { %v5365_v49 = vmul.f32 %v14855_v48, %v14849_v15  ;;  %v5367_v17 = vmul.f32 %v14855_v48, %v14853_v53  ;;  %v20548_v54 = vld [vmem:[#allocation254_spill] sm:$0xff]  ;;  %v20551_v15 = vld [vmem:[#allocation257_spill] sm:$0xff]  ;;  %v20554_v53 = vld [vmem:[#allocation260_spill] sm:$0xff] }
0x19f3   :  { %5432 = vmatprep.mubr.f32.mxu1 %v5361_v13  ;;  %5502 = vmatprep.mubr.f32.mxu0 %v5363_v4  ;;  %v20557_v13 = vld [vmem:[#allocation263_spill] sm:$0xff]  ;;  %v20558_v4 = vld [vmem:[#allocation264_spill] sm:$0xff] }
0x19f4   :  { %5433 = vmatmul.mubr.f32.vlgmr.msra.gmra.mrb[44].mxu1 %v5360_v21  ;;  %5503 = vmatmul.mubr.f32.vlgmr.msra.gmra.mrb[46].mxu0 %v5362_v8  ;;  %v5364_v21 = vmul.f32 %v14855_v48, %v14847_v46  ;;  %v5366_v8 = vmul.f32 %v14855_v48, %v14851_v5  ;;  %v20565_v46 = vld [vmem:[#allocation271_spill] sm:$0xff]  ;;  %v20566_v5 = vld [vmem:[#allocation272_spill] sm:$0xff]  ;;  %v20567_v48 = vld [vmem:[#allocation273_spill] sm:$0xff] }
0x19f5   :  { %13057 = vmatpush3.bf16.msra.mxu1 %v20223_v51  ;;  %13089 = vmatpush3.bf16.msra.mxu0 %v20224_v36 }
0x19f6   :  { %5572 = vmatprep.mubr.f32.mxu1 %v5365_v49  ;;  %5642 = vmatprep.mubr.f32.mxu0 %v5367_v17  ;;  %v20559_v49 = vld [vmem:[#allocation265_spill] sm:$0xff]  ;;  %v20560_v17 = vld [vmem:[#allocation266_spill] sm:$0xff] }
0x19f7   :  { %13059 = vmatprep.subr.bf16.mxu1 %v20225_v39  ;;  %13091 = vmatprep.subr.bf16.mxu0 %v20226_v42 }
0x19f9   :  { %13061 = vmatpush3.bf16.msra.mxu1 %v20227_v62  ;;  %13093 = vmatpush3.bf16.msra.mxu0 %v20228_v56 }
0x19fa   :  { %13063 = vmatprep.subr.bf16.mxu1 %v20229_v55  ;;  %13095 = vmatprep.subr.bf16.mxu0 %v20230_v35 }
0x19fd   :  { %13065 = vmatpush3.bf16.msra.mxu1 %v20231_v38  ;;  %13097 = vmatpush3.bf16.msra.mxu0 %v20538_v23 }
0x19fe   :  { %13067 = vmatprep.subr.bf16.mxu1 %v20539_v25  ;;  %13099 = vmatprep.subr.bf16.mxu0 %v20540_v34 }
0x1a01   :  { %13069 = vmatpush3.bf16.msra.mxu1 %v20541_v57  ;;  %13101 = vmatpush3.bf16.msra.mxu0 %v20542_v10 }
0x1a02   :  { %13071 = vmatprep.subr.bf16.mxu1 %v20543_v31  ;;  %13103 = vmatprep.subr.bf16.mxu0 %v20544_v1 }
0x1a05   :  { %13073 = vmatpush3.bf16.msra.mxu1 %v20545_v20  ;;  %13105 = vmatpush3.bf16.msra.mxu0 %v20546_v22 }
0x1a06   :  { %13075 = vmatprep.subr.bf16.mxu1 %v20547_v37  ;;  %13107 = vmatprep.subr.bf16.mxu0 %v20548_v54  ;;  %v20592_v54 = vld [vmem:[#allocation297_spill] sm:$0xff] }
0x1a09   :  { %13077 = vmatpush3.bf16.msra.mxu1 %v20549_v2  ;;  %13109 = vmatpush3.bf16.msra.mxu0 %v20550_v29 }
0x1a0a   :  { %13079 = vmatprep.subr.bf16.mxu1 %v20551_v15  ;;  %13111 = vmatprep.subr.bf16.mxu0 %v20552_v3  ;;  %v20561_v3 = vld [vmem:[#allocation267_spill] sm:$0xff] }
0x1a0d   :  { %13081 = vmatpush3.bf16.msra.mxu1 %v20553_v9  ;;  %13113 = vmatpush3.bf16.msra.mxu0 %v20554_v53  ;;  %v20562_v9 = vld [vmem:[#allocation268_spill] sm:$0xff]  ;;  %v20563_v53 = vld [vmem:[#allocation269_spill] sm:$0xff] }
0x1a0e   :  { %13083 = vmatprep.subr.bf16.mxu1 %v20555_v30  ;;  %13115 = vmatprep.subr.bf16.mxu0 %v20556_v14  ;;  %v20564_v30 = vld [vmem:[#allocation270_spill] sm:$0xff] }
0x1a11   :  { %13085 = vmatpush3.bf16.msra.mxu1 %v20557_v13  ;;  %13117 = vmatpush3.bf16.msra.mxu0 %v20558_v4 }
0x1a12   :  { %13151 = vmatprep.subr.bf16.mxu1 %v20559_v49  ;;  %13119 = vmatprep.subr.bf16.mxu0 %v20560_v17  ;;  %v20574_v17 = vld [vmem:[#allocation280_spill] sm:$0xff]  ;;  %v20575_v49 = vld [vmem:[#allocation281_spill] sm:$0xff] }
0x1a14   :  { %5573 = vmatmul.mubr.f32.vlgmr.msra.gmra.mrb[46].mxu1 %v5364_v21  ;;  %5643 = vmatmul.mubr.f32.vlgmr.msra.gmra.mrb[48].mxu0 %v5366_v8  ;;  %v20568_v21 = vld [vmem:[#allocation274_spill] sm:$0xff]  ;;  %v20569_v8 = vld [vmem:[#allocation275_spill] sm:$0xff] }
0x1a15   :  { %13153 = vmatpush1.bf16.msra.mxu1 %v20561_v3  ;;  %13121 = vmatpush1.bf16.msra.mxu0 %v20562_v9  ;;  %v20570_v3 = vld [vmem:[#allocation276_spill] sm:$0xff]  ;;  %v20571_v9 = vld [vmem:[#allocation277_spill] sm:$0xff] }
0x1a16   :  { %13155 = vmatprep.subr.bf16.mxu1 %v20563_v53  ;;  %13123 = vmatprep.subr.bf16.mxu0 %v20564_v30  ;;  %v20572_v53 = vld [vmem:[#allocation278_spill] sm:$0xff]  ;;  %v20573_v30 = vld [vmem:[#allocation279_spill] sm:$0xff] }
0x1a17   :  { %5713 = vmatprep.mubr.f32.mxu0 %v19797_v50  ;;  %5784 = vmatprep.mubr.f32.mxu1 %v19797_v50 }
0x1a19   :  { %13157 = vmatpush1.bf16.msra.mxu1 %v20565_v46  ;;  %13125 = vmatpush1.bf16.msra.mxu0 %v20566_v5  ;;  %v20576_v46 = vld [vmem:[#allocation282_spill] sm:$0xff]  ;;  %v20577_v5 = vld [vmem:[#allocation283_spill] sm:$0xff] }
0x1a1a   :  { %13159 = vmatprep.subr.bf16.mxu1 %v20567_v48  ;;  %13127 = vmatprep.subr.bf16.mxu0 %v20568_v21  ;;  %v20578_v48 = vld [vmem:[#allocation284_spill] sm:$0xff]  ;;  %v20579_v21 = vld [vmem:[#allocation285_spill] sm:$0xff] }
0x1a1d   :  { %13161 = vmatpush1.bf16.msra.mxu1 %v20569_v8  ;;  %13129 = vmatpush1.bf16.msra.mxu0 %v20570_v3  ;;  %v20580_v8 = vld [vmem:[#allocation286_spill] sm:$0xff]  ;;  %v20581_v3 = vld [vmem:[#allocation287_spill] sm:$0xff] }
0x1a1e   :  { %13163 = vmatprep.subr.bf16.mxu1 %v20571_v9  ;;  %13131 = vmatprep.subr.bf16.mxu0 %v20572_v53  ;;  %v20582_v9 = vld [vmem:[#allocation288_spill] sm:$0xff]  ;;  %v20583_v53 = vld [vmem:[#allocation289_spill] sm:$0xff] }
0x1a21   :  { %13165 = vmatpush1.bf16.msra.mxu1 %v20573_v30  ;;  %13133 = vmatpush1.bf16.msra.mxu0 %v20574_v17  ;;  %v20584_v30 = vld [vmem:[#allocation290_spill] sm:$0xff]  ;;  %v20585_v17 = vld [vmem:[#allocation291_spill] sm:$0xff] }
0x1a22   :  { %13167 = vmatprep.subr.bf16.mxu1 %v20575_v49  ;;  %13135 = vmatprep.subr.bf16.mxu0 %v20576_v46  ;;  %v20586_v49 = vld [vmem:[#allocation292_spill] sm:$0xff]  ;;  %v20587_v46 = vld [vmem:[#allocation293_spill] sm:$0xff] }
0x1a25   :  { %13169 = vmatpush1.bf16.msra.mxu1 %v20577_v5  ;;  %13137 = vmatpush1.bf16.msra.mxu0 %v20578_v48  ;;  %v20588_v5 = vld [vmem:[#allocation294_spill] sm:$0xff]  ;;  %v20589_v48 = vld [vmem:[#allocation295_spill] sm:$0xff] }
0x1a26   :  { %13171 = vmatprep.subr.bf16.mxu1 %v20579_v21  ;;  %13139 = vmatprep.subr.bf16.mxu0 %v20580_v8  ;;  %v20590_v21 = vld [vmem:[#allocation296_spill] sm:$0xff] }
0x1a29   :  { %13173 = vmatpush1.bf16.msra.mxu1 %v20581_v3  ;;  %13141 = vmatpush1.bf16.msra.mxu0 %v20582_v9  ;;  %v20591_v3 = vld [vmem:[#allocation305_spill] sm:$0xff] }
0x1a2a   :  { %13175 = vmatprep.subr.bf16.mxu1 %v20583_v53  ;;  %13143 = vmatprep.subr.bf16.mxu0 %v20584_v30 }
0x1a2d   :  { %13177 = vmatpush1.bf16.msra.mxu1 %v20585_v17  ;;  %13145 = vmatpush1.bf16.msra.mxu0 %v20586_v49 }
0x1a2e   :  { %13179 = vmatprep.subr.bf16.mxu1 %v20587_v46  ;;  %13147 = vmatprep.subr.bf16.mxu0 %v20588_v5 }
0x1a31   :  { %13181 = vmatpush1.bf16.msra.mxu1 %v20589_v48  ;;  %13149 = vmatpush1.bf16.msra.mxu0 %v20590_v21  ;;  %v14959_v21 = vld [vmem:[%s19969_s23] sm:$0xff] }
0x1a32   :  { %13182 = vmatprep.subr.bf16.mxu1 %v19968_v24  ;;  %13207 = vmatprep.subr.bf16.mxu0 %v20591_v3 }
0x1ac7   :  { %v10262_v9 = vpop.f32.mrb[44].mxu1  ;;  %v10297_v53 = vpop.f32.mrb[46].mxu0 }
0x1ac8   :  { %v10263_v8 = vpop.f32.mrb[45].mxu1  ;;  %v10298_v30 = vpop.f32.mrb[47].mxu0 }
0x1ac9   :  { %v10264_v4 = vadd.f32 %v10263_v8, %v10262_v9  ;;  %v10299_v17 = vadd.f32 %v10298_v30, %v10297_v53  ;;  %v20593_v9 = vld [vmem:[#allocation307_spill] sm:$0xff]  ;;  %v20594_v53 = vld [vmem:[#allocation309_spill] sm:$0xff] }
0x1aca   :  { %v20598_v30 = vld [vmem:[#allocation299_spill] sm:$0xff] }
0x1acb   :  { %v5505_v13 = vadd.f32 %v10299_v17, %v10264_v4  ;;  %v20601_v4 = vld [vmem:[#allocation300_spill] sm:$0xff]  ;;  %v20603_v17 = vld [vmem:[#allocation321_spill] sm:$0xff]  ;;  %v20608_v8 = vld [vmem:[#allocation327_spill] sm:$0xff] }
0x1ae7   :  { %v10332_v49 = vpop.f32.mrb[46].mxu1  ;;  %v10367_v14 = vpop.f32.mrb[48].mxu0 }
0x1ae8   :  { %v10333_v46 = vpop.f32.mrb[47].mxu1  ;;  %v10368_v15 = vpop.f32.mrb[49].mxu0 }
0x1ae9   :  { %v10334_v5 = vadd.f32 %v10333_v46, %v10332_v49  ;;  %v10369_v29 = vadd.f32 %v10368_v15, %v10367_v14  ;;  %v20597_v15 = vld [vmem:[#allocation313_spill] sm:$0xff]  ;;  %v20599_v14 = vld [vmem:[#allocation315_spill] sm:$0xff] }
0x1aea   :  { %v20602_v49 = vld [vmem:[#allocation319_spill] sm:$0xff]  ;;  %v20604_v46 = vld [vmem:[#allocation301_spill] sm:$0xff] }
0x1aeb   :  { %v5575_v48 = vadd.f32 %v10334_v5, %v5505_v13  ;;  %v20600_v13 = vld [vmem:[#allocation317_spill] sm:$0xff]  ;;  %v20605_v5 = vld [vmem:[#allocation323_spill] sm:$0xff] }
0x1aed   :  { %v5645_v2 = vadd.f32 %v10369_v29, %v5575_v48  ;;  %v20595_v29 = vld [vmem:[#allocation298_spill] sm:$0xff]  ;;  %v20606_v48 = vld [vmem:[#allocation325_spill] sm:$0xff] }
0x1aef   :  { %v5648_v3 = vadd.f32 %v14959_v21, %v5645_v2  ;;  %v20596_v2 = vld [vmem:[#allocation311_spill] sm:$0xff]  ;;  %v20607_v21 = vld [vmem:[#allocation302_spill] sm:$0xff] }
0x1af1   :  { %5714 = vmatmul.mubr.f32.vlgmr.msra.gmra.mrb[36].mxu0 %v5648_v3  ;;  %5785 = vmatmul.mubr.f32.vlgmr.msra.gmra.mrb[36].mxu1 %v5648_v3 }
0x1af2   :  { %13184 = vmatpush3.bf16.msra.mxu1 %v20592_v54  ;;  %11081 = vmatprep.mubr.msk.f32.mxu1 %vm15358_vm0, %v19797_v50 }
0x1af3   :  { %13185 = vmatprep.subr.bf16.mxu1 %v19968_v24  ;;  %13209 = vmatpush1.bf16.msra.mxu0 %v20593_v9 }
0x1af4   :  { %13211 = vmatprep.subr.bf16.mxu0 %v20594_v53  ;;  %5927 = vmatprep.mubr.f32.mxu0 %v19797_v50 }
0x1af6   :  { %13187 = vmatpush3.bf16.msra.mxu1 %v20595_v29 }
0x1af7   :  { %13188 = vmatprep.subr.bf16.mxu1 %v19968_v24  ;;  %13213 = vmatpush1.bf16.msra.mxu0 %v20596_v2 }
0x1af8   :  { %13215 = vmatprep.subr.bf16.mxu0 %v20597_v15 }
0x1afa   :  { %13190 = vmatpush3.bf16.msra.mxu1 %v20598_v30  ;;  %v20633_v30 = vld [vmem:[#allocation339_spill] sm:$0xff] }
0x1afb   :  { %13191 = vmatprep.subr.bf16.mxu1 %v19968_v24  ;;  %13217 = vmatpush1.bf16.msra.mxu0 %v20599_v14  ;;  %v20628_v14 = vld [vmem:[#allocation330_spill] sm:$0xff] }
0x1afc   :  { %13219 = vmatprep.subr.bf16.mxu0 %v20600_v13  ;;  %v20610_v13 = vld [vmem:[#allocation303_spill] sm:$0xff] }
0x1afe   :  { %13193 = vmatpush3.bf16.msra.mxu1 %v20601_v4  ;;  %v20609_v4 = vld [vmem:[#allocation329_spill] sm:$0xff] }
0x1aff   :  { %13194 = vmatprep.subr.bf16.mxu1 %v19968_v24  ;;  %13221 = vmatpush1.bf16.msra.mxu0 %v20602_v49  ;;  %v20613_v49 = vld [vmem:[#allocation304_spill] sm:$0xff] }
0x1b00   :  { %13223 = vmatprep.subr.bf16.mxu0 %v20603_v17  ;;  %v20611_v17 = vld [vmem:[#allocation331_spill] sm:$0xff] }
0x1b02   :  { %13196 = vmatpush3.bf16.msra.mxu1 %v20604_v46  ;;  %v20612_v46 = vld [vmem:[#allocation333_spill] sm:$0xff] }
0x1b03   :  { %13197 = vmatprep.subr.bf16.mxu1 %v19968_v24  ;;  %13225 = vmatpush1.bf16.msra.mxu0 %v20605_v5  ;;  %v20614_v5 = vld [vmem:[#allocation306_spill] sm:$0xff] }
0x1b04   :  { %13227 = vmatprep.subr.bf16.mxu0 %v20606_v48  ;;  %v20615_v48 = vld [vmem:[#allocation335_spill] sm:$0xff] }
0x1b06   :  { %13199 = vmatpush3.bf16.msra.mxu1 %v20607_v21  ;;  %v20616_v21 = vld [vmem:[#allocation337_spill] sm:$0xff] }
0x1b07   :  { %13200 = vmatprep.subr.bf16.mxu1 %v19968_v24  ;;  %13229 = vmatpush1.bf16.msra.mxu0 %v20608_v8  ;;  %v20617_v8 = vld [vmem:[#allocation308_spill] sm:$0xff] }
0x1b08   :  { %13231 = vmatprep.subr.bf16.mxu0 %v20609_v4  ;;  %v20619_v4 = vld [vmem:[#allocation312_spill] sm:$0xff] }
0x1b0a   :  { %13202 = vmatpush3.bf16.msra.mxu1 %v20610_v13  ;;  %v20618_v13 = vld [vmem:[#allocation310_spill] sm:$0xff] }
0x1b0b   :  { %13203 = vmatprep.subr.bf16.mxu1 %v19968_v24  ;;  %13233 = vmatpush1.bf16.msra.mxu0 %v20611_v17  ;;  %v20620_v17 = vld [vmem:[#allocation314_spill] sm:$0xff] }
0x1b0c   :  { %13235 = vmatprep.subr.bf16.mxu0 %v20612_v46  ;;  %v20621_v46 = vld [vmem:[#allocation316_spill] sm:$0xff] }
0x1b0e   :  { %13205 = vmatpush3.bf16.msra.mxu1 %v20613_v49  ;;  %v20622_v49 = vld [vmem:[#allocation318_spill] sm:$0xff] }
0x1b0f   :  { %13239 = vmatprep.subr.bf16.mxu1 %v20614_v5  ;;  %13237 = vmatpush1.bf16.msra.mxu0 %v20615_v48  ;;  %v20623_v5 = vld [vmem:[#allocation320_spill] sm:$0xff]  ;;  %v20624_v48 = vld [vmem:[#allocation322_spill] sm:$0xff] }
0x1b10   :  { %13271 = vmatprep.subr.bf16.mxu0 %v20616_v21  ;;  %v20625_v21 = vld [vmem:[#allocation324_spill] sm:$0xff] }
0x1b11   :  { %11082 = vmatmul.mubr.f32.vlgmr.msra.gmra.mrb[48].mxu1 %v5648_v3  ;;  %v20626_v3 = vld [vmem:[#allocation326_spill] sm:$0xff] }
0x1b12   :  { %13241 = vmatpush1.bf16.msra.mxu1 %v20617_v8  ;;  %5998 = vmatprep.mubr.f32.mxu1 %v19797_v50  ;;  %v20627_v8 = vld [vmem:[#allocation328_spill] sm:$0xff] }
0x1b13   :  { %13243 = vmatprep.subr.bf16.mxu1 %v20618_v13  ;;  %v20629_v13 = vld [vmem:[#allocation332_spill] sm:$0xff] }
0x1b16   :  { %13245 = vmatpush1.bf16.msra.mxu1 %v20619_v4  ;;  %v20630_v4 = vld [vmem:[#allocation334_spill] sm:$0xff] }
0x1b17   :  { %13247 = vmatprep.subr.bf16.mxu1 %v20620_v17  ;;  %v20631_v17 = vld [vmem:[#allocation336_spill] sm:$0xff] }
0x1b1a   :  { %13249 = vmatpush1.bf16.msra.mxu1 %v20621_v46  ;;  %v20632_v46 = vld [vmem:[#allocation338_spill] sm:$0xff] }
0x1b1b   :  { %13251 = vmatprep.subr.bf16.mxu1 %v20622_v49 }
0x1b1e   :  { %13253 = vmatpush1.bf16.msra.mxu1 %v20623_v5 }
0x1b1f   :  { %13255 = vmatprep.subr.bf16.mxu1 %v20624_v48 }
0x1b22   :  { %13257 = vmatpush1.bf16.msra.mxu1 %v20625_v21 }
0x1b23   :  { %13259 = vmatprep.subr.bf16.mxu1 %v20626_v3 }
0x1b26   :  { %13261 = vmatpush1.bf16.msra.mxu1 %v20627_v8 }
0x1b27   :  { %13263 = vmatprep.subr.bf16.mxu1 %v20628_v14 }
0x1b2a   :  { %13265 = vmatpush1.bf16.msra.mxu1 %v20629_v13 }
0x1b2b   :  { %13267 = vmatprep.subr.bf16.mxu1 %v20630_v4 }
0x1b2e   :  { %13269 = vmatpush1.bf16.msra.mxu1 %v20631_v17 }
0x1b2f   :  { %13303 = vmatprep.subr.bf16.mxu1 %v20632_v46 }
0x1bc4   :  { %v5715_v49 = vpop.f32.mrb[36].mxu0  ;;  %v5786_v5 = vpop.f32.mrb[36].mxu1 }
0x1bc5   :  { %v6221_v48 = vadd.f32 %v5715_v49, %v20633_v30  ;;  %v5717_v15 = vpop.f32.mrb[37].mxu0  ;;  %v5788_v21 = vpop.f32.mrb[37].mxu1  ;;  %v6223_v13 = vadd.f32 %v5786_v5, %v20329_v0  ;;  %v20643_v5 = vld [vmem:[#allocation372_spill] sm:$0xff] }
0x1bc6   :  { %v6222_v3 = vadd.f32 %v5717_v15, %v20328_v32 }
0x1bc7   :  { %v9800_v2 = vmul.f32 -1.442695, %v6221_v48 }
0x1bc8   :  { %v9801_v8 = vmul.f32 -1.442695, %v6222_v3  ;;  %v20644_v3 = vld [vmem:[#allocation373_spill] sm:$0xff] }
0x1bc9   :  { %14856 = vpow2.f32 %v9800_v2 }
0x1bca   :  { %14858 = vpow2.f32 %v9801_v8 }
0x1bcb   :  { %14860 = vtanh.f32 %v6223_v13 }
0x1bd3   :  { %v14857_v14 = vpop.eup %14856 }
0x1bd4   :  { %v14859_v4 = vpop.eup %14858  ;;  %v6228_v29 = vadd.f32 1.0, %v14857_v14  ;;  %v14960_v14 = vld [vmem:[%s18972_s18] ss:$0 sm:$0xff] }
0x1bd5   :  { %v6234_v17 = vadd.f32 1.0, %v14859_v4  ;;  %v14861_v46 = vpop.eup %14860 }
0x1bd6   :  { %14862 = vrcp.f32 %v6228_v29  ;;  %v20639_v29 = vld [vmem:[#allocation368_spill] sm:$0xff] }
0x1bd7   :  { %14864 = vrcp.f32 %v6234_v17  ;;  %v20641_v17 = vld [vmem:[#allocation370_spill] sm:$0xff] }
0x1be0   :  { %v14863_v53 = vpop.eup %14862 }
0x1be1   :  { %v14865_v49 = vpop.eup %14864  ;;  %v6245_v30 = vmul.f32 %v14863_v53, %v14861_v46  ;;  %v20638_v53 = vld [vmem:[#allocation367_spill] sm:$0xff] }
0x1be2   :  { %v6244_v9 = vmul.f32 %v14865_v49, %v17259_v7  ;;  %v20635_v7 = vld [vmem:[#allocation359_spill] sm:$0xff] }
0x1be3   :  { %v20642_v46 = vld [vmem:[#allocation371_spill] sm:$0xff] }
0x1be4   :  { %v17707_v15 = vadd.f32 %v6245_v30, %v6244_v9  ;;  %v5857_v48 = vpop.f32.mrb[48].mxu1  ;;  %v20637_v9 = vld [vmem:[#allocation366_spill] sm:$0xff]  ;;  %v20640_v30 = vld [vmem:[#allocation369_spill] sm:$0xff] }
0x1be5   :  { %v5861_v2 = vadd.f32 %v5857_v48, %v17514_v61  ;;  %v11083_v8 = vpop.f32.mrb[49].mxu1  ;;  %v20636_v61 = vld [vmem:[#allocation363_spill] sm:$0xff]  ;;  %v6224_v4 = vadd.f32 %v5788_v21, %v20640_v30  ;;  %v20648_v21 = vld [vmem:[#allocation52_spill] sm:$0xff] }
0x1be6   :  { %v20645_v48 = vld [vmem:[#allocation39_spill] sm:$0xff]  ;;  %v20647_v8 = vld [vmem:[#allocation40_spill] sm:$0xff] }
0x1be7   :  { %v17713_v13 = vadd.f32 %v14960_v14, %v5861_v2  ;;  %v9802_v49 = vmul.f32 -1.442695, %v6224_v4  ;;  %v20646_v2 = vld [vmem:[#allocation50_spill] sm:$0xff]  ;;  %v20649_v14 = vld [vmem:[#allocation41_spill] sm:$0xff] }
0x1be8   :  { %v20651_v4 = vld [vmem:[#allocation42_spill] sm:$0xff] }
0x1be9   :  { %20634 = vst [vmem:[#allocation382_spill] sm:$0xff] %v17713_v13  ;;  %5928 = vmatmul.mubr.f32.vlgmr.msra.gmra.mrb[50].mxu0 %v17713_v13  ;;  %5999 = vmatmul.mubr.f32.vlgmr.msra.gmra.mrb[50].mxu1 %v17713_v13  ;;  %14866 = vpow2.f32 %v9802_v49  ;;  %v20657_v49 = vld [vmem:[#allocation45_spill] sm:$0xff] }
0x1bea   :  { %13273 = vmatpush1.bf16.msra.mxu0 %v16752_v43  ;;  %13305 = vmatpush1.bf16.msra.mxu1 %v16754_v63  ;;  %14868 = vtanh.f32 %v17707_v15 }
0x1beb   :  { %13275 = vmatprep.subr.bf16.mxu0 %v16758_v45  ;;  %13307 = vmatprep.subr.bf16.mxu1 %v20331_v19 }
0x1bec   :  { %6069 = vmatprep.mubr.f32.mxu0 %v19797_v50  ;;  %6140 = vmatprep.mubr.f32.mxu1 %v19797_v50 }
0x1bee   :  { %13277 = vmatpush1.bf16.msra.mxu0 %v20332_v11  ;;  %13309 = vmatpush1.bf16.msra.mxu1 %v20333_v12 }
0x1bef   :  { %13279 = vmatprep.subr.bf16.mxu0 %v20334_v26  ;;  %13311 = vmatprep.subr.bf16.mxu1 %v20335_v28 }
0x1bf2   :  { %13281 = vmatpush1.bf16.msra.mxu0 %v20336_v16  ;;  %13313 = vmatpush1.bf16.msra.mxu1 %v20337_v18 }
0x1bf3   :  { %13283 = vmatprep.subr.bf16.mxu0 %v20338_v6  ;;  %13315 = vmatprep.subr.bf16.mxu1 %v20339_v59 }
0x1bf6   :  { %13285 = vmatpush1.bf16.msra.mxu0 %v20340_v44  ;;  %13317 = vmatpush1.bf16.msra.mxu1 %v20341_v58 }
0x1bf7   :  { %13287 = vmatprep.subr.bf16.mxu0 %v16798_v41  ;;  %13319 = vmatprep.subr.bf16.mxu1 %v20342_v52  ;;  %v14971_v41 = vld [vmem:[#allocation15 + $0x38] sm:$0xff] }
0x1bfa   :  { %13289 = vmatpush1.bf16.msra.mxu0 %v20635_v7  ;;  %13321 = vmatpush1.bf16.msra.mxu1 %v20344_v27  ;;  %v14969_v27 = vld [vmem:[#allocation15 + $0x18] sm:$0xff]  ;;  %v14970_v7 = vld [vmem:[#allocation15 + $0x28] sm:$0xff] }
0x1bfb   :  { %13291 = vmatprep.subr.bf16.mxu0 %v16810_v47  ;;  %13323 = vmatprep.subr.bf16.mxu1 %v20345_v60  ;;  %v14968_v47 = vld [vmem:[#allocation15 + $0x8] sm:$0xff] }
0x1bfe   :  { %13293 = vmatpush1.bf16.msra.mxu0 %v20636_v61  ;;  %13325 = vmatpush1.bf16.msra.mxu1 %v16818_v33  ;;  %v14966_v33 = vld [vmem:[#allocation15 + $0x20] sm:$0xff]  ;;  %v14967_v61 = vld [vmem:[#allocation15 + $0x30] sm:$0xff] }
0x1bff   :  { %13295 = vmatprep.subr.bf16.mxu0 %v16823_v40  ;;  %13327 = vmatprep.subr.bf16.mxu1 %v20637_v9 }
0x1c02   :  { %13297 = vmatpush1.bf16.msra.mxu0 %v20638_v53  ;;  %13329 = vmatpush1.bf16.msra.mxu1 %v20639_v29 }
0x1c03   :  { %13299 = vmatprep.subr.bf16.mxu0 %v20641_v17  ;;  %13331 = vmatprep.subr.bf16.mxu1 %v20642_v46  ;;  %v20650_v46 = vld [vmem:[#allocation53_spill] sm:$0xff]  ;;  %v20663_v17 = vld [vmem:[#allocation48_spill] sm:$0xff] }
0x1c06   :  { %13301 = vmatpush1.bf16.msra.mxu0 %v20643_v5  ;;  %13333 = vmatpush1.bf16.msra.mxu1 %v20644_v3  ;;  %v20659_v3 = vld [vmem:[#allocation46_spill] sm:$0xff] }
0x1c07   :  { %13335 = vmatprep.subr.bf16.mxu0 %v20645_v48  ;;  %13367 = vmatprep.subr.bf16.mxu1 %v20646_v2  ;;  %v20652_v2 = vld [vmem:[#allocation55_spill] sm:$0xff]  ;;  %v20660_v5 = vld [vmem:[#allocation62_spill] sm:$0xff] }
0x1c08   :  { %v20653_v48 = vld [vmem:[#allocation43_spill] sm:$0xff] }
0x1c09   :  { %6070 = vmatmul.mubr.f32.vlgmr.msra.gmra.mrb[52].mxu0 %v17713_v13  ;;  %6141 = vmatmul.mubr.f32.vlgmr.msra.gmra.mrb[52].mxu1 %v17713_v13  ;;  %v20654_v13 = vld [vmem:[#allocation56_spill] sm:$0xff] }
0x1c0a   :  { %13337 = vmatpush1.bf16.msra.mxu0 %v20647_v8  ;;  %13369 = vmatpush1.bf16.msra.mxu1 %v20648_v21  ;;  %v20655_v8 = vld [vmem:[#allocation44_spill] sm:$0xff]  ;;  %v20656_v21 = vld [vmem:[#allocation59_spill] sm:$0xff] }
0x1c0b   :  { %13339 = vmatprep.subr.bf16.mxu0 %v20649_v14  ;;  %13371 = vmatprep.subr.bf16.mxu1 %v20650_v46  ;;  %v20658_v14 = vld [vmem:[#allocation60_spill] sm:$0xff]  ;;  %v14867_v46 = vpop.eup %14866 }
0x1c0c   :  { %6313 = vmatprep.mubr.f32.mxu0 %v19797_v50  ;;  %6384 = vmatprep.mubr.f32.mxu1 %v19797_v50 }
0x1c0e   :  { %13341 = vmatpush1.bf16.msra.mxu0 %v20651_v4  ;;  %13373 = vmatpush1.bf16.msra.mxu1 %v20652_v2  ;;  %v20661_v4 = vld [vmem:[#allocation47_spill] sm:$0xff] }
0x1c0f   :  { %13343 = vmatprep.subr.bf16.mxu0 %v20653_v48  ;;  %13375 = vmatprep.subr.bf16.mxu1 %v20654_v13  ;;  %v20662_v2 = vld [vmem:[#allocation63_spill] sm:$0xff]  ;;  %v6241_v48 = vadd.f32 1.0, %v14867_v46  ;;  %v20664_v13 = vld [vmem:[#allocation64_spill] sm:$0xff]  ;;  %v20671_v46 = vld [vmem:[#allocation57_spill] sm:$0xff] }
0x1c11   :  { %14870 = vrcp.f32 %v6241_v48  ;;  %v20676_v48 = vld [vmem:[#allocation70_spill] sm:$0xff] }
0x1c12   :  { %13345 = vmatpush1.bf16.msra.mxu0 %v20655_v8  ;;  %13377 = vmatpush1.bf16.msra.mxu1 %v20656_v21  ;;  %v20665_v21 = vld [vmem:[#allocation49_spill] sm:$0xff] }
0x1c13   :  { %13347 = vmatprep.subr.bf16.mxu0 %v20657_v49  ;;  %13379 = vmatprep.subr.bf16.mxu1 %v20658_v14  ;;  %v20666_v49 = vld [vmem:[#allocation65_spill] sm:$0xff]  ;;  %v20667_v14 = vld [vmem:[#allocation51_spill] sm:$0xff] }
0x1c16   :  { %13349 = vmatpush1.bf16.msra.mxu0 %v20659_v3  ;;  %13381 = vmatpush1.bf16.msra.mxu1 %v20660_v5  ;;  %v20668_v3 = vld [vmem:[#allocation66_spill] sm:$0xff] }
0x1c17   :  { %13351 = vmatprep.subr.bf16.mxu0 %v20661_v4  ;;  %13383 = vmatprep.subr.bf16.mxu1 %v20662_v2  ;;  %v20669_v5 = vld [vmem:[#allocation54_spill] sm:$0xff]  ;;  %v20670_v4 = vld [vmem:[#allocation67_spill] sm:$0xff]  ;;  %v20674_v2 = vld [vmem:[#allocation69_spill] sm:$0xff] }
0x1c1a   :  { %13353 = vmatpush1.bf16.msra.mxu0 %v20663_v17  ;;  %13385 = vmatpush1.bf16.msra.mxu1 %v20664_v13  ;;  %v20672_v17 = vld [vmem:[#allocation68_spill] sm:$0xff]  ;;  %v20673_v13 = vld [vmem:[#allocation58_spill] sm:$0xff] }
0x1c1b   :  { %13355 = vmatprep.subr.bf16.mxu0 %v20665_v21  ;;  %13387 = vmatprep.subr.bf16.mxu1 %v20666_v49  ;;  %v14869_v21 = vpop.eup %14868  ;;  %v20675_v49 = vld [vmem:[#allocation61_spill] sm:$0xff] }
0x1c1c   :  { %v14871_v8 = vpop.eup %14870 }
0x1c1e   :  { %13357 = vmatpush1.bf16.msra.mxu0 %v20667_v14  ;;  %13389 = vmatpush1.bf16.msra.mxu1 %v20668_v3  ;;  %v6248_v14 = vmul.f32 %v14871_v8, %v14869_v21  ;;  %v20679_v8 = vld [vmem:[#allocation73_spill] sm:$0xff]  ;;  %v20680_v21 = vld [vmem:[#allocation74_spill] sm:$0xff]  ;;  %v20725_v3 = vld [vmem:[#allocation103_spill] sm:$0xff] }
0x1c1f   :  { %13359 = vmatprep.subr.bf16.mxu0 %v20669_v5  ;;  %13391 = vmatprep.subr.bf16.mxu1 %v20670_v4  ;;  %v20699_v4 = vld [vmem:[#allocation97_spill] sm:$0xff]  ;;  %v20706_v5 = vld [vmem:[#allocation112_spill] sm:$0xff] }
0x1c22   :  { %13361 = vmatpush1.bf16.msra.mxu0 %v20671_v46  ;;  %13393 = vmatpush1.bf16.msra.mxu1 %v20672_v17  ;;  %v20677_v46 = vld [vmem:[#allocation71_spill] sm:$0xff]  ;;  %v20697_v17 = vld [vmem:[#allocation93_spill] sm:$0xff] }
0x1c23   :  { %13363 = vmatprep.subr.bf16.mxu0 %v20673_v13  ;;  %13395 = vmatprep.subr.bf16.mxu1 %v20674_v2  ;;  %v20678_v2 = vld [vmem:[#allocation72_spill] sm:$0xff] }
0x1c24   :  { %v20693_v13 = vld [vmem:[#allocation88_spill] sm:$0xff] }
0x1c26   :  { %13365 = vmatpush1.bf16.msra.mxu0 %v20675_v49  ;;  %13397 = vmatpush1.bf16.msra.mxu1 %v20676_v48  ;;  %v20682_v48 = vld [vmem:[#allocation76_spill] sm:$0xff]  ;;  %v20684_v49 = vld [vmem:[#allocation78_spill] sm:$0xff] }
0x1c27   :  { %13398 = vmatprep.subr.bf16.mxu0 %v19968_v24  ;;  %13422 = vmatprep.subr.bf16.mxu1 %v19968_v24 }
0x1c29   :  { %6314 = vmatmul.mubr.f32.vlgmr.msra.gmra.mrb[54].mxu0 %v6248_v14  ;;  %6385 = vmatmul.mubr.f32.vlgmr.msra.gmra.mrb[54].mxu1 %v6248_v14 }
0x1c2a   :  { %13400 = vmatpush3.bf16.msra.mxu0 %v20677_v46  ;;  %11116 = vmatprep.mubr.msk.f32.mxu0 %vm15358_vm0, %v19797_v50  ;;  %v20681_v46 = vld [vmem:[#allocation75_spill] sm:$0xff] }
0x1c2b   :  { %13401 = vmatprep.subr.bf16.mxu0 %v19968_v24  ;;  %13424 = vmatpush3.bf16.msra.mxu1 %v20678_v2  ;;  %v20683_v2 = vld [vmem:[#allocation77_spill] sm:$0xff] }
0x1c2c   :  { %13425 = vmatprep.subr.bf16.mxu1 %v19968_v24  ;;  %11151 = vmatprep.mubr.msk.f32.mxu1 %vm15358_vm0, %v19797_v50 }
0x1c2e   :  { %13403 = vmatpush3.bf16.msra.mxu0 %v20679_v8  ;;  %v20685_v8 = vld [vmem:[#allocation79_spill] sm:$0xff] }
0x1c2f   :  { %13404 = vmatprep.subr.bf16.mxu0 %v19968_v24  ;;  %13427 = vmatpush3.bf16.msra.mxu1 %v20680_v21  ;;  %v20686_v21 = vld [vmem:[#allocation80_spill] sm:$0xff] }
0x1c30   :  { %13428 = vmatprep.subr.bf16.mxu1 %v19968_v24 }
0x1c32   :  { %13406 = vmatpush3.bf16.msra.mxu0 %v20681_v46  ;;  %v20687_v46 = vld [vmem:[#allocation81_spill] sm:$0xff] }
0x1c33   :  { %13407 = vmatprep.subr.bf16.mxu0 %v19968_v24  ;;  %13430 = vmatpush3.bf16.msra.mxu1 %v20682_v48  ;;  %v20688_v48 = vld [vmem:[#allocation82_spill] sm:$0xff] }
0x1c34   :  { %13431 = vmatprep.subr.bf16.mxu1 %v19968_v24 }
0x1c36   :  { %13409 = vmatpush3.bf16.msra.mxu0 %v20683_v2  ;;  %v20689_v2 = vld [vmem:[#allocation83_spill] sm:$0xff] }
0x1c37   :  { %13410 = vmatprep.subr.bf16.mxu0 %v19968_v24  ;;  %13433 = vmatpush3.bf16.msra.mxu1 %v20684_v49  ;;  %v20690_v49 = vld [vmem:[#allocation84_spill] sm:$0xff] }
0x1c38   :  { %13434 = vmatprep.subr.bf16.mxu1 %v19968_v24 }
0x1c3a   :  { %13412 = vmatpush3.bf16.msra.mxu0 %v20685_v8  ;;  %v20691_v8 = vld [vmem:[#allocation85_spill] sm:$0xff] }
0x1c3b   :  { %13413 = vmatprep.subr.bf16.mxu0 %v19968_v24  ;;  %13436 = vmatpush3.bf16.msra.mxu1 %v20686_v21  ;;  %v20692_v21 = vld [vmem:[#allocation86_spill] sm:$0xff] }
0x1c3c   :  { %13437 = vmatprep.subr.bf16.mxu1 %v19968_v24 }
0x1c3e   :  { %13415 = vmatpush3.bf16.msra.mxu0 %v20687_v46  ;;  %v20694_v46 = vld [vmem:[#allocation90_spill] sm:$0xff] }
0x1c3f   :  { %13416 = vmatprep.subr.bf16.mxu0 %v19968_v24  ;;  %13439 = vmatpush3.bf16.msra.mxu1 %v20688_v48  ;;  %v20695_v48 = vld [vmem:[#allocation89_spill] sm:$0xff] }
0x1c40   :  { %13440 = vmatprep.subr.bf16.mxu1 %v19968_v24 }
0x1c42   :  { %13418 = vmatpush3.bf16.msra.mxu0 %v20689_v2  ;;  %v20696_v2 = vld [vmem:[#allocation92_spill] sm:$0xff] }
0x1c43   :  { %13419 = vmatprep.subr.bf16.mxu0 %v19968_v24  ;;  %13442 = vmatpush3.bf16.msra.mxu1 %v20690_v49  ;;  %v20698_v49 = vld [vmem:[#allocation96_spill] sm:$0xff] }
0x1c44   :  { %13443 = vmatprep.subr.bf16.mxu1 %v19968_v24 }
0x1c46   :  { %13421 = vmatpush3.bf16.msra.mxu0 %v20691_v8  ;;  %v20700_v8 = vld [vmem:[#allocation100_spill] sm:$0xff] }
0x1c47   :  { %13445 = vmatpush3.bf16.msra.mxu1 %v20692_v21  ;;  %13447 = vmatprep.subr.bf16.mxu0 %v20693_v13  ;;  %v20701_v21 = vld [vmem:[#allocation102_spill] sm:$0xff]  ;;  %v20702_v13 = vld [vmem:[#allocation104_spill] sm:$0xff] }
0x1c48   :  { %13479 = vmatprep.subr.bf16.mxu1 %v20694_v46  ;;  %v20703_v46 = vld [vmem:[#allocation106_spill] sm:$0xff] }
0x1c49   :  { %11117 = vmatmul.mubr.f32.vlgmr.msra.gmra.mrb[56].mxu0 %v6248_v14  ;;  %v20704_v14 = vld [vmem:[#allocation108_spill] sm:$0xff] }
0x1c4a   :  { %13449 = vmatpush1.bf16.msra.mxu0 %v20695_v48  ;;  %6626 = vmatprep.mubr.f32.mxu0 %v19797_v50  ;;  %v20705_v48 = vld [vmem:[#allocation110_spill] sm:$0xff] }
0x1c4b   :  { %13451 = vmatprep.subr.bf16.mxu0 %v20696_v2  ;;  %v20707_v2 = vld [vmem:[#allocation114_spill] sm:$0xff] }
0x1c4e   :  { %13453 = vmatpush1.bf16.msra.mxu0 %v20697_v17  ;;  %v20708_v17 = vld [vmem:[#allocation116_spill] sm:$0xff] }
0x1c4f   :  { %13455 = vmatprep.subr.bf16.mxu0 %v20698_v49  ;;  %v20709_v49 = vld [vmem:[#allocation117_spill] sm:$0xff] }
0x1c52   :  { %13457 = vmatpush1.bf16.msra.mxu0 %v20699_v4  ;;  %v20710_v4 = vld [vmem:[#allocation120_spill] sm:$0xff] }
0x1c53   :  { %13459 = vmatprep.subr.bf16.mxu0 %v20700_v8 }
0x1c56   :  { %13461 = vmatpush1.bf16.msra.mxu0 %v20701_v21 }
0x1c57   :  { %13463 = vmatprep.subr.bf16.mxu0 %v20702_v13 }
0x1c5a   :  { %13465 = vmatpush1.bf16.msra.mxu0 %v20703_v46 }
0x1c5b   :  { %13467 = vmatprep.subr.bf16.mxu0 %v20704_v14 }
0x1c5e   :  { %13469 = vmatpush1.bf16.msra.mxu0 %v20705_v48 }
0x1c5f   :  { %13471 = vmatprep.subr.bf16.mxu0 %v20706_v5 }
0x1c62   :  { %13473 = vmatpush1.bf16.msra.mxu0 %v20707_v2 }
0x1c63   :  { %13475 = vmatprep.subr.bf16.mxu0 %v20708_v17 }
0x1c66   :  { %13477 = vmatpush1.bf16.msra.mxu0 %v20709_v49 }
0x1c67   :  { %13511 = vmatprep.subr.bf16.mxu0 %v20710_v4  ;;  %v14961_v4 = vld [vmem:[%s18966_s12] ss:$0 sm:$0xff] }
0x1cbc   :  { %v17842_v8 = vpop.f32.mrb[50].mxu0  ;;  %v17844_v21 = vpop.f32.mrb[50].mxu1 }
0x1cbd   :  { %20711 = vst [vmem:[#allocation122_spill] sm:$0xff] %v17842_v8  ;;  %20712 = vst [vmem:[#allocation244_spill] sm:$0xff] %v17844_v21  ;;  %v17846_v13 = vpop.f32.mrb[51].mxu0  ;;  %v17848_v46 = vpop.f32.mrb[51].mxu1 }
0x1cbe   :  { %20713 = vst [vmem:[#allocation245_spill] sm:$0xff] %v17846_v13  ;;  %20714 = vst [vmem:[#allocation246_spill] sm:$0xff] %v17848_v46  ;;  %v20719_v13 = vld [vmem:[#allocation91_spill] sm:$0xff]  ;;  %v20724_v46 = vld [vmem:[#allocation101_spill] sm:$0xff] }
0x1cdc   :  { %v17850_v14 = vpop.f32.mrb[52].mxu0  ;;  %v17852_v48 = vpop.f32.mrb[52].mxu1 }
0x1cdd   :  { %20715 = vst [vmem:[#allocation247_spill] sm:$0xff] %v17850_v14  ;;  %20716 = vst [vmem:[#allocation248_spill] sm:$0xff] %v17852_v48  ;;  %v17854_v5 = vpop.f32.mrb[53].mxu0  ;;  %v17856_v2 = vpop.f32.mrb[53].mxu1  ;;  %v20720_v14 = vld [vmem:[#allocation94_spill] sm:$0xff]  ;;  %v20721_v48 = vld [vmem:[#allocation95_spill] sm:$0xff] }
0x1cde   :  { %20717 = vst [vmem:[#allocation369_spill] sm:$0xff] %v17854_v5  ;;  %20718 = vst [vmem:[#allocation383_spill] sm:$0xff] %v17856_v2  ;;  %v20722_v5 = vld [vmem:[#allocation98_spill] sm:$0xff]  ;;  %v20723_v2 = vld [vmem:[#allocation99_spill] sm:$0xff] }
0x1d1c   :  { %v6457_v17 = vpop.f32.mrb[56].mxu0 }
0x1d1d   :  { %v6461_v8 = vadd.f32 %v14961_v4, %v6457_v17  ;;  %v11118_v49 = vpop.f32.mrb[57].mxu0  ;;  %v20726_v17 = vld [vmem:[#allocation105_spill] sm:$0xff]  ;;  %v20727_v4 = vld [vmem:[#allocation107_spill] sm:$0xff] }
0x1d1e   :  { %v20728_v49 = vld [vmem:[#allocation109_spill] sm:$0xff] }
0x1d1f   :  { %v6462_v21 = vmax.f32 %v6461_v8, 0.0  ;;  %v20729_v8 = vld [vmem:[#allocation111_spill] sm:$0xff] }
0x1d21   :  { %11152 = vmatmul.mubr.f32.vlgmr.msra.gmra.mrb[56].mxu1 %v6462_v21  ;;  %v20730_v21 = vld [vmem:[#allocation113_spill] sm:$0xff] }
0x1d22   :  { %13481 = vmatpush1.bf16.msra.mxu1 %v20719_v13  ;;  %6697 = vmatprep.mubr.f32.mxu1 %v19797_v50 }
0x1d23   :  { %13483 = vmatprep.subr.bf16.mxu1 %v20720_v14  ;;  %v20731_v14 = vld [vmem:[#allocation115_spill] sm:$0xff] }
0x1d26   :  { %13485 = vmatpush1.bf16.msra.mxu1 %v20721_v48  ;;  %v20732_v48 = vld [vmem:[#allocation118_spill] sm:$0xff] }
0x1d27   :  { %13487 = vmatprep.subr.bf16.mxu1 %v20722_v5  ;;  %v20733_v5 = vld [vmem:[#allocation119_spill] sm:$0xff] }
0x1d2a   :  { %13489 = vmatpush1.bf16.msra.mxu1 %v20723_v2  ;;  %v20734_v2 = vld [vmem:[#allocation121_spill] sm:$0xff] }
0x1d2b   :  { %13491 = vmatprep.subr.bf16.mxu1 %v20724_v46 }
0x1d2e   :  { %13493 = vmatpush1.bf16.msra.mxu1 %v20725_v3  ;;  %v20735_v3 = vld [vmem:[#allocation87_spill] sm:$0xff] }
0x1d2f   :  { %13495 = vmatprep.subr.bf16.mxu1 %v20726_v17  ;;  %v9796_v17 = vsel %vm4812_vm14, 1.0, %v19797_v50 }
0x1d30   :  { %vm4815_vm15 = vcmp.gt.f32.partialorder %v9796_v17, 0.0 }
0x1d31   :  { %vm4816_vm1 = vmand %vm4815_vm15, %vm946_vm4 }
0x1d32   :  { %13497 = vmatpush1.bf16.msra.mxu1 %v20727_v4 }
0x1d33   :  { %13499 = vmatprep.subr.bf16.mxu1 %v20728_v49  ;;  %v20737_v49 = vld [vmem:[#allocation340_spill] sm:$0xff] }
0x1d36   :  { %13501 = vmatpush1.bf16.msra.mxu1 %v20729_v8 }
0x1d37   :  { %13503 = vmatprep.subr.bf16.mxu1 %v20730_v21 }
0x1d3a   :  { %13505 = vmatpush1.bf16.msra.mxu1 %v20731_v14  ;;  %v14962_v14 = vld [vmem:[%s18968_s14] ss:$0 sm:$0xff] }
0x1d3b   :  { %13507 = vmatprep.subr.bf16.mxu1 %v20732_v48 }
0x1d3e   :  { %13509 = vmatpush1.bf16.msra.mxu1 %v20733_v5  ;;  %v17888_v5 = vsel %vm4816_vm1, -10000000.0, %v20737_v49 }
0x1d3f   :  { %13543 = vmatprep.subr.bf16.mxu1 %v20734_v2  ;;  %20738 = vst [vmem:[#allocation341_spill] sm:$0xff] %v17888_v5 }
0x1df4   :  { %v6530_v8 = vpop.f32.mrb[56].mxu1 }
0x1df5   :  { %v6531_v21 = vadd.f32 %v14962_v14, %v6530_v8  ;;  %v11153_v48 = vpop.f32.mrb[57].mxu1 }
0x1df7   :  { %v6534_v2 = vadd.f32 %v6531_v21, %v17888_v5 }
0x1df9   :  { %6536 = vst [vmem:[#allocation27 + $0x18] sm:$0xff] %v6534_v2  ;;  %6537 = vmax.xlane.f32.xlu1 %v6534_v2 }
0x1e86   :  { %v6538_v46 = vpop.xlane.xlu1 %6537 }
0x1e87   :  { %vm6539_vm2 = vcmp.eq.f32.partialorder %v6534_v2, %v6538_v46  ;;  %v20740_v2 = vmov 1.0   ;;  %v20747_v46 = vld [vmem:[#allocation129_spill] sm:$0xff] }
0x1e88   :  { %v6540_v17 = vsel %vm6539_vm2, %v20735_v3, 128 }
0x1e89   :  { %v6542_v4 = vshra.s32 %v6540_v17, 16  ;;  %v6541_v29 = vand.u32 65535, %v6540_v17  ;;  %v20748_v17 = vld [vmem:[#allocation130_spill] sm:$0xff] }
0x1e8b   :  { %v6544_v13 = vcvt.s32.f32 %v6542_v4  ;;  %v6543_v9 = vcvt.s32.f32 %v6541_v29  ;;  %v20745_v29 = vld [vmem:[#allocation127_spill] sm:$0xff]  ;;  %v20746_v4 = vld [vmem:[#allocation128_spill] sm:$0xff] }
0x1e8d   :  { %6545 = vmin.xlane.f32.xlu0 %v6544_v13 }
0x1f1a   :  { %v6546_v53 = vpop.xlane.xlu0 %6545 }
0x1f1b   :  { %vm6547_vm3 = vcmp.eq.f32.partialorder %v6544_v13, %v6546_v53  ;;  %v6552_v48 = vcvt.f32.s32 %v6546_v53  ;;  %v20741_v13 = vld [vmem:[#allocation123_spill] sm:$0xff]  ;;  %v20744_v53 = vld [vmem:[#allocation126_spill] sm:$0xff] }
0x1f1c   :  { %v6548_v14 = vsel %vm6547_vm3, %v6543_v9, inf  ;;  %v20742_v9 = vld [vmem:[#allocation124_spill] sm:$0xff] }
0x1f1d   :  { %6549 = vmin.xlane.f32.xlu1 %v6548_v14  ;;  %v6553_v8 = vshll.u32 %v6552_v48, 16  ;;  %v20749_v14 = vld [vmem:[#allocation131_spill] sm:$0xff]  ;;  %v20750_v48 = vld [vmem:[#allocation132_spill] sm:$0xff] }
0x1faa   :  { %v6550_v49 = vpop.xlane.xlu1 %6549 }
0x1fab   :  { %v6551_v40 = vcvt.f32.s32 %v6550_v49  ;;  %v20751_v49 = vld [vmem:[#allocation133_spill] sm:$0xff] }
0x1fad   :  { %v17892_v21 = vadd.s32 %v6553_v8, %v6551_v40  ;;  %v20743_v40 = vld [vmem:[#allocation125_spill] sm:$0xff]  ;;  %v20752_v8 = vld [vmem:[#allocation134_spill] sm:$0xff] }
0x1faf   :  { %20739 = vst [vmem:[#allocation340_spill] sm:$0xff] %v17892_v21  ;;  %vm6555_vm5 = vcmp.eq.s32.totalorder %v20735_v3, %v17892_v21  ;;  %v14964_v21 = vld [vmem:[#allocation15] sm:$0xff]  ;;  %v14965_v3 = vld [vmem:[#allocation15 + $0x10] sm:$0xff] }
0x1fb0   :  { %9804 = vmatmul.mubr.msk.f32.vlgmr.msra.gmra.mrb[54].mxu0 %vm6555_vm5, %v20740_v2  ;;  %9805 = vmatmul.mubr.msk.f32.vlgmr.msra.gmra.mrb[54].mxu1 %vm6555_vm5, %v20740_v2 }
0x1fb1   :  { %13513 = vmatpush1.bf16.msra.mxu0 %v20741_v13  ;;  %6768 = vmatprep.mubr.f32.mxu0 %v19797_v50  ;;  %v20802_v13 = vld [vmem:[#allocation184_spill] sm:$0xff] }
0x1fb2   :  { %13515 = vmatprep.subr.bf16.mxu0 %v20742_v9  ;;  %13545 = vmatpush1.bf16.msra.mxu1 %v20743_v40  ;;  %v20753_v40 = vld [vmem:[#allocation135_spill] sm:$0xff]  ;;  %v20755_v9 = vld [vmem:[#allocation137_spill] sm:$0xff] }
0x1fb3   :  { %13547 = vmatprep.subr.bf16.mxu1 %v20744_v53  ;;  %6840 = vmatprep.mubr.f32.mxu1 %v19797_v50  ;;  %v20754_v53 = vld [vmem:[#allocation136_spill] sm:$0xff] }
0x1fb5   :  { %13517 = vmatpush1.bf16.msra.mxu0 %v20745_v29  ;;  %v20756_v29 = vld [vmem:[#allocation138_spill] sm:$0xff] }
0x1fb6   :  { %13519 = vmatprep.subr.bf16.mxu0 %v20746_v4  ;;  %13549 = vmatpush1.bf16.msra.mxu1 %v20747_v46  ;;  %v20757_v4 = vld [vmem:[#allocation139_spill] sm:$0xff]  ;;  %v20758_v46 = vld [vmem:[#allocation140_spill] sm:$0xff] }
0x1fb7   :  { %13551 = vmatprep.subr.bf16.mxu1 %v20748_v17  ;;  %v20759_v17 = vld [vmem:[#allocation141_spill] sm:$0xff] }
0x1fb9   :  { %13521 = vmatpush1.bf16.msra.mxu0 %v20749_v14  ;;  %v20760_v14 = vld [vmem:[#allocation142_spill] sm:$0xff] }
0x1fba   :  { %13523 = vmatprep.subr.bf16.mxu0 %v20750_v48  ;;  %13553 = vmatpush1.bf16.msra.mxu1 %v20751_v49  ;;  %v20761_v48 = vld [vmem:[#allocation143_spill] sm:$0xff]  ;;  %v20762_v49 = vld [vmem:[#allocation144_spill] sm:$0xff] }
0x1fbb   :  { %13555 = vmatprep.subr.bf16.mxu1 %v20752_v8  ;;  %v20763_v8 = vld [vmem:[#allocation145_spill] sm:$0xff] }
0x1fbd   :  { %13525 = vmatpush1.bf16.msra.mxu0 %v20753_v40  ;;  %v20764_v40 = vld [vmem:[#allocation146_spill] sm:$0xff] }
0x1fbe   :  { %13527 = vmatprep.subr.bf16.mxu0 %v20754_v53  ;;  %13557 = vmatpush1.bf16.msra.mxu1 %v20755_v9  ;;  %v20765_v53 = vld [vmem:[#allocation147_spill] sm:$0xff]  ;;  %v20766_v9 = vld [vmem:[#allocation148_spill] sm:$0xff] }
0x1fbf   :  { %13559 = vmatprep.subr.bf16.mxu1 %v20756_v29  ;;  %v20767_v29 = vld [vmem:[#allocation149_spill] sm:$0xff] }
0x1fc1   :  { %13529 = vmatpush1.bf16.msra.mxu0 %v20757_v4  ;;  %v20768_v4 = vld [vmem:[#allocation150_spill] sm:$0xff] }
0x1fc2   :  { %13531 = vmatprep.subr.bf16.mxu0 %v20758_v46  ;;  %13561 = vmatpush1.bf16.msra.mxu1 %v20759_v17  ;;  %v20769_v46 = vld [vmem:[#allocation151_spill] sm:$0xff]  ;;  %v20770_v17 = vld [vmem:[#allocation152_spill] sm:$0xff] }
0x1fc3   :  { %13563 = vmatprep.subr.bf16.mxu1 %v20760_v14  ;;  %v20771_v14 = vld [vmem:[#allocation153_spill] sm:$0xff] }
0x1fc5   :  { %13533 = vmatpush1.bf16.msra.mxu0 %v20761_v48  ;;  %v20772_v48 = vld [vmem:[#allocation169_spill] sm:$0xff] }
0x1fc6   :  { %13535 = vmatprep.subr.bf16.mxu0 %v20762_v49  ;;  %13565 = vmatpush1.bf16.msra.mxu1 %v20763_v8  ;;  %v20782_v8 = vld [vmem:[#allocation163_spill] sm:$0xff]  ;;  %v20784_v49 = vld [vmem:[#allocation165_spill] sm:$0xff] }
0x1fc7   :  { %13567 = vmatprep.subr.bf16.mxu1 %v20764_v40  ;;  %v20781_v40 = vld [vmem:[#allocation162_spill] sm:$0xff] }
0x1fc9   :  { %13537 = vmatpush1.bf16.msra.mxu0 %v20765_v53  ;;  %v20773_v53 = vld [vmem:[#allocation154_spill] sm:$0xff] }
0x1fca   :  { %13539 = vmatprep.subr.bf16.mxu0 %v20766_v9  ;;  %13569 = vmatpush1.bf16.msra.mxu1 %v20767_v29  ;;  %v20774_v29 = vld [vmem:[#allocation155_spill] sm:$0xff]  ;;  %v20780_v9 = vld [vmem:[#allocation161_spill] sm:$0xff] }
0x1fcb   :  { %13571 = vmatprep.subr.bf16.mxu1 %v20768_v4  ;;  %v20775_v4 = vld [vmem:[#allocation156_spill] sm:$0xff] }
0x1fcd   :  { %13541 = vmatpush1.bf16.msra.mxu0 %v20769_v46  ;;  %v20776_v46 = vld [vmem:[#allocation157_spill] sm:$0xff] }
0x1fce   :  { %13575 = vmatprep.subr.bf16.mxu0 %v20770_v17  ;;  %13573 = vmatpush1.bf16.msra.mxu1 %v20771_v14  ;;  %v20777_v17 = vld [vmem:[#allocation158_spill] sm:$0xff]  ;;  %v20778_v14 = vld [vmem:[#allocation159_spill] sm:$0xff] }
0x1fcf   :  { %13607 = vmatprep.subr.bf16.mxu1 %v20772_v48  ;;  %v20779_v48 = vld [vmem:[#allocation160_spill] sm:$0xff] }
0x1fd0   :  { %9806 = vmatmul.mubr.msk.f32.vlgmr.msra.gmra.mrb[58].mxu0 %vm6555_vm5, %v20740_v2  ;;  %v20803_v2 = vld [vmem:[#allocation185_spill] sm:$0xff] }
0x1fd1   :  { %13577 = vmatpush1.bf16.msra.mxu0 %v20773_v53  ;;  %6911 = vmatprep.mubr.f32.mxu0 %v19797_v50  ;;  %v20783_v53 = vld [vmem:[#allocation164_spill] sm:$0xff] }
0x1fd2   :  { %13579 = vmatprep.subr.bf16.mxu0 %v20774_v29  ;;  %v20785_v29 = vld [vmem:[#allocation166_spill] sm:$0xff] }
0x1fd5   :  { %13581 = vmatpush1.bf16.msra.mxu0 %v20775_v4  ;;  %v20786_v4 = vld [vmem:[#allocation167_spill] sm:$0xff] }
0x1fd6   :  { %13583 = vmatprep.subr.bf16.mxu0 %v20776_v46  ;;  %v20787_v46 = vld [vmem:[#allocation168_spill] sm:$0xff] }
0x1fd9   :  { %13585 = vmatpush1.bf16.msra.mxu0 %v20777_v17  ;;  %v20788_v17 = vld [vmem:[#allocation170_spill] sm:$0xff] }
0x1fda   :  { %13587 = vmatprep.subr.bf16.mxu0 %v20778_v14 }
0x1fdd   :  { %13589 = vmatpush1.bf16.msra.mxu0 %v20779_v48 }
0x1fde   :  { %13591 = vmatprep.subr.bf16.mxu0 %v20780_v9  ;;  %v14963_v9 = vld [vmem:[%s18970_s16] ss:$0 sm:$0xff] }
0x1fe1   :  { %13593 = vmatpush1.bf16.msra.mxu0 %v20781_v40 }
0x1fe2   :  { %13595 = vmatprep.subr.bf16.mxu0 %v20782_v8  ;;  %v20797_v8 = vld [vmem:[#allocation179_spill] sm:$0xff] }
0x1fe5   :  { %13597 = vmatpush1.bf16.msra.mxu0 %v20783_v53  ;;  %v20789_v53 = vld [vmem:[#allocation171_spill] sm:$0xff] }
0x1fe6   :  { %13599 = vmatprep.subr.bf16.mxu0 %v20784_v49  ;;  %v20790_v49 = vld [vmem:[#allocation172_spill] sm:$0xff] }
0x1fe9   :  { %13601 = vmatpush1.bf16.msra.mxu0 %v20785_v29  ;;  %v20791_v29 = vld [vmem:[#allocation173_spill] sm:$0xff] }
0x1fea   :  { %13603 = vmatprep.subr.bf16.mxu0 %v20786_v4  ;;  %v20792_v4 = vld [vmem:[#allocation174_spill] sm:$0xff] }
0x1fed   :  { %13605 = vmatpush1.bf16.msra.mxu0 %v20787_v46  ;;  %v20794_v46 = vld [vmem:[#allocation176_spill] sm:$0xff] }
0x1fee   :  { %13639 = vmatprep.subr.bf16.mxu0 %v20788_v17  ;;  %v20793_v17 = vld [vmem:[#allocation175_spill] sm:$0xff] }
0x20a3   :  { %v6770_v14 = vpop.f32.mrb[58].mxu0 }
0x20a4   :  { %v6775_v40 = vadd.f32 %v14963_v9, %v6770_v14  ;;  %v17962_v48 = vpop.f32.mrb[59].mxu0  ;;  %v20795_v9 = vld [vmem:[#allocation177_spill] sm:$0xff]  ;;  %v20796_v14 = vld [vmem:[#allocation178_spill] sm:$0xff] }
0x20a6   :  { %6841 = vmatmul.mubr.f32.vlgmr.msra.gmra.mrb[58].mxu1 %v6775_v40  ;;  %6912 = vmatmul.mubr.f32.vlgmr.msra.gmra.mrb[60].mxu0 %v6775_v40 }
0x20a7   :  { %13609 = vmatpush1.bf16.msra.mxu1 %v20789_v53  ;;  %13641 = vmatpush1.bf16.msra.mxu0 %v20790_v49  ;;  %v20798_v53 = vld [vmem:[#allocation180_spill] sm:$0xff]  ;;  %v20799_v49 = vld [vmem:[#allocation181_spill] sm:$0xff] }
0x20a8   :  { %13611 = vmatprep.subr.bf16.mxu1 %v20791_v29  ;;  %13643 = vmatprep.subr.bf16.mxu0 %v20792_v4  ;;  %v20800_v29 = vld [vmem:[#allocation182_spill] sm:$0xff]  ;;  %v20801_v4 = vld [vmem:[#allocation183_spill] sm:$0xff] }
0x20a9   :  { %6982 = vmatprep.mubr.f32.mxu1 %v19797_v50  ;;  %7053 = vmatprep.mubr.f32.mxu0 %v19797_v50 }
0x20ab   :  { %13613 = vmatpush1.bf16.msra.mxu1 %v20793_v17  ;;  %13645 = vmatpush1.bf16.msra.mxu0 %v20794_v46  ;;  %v20804_v17 = vld [vmem:[#allocation186_spill] sm:$0xff]  ;;  %v20805_v46 = vld [vmem:[#allocation187_spill] sm:$0xff] }
0x20ac   :  { %13615 = vmatprep.subr.bf16.mxu1 %v20795_v9  ;;  %13647 = vmatprep.subr.bf16.mxu0 %v20796_v14  ;;  %v20806_v9 = vld [vmem:[#allocation188_spill] sm:$0xff]  ;;  %v20807_v14 = vld [vmem:[#allocation189_spill] sm:$0xff] }
0x20af   :  { %13617 = vmatpush1.bf16.msra.mxu1 %v20797_v8  ;;  %13649 = vmatpush1.bf16.msra.mxu0 %v20798_v53  ;;  %v20808_v8 = vld [vmem:[#allocation190_spill] sm:$0xff]  ;;  %v20809_v53 = vld [vmem:[#allocation191_spill] sm:$0xff] }
0x20b0   :  { %13619 = vmatprep.subr.bf16.mxu1 %v20799_v49  ;;  %13651 = vmatprep.subr.bf16.mxu0 %v20800_v29  ;;  %v20810_v49 = vld [vmem:[#allocation192_spill] sm:$0xff]  ;;  %v20811_v29 = vld [vmem:[#allocation193_spill] sm:$0xff] }
0x20b3   :  { %13621 = vmatpush1.bf16.msra.mxu1 %v20801_v4  ;;  %13653 = vmatpush1.bf16.msra.mxu0 %v20802_v13  ;;  %v20812_v4 = vld [vmem:[#allocation194_spill] sm:$0xff]  ;;  %v20813_v13 = vld [vmem:[#allocation195_spill] sm:$0xff] }
0x20b4   :  { %13623 = vmatprep.subr.bf16.mxu1 %v20803_v2  ;;  %13655 = vmatprep.subr.bf16.mxu0 %v20804_v17  ;;  %v20814_v2 = vld [vmem:[#allocation196_spill] sm:$0xff]  ;;  %v20815_v17 = vld [vmem:[#allocation197_spill] sm:$0xff] }
0x20b7   :  { %13625 = vmatpush1.bf16.msra.mxu1 %v20805_v46  ;;  %13657 = vmatpush1.bf16.msra.mxu0 %v20806_v9  ;;  %v20816_v46 = vld [vmem:[#allocation198_spill] sm:$0xff]  ;;  %v20817_v9 = vld [vmem:[#allocation199_spill] sm:$0xff] }
0x20b8   :  { %13627 = vmatprep.subr.bf16.mxu1 %v20807_v14  ;;  %13659 = vmatprep.subr.bf16.mxu0 %v20808_v8  ;;  %v20818_v14 = vld [vmem:[#allocation200_spill] sm:$0xff]  ;;  %v20819_v8 = vld [vmem:[#allocation201_spill] sm:$0xff] }
0x20bb   :  { %13629 = vmatpush1.bf16.msra.mxu1 %v20809_v53  ;;  %13661 = vmatpush1.bf16.msra.mxu0 %v20810_v49  ;;  %v20820_v53 = vld [vmem:[#allocation202_spill] sm:$0xff] }
0x20bc   :  { %13631 = vmatprep.subr.bf16.mxu1 %v20811_v29  ;;  %13663 = vmatprep.subr.bf16.mxu0 %v20812_v4  ;;  %v20821_v29 = vld [vmem:[#allocation203_spill] sm:$0xff]  ;;  %v20822_v4 = vld [vmem:[#allocation204_spill] sm:$0xff] }
0x20bf   :  { %13633 = vmatpush1.bf16.msra.mxu1 %v20813_v13  ;;  %13665 = vmatpush1.bf16.msra.mxu0 %v20814_v2  ;;  %v20823_v13 = vld [vmem:[#allocation205_spill] sm:$0xff]  ;;  %v20824_v2 = vld [vmem:[#allocation206_spill] sm:$0xff] }
0x20c0   :  { %13635 = vmatprep.subr.bf16.mxu1 %v20815_v17  ;;  %13667 = vmatprep.subr.bf16.mxu0 %v20816_v46  ;;  %v20825_v17 = vld [vmem:[#allocation207_spill] sm:$0xff]  ;;  %v20826_v46 = vld [vmem:[#allocation208_spill] sm:$0xff] }
0x20c3   :  { %13637 = vmatpush1.bf16.msra.mxu1 %v20817_v9  ;;  %13669 = vmatpush1.bf16.msra.mxu0 %v20818_v14  ;;  %v20827_v9 = vld [vmem:[#allocation209_spill] sm:$0xff]  ;;  %v20828_v14 = vld [vmem:[#allocation210_spill] sm:$0xff] }
0x20c4   :  { %13671 = vmatprep.subr.bf16.mxu1 %v20819_v8  ;;  %13703 = vmatprep.subr.bf16.mxu0 %v20820_v53  ;;  %v20829_v8 = vld [vmem:[#allocation211_spill] sm:$0xff]  ;;  %v20830_v53 = vld [vmem:[#allocation212_spill] sm:$0xff] }
0x20c6   :  { %6983 = vmatmul.mubr.f32.vlgmr.msra.gmra.mrb[60].mxu1 %v6775_v40  ;;  %7054 = vmatmul.mubr.f32.vlgmr.msra.gmra.mrb[62].mxu0 %v6775_v40  ;;  %v20831_v40 = vld [vmem:[#allocation213_spill] sm:$0xff] }
0x20c7   :  { %13673 = vmatpush3.bf16.msra.mxu1 %v20821_v29  ;;  %13705 = vmatpush3.bf16.msra.mxu0 %v20822_v4  ;;  %v20832_v29 = vld [vmem:[#allocation214_spill] sm:$0xff]  ;;  %v20833_v4 = vld [vmem:[#allocation215_spill] sm:$0xff] }
0x20c8   :  { %13675 = vmatprep.subr.bf16.mxu1 %v20823_v13  ;;  %13707 = vmatprep.subr.bf16.mxu0 %v20824_v2  ;;  %v20834_v13 = vld [vmem:[#allocation216_spill] sm:$0xff]  ;;  %v20835_v2 = vld [vmem:[#allocation217_spill] sm:$0xff] }
0x20cb   :  { %13677 = vmatpush3.bf16.msra.mxu1 %v20825_v17  ;;  %13709 = vmatpush3.bf16.msra.mxu0 %v20826_v46  ;;  %v20836_v17 = vld [vmem:[#allocation218_spill] sm:$0xff]  ;;  %v20837_v46 = vld [vmem:[#allocation219_spill] sm:$0xff] }
0x20cc   :  { %13679 = vmatprep.subr.bf16.mxu1 %v20827_v9  ;;  %13711 = vmatprep.subr.bf16.mxu0 %v20828_v14  ;;  %v20838_v9 = vld [vmem:[#allocation220_spill] sm:$0xff]  ;;  %v20839_v14 = vld [vmem:[#allocation221_spill] sm:$0xff] }
0x20cf   :  { %13681 = vmatpush3.bf16.msra.mxu1 %v20829_v8  ;;  %13713 = vmatpush3.bf16.msra.mxu0 %v20830_v53  ;;  %v20840_v8 = vld [vmem:[#allocation222_spill] sm:$0xff]  ;;  %v20841_v53 = vld [vmem:[#allocation223_spill] sm:$0xff] }
0x20d0   :  { %13683 = vmatprep.subr.bf16.mxu1 %v20831_v40  ;;  %13715 = vmatprep.subr.bf16.mxu0 %v20832_v29  ;;  %v20842_v40 = vld [vmem:[#allocation224_spill] sm:$0xff]  ;;  %v20843_v29 = vld [vmem:[#allocation225_spill] sm:$0xff] }
0x20d3   :  { %13685 = vmatpush3.bf16.msra.mxu1 %v20833_v4  ;;  %13717 = vmatpush3.bf16.msra.mxu0 %v20834_v13  ;;  %v20844_v4 = vld [vmem:[#allocation226_spill] sm:$0xff]  ;;  %v20845_v13 = vld [vmem:[#allocation227_spill] sm:$0xff] }
0x20d4   :  { %13687 = vmatprep.subr.bf16.mxu1 %v20835_v2  ;;  %13719 = vmatprep.subr.bf16.mxu0 %v20836_v17  ;;  %v20846_v2 = vld [vmem:[#allocation228_spill] sm:$0xff]  ;;  %v20847_v17 = vld [vmem:[#allocation229_spill] sm:$0xff] }
0x20d7   :  { %13689 = vmatpush3.bf16.msra.mxu1 %v20837_v46  ;;  %13721 = vmatpush3.bf16.msra.mxu0 %v20838_v9  ;;  %v20848_v46 = vld [vmem:[#allocation230_spill] sm:$0xff]  ;;  %v20849_v9 = vld [vmem:[#allocation231_spill] sm:$0xff] }
0x20d8   :  { %13691 = vmatprep.subr.bf16.mxu1 %v20839_v14  ;;  %13723 = vmatprep.subr.bf16.mxu0 %v20840_v8  ;;  %v20850_v14 = vld [vmem:[#allocation232_spill] sm:$0xff]  ;;  %v20851_v8 = vld [vmem:[#allocation233_spill] sm:$0xff] }
0x20db   :  { %13693 = vmatpush3.bf16.msra.mxu1 %v20841_v53  ;;  %13725 = vmatpush3.bf16.msra.mxu0 %v20842_v40  ;;  %v20852_v53 = vld [vmem:[#allocation234_spill] sm:$0xff] }
0x20dc   :  { %13695 = vmatprep.subr.bf16.mxu1 %v20843_v29  ;;  %13727 = vmatprep.subr.bf16.mxu0 %v20844_v4 }
0x20df   :  { %13697 = vmatpush3.bf16.msra.mxu1 %v20845_v13  ;;  %13729 = vmatpush3.bf16.msra.mxu0 %v20846_v2 }
0x20e0   :  { %13699 = vmatprep.subr.bf16.mxu1 %v20847_v17  ;;  %13731 = vmatprep.subr.bf16.mxu0 %v20848_v46 }
0x20e3   :  { %13701 = vmatpush3.bf16.msra.mxu1 %v20849_v9  ;;  %13733 = vmatpush3.bf16.msra.mxu0 %v20850_v14 }
0x20e4   :  { %13735 = vmatprep.subr.bf16.mxu1 %v20851_v8  ;;  %13767 = vmatprep.subr.bf16.mxu0 %v20852_v53 }
0x2179   :  { %v6842_v40 = vpop.f32.mrb[58].mxu1  ;;  %v6913_v29 = vpop.f32.mrb[60].mxu0 }
0x217a   :  { %v6844_v49 = vpop.f32.mrb[59].mxu1  ;;  %v6915_v4 = vpop.f32.mrb[61].mxu0  ;;  %v6843_v2 = vadd.f32 %v14964_v21, %v6842_v40  ;;  %v6914_v17 = vadd.f32 %v14965_v3, %v6913_v29 }
0x217b   :  { %v6845_v8 = vadd.f32 %v14968_v47, %v6844_v49  ;;  %v6916_v53 = vadd.f32 %v14969_v27, %v6915_v4 }
0x2199   :  { %v6984_v5 = vpop.f32.mrb[60].mxu1  ;;  %v7055_v13 = vpop.f32.mrb[62].mxu0 }
0x219a   :  { %v6985_v46 = vadd.f32 %v14966_v33, %v6984_v5  ;;  %v7056_v9 = vadd.f32 %v14967_v61, %v7055_v13  ;;  %v6986_v60 = vpop.f32.mrb[61].mxu1  ;;  %v7057_v14 = vpop.f32.mrb[63].mxu0 }
0x219b   :  { %v6987_v52 = vadd.f32 %v14970_v7, %v6986_v60  ;;  %v7058_v58 = vadd.f32 %v14971_v41, %v7057_v14 }
0x219c   :  { %v7060_v44 = vmax.f32 %v6843_v2, %v6985_v46  ;;  %v7062_v59 = vmax.f32 %v6914_v17, %v7056_v9 }
0x219d   :  { %v7061_v6 = vmax.f32 %v6845_v8, %v6987_v52  ;;  %v7063_v21 = vmax.f32 %v6916_v53, %v7058_v58 }
0x219f   :  { %v7064_v40 = vmax.f32 %v7060_v44, %v7061_v6  ;;  %v7065_v3 = vmax.f32 %v7062_v59, %v7063_v21 }
0x21a1   :  { %v7066_v29 = vmax.f32 %v7064_v40, %v7065_v3 }
0x21a3   :  { %7067 = vmax.xlane.f32.xlu0 %v7066_v29 }
0x2230   :  { %v7068_v33 = vpop.xlane.xlu0 %7067 }
0x2231   :  { %v7069_v61 = vsub.f32 %v6843_v2, %v7068_v33  ;;  %v7070_v5 = vsub.f32 %v6845_v8, %v7068_v33  ;;  %v7071_v13 = vsub.f32 %v6914_v17, %v7068_v33  ;;  %v7072_v18 = vsub.f32 %v6916_v53, %v7068_v33 }
0x2232   :  { %v7073_v4 = vsub.f32 %v6985_v46, %v7068_v33  ;;  %v7074_v60 = vsub.f32 %v6987_v52, %v7068_v33  ;;  %v7075_v7 = vsub.f32 %v7056_v9, %v7068_v33  ;;  %v7076_v6 = vsub.f32 %v7058_v58, %v7068_v33 }
0x2233   :  { %v7077_v47 = vmul.f32 1.442695, %v7069_v61  ;;  %v7079_v49 = vmul.f32 1.442695, %v7070_v5  ;;  %v7081_v27 = vmul.f32 1.442695, %v7071_v13 }
0x2234   :  { %v7083_v41 = vmul.f32 1.442695, %v7072_v18  ;;  %v7085_v14 = vmul.f32 1.442695, %v7073_v4  ;;  %v7087_v59 = vmul.f32 1.442695, %v7074_v60 }
0x2235   :  { %14872 = vpow2.f32 %v7077_v47  ;;  %v7089_v44 = vmul.f32 1.442695, %v7075_v7  ;;  %v7091_v2 = vmul.f32 1.442695, %v7076_v6  ;;  %v20854_v6 = vld [vmem:[#allocation255_spill] sm:$0xff] }
0x2236   :  { %14874 = vpow2.f32 %v7079_v49 }
0x2237   :  { %14876 = vpow2.f32 %v7081_v27 }
0x2238   :  { %14878 = vpow2.f32 %v7083_v41 }
0x2239   :  { %14880 = vpow2.f32 %v7085_v14  ;;  %v20853_v14 = vld [vmem:[#allocation254_spill] sm:$0xff] }
0x223a   :  { %14882 = vpow2.f32 %v7087_v59  ;;  %v20855_v59 = vld [vmem:[#allocation256_spill] sm:$0xff] }
0x223b   :  { %14884 = vpow2.f32 %v7089_v44  ;;  %v20856_v44 = vld [vmem:[#allocation257_spill] sm:$0xff] }
0x223c   :  { %14886 = vpow2.f32 %v7091_v2  ;;  %v20857_v2 = vld [vmem:[#allocation258_spill] sm:$0xff] }
0x223f   :  { %v14873_v17 = vpop.eup %14872 }
0x2240   :  { %v14875_v53 = vpop.eup %14874 }
0x2241   :  { %v7093_v8 = vadd.f32 %v14875_v53, %v14873_v17  ;;  %v14877_v21 = vpop.eup %14876 }
0x2242   :  { %v14879_v40 = vpop.eup %14878 }
0x2243   :  { %v7094_v46 = vadd.f32 %v14877_v21, %v7093_v8  ;;  %v14881_v52 = vpop.eup %14880  ;;  %v20860_v8 = vld [vmem:[#allocation261_spill] sm:$0xff] }
0x2244   :  { %v14883_v9 = vpop.eup %14882 }
0x2245   :  { %v7095_v18 = vadd.f32 %v14879_v40, %v7094_v46  ;;  %v14885_v58 = vpop.eup %14884  ;;  %v20862_v46 = vld [vmem:[#allocation263_spill] sm:$0xff] }
0x2246   :  { %v14887_v61 = vpop.eup %14886 }
0x2247   :  { %v7096_v3 = vadd.f32 %v14881_v52, %v7095_v18 }
0x2249   :  { %v7097_v29 = vadd.f32 %v14883_v9, %v7096_v3 }
0x224b   :  { %v7098_v33 = vadd.f32 %v14885_v58, %v7097_v29  ;;  %v20865_v29 = vld [vmem:[#allocation266_spill] sm:$0xff] }
0x224d   :  { %v7099_v5 = vadd.f32 %v14887_v61, %v7098_v33  ;;  %v20866_v33 = vld [vmem:[#allocation267_spill] sm:$0xff] }
0x224f   :  { %7100 = vadd.xlane.f32.xlu1 %v7099_v5  ;;  %v20868_v5 = vld [vmem:[#allocation269_spill] sm:$0xff] }
0x22dc   :  { %v7101_v13 = vpop.xlane.xlu1 %7100 }
0x22dd   :  { %14888 = vrcp.f32 %v7101_v13  ;;  %v20869_v13 = vld [vmem:[#allocation270_spill] sm:$0xff] }
0x22e7   :  { %v14889_v47 = vpop.eup %14888 }
0x22e8   :  { %v7104_v49 = vmul.f32 %v14889_v47, %v14875_v53  ;;  %v7106_v27 = vmul.f32 %v14889_v47, %v14879_v40  ;;  %v7103_v4 = vmul.f32 %v14889_v47, %v14873_v17  ;;  %v7105_v41 = vmul.f32 %v14889_v47, %v14877_v21  ;;  %v20858_v17 = vld [vmem:[#allocation259_spill] sm:$0xff]  ;;  %v20859_v53 = vld [vmem:[#allocation260_spill] sm:$0xff]  ;;  %v20861_v21 = vld [vmem:[#allocation262_spill] sm:$0xff] }
0x22e9   :  { %v7108_v60 = vmul.f32 %v14889_v47, %v14883_v9  ;;  %v7110_v7 = vmul.f32 %v14889_v47, %v14887_v61  ;;  %v20863_v40 = vld [vmem:[#allocation264_spill] sm:$0xff]  ;;  %v7107_v18 = vmul.f32 %v14889_v47, %v14881_v52  ;;  %v7109_v3 = vmul.f32 %v14889_v47, %v14885_v58  ;;  %v20864_v9 = vld [vmem:[#allocation265_spill] sm:$0xff]  ;;  %v20870_v52 = vld [vmem:[#allocation271_spill] sm:$0xff] }
0x22ea   :  { %7175 = vmatprep.mubr.f32.mxu1 %v7104_v49  ;;  %7245 = vmatprep.mubr.f32.mxu0 %v7106_v27  ;;  %v20867_v61 = vld [vmem:[#allocation268_spill] sm:$0xff]  ;;  %v20872_v47 = vld [vmem:[#allocation273_spill] sm:$0xff]  ;;  %v20873_v49 = vld [vmem:[#allocation274_spill] sm:$0xff] }
0x22eb   :  { %7176 = vmatmul.mubr.f32.vlgmr.msra.gmra.mrb[62].mxu1 %v7103_v4  ;;  %7246 = vmatmul.mubr.f32.vlgmr.msra.gmra.mrb[64].mxu0 %v7105_v41  ;;  %v20871_v58 = vld [vmem:[#allocation272_spill] sm:$0xff]  ;;  %v20874_v27 = vld [vmem:[#allocation275_spill] sm:$0xff]  ;;  %v20876_v41 = vld [vmem:[#allocation277_spill] sm:$0xff] }
0x22ec   :  { %13737 = vmatpush3.bf16.msra.mxu1 %v20223_v51  ;;  %13769 = vmatpush3.bf16.msra.mxu0 %v20224_v36  ;;  %v20875_v4 = vld [vmem:[#allocation276_spill] sm:$0xff] }
0x22ed   :  { %7315 = vmatprep.mubr.f32.mxu1 %v7108_v60  ;;  %7385 = vmatprep.mubr.f32.mxu0 %v7110_v7  ;;  %v20877_v60 = vld [vmem:[#allocation278_spill] sm:$0xff]  ;;  %v20878_v7 = vld [vmem:[#allocation279_spill] sm:$0xff] }
0x22ee   :  { %13739 = vmatprep.subr.bf16.mxu1 %v20225_v39  ;;  %13771 = vmatprep.subr.bf16.mxu0 %v20226_v42 }
0x22f0   :  { %13741 = vmatpush3.bf16.msra.mxu1 %v20227_v62  ;;  %13773 = vmatpush3.bf16.msra.mxu0 %v20228_v56 }
0x22f1   :  { %13743 = vmatprep.subr.bf16.mxu1 %v20229_v55  ;;  %13775 = vmatprep.subr.bf16.mxu0 %v20230_v35 }
0x22f4   :  { %13745 = vmatpush3.bf16.msra.mxu1 %v20231_v38  ;;  %13777 = vmatpush3.bf16.msra.mxu0 %v20538_v23 }
0x22f5   :  { %13747 = vmatprep.subr.bf16.mxu1 %v20539_v25  ;;  %13779 = vmatprep.subr.bf16.mxu0 %v20540_v34 }
0x22f8   :  { %13749 = vmatpush3.bf16.msra.mxu1 %v20541_v57  ;;  %13781 = vmatpush3.bf16.msra.mxu0 %v20542_v10 }
0x22f9   :  { %13751 = vmatprep.subr.bf16.mxu1 %v20543_v31  ;;  %13783 = vmatprep.subr.bf16.mxu0 %v20544_v1  ;;  %v21182_v31 = vld [vmem:[#allocation383_spill] sm:$0xff] }
0x22fc   :  { %13753 = vmatpush3.bf16.msra.mxu1 %v20545_v20  ;;  %13785 = vmatpush3.bf16.msra.mxu0 %v20546_v22  ;;  %v21180_v20 = vld [vmem:[#allocation381_spill] sm:$0xff] }
0x22fd   :  { %13755 = vmatprep.subr.bf16.mxu1 %v20547_v37  ;;  %13787 = vmatprep.subr.bf16.mxu0 %v20853_v14  ;;  %v18550_v14 = vld [vmem:[#allocation18 + $0x28] sm:$0xff] }
0x2300   :  { %13757 = vmatpush3.bf16.msra.mxu1 %v20854_v6  ;;  %13789 = vmatpush3.bf16.msra.mxu0 %v20855_v59  ;;  %v18544_v6 = vld [vmem:[#allocation18 + $0x20] sm:$0xff] }
0x2301   :  { %13759 = vmatprep.subr.bf16.mxu1 %v20856_v44  ;;  %13791 = vmatprep.subr.bf16.mxu0 %v20857_v2  ;;  %v21175_v2 = vld [vmem:[#allocation379_spill] sm:$0xff]  ;;  %v21176_v44 = vld [vmem:[#allocation380_spill] sm:$0xff] }
0x2304   :  { %13761 = vmatpush3.bf16.msra.mxu1 %v20858_v17  ;;  %13793 = vmatpush3.bf16.msra.mxu0 %v20859_v53  ;;  %v18534_v53 = vld [vmem:[#allocation20 + $0x18] sm:$0xff] }
0x2305   :  { %13763 = vmatprep.subr.bf16.mxu1 %v20860_v8  ;;  %13795 = vmatprep.subr.bf16.mxu0 %v20861_v21  ;;  %v18528_v21 = vld [vmem:[#allocation20 + $0x10] sm:$0xff] }
0x2308   :  { %13765 = vmatpush3.bf16.msra.mxu1 %v20862_v46  ;;  %13797 = vmatpush3.bf16.msra.mxu0 %v20863_v40 }
0x2309   :  { %13831 = vmatprep.subr.bf16.mxu1 %v20864_v9  ;;  %13799 = vmatprep.subr.bf16.mxu0 %v20865_v29 }
0x230b   :  { %7316 = vmatmul.mubr.f32.vlgmr.msra.gmra.mrb[64].mxu1 %v7107_v18  ;;  %7386 = vmatmul.mubr.f32.vlgmr.msra.gmra.mrb[66].mxu0 %v7109_v3  ;;  %v20879_v18 = vld [vmem:[#allocation280_spill] sm:$0xff]  ;;  %v20880_v3 = vld [vmem:[#allocation281_spill] sm:$0xff] }
0x230c   :  { %13833 = vmatpush1.bf16.msra.mxu1 %v20866_v33  ;;  %13801 = vmatpush1.bf16.msra.mxu0 %v20867_v61 }
0x230d   :  { %13835 = vmatprep.subr.bf16.mxu1 %v20868_v5  ;;  %13803 = vmatprep.subr.bf16.mxu0 %v20869_v13 }
0x230e   :  { %7456 = vmatprep.mubr.f32.mxu0 %v19797_v50  ;;  %7527 = vmatprep.mubr.f32.mxu1 %v19797_v50 }
0x2310   :  { %13837 = vmatpush1.bf16.msra.mxu1 %v20870_v52  ;;  %13805 = vmatpush1.bf16.msra.mxu0 %v20871_v58  ;;  %v20881_v52 = vld [vmem:[#allocation282_spill] sm:$0xff]  ;;  %v20882_v58 = vld [vmem:[#allocation283_spill] sm:$0xff] }
0x2311   :  { %13839 = vmatprep.subr.bf16.mxu1 %v20872_v47  ;;  %13807 = vmatprep.subr.bf16.mxu0 %v20873_v49  ;;  %v20883_v47 = vld [vmem:[#allocation284_spill] sm:$0xff]  ;;  %v20884_v49 = vld [vmem:[#allocation285_spill] sm:$0xff] }
0x2314   :  { %13841 = vmatpush1.bf16.msra.mxu1 %v20874_v27  ;;  %13809 = vmatpush1.bf16.msra.mxu0 %v20875_v4  ;;  %v20885_v27 = vld [vmem:[#allocation286_spill] sm:$0xff]  ;;  %v20886_v4 = vld [vmem:[#allocation287_spill] sm:$0xff] }
0x2315   :  { %13843 = vmatprep.subr.bf16.mxu1 %v20876_v41  ;;  %13811 = vmatprep.subr.bf16.mxu0 %v20877_v60  ;;  %v20887_v41 = vld [vmem:[#allocation288_spill] sm:$0xff]  ;;  %v20888_v60 = vld [vmem:[#allocation289_spill] sm:$0xff] }
0x2318   :  { %13845 = vmatpush1.bf16.msra.mxu1 %v20878_v7  ;;  %13813 = vmatpush1.bf16.msra.mxu0 %v20879_v18  ;;  %v20889_v7 = vld [vmem:[#allocation290_spill] sm:$0xff]  ;;  %v20890_v18 = vld [vmem:[#allocation291_spill] sm:$0xff] }
0x2319   :  { %13847 = vmatprep.subr.bf16.mxu1 %v20880_v3  ;;  %13815 = vmatprep.subr.bf16.mxu0 %v20881_v52  ;;  %v20891_v3 = vld [vmem:[#allocation292_spill] sm:$0xff]  ;;  %v20892_v52 = vld [vmem:[#allocation293_spill] sm:$0xff] }
0x231c   :  { %13849 = vmatpush1.bf16.msra.mxu1 %v20882_v58  ;;  %13817 = vmatpush1.bf16.msra.mxu0 %v20883_v47  ;;  %v20893_v58 = vld [vmem:[#allocation294_spill] sm:$0xff]  ;;  %v20894_v47 = vld [vmem:[#allocation295_spill] sm:$0xff] }
0x231d   :  { %13851 = vmatprep.subr.bf16.mxu1 %v20884_v49  ;;  %13819 = vmatprep.subr.bf16.mxu0 %v20885_v27  ;;  %v20895_v49 = vld [vmem:[#allocation296_spill] sm:$0xff] }
0x2320   :  { %13853 = vmatpush1.bf16.msra.mxu1 %v20886_v4  ;;  %13821 = vmatpush1.bf16.msra.mxu0 %v20887_v41  ;;  %v20896_v4 = vld [vmem:[#allocation305_spill] sm:$0xff] }
0x2321   :  { %13855 = vmatprep.subr.bf16.mxu1 %v20888_v60  ;;  %13823 = vmatprep.subr.bf16.mxu0 %v20889_v7 }
0x2324   :  { %13857 = vmatpush1.bf16.msra.mxu1 %v20890_v18  ;;  %13825 = vmatpush1.bf16.msra.mxu0 %v20891_v3 }
0x2325   :  { %13859 = vmatprep.subr.bf16.mxu1 %v20892_v52  ;;  %13827 = vmatprep.subr.bf16.mxu0 %v20893_v58 }
0x2328   :  { %13861 = vmatpush1.bf16.msra.mxu1 %v20894_v47  ;;  %13829 = vmatpush1.bf16.msra.mxu0 %v20895_v49  ;;  %v14972_v49 = vld [vmem:[%s19969_s23] sm:$0xff] }
0x2329   :  { %13862 = vmatprep.subr.bf16.mxu1 %v19968_v24  ;;  %13887 = vmatprep.subr.bf16.mxu0 %v20896_v4 }
0x23be   :  { %v10453_v41 = vpop.f32.mrb[62].mxu1  ;;  %v10488_v60 = vpop.f32.mrb[64].mxu0 }
0x23bf   :  { %v10454_v27 = vpop.f32.mrb[63].mxu1  ;;  %v10489_v7 = vpop.f32.mrb[65].mxu0 }
0x23c0   :  { %v10455_v5 = vadd.f32 %v10454_v27, %v10453_v41  ;;  %v10490_v18 = vadd.f32 %v10489_v7, %v10488_v60  ;;  %v20907_v27 = vld [vmem:[#allocation321_spill] sm:$0xff]  ;;  %v20909_v60 = vld [vmem:[#allocation323_spill] sm:$0xff] }
0x23c1   :  { %v20908_v41 = vld [vmem:[#allocation301_spill] sm:$0xff] }
0x23c2   :  { %v7248_v13 = vadd.f32 %v10490_v18, %v10455_v5  ;;  %v20897_v5 = vld [vmem:[#allocation307_spill] sm:$0xff]  ;;  %v20910_v7 = vld [vmem:[#allocation325_spill] sm:$0xff]  ;;  %v20911_v18 = vld [vmem:[#allocation302_spill] sm:$0xff] }
0x23de   :  { %v10523_v3 = vpop.f32.mrb[64].mxu1  ;;  %v10558_v33 = vpop.f32.mrb[66].mxu0 }
0x23df   :  { %v10524_v52 = vpop.f32.mrb[65].mxu1  ;;  %v10559_v61 = vpop.f32.mrb[67].mxu0 }
0x23e0   :  { %v10525_v58 = vadd.f32 %v10524_v52, %v10523_v3  ;;  %v10560_v9 = vadd.f32 %v10559_v61, %v10558_v33  ;;  %v20898_v52 = vld [vmem:[#allocation309_spill] sm:$0xff]  ;;  %v20902_v61 = vld [vmem:[#allocation299_spill] sm:$0xff] }
0x23e1   :  { %v20901_v33 = vld [vmem:[#allocation313_spill] sm:$0xff]  ;;  %v20912_v3 = vld [vmem:[#allocation327_spill] sm:$0xff] }
0x23e2   :  { %v7318_v47 = vadd.f32 %v10525_v58, %v7248_v13  ;;  %v20903_v13 = vld [vmem:[#allocation315_spill] sm:$0xff]  ;;  %v20904_v58 = vld [vmem:[#allocation317_spill] sm:$0xff] }
0x23e4   :  { %v7388_v29 = vadd.f32 %v10560_v9, %v7318_v47  ;;  %v20899_v9 = vld [vmem:[#allocation298_spill] sm:$0xff]  ;;  %v20905_v47 = vld [vmem:[#allocation300_spill] sm:$0xff] }
0x23e6   :  { %v7391_v4 = vadd.f32 %v14972_v49, %v7388_v29  ;;  %v20900_v29 = vld [vmem:[#allocation311_spill] sm:$0xff] }
0x23e7   :  { %v20906_v49 = vld [vmem:[#allocation319_spill] sm:$0xff] }
0x23e8   :  { %7457 = vmatmul.mubr.f32.vlgmr.msra.gmra.mrb[54].mxu0 %v7391_v4  ;;  %7528 = vmatmul.mubr.f32.vlgmr.msra.gmra.mrb[54].mxu1 %v7391_v4 }
0x23e9   :  { %13864 = vmatpush3.bf16.msra.mxu1 %v20592_v54  ;;  %11186 = vmatprep.mubr.msk.f32.mxu1 %vm15358_vm0, %v19797_v50  ;;  %v14984_v54 = vld [vmem:[#allocation15 + $0x38] sm:$0xff] }
0x23ea   :  { %13865 = vmatprep.subr.bf16.mxu1 %v19968_v24  ;;  %13889 = vmatpush1.bf16.msra.mxu0 %v20897_v5 }
0x23eb   :  { %13891 = vmatprep.subr.bf16.mxu0 %v20898_v52  ;;  %7670 = vmatprep.mubr.f32.mxu0 %v19797_v50 }
0x23ed   :  { %13867 = vmatpush3.bf16.msra.mxu1 %v20899_v9 }
0x23ee   :  { %13868 = vmatprep.subr.bf16.mxu1 %v19968_v24  ;;  %13893 = vmatpush1.bf16.msra.mxu0 %v20900_v29 }
0x23ef   :  { %13895 = vmatprep.subr.bf16.mxu0 %v20901_v33 }
0x23f1   :  { %13870 = vmatpush3.bf16.msra.mxu1 %v20902_v61  ;;  %v20937_v61 = vld [vmem:[#allocation339_spill] sm:$0xff] }
0x23f2   :  { %13871 = vmatprep.subr.bf16.mxu1 %v19968_v24  ;;  %13897 = vmatpush1.bf16.msra.mxu0 %v20903_v13  ;;  %v20932_v13 = vld [vmem:[#allocation330_spill] sm:$0xff] }
0x23f3   :  { %13899 = vmatprep.subr.bf16.mxu0 %v20904_v58  ;;  %v20914_v58 = vld [vmem:[#allocation303_spill] sm:$0xff] }
0x23f5   :  { %13873 = vmatpush3.bf16.msra.mxu1 %v20905_v47  ;;  %v20913_v47 = vld [vmem:[#allocation329_spill] sm:$0xff] }
0x23f6   :  { %13874 = vmatprep.subr.bf16.mxu1 %v19968_v24  ;;  %13901 = vmatpush1.bf16.msra.mxu0 %v20906_v49  ;;  %v20917_v49 = vld [vmem:[#allocation304_spill] sm:$0xff] }
0x23f7   :  { %13903 = vmatprep.subr.bf16.mxu0 %v20907_v27  ;;  %v20915_v27 = vld [vmem:[#allocation331_spill] sm:$0xff] }
0x23f9   :  { %13876 = vmatpush3.bf16.msra.mxu1 %v20908_v41  ;;  %v20916_v41 = vld [vmem:[#allocation333_spill] sm:$0xff] }
0x23fa   :  { %13877 = vmatprep.subr.bf16.mxu1 %v19968_v24  ;;  %13905 = vmatpush1.bf16.msra.mxu0 %v20909_v60  ;;  %v20918_v60 = vld [vmem:[#allocation306_spill] sm:$0xff] }
0x23fb   :  { %13907 = vmatprep.subr.bf16.mxu0 %v20910_v7  ;;  %v20919_v7 = vld [vmem:[#allocation335_spill] sm:$0xff] }
0x23fd   :  { %13879 = vmatpush3.bf16.msra.mxu1 %v20911_v18  ;;  %v20920_v18 = vld [vmem:[#allocation337_spill] sm:$0xff] }
0x23fe   :  { %13880 = vmatprep.subr.bf16.mxu1 %v19968_v24  ;;  %13909 = vmatpush1.bf16.msra.mxu0 %v20912_v3  ;;  %v20921_v3 = vld [vmem:[#allocation308_spill] sm:$0xff] }
0x23ff   :  { %13911 = vmatprep.subr.bf16.mxu0 %v20913_v47  ;;  %v20923_v47 = vld [vmem:[#allocation312_spill] sm:$0xff] }
0x2401   :  { %13882 = vmatpush3.bf16.msra.mxu1 %v20914_v58  ;;  %v20922_v58 = vld [vmem:[#allocation310_spill] sm:$0xff] }
0x2402   :  { %13883 = vmatprep.subr.bf16.mxu1 %v19968_v24  ;;  %13913 = vmatpush1.bf16.msra.mxu0 %v20915_v27  ;;  %v20924_v27 = vld [vmem:[#allocation314_spill] sm:$0xff] }
0x2403   :  { %13915 = vmatprep.subr.bf16.mxu0 %v20916_v41  ;;  %v20925_v41 = vld [vmem:[#allocation316_spill] sm:$0xff] }
0x2405   :  { %13885 = vmatpush3.bf16.msra.mxu1 %v20917_v49  ;;  %v20926_v49 = vld [vmem:[#allocation318_spill] sm:$0xff] }
0x2406   :  { %13919 = vmatprep.subr.bf16.mxu1 %v20918_v60  ;;  %13917 = vmatpush1.bf16.msra.mxu0 %v20919_v7  ;;  %v20927_v60 = vld [vmem:[#allocation320_spill] sm:$0xff]  ;;  %v20928_v7 = vld [vmem:[#allocation322_spill] sm:$0xff] }
0x2407   :  { %13951 = vmatprep.subr.bf16.mxu0 %v20920_v18  ;;  %v20929_v18 = vld [vmem:[#allocation324_spill] sm:$0xff] }
0x2408   :  { %11187 = vmatmul.mubr.f32.vlgmr.msra.gmra.mrb[66].mxu1 %v7391_v4  ;;  %v20930_v4 = vld [vmem:[#allocation326_spill] sm:$0xff] }
0x2409   :  { %13921 = vmatpush1.bf16.msra.mxu1 %v20921_v3  ;;  %7741 = vmatprep.mubr.f32.mxu1 %v19797_v50  ;;  %v20931_v3 = vld [vmem:[#allocation328_spill] sm:$0xff] }
0x240a   :  { %13923 = vmatprep.subr.bf16.mxu1 %v20922_v58  ;;  %v20933_v58 = vld [vmem:[#allocation332_spill] sm:$0xff] }
0x240d   :  { %13925 = vmatpush1.bf16.msra.mxu1 %v20923_v47  ;;  %v20934_v47 = vld [vmem:[#allocation334_spill] sm:$0xff] }
0x240e   :  { %13927 = vmatprep.subr.bf16.mxu1 %v20924_v27  ;;  %v20935_v27 = vld [vmem:[#allocation336_spill] sm:$0xff] }
0x2411   :  { %13929 = vmatpush1.bf16.msra.mxu1 %v20925_v41  ;;  %v20936_v41 = vld [vmem:[#allocation338_spill] sm:$0xff] }
0x2412   :  { %13931 = vmatprep.subr.bf16.mxu1 %v20926_v49 }
0x2415   :  { %13933 = vmatpush1.bf16.msra.mxu1 %v20927_v60 }
0x2416   :  { %13935 = vmatprep.subr.bf16.mxu1 %v20928_v7 }
0x2419   :  { %13937 = vmatpush1.bf16.msra.mxu1 %v20929_v18 }
0x241a   :  { %13939 = vmatprep.subr.bf16.mxu1 %v20930_v4 }
0x241d   :  { %13941 = vmatpush1.bf16.msra.mxu1 %v20931_v3 }
0x241e   :  { %13943 = vmatprep.subr.bf16.mxu1 %v20932_v13 }
0x2421   :  { %13945 = vmatpush1.bf16.msra.mxu1 %v20933_v58 }
0x2422   :  { %13947 = vmatprep.subr.bf16.mxu1 %v20934_v47 }
0x2425   :  { %13949 = vmatpush1.bf16.msra.mxu1 %v20935_v27 }
0x2426   :  { %13983 = vmatprep.subr.bf16.mxu1 %v20936_v41 }
0x24bb   :  { %v7458_v49 = vpop.f32.mrb[54].mxu0  ;;  %v7529_v60 = vpop.f32.mrb[54].mxu1 }
0x24bc   :  { %v7964_v7 = vadd.f32 %v7458_v49, %v20937_v61  ;;  %v7460_v33 = vpop.f32.mrb[55].mxu0  ;;  %v7531_v18 = vpop.f32.mrb[55].mxu1  ;;  %v7966_v47 = vadd.f32 %v7529_v60, %v20329_v0 }
0x24bd   :  { %v7965_v4 = vadd.f32 %v7460_v33, %v20328_v32  ;;  %v7967_v58 = vadd.f32 %v7531_v18, %v20640_v30  ;;  %v20941_v18 = vld [vmem:[#allocation355_spill] sm:$0xff] }
0x24be   :  { %v9807_v29 = vmul.f32 -1.442695, %v7964_v7 }
0x24bf   :  { %v9808_v3 = vmul.f32 -1.442695, %v7965_v4  ;;  %v9809_v13 = vmul.f32 -1.442695, %v7967_v58  ;;  %v20942_v4 = vld [vmem:[#allocation356_spill] sm:$0xff] }
0x24c0   :  { %14890 = vpow2.f32 %v9807_v29 }
0x24c1   :  { %14892 = vpow2.f32 %v9808_v3 }
0x24c2   :  { %14894 = vpow2.f32 %v9809_v13 }
0x24c3   :  { %14896 = vtanh.f32 %v7966_v47  ;;  %v20938_v47 = vld [vmem:[#allocation352_spill] sm:$0xff] }
0x24ca   :  { %v14891_v27 = vpop.eup %14890 }
0x24cb   :  { %v14893_v9 = vpop.eup %14892  ;;  %v7971_v41 = vadd.f32 1.0, %v14891_v27  ;;  %v20939_v27 = vld [vmem:[#allocation353_spill] sm:$0xff] }
0x24cc   :  { %v7977_v52 = vadd.f32 1.0, %v14893_v9  ;;  %v14895_v61 = vpop.eup %14894  ;;  %v14973_v9 = vld [vmem:[%s18972_s18] ss:$0 sm:$0xff] }
0x24cd   :  { %14898 = vrcp.f32 %v7971_v41  ;;  %v14897_v49 = vpop.eup %14896  ;;  %v7984_v29 = vadd.f32 1.0, %v14895_v61  ;;  %v20940_v41 = vld [vmem:[#allocation354_spill] sm:$0xff]  ;;  %v20943_v61 = vld [vmem:[#allocation357_spill] sm:$0xff] }
0x24ce   :  { %14900 = vrcp.f32 %v7977_v52 }
0x24cf   :  { %14902 = vrcp.f32 %v7984_v29  ;;  %v20948_v29 = vld [vmem:[#allocation362_spill] sm:$0xff] }
0x24d7   :  { %v14899_v32 = vpop.eup %14898 }
0x24d8   :  { %v14901_v33 = vpop.eup %14900  ;;  %v7988_v7 = vmul.f32 %v14899_v32, %v14897_v49  ;;  %v20944_v49 = vld [vmem:[#allocation358_spill] sm:$0xff]  ;;  %v20945_v32 = vld [vmem:[#allocation359_spill] sm:$0xff] }
0x24d9   :  { %v7987_v3 = vmul.f32 %v14901_v33, %v17707_v15  ;;  %v14903_v15 = vpop.eup %14902  ;;  %v20946_v33 = vld [vmem:[#allocation360_spill] sm:$0xff] }
0x24db   :  { %v7989_v30 = vadd.f32 %v7988_v7, %v7987_v3  ;;  %v7600_v58 = vpop.f32.mrb[66].mxu1  ;;  %v20947_v7 = vld [vmem:[#allocation361_spill] sm:$0xff]  ;;  %v20949_v3 = vld [vmem:[#allocation363_spill] sm:$0xff] }
0x24dc   :  { %v7604_v0 = vadd.f32 %v7600_v58, %v17962_v48  ;;  %v11188_v60 = vpop.f32.mrb[67].mxu1  ;;  %v20951_v58 = vld [vmem:[#allocation365_spill] sm:$0xff] }
0x24dd   :  { %14904 = vtanh.f32 %v7989_v30  ;;  %v20950_v30 = vld [vmem:[#allocation364_spill] sm:$0xff]  ;;  %v20953_v60 = vld [vmem:[#allocation367_spill] sm:$0xff] }
0x24de   :  { %v18160_v52 = vadd.f32 %v14973_v9, %v7604_v0  ;;  %v20952_v0 = vld [vmem:[#allocation366_spill] sm:$0xff]  ;;  %v20954_v9 = vld [vmem:[#allocation368_spill] sm:$0xff] }
0x24e0   :  { %7671 = vmatmul.mubr.f32.vlgmr.msra.gmra.mrb[68].mxu0 %v18160_v52  ;;  %7742 = vmatmul.mubr.f32.vlgmr.msra.gmra.mrb[68].mxu1 %v18160_v52 }
0x24e1   :  { %13953 = vmatpush1.bf16.msra.mxu0 %v16752_v43  ;;  %13985 = vmatpush1.bf16.msra.mxu1 %v16754_v63  ;;  %v14981_v63 = vld [vmem:[#allocation15 + $0x8] sm:$0xff]  ;;  %v14982_v43 = vld [vmem:[#allocation15 + $0x18] sm:$0xff] }
0x24e2   :  { %13955 = vmatprep.subr.bf16.mxu0 %v16758_v45  ;;  %13987 = vmatprep.subr.bf16.mxu1 %v20331_v19  ;;  %v14980_v19 = vld [vmem:[#allocation15 + $0x30] sm:$0xff] }
0x24e3   :  { %7812 = vmatprep.mubr.f32.mxu0 %v19797_v50  ;;  %7883 = vmatprep.mubr.f32.mxu1 %v19797_v50 }
0x24e5   :  { %13957 = vmatpush1.bf16.msra.mxu0 %v20332_v11  ;;  %13989 = vmatpush1.bf16.msra.mxu1 %v20333_v12  ;;  %v14979_v11 = vld [vmem:[#allocation15 + $0x20] sm:$0xff] }
0x24e6   :  { %13959 = vmatprep.subr.bf16.mxu0 %v20334_v26  ;;  %13991 = vmatprep.subr.bf16.mxu1 %v20335_v28 }
0x24e7   :  { %v14905_v48 = vpop.eup %14904 }
0x24e8   :  { %v18174_v13 = vmul.f32 %v14905_v48, %v14903_v15  ;;  %v20955_v15 = vld [vmem:[#allocation370_spill] sm:$0xff]  ;;  %v20956_v48 = vld [vmem:[#allocation371_spill] sm:$0xff] }
0x24e9   :  { %13961 = vmatpush1.bf16.msra.mxu0 %v20336_v16  ;;  %13993 = vmatpush1.bf16.msra.mxu1 %v20938_v47  ;;  %v21031_v47 = vld [vmem:[#allocation95_spill] sm:$0xff] }
0x24ea   :  { %13963 = vmatprep.subr.bf16.mxu0 %v20939_v27  ;;  %13995 = vmatprep.subr.bf16.mxu1 %v20940_v41  ;;  %v21029_v41 = vld [vmem:[#allocation91_spill] sm:$0xff]  ;;  %v21030_v27 = vld [vmem:[#allocation94_spill] sm:$0xff] }
0x24ed   :  { %13965 = vmatpush1.bf16.msra.mxu0 %v20941_v18  ;;  %13997 = vmatpush1.bf16.msra.mxu1 %v20942_v4 }
0x24ee   :  { %13967 = vmatprep.subr.bf16.mxu0 %v20943_v61  ;;  %13999 = vmatprep.subr.bf16.mxu1 %v20944_v49  ;;  %v14974_v49 = vld [vmem:[%s18966_s12] ss:$0 sm:$0xff] }
0x24f1   :  { %13969 = vmatpush1.bf16.msra.mxu0 %v20945_v32  ;;  %14001 = vmatpush1.bf16.msra.mxu1 %v20946_v33  ;;  %v20957_v33 = vld [vmem:[#allocation372_spill] sm:$0xff] }
0x24f2   :  { %13971 = vmatprep.subr.bf16.mxu0 %v20947_v7  ;;  %14003 = vmatprep.subr.bf16.mxu1 %v20948_v29  ;;  %v20958_v7 = vld [vmem:[#allocation373_spill] sm:$0xff]  ;;  %v20959_v29 = vld [vmem:[#allocation39_spill] sm:$0xff] }
0x24f5   :  { %13973 = vmatpush1.bf16.msra.mxu0 %v20949_v3  ;;  %14005 = vmatpush1.bf16.msra.mxu1 %v20950_v30  ;;  %v20960_v3 = vld [vmem:[#allocation50_spill] sm:$0xff]  ;;  %v20975_v30 = vld [vmem:[#allocation47_spill] sm:$0xff] }
0x24f6   :  { %13975 = vmatprep.subr.bf16.mxu0 %v20951_v58  ;;  %14007 = vmatprep.subr.bf16.mxu1 %v20952_v0  ;;  %v20961_v0 = vld [vmem:[#allocation40_spill] sm:$0xff]  ;;  %v20974_v58 = vld [vmem:[#allocation62_spill] sm:$0xff] }
0x24f9   :  { %13977 = vmatpush1.bf16.msra.mxu0 %v20953_v60  ;;  %14009 = vmatpush1.bf16.msra.mxu1 %v20954_v9  ;;  %v20962_v60 = vld [vmem:[#allocation52_spill] sm:$0xff]  ;;  %v20963_v9 = vld [vmem:[#allocation41_spill] sm:$0xff] }
0x24fa   :  { %13979 = vmatprep.subr.bf16.mxu0 %v20955_v15  ;;  %14011 = vmatprep.subr.bf16.mxu1 %v20956_v48  ;;  %v20964_v15 = vld [vmem:[#allocation53_spill] sm:$0xff]  ;;  %v20969_v48 = vld [vmem:[#allocation44_spill] sm:$0xff] }
0x24fd   :  { %13981 = vmatpush1.bf16.msra.mxu0 %v20957_v33  ;;  %14013 = vmatpush1.bf16.msra.mxu1 %v20958_v7  ;;  %v20965_v7 = vld [vmem:[#allocation42_spill] sm:$0xff]  ;;  %v20968_v33 = vld [vmem:[#allocation56_spill] sm:$0xff] }
0x24fe   :  { %14015 = vmatprep.subr.bf16.mxu0 %v20959_v29  ;;  %14047 = vmatprep.subr.bf16.mxu1 %v20960_v3  ;;  %v20966_v29 = vld [vmem:[#allocation55_spill] sm:$0xff] }
0x24ff   :  { %v20967_v3 = vld [vmem:[#allocation43_spill] sm:$0xff] }
0x2500   :  { %7813 = vmatmul.mubr.f32.vlgmr.msra.gmra.mrb[70].mxu0 %v18160_v52  ;;  %7884 = vmatmul.mubr.f32.vlgmr.msra.gmra.mrb[70].mxu1 %v18160_v52 }
0x2501   :  { %14017 = vmatpush1.bf16.msra.mxu0 %v20961_v0  ;;  %14049 = vmatpush1.bf16.msra.mxu1 %v20962_v60  ;;  %v20970_v0 = vld [vmem:[#allocation59_spill] sm:$0xff]  ;;  %v20971_v60 = vld [vmem:[#allocation45_spill] sm:$0xff] }
0x2502   :  { %14019 = vmatprep.subr.bf16.mxu0 %v20963_v9  ;;  %14051 = vmatprep.subr.bf16.mxu1 %v20964_v15  ;;  %v20972_v9 = vld [vmem:[#allocation60_spill] sm:$0xff]  ;;  %v20973_v15 = vld [vmem:[#allocation46_spill] sm:$0xff] }
0x2503   :  { %8056 = vmatprep.mubr.f32.mxu0 %v19797_v50  ;;  %8127 = vmatprep.mubr.f32.mxu1 %v19797_v50 }
0x2505   :  { %14021 = vmatpush1.bf16.msra.mxu0 %v20965_v7  ;;  %14053 = vmatpush1.bf16.msra.mxu1 %v20966_v29  ;;  %v20976_v7 = vld [vmem:[#allocation63_spill] sm:$0xff]  ;;  %v20977_v29 = vld [vmem:[#allocation48_spill] sm:$0xff] }
0x2506   :  { %14023 = vmatprep.subr.bf16.mxu0 %v20967_v3  ;;  %14055 = vmatprep.subr.bf16.mxu1 %v20968_v33  ;;  %v20978_v3 = vld [vmem:[#allocation64_spill] sm:$0xff]  ;;  %v20979_v33 = vld [vmem:[#allocation49_spill] sm:$0xff] }
0x2509   :  { %14025 = vmatpush1.bf16.msra.mxu0 %v20969_v48  ;;  %14057 = vmatpush1.bf16.msra.mxu1 %v20970_v0  ;;  %v20980_v48 = vld [vmem:[#allocation65_spill] sm:$0xff]  ;;  %v20981_v0 = vld [vmem:[#allocation51_spill] sm:$0xff] }
0x250a   :  { %14027 = vmatprep.subr.bf16.mxu0 %v20971_v60  ;;  %14059 = vmatprep.subr.bf16.mxu1 %v20972_v9  ;;  %v20982_v60 = vld [vmem:[#allocation66_spill] sm:$0xff] }
0x250b   :  { %v20983_v9 = vld [vmem:[#allocation54_spill] sm:$0xff] }
0x250d   :  { %14029 = vmatpush1.bf16.msra.mxu0 %v20973_v15  ;;  %14061 = vmatpush1.bf16.msra.mxu1 %v20974_v58  ;;  %v20984_v15 = vld [vmem:[#allocation67_spill] sm:$0xff]  ;;  %v20985_v58 = vld [vmem:[#allocation57_spill] sm:$0xff] }
0x250e   :  { %14031 = vmatprep.subr.bf16.mxu0 %v20975_v30  ;;  %14063 = vmatprep.subr.bf16.mxu1 %v20976_v7  ;;  %v20986_v30 = vld [vmem:[#allocation68_spill] sm:$0xff]  ;;  %v20987_v7 = vld [vmem:[#allocation58_spill] sm:$0xff] }
0x2511   :  { %14033 = vmatpush1.bf16.msra.mxu0 %v20977_v29  ;;  %14065 = vmatpush1.bf16.msra.mxu1 %v20978_v3  ;;  %v20988_v29 = vld [vmem:[#allocation69_spill] sm:$0xff] }
0x2512   :  { %14035 = vmatprep.subr.bf16.mxu0 %v20979_v33  ;;  %14067 = vmatprep.subr.bf16.mxu1 %v20980_v48  ;;  %v20989_v3 = vld [vmem:[#allocation61_spill] sm:$0xff]  ;;  %v20990_v33 = vld [vmem:[#allocation70_spill] sm:$0xff]  ;;  %v20991_v48 = vld [vmem:[#allocation71_spill] sm:$0xff] }
0x2515   :  { %14037 = vmatpush1.bf16.msra.mxu0 %v20981_v0  ;;  %14069 = vmatpush1.bf16.msra.mxu1 %v20982_v60  ;;  %v20992_v0 = vld [vmem:[#allocation72_spill] sm:$0xff]  ;;  %v20993_v60 = vld [vmem:[#allocation73_spill] sm:$0xff] }
0x2516   :  { %14039 = vmatprep.subr.bf16.mxu0 %v20983_v9  ;;  %14071 = vmatprep.subr.bf16.mxu1 %v20984_v15  ;;  %v20994_v9 = vld [vmem:[#allocation74_spill] sm:$0xff]  ;;  %v20995_v15 = vld [vmem:[#allocation75_spill] sm:$0xff] }
0x2519   :  { %14041 = vmatpush1.bf16.msra.mxu0 %v20985_v58  ;;  %14073 = vmatpush1.bf16.msra.mxu1 %v20986_v30  ;;  %v20996_v58 = vld [vmem:[#allocation76_spill] sm:$0xff]  ;;  %v20997_v30 = vld [vmem:[#allocation77_spill] sm:$0xff] }
0x251a   :  { %14043 = vmatprep.subr.bf16.mxu0 %v20987_v7  ;;  %14075 = vmatprep.subr.bf16.mxu1 %v20988_v29  ;;  %v20998_v7 = vld [vmem:[#allocation78_spill] sm:$0xff]  ;;  %v20999_v29 = vld [vmem:[#allocation79_spill] sm:$0xff] }
0x251d   :  { %14045 = vmatpush1.bf16.msra.mxu0 %v20989_v3  ;;  %14077 = vmatpush1.bf16.msra.mxu1 %v20990_v33  ;;  %v21000_v3 = vld [vmem:[#allocation80_spill] sm:$0xff]  ;;  %v21001_v33 = vld [vmem:[#allocation81_spill] sm:$0xff] }
0x251e   :  { %14078 = vmatprep.subr.bf16.mxu0 %v19968_v24  ;;  %14102 = vmatprep.subr.bf16.mxu1 %v19968_v24 }
0x2520   :  { %8057 = vmatmul.mubr.f32.vlgmr.msra.gmra.mrb[72].mxu0 %v18174_v13  ;;  %8128 = vmatmul.mubr.f32.vlgmr.msra.gmra.mrb[72].mxu1 %v18174_v13 }
0x2521   :  { %14080 = vmatpush3.bf16.msra.mxu0 %v20991_v48  ;;  %11221 = vmatprep.mubr.msk.f32.mxu0 %vm15358_vm0, %v19797_v50  ;;  %v21002_v48 = vld [vmem:[#allocation82_spill] sm:$0xff] }
0x2522   :  { %14081 = vmatprep.subr.bf16.mxu0 %v19968_v24  ;;  %14104 = vmatpush3.bf16.msra.mxu1 %v20992_v0  ;;  %v21003_v0 = vld [vmem:[#allocation83_spill] sm:$0xff] }
0x2523   :  { %14105 = vmatprep.subr.bf16.mxu1 %v19968_v24  ;;  %11256 = vmatprep.mubr.msk.f32.mxu1 %vm15358_vm0, %v19797_v50 }
0x2525   :  { %14083 = vmatpush3.bf16.msra.mxu0 %v20993_v60  ;;  %v21004_v60 = vld [vmem:[#allocation84_spill] sm:$0xff] }
0x2526   :  { %14084 = vmatprep.subr.bf16.mxu0 %v19968_v24  ;;  %14107 = vmatpush3.bf16.msra.mxu1 %v20994_v9  ;;  %v21005_v9 = vld [vmem:[#allocation85_spill] sm:$0xff] }
0x2527   :  { %14108 = vmatprep.subr.bf16.mxu1 %v19968_v24 }
0x2529   :  { %14086 = vmatpush3.bf16.msra.mxu0 %v20995_v15  ;;  %v21006_v15 = vld [vmem:[#allocation86_spill] sm:$0xff] }
0x252a   :  { %14087 = vmatprep.subr.bf16.mxu0 %v19968_v24  ;;  %14110 = vmatpush3.bf16.msra.mxu1 %v20996_v58  ;;  %v21007_v58 = vld [vmem:[#allocation88_spill] sm:$0xff] }
0x252b   :  { %14111 = vmatprep.subr.bf16.mxu1 %v19968_v24 }
0x252d   :  { %14089 = vmatpush3.bf16.msra.mxu0 %v20997_v30  ;;  %v21008_v30 = vld [vmem:[#allocation90_spill] sm:$0xff] }
0x252e   :  { %14090 = vmatprep.subr.bf16.mxu0 %v19968_v24  ;;  %14113 = vmatpush3.bf16.msra.mxu1 %v20998_v7  ;;  %v21009_v7 = vld [vmem:[#allocation89_spill] sm:$0xff] }
0x252f   :  { %14114 = vmatprep.subr.bf16.mxu1 %v19968_v24 }
0x2531   :  { %14092 = vmatpush3.bf16.msra.mxu0 %v20999_v29  ;;  %v21010_v29 = vld [vmem:[#allocation92_spill] sm:$0xff] }
0x2532   :  { %14093 = vmatprep.subr.bf16.mxu0 %v19968_v24  ;;  %14116 = vmatpush3.bf16.msra.mxu1 %v21000_v3  ;;  %v21011_v3 = vld [vmem:[#allocation93_spill] sm:$0xff] }
0x2533   :  { %14117 = vmatprep.subr.bf16.mxu1 %v19968_v24 }
0x2535   :  { %14095 = vmatpush3.bf16.msra.mxu0 %v21001_v33  ;;  %v21012_v33 = vld [vmem:[#allocation96_spill] sm:$0xff] }
0x2536   :  { %14096 = vmatprep.subr.bf16.mxu0 %v19968_v24  ;;  %14119 = vmatpush3.bf16.msra.mxu1 %v21002_v48  ;;  %v21013_v48 = vld [vmem:[#allocation97_spill] sm:$0xff] }
0x2537   :  { %14120 = vmatprep.subr.bf16.mxu1 %v19968_v24 }
0x2539   :  { %14098 = vmatpush3.bf16.msra.mxu0 %v21003_v0  ;;  %v21014_v0 = vld [vmem:[#allocation100_spill] sm:$0xff] }
0x253a   :  { %14099 = vmatprep.subr.bf16.mxu0 %v19968_v24  ;;  %14122 = vmatpush3.bf16.msra.mxu1 %v21004_v60  ;;  %v21015_v60 = vld [vmem:[#allocation102_spill] sm:$0xff] }
0x253b   :  { %14123 = vmatprep.subr.bf16.mxu1 %v19968_v24 }
0x253d   :  { %14101 = vmatpush3.bf16.msra.mxu0 %v21005_v9  ;;  %v21016_v9 = vld [vmem:[#allocation104_spill] sm:$0xff] }
0x253e   :  { %14125 = vmatpush3.bf16.msra.mxu1 %v21006_v15  ;;  %14127 = vmatprep.subr.bf16.mxu0 %v21007_v58  ;;  %v21017_v15 = vld [vmem:[#allocation106_spill] sm:$0xff] }
0x253f   :  { %14159 = vmatprep.subr.bf16.mxu1 %v21008_v30  ;;  %v21019_v58 = vld [vmem:[#allocation110_spill] sm:$0xff]  ;;  %v21020_v30 = vld [vmem:[#allocation112_spill] sm:$0xff] }
0x2540   :  { %11222 = vmatmul.mubr.f32.vlgmr.msra.gmra.mrb[74].mxu0 %v18174_v13  ;;  %v21018_v13 = vld [vmem:[#allocation108_spill] sm:$0xff] }
0x2541   :  { %14129 = vmatpush1.bf16.msra.mxu0 %v21009_v7  ;;  %8369 = vmatprep.mubr.f32.mxu0 %v19797_v50  ;;  %v21021_v7 = vld [vmem:[#allocation114_spill] sm:$0xff] }
0x2542   :  { %14131 = vmatprep.subr.bf16.mxu0 %v21010_v29  ;;  %v21022_v29 = vld [vmem:[#allocation116_spill] sm:$0xff] }
0x2545   :  { %14133 = vmatpush1.bf16.msra.mxu0 %v21011_v3  ;;  %v21023_v3 = vld [vmem:[#allocation117_spill] sm:$0xff] }
0x2546   :  { %14135 = vmatprep.subr.bf16.mxu0 %v21012_v33  ;;  %v21024_v33 = vld [vmem:[#allocation120_spill] sm:$0xff] }
0x2549   :  { %14137 = vmatpush1.bf16.msra.mxu0 %v21013_v48 }
0x254a   :  { %14139 = vmatprep.subr.bf16.mxu0 %v21014_v0 }
0x254d   :  { %14141 = vmatpush1.bf16.msra.mxu0 %v21015_v60 }
0x254e   :  { %14143 = vmatprep.subr.bf16.mxu0 %v21016_v9 }
0x2551   :  { %14145 = vmatpush1.bf16.msra.mxu0 %v21017_v15 }
0x2552   :  { %14147 = vmatprep.subr.bf16.mxu0 %v21018_v13 }
0x2555   :  { %14149 = vmatpush1.bf16.msra.mxu0 %v21019_v58 }
0x2556   :  { %14151 = vmatprep.subr.bf16.mxu0 %v21020_v30 }
0x2559   :  { %14153 = vmatpush1.bf16.msra.mxu0 %v21021_v7 }
0x255a   :  { %14155 = vmatprep.subr.bf16.mxu0 %v21022_v29 }
0x255d   :  { %14157 = vmatpush1.bf16.msra.mxu0 %v21023_v3 }
0x255e   :  { %14191 = vmatprep.subr.bf16.mxu0 %v21024_v33 }
0x25b3   :  { %v18292_v48 = vpop.f32.mrb[68].mxu0  ;;  %v18294_v0 = vpop.f32.mrb[68].mxu1 }
0x25b4   :  { %v18296_v60 = vpop.f32.mrb[69].mxu0  ;;  %v18298_v9 = vpop.f32.mrb[69].mxu1 }
0x25d3   :  { %v18300_v15 = vpop.f32.mrb[70].mxu0  ;;  %v18302_v13 = vpop.f32.mrb[70].mxu1 }
0x25d4   :  { %21025 = vst [vmem:[#allocation339_spill] sm:$0xff] %v18300_v15  ;;  %21026 = vst [vmem:[#allocation39_spill] sm:$0xff] %v18302_v13  ;;  %v18304_v58 = vpop.f32.mrb[71].mxu0  ;;  %v18306_v30 = vpop.f32.mrb[71].mxu1  ;;  %v18572_v15 = vld [vmem:[#allocation18 + $0x38] sm:$0xff] }
0x25d5   :  { %21027 = vst [vmem:[#allocation50_spill] sm:$0xff] %v18304_v58  ;;  %21028 = vst [vmem:[#allocation40_spill] sm:$0xff] %v18306_v30  ;;  %v18548_v30 = vld [vmem:[#allocation18 + $0x30] sm:$0xff] }
0x25f3   :  { %v8058_v7 = vpop.f32.mrb[72].mxu0  ;;  %v8129_v29 = vpop.f32.mrb[72].mxu1 }
0x25f4   :  { %v8060_v3 = vpop.f32.mrb[73].mxu0  ;;  %v8131_v33 = vpop.f32.mrb[73].mxu1  ;;  %v21032_v7 = vld [vmem:[#allocation98_spill] sm:$0xff]  ;;  %v21033_v29 = vld [vmem:[#allocation99_spill] sm:$0xff] }
0x25f5   :  { %v21034_v3 = vld [vmem:[#allocation101_spill] sm:$0xff]  ;;  %v21035_v33 = vld [vmem:[#allocation103_spill] sm:$0xff] }
0x2613   :  { %v8200_v32 = vpop.f32.mrb[74].mxu0 }
0x2614   :  { %v8204_v61 = vadd.f32 %v14974_v49, %v8200_v32  ;;  %v11223_v4 = vpop.f32.mrb[75].mxu0  ;;  %v21036_v49 = vld [vmem:[#allocation105_spill] sm:$0xff]  ;;  %v21043_v32 = vld [vmem:[#allocation119_spill] sm:$0xff] }
0x2615   :  { %v21037_v4 = vld [vmem:[#allocation107_spill] sm:$0xff] }
0x2616   :  { %v8205_v18 = vmax.f32 %v8204_v61, 0.0  ;;  %v21040_v61 = vld [vmem:[#allocation113_spill] sm:$0xff] }
0x2618   :  { %11257 = vmatmul.mubr.f32.vlgmr.msra.gmra.mrb[74].mxu1 %v8205_v18  ;;  %v21038_v18 = vld [vmem:[#allocation109_spill] sm:$0xff] }
0x2619   :  { %14161 = vmatpush1.bf16.msra.mxu1 %v21029_v41  ;;  %8440 = vmatprep.mubr.f32.mxu1 %v19797_v50  ;;  %v21039_v41 = vld [vmem:[#allocation111_spill] sm:$0xff] }
0x261a   :  { %14163 = vmatprep.subr.bf16.mxu1 %v21030_v27  ;;  %v21041_v27 = vld [vmem:[#allocation115_spill] sm:$0xff] }
0x261d   :  { %14165 = vmatpush1.bf16.msra.mxu1 %v21031_v47  ;;  %v21042_v47 = vld [vmem:[#allocation118_spill] sm:$0xff] }
0x261e   :  { %14167 = vmatprep.subr.bf16.mxu1 %v21032_v7  ;;  %v21044_v7 = vld [vmem:[#allocation121_spill] sm:$0xff] }
0x2621   :  { %14169 = vmatpush1.bf16.msra.mxu1 %v21033_v29  ;;  %v21045_v29 = vld [vmem:[#allocation87_spill] sm:$0xff] }
0x2622   :  { %14171 = vmatprep.subr.bf16.mxu1 %v21034_v3 }
0x2625   :  { %14173 = vmatpush1.bf16.msra.mxu1 %v21035_v33  ;;  %v9803_v33 = vsel %vm6555_vm5, 1.0, %v19797_v50 }
0x2626   :  { %14175 = vmatprep.subr.bf16.mxu1 %v21036_v49  ;;  %vm6558_vm6 = vcmp.gt.f32.partialorder %v9803_v33, 0.0 }
0x2627   :  { %vm6559_vm7 = vmand %vm6558_vm6, %vm946_vm4 }
0x2629   :  { %14177 = vmatpush1.bf16.msra.mxu1 %v21037_v4  ;;  %v14975_v4 = vld [vmem:[%s18968_s14] ss:$0 sm:$0xff] }
0x262a   :  { %14179 = vmatprep.subr.bf16.mxu1 %v21038_v18 }
0x262d   :  { %14181 = vmatpush1.bf16.msra.mxu1 %v21039_v41 }
0x262e   :  { %14183 = vmatprep.subr.bf16.mxu1 %v21040_v61  ;;  %v21047_v61 = vld [vmem:[#allocation341_spill] sm:$0xff] }
0x2631   :  { %14185 = vmatpush1.bf16.msra.mxu1 %v21041_v27  ;;  %v6560_v27 = vsel %vm6559_vm7, -10000000.0, %v21047_v61 }
0x2632   :  { %14187 = vmatprep.subr.bf16.mxu1 %v21042_v47 }
0x2635   :  { %14189 = vmatpush1.bf16.msra.mxu1 %v21043_v32 }
0x2636   :  { %14223 = vmatprep.subr.bf16.mxu1 %v21044_v7 }
0x26eb   :  { %v8273_v49 = vpop.f32.mrb[74].mxu1 }
0x26ec   :  { %v8274_v18 = vadd.f32 %v14975_v4, %v8273_v49  ;;  %v11258_v41 = vpop.f32.mrb[75].mxu1 }
0x26ee   :  { %v8277_v47 = vadd.f32 %v8274_v18, %v6560_v27  ;;  %v21048_v27 = vmov 1.0  }
0x26f0   :  { %8279 = vst [vmem:[#allocation27 + $0x20] sm:$0xff] %v8277_v47  ;;  %8280 = vmax.xlane.f32.xlu0 %v8277_v47 }
0x277d   :  { %v8281_v32 = vpop.xlane.xlu0 %8280 }
0x277e   :  { %vm8282_vm8 = vcmp.eq.f32.partialorder %v8277_v47, %v8281_v32  ;;  %v21049_v47 = vld [vmem:[#allocation123_spill] sm:$0xff]  ;;  %v21054_v32 = vld [vmem:[#allocation128_spill] sm:$0xff] }
0x277f   :  { %v8283_v7 = vsel %vm8282_vm8, %v21045_v29, 128 }
0x2780   :  { %v8285_v3 = vshra.s32 %v8283_v7, 16  ;;  %v8284_v16 = vand.u32 65535, %v8283_v7  ;;  %v21055_v7 = vld [vmem:[#allocation129_spill] sm:$0xff] }
0x2782   :  { %v8287_v33 = vcvt.s32.f32 %v8285_v3  ;;  %v8286_v26 = vcvt.s32.f32 %v8284_v16  ;;  %v21053_v16 = vld [vmem:[#allocation127_spill] sm:$0xff]  ;;  %v21056_v3 = vld [vmem:[#allocation130_spill] sm:$0xff] }
0x2784   :  { %8288 = vmin.xlane.f32.xlu1 %v8287_v33 }
0x2811   :  { %v8289_v28 = vpop.xlane.xlu1 %8288 }
0x2812   :  { %vm8290_vm4 = vcmp.eq.f32.partialorder %v8287_v33, %v8289_v28  ;;  %v8295_v49 = vcvt.f32.s32 %v8289_v28  ;;  %v21052_v28 = vld [vmem:[#allocation126_spill] sm:$0xff]  ;;  %v21057_v33 = vld [vmem:[#allocation131_spill] sm:$0xff] }
0x2813   :  { %v8291_v12 = vsel %vm8290_vm4, %v8286_v26, inf  ;;  %v21051_v26 = vld [vmem:[#allocation125_spill] sm:$0xff] }
0x2814   :  { %8292 = vmin.xlane.f32.xlu0 %v8291_v12  ;;  %v8296_v41 = vshll.u32 %v8295_v49, 16  ;;  %v21050_v12 = vld [vmem:[#allocation124_spill] sm:$0xff] }
0x2815   :  { %v21058_v49 = vld [vmem:[#allocation132_spill] sm:$0xff] }
0x28a1   :  { %v8293_v4 = vpop.xlane.xlu0 %8292 }
0x28a2   :  { %v8294_v61 = vcvt.f32.s32 %v8293_v4  ;;  %v21059_v4 = vld [vmem:[#allocation133_spill] sm:$0xff] }
0x28a4   :  { %v8297_v18 = vadd.s32 %v8296_v41, %v8294_v61  ;;  %v21060_v41 = vld [vmem:[#allocation134_spill] sm:$0xff]  ;;  %v21061_v61 = vld [vmem:[#allocation135_spill] sm:$0xff] }
0x28a6   :  { %vm8298_vm9 = vcmp.eq.s32.totalorder %v21045_v29, %v8297_v18  ;;  %v21089_v29 = vld [vmem:[#allocation162_spill] sm:$0xff]  ;;  %v21090_v18 = vld [vmem:[#allocation163_spill] sm:$0xff] }
0x28a7   :  { %9811 = vmatmul.mubr.msk.f32.vlgmr.msra.gmra.mrb[76].mxu0 %vm8298_vm9, %v21048_v27  ;;  %9812 = vmatmul.mubr.msk.f32.vlgmr.msra.gmra.mrb[76].mxu1 %vm8298_vm9, %v21048_v27 }
0x28a8   :  { %14193 = vmatpush1.bf16.msra.mxu0 %v21049_v47  ;;  %8511 = vmatprep.mubr.f32.mxu0 %v19797_v50  ;;  %v21062_v47 = vld [vmem:[#allocation136_spill] sm:$0xff] }
0x28a9   :  { %14195 = vmatprep.subr.bf16.mxu0 %v21050_v12  ;;  %14225 = vmatpush1.bf16.msra.mxu1 %v21051_v26  ;;  %v21063_v12 = vld [vmem:[#allocation137_spill] sm:$0xff]  ;;  %v21064_v26 = vld [vmem:[#allocation138_spill] sm:$0xff] }
0x28aa   :  { %14227 = vmatprep.subr.bf16.mxu1 %v21052_v28  ;;  %8583 = vmatprep.mubr.f32.mxu1 %v19797_v50  ;;  %v21065_v28 = vld [vmem:[#allocation139_spill] sm:$0xff] }
0x28ac   :  { %14197 = vmatpush1.bf16.msra.mxu0 %v21053_v16  ;;  %v21066_v16 = vld [vmem:[#allocation140_spill] sm:$0xff] }
0x28ad   :  { %14199 = vmatprep.subr.bf16.mxu0 %v21054_v32  ;;  %14229 = vmatpush1.bf16.msra.mxu1 %v21055_v7  ;;  %v21067_v32 = vld [vmem:[#allocation141_spill] sm:$0xff]  ;;  %v21068_v7 = vld [vmem:[#allocation142_spill] sm:$0xff] }
0x28ae   :  { %14231 = vmatprep.subr.bf16.mxu1 %v21056_v3  ;;  %v21069_v3 = vld [vmem:[#allocation143_spill] sm:$0xff] }
0x28b0   :  { %14201 = vmatpush1.bf16.msra.mxu0 %v21057_v33  ;;  %v21070_v33 = vld [vmem:[#allocation144_spill] sm:$0xff] }
0x28b1   :  { %14203 = vmatprep.subr.bf16.mxu0 %v21058_v49  ;;  %14233 = vmatpush1.bf16.msra.mxu1 %v21059_v4  ;;  %v21071_v49 = vld [vmem:[#allocation145_spill] sm:$0xff]  ;;  %v21072_v4 = vld [vmem:[#allocation146_spill] sm:$0xff] }
0x28b2   :  { %14235 = vmatprep.subr.bf16.mxu1 %v21060_v41  ;;  %v21073_v41 = vld [vmem:[#allocation147_spill] sm:$0xff] }
0x28b4   :  { %14205 = vmatpush1.bf16.msra.mxu0 %v21061_v61  ;;  %v21074_v61 = vld [vmem:[#allocation148_spill] sm:$0xff] }
0x28b5   :  { %14207 = vmatprep.subr.bf16.mxu0 %v21062_v47  ;;  %14237 = vmatpush1.bf16.msra.mxu1 %v21063_v12  ;;  %v21075_v47 = vld [vmem:[#allocation149_spill] sm:$0xff]  ;;  %v21076_v12 = vld [vmem:[#allocation150_spill] sm:$0xff] }
0x28b6   :  { %14239 = vmatprep.subr.bf16.mxu1 %v21064_v26  ;;  %v21077_v26 = vld [vmem:[#allocation151_spill] sm:$0xff] }
0x28b8   :  { %14209 = vmatpush1.bf16.msra.mxu0 %v21065_v28  ;;  %v21078_v28 = vld [vmem:[#allocation152_spill] sm:$0xff] }
0x28b9   :  { %14211 = vmatprep.subr.bf16.mxu0 %v21066_v16  ;;  %14241 = vmatpush1.bf16.msra.mxu1 %v21067_v32  ;;  %v21079_v16 = vld [vmem:[#allocation153_spill] sm:$0xff] }
0x28ba   :  { %14243 = vmatprep.subr.bf16.mxu1 %v21068_v7  ;;  %v21080_v32 = vld [vmem:[#allocation169_spill] sm:$0xff]  ;;  %v21081_v7 = vld [vmem:[#allocation154_spill] sm:$0xff] }
0x28bc   :  { %14213 = vmatpush1.bf16.msra.mxu0 %v21069_v3  ;;  %v21082_v3 = vld [vmem:[#allocation155_spill] sm:$0xff] }
0x28bd   :  { %14215 = vmatprep.subr.bf16.mxu0 %v21070_v33  ;;  %14245 = vmatpush1.bf16.msra.mxu1 %v21071_v49  ;;  %v21083_v33 = vld [vmem:[#allocation156_spill] sm:$0xff]  ;;  %v21084_v49 = vld [vmem:[#allocation157_spill] sm:$0xff] }
0x28be   :  { %14247 = vmatprep.subr.bf16.mxu1 %v21072_v4  ;;  %v21085_v4 = vld [vmem:[#allocation158_spill] sm:$0xff] }
0x28c0   :  { %14217 = vmatpush1.bf16.msra.mxu0 %v21073_v41  ;;  %v21086_v41 = vld [vmem:[#allocation159_spill] sm:$0xff] }
0x28c1   :  { %14219 = vmatprep.subr.bf16.mxu0 %v21074_v61  ;;  %14249 = vmatpush1.bf16.msra.mxu1 %v21075_v47  ;;  %v21087_v61 = vld [vmem:[#allocation160_spill] sm:$0xff]  ;;  %v21088_v47 = vld [vmem:[#allocation161_spill] sm:$0xff] }
0x28c2   :  { %14251 = vmatprep.subr.bf16.mxu1 %v21076_v12  ;;  %v21092_v12 = vld [vmem:[#allocation165_spill] sm:$0xff] }
0x28c4   :  { %14221 = vmatpush1.bf16.msra.mxu0 %v21077_v26  ;;  %v21093_v26 = vld [vmem:[#allocation166_spill] sm:$0xff] }
0x28c5   :  { %14255 = vmatprep.subr.bf16.mxu0 %v21078_v28  ;;  %14253 = vmatpush1.bf16.msra.mxu1 %v21079_v16  ;;  %v21094_v28 = vld [vmem:[#allocation167_spill] sm:$0xff]  ;;  %v21095_v16 = vld [vmem:[#allocation168_spill] sm:$0xff] }
0x28c6   :  { %14287 = vmatprep.subr.bf16.mxu1 %v21080_v32  ;;  %v21096_v32 = vld [vmem:[#allocation170_spill] sm:$0xff] }
0x28c7   :  { %9813 = vmatmul.mubr.msk.f32.vlgmr.msra.gmra.mrb[78].mxu0 %vm8298_vm9, %v21048_v27  ;;  %v21091_v27 = vld [vmem:[#allocation164_spill] sm:$0xff] }
0x28c8   :  { %14257 = vmatpush1.bf16.msra.mxu0 %v21081_v7  ;;  %8654 = vmatprep.mubr.f32.mxu0 %v19797_v50 }
0x28c9   :  { %14259 = vmatprep.subr.bf16.mxu0 %v21082_v3 }
0x28cc   :  { %14261 = vmatpush1.bf16.msra.mxu0 %v21083_v33 }
0x28cd   :  { %14263 = vmatprep.subr.bf16.mxu0 %v21084_v49 }
0x28d0   :  { %14265 = vmatpush1.bf16.msra.mxu0 %v21085_v4 }
0x28d1   :  { %14267 = vmatprep.subr.bf16.mxu0 %v21086_v41  ;;  %v14976_v41 = vld [vmem:[%s18970_s16] ss:$0 sm:$0xff] }
0x28d4   :  { %14269 = vmatpush1.bf16.msra.mxu0 %v21087_v61 }
0x28d5   :  { %14271 = vmatprep.subr.bf16.mxu0 %v21088_v47 }
0x28d8   :  { %14273 = vmatpush1.bf16.msra.mxu0 %v21089_v29  ;;  %v21098_v29 = vld [vmem:[#allocation171_spill] sm:$0xff] }
0x28d9   :  { %14275 = vmatprep.subr.bf16.mxu0 %v21090_v18  ;;  %v21099_v18 = vld [vmem:[#allocation172_spill] sm:$0xff] }
0x28dc   :  { %14277 = vmatpush1.bf16.msra.mxu0 %v21091_v27  ;;  %v21100_v27 = vld [vmem:[#allocation173_spill] sm:$0xff] }
0x28dd   :  { %14279 = vmatprep.subr.bf16.mxu0 %v21092_v12  ;;  %v21101_v12 = vld [vmem:[#allocation174_spill] sm:$0xff] }
0x28e0   :  { %14281 = vmatpush1.bf16.msra.mxu0 %v21093_v26  ;;  %v21102_v26 = vld [vmem:[#allocation175_spill] sm:$0xff] }
0x28e1   :  { %14283 = vmatprep.subr.bf16.mxu0 %v21094_v28  ;;  %v21103_v28 = vld [vmem:[#allocation176_spill] sm:$0xff] }
0x28e4   :  { %14285 = vmatpush1.bf16.msra.mxu0 %v21095_v16  ;;  %v21104_v16 = vld [vmem:[#allocation177_spill] sm:$0xff] }
0x28e5   :  { %14319 = vmatprep.subr.bf16.mxu0 %v21096_v32  ;;  %v21105_v32 = vld [vmem:[#allocation178_spill] sm:$0xff] }
0x297a   :  { %v8371_v7 = vpop.f32.mrb[76].mxu0  ;;  %v8442_v3 = vpop.f32.mrb[76].mxu1 }
0x297b   :  { %v8373_v33 = vpop.f32.mrb[77].mxu0  ;;  %v8444_v49 = vpop.f32.mrb[77].mxu1  ;;  %v21106_v7 = vld [vmem:[#allocation179_spill] sm:$0xff]  ;;  %v21107_v3 = vld [vmem:[#allocation180_spill] sm:$0xff] }
0x297c   :  { %v21108_v33 = vld [vmem:[#allocation181_spill] sm:$0xff]  ;;  %v21109_v49 = vld [vmem:[#allocation182_spill] sm:$0xff] }
0x299a   :  { %v8513_v4 = vpop.f32.mrb[78].mxu0 }
0x299b   :  { %v8518_v61 = vadd.f32 %v14976_v41, %v8513_v4  ;;  %v18403_v47 = vpop.f32.mrb[79].mxu0  ;;  %v21110_v4 = vld [vmem:[#allocation183_spill] sm:$0xff]  ;;  %v21111_v41 = vld [vmem:[#allocation184_spill] sm:$0xff] }
0x299c   :  { %21097 = vst [vmem:[#allocation52_spill] sm:$0xff] %v18403_v47  ;;  %v14983_v47 = vld [vmem:[#allocation15 + $0x28] sm:$0xff] }
0x299d   :  { %8584 = vmatmul.mubr.f32.vlgmr.msra.gmra.mrb[78].mxu1 %v8518_v61  ;;  %8655 = vmatmul.mubr.f32.vlgmr.msra.gmra.mrb[80].mxu0 %v8518_v61 }
0x299e   :  { %14289 = vmatpush1.bf16.msra.mxu1 %v21098_v29  ;;  %14321 = vmatpush1.bf16.msra.mxu0 %v21099_v18  ;;  %v21112_v29 = vld [vmem:[#allocation185_spill] sm:$0xff]  ;;  %v21113_v18 = vld [vmem:[#allocation186_spill] sm:$0xff] }
0x299f   :  { %14291 = vmatprep.subr.bf16.mxu1 %v21100_v27  ;;  %14323 = vmatprep.subr.bf16.mxu0 %v21101_v12  ;;  %v21114_v27 = vld [vmem:[#allocation187_spill] sm:$0xff]  ;;  %v21115_v12 = vld [vmem:[#allocation188_spill] sm:$0xff] }
0x29a0   :  { %8725 = vmatprep.mubr.f32.mxu1 %v19797_v50  ;;  %8796 = vmatprep.mubr.f32.mxu0 %v19797_v50 }
0x29a2   :  { %14293 = vmatpush1.bf16.msra.mxu1 %v21102_v26  ;;  %14325 = vmatpush1.bf16.msra.mxu0 %v21103_v28  ;;  %v21116_v26 = vld [vmem:[#allocation189_spill] sm:$0xff]  ;;  %v21117_v28 = vld [vmem:[#allocation190_spill] sm:$0xff] }
0x29a3   :  { %14295 = vmatprep.subr.bf16.mxu1 %v21104_v16  ;;  %14327 = vmatprep.subr.bf16.mxu0 %v21105_v32  ;;  %v21118_v16 = vld [vmem:[#allocation191_spill] sm:$0xff]  ;;  %v21119_v32 = vld [vmem:[#allocation192_spill] sm:$0xff] }
0x29a6   :  { %14297 = vmatpush1.bf16.msra.mxu1 %v21106_v7  ;;  %14329 = vmatpush1.bf16.msra.mxu0 %v21107_v3  ;;  %v21120_v7 = vld [vmem:[#allocation193_spill] sm:$0xff]  ;;  %v21121_v3 = vld [vmem:[#allocation194_spill] sm:$0xff] }
0x29a7   :  { %14299 = vmatprep.subr.bf16.mxu1 %v21108_v33  ;;  %14331 = vmatprep.subr.bf16.mxu0 %v21109_v49  ;;  %v21122_v33 = vld [vmem:[#allocation195_spill] sm:$0xff]  ;;  %v21123_v49 = vld [vmem:[#allocation196_spill] sm:$0xff] }
0x29aa   :  { %14301 = vmatpush1.bf16.msra.mxu1 %v21110_v4  ;;  %14333 = vmatpush1.bf16.msra.mxu0 %v21111_v41  ;;  %v21124_v4 = vld [vmem:[#allocation197_spill] sm:$0xff]  ;;  %v21125_v41 = vld [vmem:[#allocation198_spill] sm:$0xff] }
0x29ab   :  { %14303 = vmatprep.subr.bf16.mxu1 %v21112_v29  ;;  %14335 = vmatprep.subr.bf16.mxu0 %v21113_v18  ;;  %v21126_v29 = vld [vmem:[#allocation199_spill] sm:$0xff]  ;;  %v21127_v18 = vld [vmem:[#allocation200_spill] sm:$0xff] }
0x29ae   :  { %14305 = vmatpush1.bf16.msra.mxu1 %v21114_v27  ;;  %14337 = vmatpush1.bf16.msra.mxu0 %v21115_v12  ;;  %v21128_v27 = vld [vmem:[#allocation201_spill] sm:$0xff]  ;;  %v21129_v12 = vld [vmem:[#allocation202_spill] sm:$0xff] }
0x29af   :  { %14307 = vmatprep.subr.bf16.mxu1 %v21116_v26  ;;  %14339 = vmatprep.subr.bf16.mxu0 %v21117_v28  ;;  %v21130_v26 = vld [vmem:[#allocation203_spill] sm:$0xff]  ;;  %v21131_v28 = vld [vmem:[#allocation204_spill] sm:$0xff] }
0x29b2   :  { %14309 = vmatpush1.bf16.msra.mxu1 %v21118_v16  ;;  %14341 = vmatpush1.bf16.msra.mxu0 %v21119_v32  ;;  %v21132_v16 = vld [vmem:[#allocation205_spill] sm:$0xff]  ;;  %v21133_v32 = vld [vmem:[#allocation206_spill] sm:$0xff] }
0x29b3   :  { %14311 = vmatprep.subr.bf16.mxu1 %v21120_v7  ;;  %14343 = vmatprep.subr.bf16.mxu0 %v21121_v3  ;;  %v21134_v7 = vld [vmem:[#allocation207_spill] sm:$0xff]  ;;  %v21135_v3 = vld [vmem:[#allocation208_spill] sm:$0xff] }
0x29b6   :  { %14313 = vmatpush1.bf16.msra.mxu1 %v21122_v33  ;;  %14345 = vmatpush1.bf16.msra.mxu0 %v21123_v49  ;;  %v21136_v33 = vld [vmem:[#allocation209_spill] sm:$0xff]  ;;  %v21137_v49 = vld [vmem:[#allocation210_spill] sm:$0xff] }
0x29b7   :  { %14315 = vmatprep.subr.bf16.mxu1 %v21124_v4  ;;  %14347 = vmatprep.subr.bf16.mxu0 %v21125_v41  ;;  %v21138_v4 = vld [vmem:[#allocation211_spill] sm:$0xff]  ;;  %v21139_v41 = vld [vmem:[#allocation212_spill] sm:$0xff] }
0x29ba   :  { %14317 = vmatpush1.bf16.msra.mxu1 %v21126_v29  ;;  %14349 = vmatpush1.bf16.msra.mxu0 %v21127_v18  ;;  %v21141_v29 = vld [vmem:[#allocation214_spill] sm:$0xff]  ;;  %v21142_v18 = vld [vmem:[#allocation215_spill] sm:$0xff] }
0x29bb   :  { %14351 = vmatprep.subr.bf16.mxu1 %v21128_v27  ;;  %14383 = vmatprep.subr.bf16.mxu0 %v21129_v12  ;;  %v21143_v27 = vld [vmem:[#allocation216_spill] sm:$0xff]  ;;  %v21144_v12 = vld [vmem:[#allocation217_spill] sm:$0xff] }
0x29bd   :  { %8726 = vmatmul.mubr.f32.vlgmr.msra.gmra.mrb[80].mxu1 %v8518_v61  ;;  %8797 = vmatmul.mubr.f32.vlgmr.msra.gmra.mrb[82].mxu0 %v8518_v61  ;;  %v21140_v61 = vld [vmem:[#allocation213_spill] sm:$0xff] }
0x29be   :  { %14353 = vmatpush3.bf16.msra.mxu1 %v21130_v26  ;;  %14385 = vmatpush3.bf16.msra.mxu0 %v21131_v28  ;;  %v21145_v26 = vld [vmem:[#allocation218_spill] sm:$0xff]  ;;  %v21146_v28 = vld [vmem:[#allocation219_spill] sm:$0xff] }
0x29bf   :  { %14355 = vmatprep.subr.bf16.mxu1 %v21132_v16  ;;  %14387 = vmatprep.subr.bf16.mxu0 %v21133_v32  ;;  %v21147_v16 = vld [vmem:[#allocation220_spill] sm:$0xff]  ;;  %v21148_v32 = vld [vmem:[#allocation221_spill] sm:$0xff] }
0x29c2   :  { %14357 = vmatpush3.bf16.msra.mxu1 %v21134_v7  ;;  %14389 = vmatpush3.bf16.msra.mxu0 %v21135_v3  ;;  %v21149_v7 = vld [vmem:[#allocation222_spill] sm:$0xff]  ;;  %v21150_v3 = vld [vmem:[#allocation223_spill] sm:$0xff] }
0x29c3   :  { %14359 = vmatprep.subr.bf16.mxu1 %v21136_v33  ;;  %14391 = vmatprep.subr.bf16.mxu0 %v21137_v49  ;;  %v21151_v33 = vld [vmem:[#allocation224_spill] sm:$0xff]  ;;  %v21152_v49 = vld [vmem:[#allocation225_spill] sm:$0xff] }
0x29c6   :  { %14361 = vmatpush3.bf16.msra.mxu1 %v21138_v4  ;;  %14393 = vmatpush3.bf16.msra.mxu0 %v21139_v41  ;;  %v21153_v4 = vld [vmem:[#allocation226_spill] sm:$0xff]  ;;  %v21154_v41 = vld [vmem:[#allocation227_spill] sm:$0xff] }
0x29c7   :  { %14363 = vmatprep.subr.bf16.mxu1 %v21140_v61  ;;  %14395 = vmatprep.subr.bf16.mxu0 %v21141_v29  ;;  %v21155_v61 = vld [vmem:[#allocation228_spill] sm:$0xff]  ;;  %v21156_v29 = vld [vmem:[#allocation229_spill] sm:$0xff] }
0x29ca   :  { %14365 = vmatpush3.bf16.msra.mxu1 %v21142_v18  ;;  %14397 = vmatpush3.bf16.msra.mxu0 %v21143_v27  ;;  %v21157_v18 = vld [vmem:[#allocation230_spill] sm:$0xff]  ;;  %v21158_v27 = vld [vmem:[#allocation231_spill] sm:$0xff] }
0x29cb   :  { %14367 = vmatprep.subr.bf16.mxu1 %v21144_v12  ;;  %14399 = vmatprep.subr.bf16.mxu0 %v21145_v26  ;;  %v21159_v12 = vld [vmem:[#allocation232_spill] sm:$0xff]  ;;  %v21160_v26 = vld [vmem:[#allocation233_spill] sm:$0xff] }
0x29ce   :  { %14369 = vmatpush3.bf16.msra.mxu1 %v21146_v28  ;;  %14401 = vmatpush3.bf16.msra.mxu0 %v21147_v16  ;;  %v21161_v28 = vld [vmem:[#allocation234_spill] sm:$0xff] }
0x29cf   :  { %14371 = vmatprep.subr.bf16.mxu1 %v21148_v32  ;;  %14403 = vmatprep.subr.bf16.mxu0 %v21149_v7 }
0x29d2   :  { %14373 = vmatpush3.bf16.msra.mxu1 %v21150_v3  ;;  %14405 = vmatpush3.bf16.msra.mxu0 %v21151_v33 }
0x29d3   :  { %14375 = vmatprep.subr.bf16.mxu1 %v21152_v49  ;;  %14407 = vmatprep.subr.bf16.mxu0 %v21153_v4  ;;  %v14977_v4 = vld [vmem:[#allocation15] sm:$0xff] }
0x29d6   :  { %14377 = vmatpush3.bf16.msra.mxu1 %v21154_v41  ;;  %14409 = vmatpush3.bf16.msra.mxu0 %v21155_v61  ;;  %v14978_v61 = vld [vmem:[#allocation15 + $0x10] sm:$0xff] }
0x29d7   :  { %14379 = vmatprep.subr.bf16.mxu1 %v21156_v29  ;;  %14411 = vmatprep.subr.bf16.mxu0 %v21157_v18 }
0x29da   :  { %14381 = vmatpush3.bf16.msra.mxu1 %v21158_v27  ;;  %14413 = vmatpush3.bf16.msra.mxu0 %v21159_v12 }
0x29db   :  { %14415 = vmatprep.subr.bf16.mxu1 %v21160_v26  ;;  %14447 = vmatprep.subr.bf16.mxu0 %v21161_v28 }
0x2a70   :  { %v8585_v16 = vpop.f32.mrb[78].mxu1  ;;  %v8656_v32 = vpop.f32.mrb[80].mxu0 }
0x2a71   :  { %v8587_v7 = vpop.f32.mrb[79].mxu1  ;;  %v8658_v3 = vpop.f32.mrb[81].mxu0  ;;  %v8586_v41 = vadd.f32 %v14977_v4, %v8585_v16  ;;  %v8657_v29 = vadd.f32 %v14978_v61, %v8656_v32 }
0x2a72   :  { %v8588_v26 = vadd.f32 %v14981_v63, %v8587_v7  ;;  %v8659_v28 = vadd.f32 %v14982_v43, %v8658_v3 }
0x2a90   :  { %v8727_v33 = vpop.f32.mrb[80].mxu1  ;;  %v8798_v49 = vpop.f32.mrb[82].mxu0 }
0x2a91   :  { %v8728_v18 = vadd.f32 %v14979_v11, %v8727_v33  ;;  %v8799_v27 = vadd.f32 %v14980_v19, %v8798_v49  ;;  %v8729_v45 = vpop.f32.mrb[81].mxu1  ;;  %v8800_v12 = vpop.f32.mrb[83].mxu0  ;;  %v21162_v11 = vld [vmem:[#allocation344_spill] sm:$0xff]  ;;  %v21163_v33 = vld [vmem:[#allocation382_spill] sm:$0xff] }
0x2a92   :  { %v8730_v5 = vadd.f32 %v14983_v47, %v8729_v45  ;;  %v8801_v24 = vadd.f32 %v14984_v54, %v8800_v12  ;;  %v2640_v19 = vmul.f32 %v21162_v11, %v21162_v11  ;;  %v6147_v63 = vmul.f32 %v21163_v33, %v21163_v33 }
0x2a93   :  { %v8803_v50 = vmax.f32 %v8586_v41, %v8728_v18  ;;  %v8805_v40 = vmax.f32 %v8657_v29, %v8799_v27 }
0x2a94   :  { %v8804_v46 = vmax.f32 %v8588_v26, %v8730_v5  ;;  %v8806_v16 = vmax.f32 %v8659_v28, %v8801_v24 }
0x2a96   :  { %v8807_v4 = vmax.f32 %v8803_v50, %v8804_v46  ;;  %v8808_v32 = vmax.f32 %v8805_v40, %v8806_v16 }
0x2a98   :  { %v8809_v61 = vmax.f32 %v8807_v4, %v8808_v32 }
0x2a9a   :  { %8810 = vmax.xlane.f32.xlu1 %v8809_v61 }
0x2a9e   :  { %2641 = vadd.xlane.f32.xlu1 %v2640_v19 }
0x2aa2   :  { %6148 = vadd.xlane.f32.xlu1 %v6147_v63 }
0x2b27   :  { %v8811_v43 = vpop.xlane.xlu1 %8810 }
0x2b28   :  { %v8812_v45 = vsub.f32 %v8586_v41, %v8811_v43  ;;  %v8813_v47 = vsub.f32 %v8588_v26, %v8811_v43  ;;  %v8814_v54 = vsub.f32 %v8657_v29, %v8811_v43  ;;  %v8815_v7 = vsub.f32 %v8659_v28, %v8811_v43 }
0x2b29   :  { %v8816_v50 = vsub.f32 %v8728_v18, %v8811_v43  ;;  %v8817_v40 = vsub.f32 %v8730_v5, %v8811_v43  ;;  %v8818_v16 = vsub.f32 %v8799_v27, %v8811_v43  ;;  %v8819_v32 = vsub.f32 %v8801_v24, %v8811_v43 }
0x2b2a   :  { %v8820_v3 = vmul.f32 1.442695, %v8812_v45  ;;  %v8822_v49 = vmul.f32 1.442695, %v8813_v47  ;;  %v8824_v12 = vmul.f32 1.442695, %v8814_v54 }
0x2b2b   :  { %v8826_v46 = vmul.f32 1.442695, %v8815_v7  ;;  %v8828_v4 = vmul.f32 1.442695, %v8816_v50  ;;  %v8830_v61 = vmul.f32 1.442695, %v8817_v40  ;;  %v2642_v50 = vpop.xlane.xlu1 %2641 }
0x2b2c   :  { %14906 = vpow2.f32 %v8820_v3  ;;  %v8832_v11 = vmul.f32 1.442695, %v8818_v16  ;;  %v8834_v41 = vmul.f32 1.442695, %v8819_v32  ;;  %v21166_v3 = vld [vmem:[#allocation235_spill] sm:$0xff] }
0x2b2d   :  { %14908 = vpow2.f32 %v8822_v49  ;;  %v4404_v49 = vmul.f32 %v21166_v3, %v21166_v3 }
0x2b2e   :  { %14910 = vpow2.f32 %v8824_v12  ;;  %v7890_v12 = vmul.f32 %v18160_v52, %v18160_v52  ;;  %v18510_v52 = vld [vmem:[#allocation18 + $0x10] sm:$0xff] }
0x2b2f   :  { %14912 = vpow2.f32 %v8826_v46  ;;  %v2643_v46 = vmax.f32 %v2642_v50, 1e-16  ;;  %v6149_v40 = vpop.xlane.xlu1 %6148  ;;  %v18517_v50 = vld [vmem:[#allocation18 + $0x18] sm:$0xff] }
0x2b30   :  { %14914 = vpow2.f32 %v8828_v4  ;;  %v6150_v16 = vmax.f32 %v6149_v40, 1e-16 }
0x2b31   :  { %14916 = vpow2.f32 %v8830_v61  ;;  %v21167_v61 = vld [vmem:[#allocation374_spill] sm:$0xff] }
0x2b32   :  { %14918 = vpow2.f32 %v8832_v11 }
0x2b33   :  { %14920 = vpow2.f32 %v8834_v41 }
0x2b34   :  { %14922 = vrsqrt.f32 %v2643_v46 }
0x2b35   :  { %14924 = vrsqrt.f32 %v6150_v16  ;;  %v18520_v16 = vld [vmem:[#allocation20] sm:$0xff] }
0x2b36   :  { %v18475_v29 = vpop.eup %14906 }
0x2b37   :  { %v18477_v26 = vpop.eup %14908 }
0x2b38   :  { %v8836_v18 = vadd.f32 %v18477_v26, %v18475_v29  ;;  %v18481_v28 = vpop.eup %14910 }
0x2b39   :  { %v18484_v24 = vpop.eup %14912 }
0x2b3a   :  { %v8837_v5 = vadd.f32 %v18481_v28, %v8836_v18  ;;  %v18487_v19 = vpop.eup %14914  ;;  %v18506_v18 = vld [vmem:[#allocation18] sm:$0xff] }
0x2b3b   :  { %21164 = vst [vmem:[#allocation41_spill] sm:$0xff] %v18487_v19  ;;  %v18490_v63 = vpop.eup %14916 }
0x2b3c   :  { %v8838_v27 = vadd.f32 %v18484_v24, %v8837_v5  ;;  %v18493_v45 = vpop.eup %14918  ;;  %v21168_v5 = vld [vmem:[#allocation375_spill] sm:$0xff] }
0x2b3d   :  { %21165 = vst [vmem:[#allocation53_spill] sm:$0xff] %v18493_v45  ;;  %v18496_v54 = vpop.eup %14920 }
0x2b3e   :  { %v8839_v33 = vadd.f32 %v18487_v19, %v8838_v27  ;;  %v14923_v4 = vpop.eup %14922 }
0x2b3f   :  { %v18503_v32 = vpop.eup %14924  ;;  %v2645_v11 = vmul.f32 %v14923_v4, %v21167_v61  ;;  %v2647_v27 = vmul.f32 %v14923_v4, %v21168_v5  ;;  %v21172_v5 = vld [vmem:[#allocation244_spill] sm:$0xff]  ;;  %v2652_v58 = vmul.f32 %v14923_v4, %v21180_v20 }
0x2b40   :  { %v8840_v43 = vadd.f32 %v18490_v63, %v8839_v33  ;;  %v21169_v33 = vld [vmem:[#allocation376_spill] sm:$0xff] }
0x2b41   :  { %v2653_v46 = vmul.f32 %v2645_v11, %v18506_v18  ;;  %v2655_v61 = vmul.f32 %v2647_v27, %v18510_v52  ;;  %v21174_v27 = vld [vmem:[#allocation378_spill] sm:$0xff] }
0x2b42   :  { %v8841_v47 = vadd.f32 %v18493_v45, %v8840_v43  ;;  %v2646_v43 = vmul.f32 %v14923_v4, %v21169_v33  ;;  %v21173_v45 = vld [vmem:[#allocation245_spill] sm:$0xff]  ;;  %v2649_v17 = vmul.f32 %v14923_v4, %v21174_v27 }
0x2b44   :  { %v8842_v7 = vadd.f32 %v18496_v54, %v8841_v47  ;;  %v18512_v47 = vld [vmem:[#allocation18 + $0x8] sm:$0xff] }
0x2b45   :  { %v2654_v33 = vmul.f32 %v2646_v43, %v18512_v47  ;;  %v2650_v43 = vmul.f32 %v14923_v4, %v21176_v44 }
0x2b46   :  { %8843 = vadd.xlane.f32.xlu0 %v8842_v7  ;;  %v21170_v7 = vld [vmem:[#allocation377_spill] sm:$0xff] }
0x2b47   :  { %v2648_v3 = vmul.f32 %v14923_v4, %v21170_v7  ;;  %v6153_v7 = vmul.f32 %v18503_v32, %v21173_v45  ;;  %v18540_v45 = vadd.f32 %v2653_v46, %v18520_v16 }
0x2b49   :  { %v2656_v11 = vmul.f32 %v2648_v3, %v18517_v50  ;;  %v21178_v3 = vld [vmem:[#allocation247_spill] sm:$0xff]  ;;  %v6161_v46 = vmul.f32 %v6153_v7, %v18512_v47 }
0x2b4a   :  { %4405 = vadd.xlane.f32.xlu0 %v4404_v49  ;;  %v21171_v49 = vld [vmem:[#allocation122_spill] sm:$0xff] }
0x2b4b   :  { %v18561_v37 = vadd.f32 %v2656_v11, %v18534_v53 }
0x2b4e   :  { %7891 = vadd.xlane.f32.xlu0 %v7890_v12  ;;  %v6152_v12 = vmul.f32 %v18503_v32, %v21171_v49  ;;  %v18530_v49 = vld [vmem:[#allocation20 + $0x8] sm:$0xff] }
0x2b50   :  { %v6160_v8 = vmul.f32 %v6152_v12, %v18506_v18  ;;  %v6156_v12 = vmul.f32 %v18503_v32, %v21178_v3  ;;  %v21179_v3 = vld [vmem:[#allocation248_spill] sm:$0xff] }
0x2b51   :  { %v6158_v22 = vmul.f32 %v18503_v32, %v21179_v3  ;;  %v18592_v3 = vld [vmem:[#allocation20 + $0x28] sm:$0xff] }
0x2b52   :  { %v18567_v13 = vadd.f32 %v6160_v8, %v18520_v16  ;;  %v6164_v20 = vmul.f32 %v6156_v12, %v18544_v6  ;;  %v21181_v8 = vld [vmem:[#allocation369_spill] sm:$0xff] }
0x2b53   :  { %v6166_v1 = vmul.f32 %v6158_v22, %v18548_v30 }
0x2bd3   :  { %v8844_v41 = vpop.xlane.xlu0 %8843 }
0x2bd4   :  { %14926 = vrcp.f32 %v8844_v41  ;;  %v6154_v41 = vmul.f32 %v18503_v32, %v21172_v5  ;;  %v2651_v5 = vmul.f32 %v14923_v4, %v21175_v2  ;;  %v18553_v2 = vadd.f32 %v2655_v61, %v18528_v21  ;;  %v18580_v4 = vld [vmem:[#allocation20 + $0x30] sm:$0xff] }
0x2bd5   :  { %v2657_v61 = vmul.f32 %v2649_v17, %v18544_v6  ;;  %v6157_v17 = vmul.f32 %v18503_v32, %v21181_v8  ;;  %v2660_v8 = vmul.f32 %v2652_v58, %v18572_v15 }
0x2bd6   :  { %v6162_v44 = vmul.f32 %v6154_v41, %v18510_v52  ;;  %v2659_v41 = vmul.f32 %v2651_v5, %v18548_v30 }
0x2bd7   :  { %v4406_v40 = vpop.xlane.xlu0 %4405 }
0x2bd8   :  { %v4407_v19 = vmax.f32 %v4406_v40, 1e-16  ;;  %v21177_v40 = vld [vmem:[#allocation246_spill] sm:$0xff]  ;;  %v18595_v12 = vadd.f32 %v6162_v44, %v18528_v21  ;;  %v18610_v44 = vld [vmem:[#allocation20 + $0x38] sm:$0xff] }
0x2bd9   :  { %v6155_v59 = vmul.f32 %v18503_v32, %v21177_v40 }
0x2bda   :  { %14928 = vrsqrt.f32 %v4407_v19  ;;  %v18557_v19 = vadd.f32 %v2654_v33, %v18530_v49  ;;  %v2658_v33 = vmul.f32 %v2650_v43, %v18550_v14 }
0x2bdb   :  { %v7892_v27 = vpop.xlane.xlu0 %7891  ;;  %v6163_v11 = vmul.f32 %v6155_v59, %v18517_v50 }
0x2bdc   :  { %v7893_v40 = vmax.f32 %v7892_v27, 1e-16  ;;  %v18577_v27 = vld [vmem:[#allocation20 + $0x20] sm:$0xff]  ;;  %v18617_v58 = vadd.f32 %v2658_v33, %v18592_v3  ;;  %v21183_v33 = vld [vmem:[#allocation236_spill] sm:$0xff] }
0x2bde   :  { %v18574_v7 = vpop.eup %14926  ;;  %14930 = vrsqrt.f32 %v7893_v40 }
0x2bdf   :  { %v8847_v5 = vmul.f32 %v18574_v7, %v18477_v26  ;;  %v8849_v43 = vmul.f32 %v18574_v7, %v18484_v24  ;;  %v8846_v40 = vmul.f32 %v18574_v7, %v18475_v29  ;;  %v8848_v59 = vmul.f32 %v18574_v7, %v18481_v28 }
0x2be0   :  { %v6159_v26 = vmul.f32 %v18503_v32, %v21182_v31  ;;  %v18602_v24 = vadd.f32 %v6161_v46, %v18530_v49  ;;  %v18605_v29 = vadd.f32 %v2657_v61, %v18577_v27  ;;  %v18608_v28 = vadd.f32 %v2659_v41, %v18580_v4 }
0x2be1   :  { %8918 = vmatprep.mubr.f32.mxu1 %v8847_v5  ;;  %8988 = vmatprep.mubr.f32.mxu0 %v8849_v43  ;;  %v8851_v22 = vmul.f32 %v18574_v7, %v18490_v63  ;;  %v8853_v31 = vmul.f32 %v18574_v7, %v18496_v54  ;;  %v18622_v32 = vadd.f32 %v6163_v11, %v18534_v53  ;;  %v2690_v41 = vmax.f32 %v18540_v45, -4.0  ;;  %v21186_v43 = vld [vmem:[#allocation239_spill] sm:$0xff] }
0x2be2   :  { %8919 = vmatmul.mubr.f32.vlgmr.msra.gmra.mrb[82].mxu1 %v8846_v40  ;;  %8989 = vmatmul.mubr.f32.vlgmr.msra.gmra.mrb[84].mxu0 %v8848_v59  ;;  %v18625_v46 = vadd.f32 %v6164_v20, %v18577_v27  ;;  %v18628_v61 = vmul.f32 %v6157_v17, %v18550_v14  ;;  %v18633_v54 = vadd.f32 %v6166_v1, %v18580_v4  ;;  %v21184_v20 = vld [vmem:[#allocation237_spill] sm:$0xff]  ;;  %v21185_v1 = vld [vmem:[#allocation238_spill] sm:$0xff]  ;;  %v21187_v59 = vld [vmem:[#allocation240_spill] sm:$0xff] }
0x2be3   :  { %14417 = vmatpush3.bf16.msra.mxu1 %v20223_v51  ;;  %14449 = vmatpush3.bf16.msra.mxu0 %v20224_v36  ;;  %v18636_v51 = vadd.f32 %v2660_v8, %v18610_v44  ;;  %v18639_v36 = vmul.f32 %v6159_v26, %v18572_v15  ;;  %v21189_v26 = vld [vmem:[#allocation242_spill] sm:$0xff] }
0x2be4   :  { %v18630_v63 = vpop.eup %14928  ;;  %9058 = vmatprep.mubr.f32.mxu1 %v8851_v22  ;;  %9128 = vmatprep.mubr.f32.mxu0 %v8853_v31  ;;  %v2692_v31 = vmax.f32 %v18553_v2, -4.0 }
0x2be5   :  { %14419 = vmatprep.subr.bf16.mxu1 %v20225_v39  ;;  %14451 = vmatprep.subr.bf16.mxu0 %v20226_v42  ;;  %v4409_v11 = vmul.f32 %v18630_v63, %v21183_v33  ;;  %v4411_v17 = vmul.f32 %v18630_v63, %v21184_v20  ;;  %v4410_v5 = vmul.f32 %v18630_v63, %v21185_v1  ;;  %v21188_v39 = vld [vmem:[#allocation241_spill] sm:$0xff] }
0x2be6   :  { %v4412_v40 = vmul.f32 %v18630_v63, %v21186_v43  ;;  %v4413_v8 = vmul.f32 %v18630_v63, %v21187_v59  ;;  %v4415_v42 = vmul.f32 %v18630_v63, %v21188_v39  ;;  %v4414_v45 = vmul.f32 %v18630_v63, %v21189_v26 }
0x2be7   :  { %14421 = vmatpush3.bf16.msra.mxu1 %v20227_v62  ;;  %14453 = vmatpush3.bf16.msra.mxu0 %v20228_v56  ;;  %v4417_v22 = vmul.f32 %v4409_v11, %v18506_v18  ;;  %v4419_v33 = vmul.f32 %v4411_v17, %v18510_v52  ;;  %v4418_v20 = vmul.f32 %v4410_v5, %v18512_v47  ;;  %v2691_v43 = vmax.f32 %v18557_v19, -4.0 }
0x2be8   :  { %v18664_v1 = vpop.eup %14930  ;;  %14423 = vmatprep.subr.bf16.mxu1 %v20229_v55  ;;  %14455 = vmatprep.subr.bf16.mxu0 %v20230_v35  ;;  %v4420_v62 = vmul.f32 %v4412_v40, %v18517_v50  ;;  %v4421_v56 = vmul.f32 %v4413_v8, %v18544_v6  ;;  %v4423_v11 = vmul.f32 %v4415_v42, %v18548_v30 }
0x2be9   :  { %v4425_v2 = vadd.f32 %v4417_v22, %v18520_v16  ;;  %v7895_v17 = vmul.f32 %v18664_v1, %v18292_v48  ;;  %v4427_v5 = vadd.f32 %v4419_v33, %v18528_v21  ;;  %v7897_v55 = vmul.f32 %v18664_v1, %v18294_v0 }
0x2bea   :  { %v4426_v35 = vadd.f32 %v4418_v20, %v18530_v49  ;;  %v7896_v19 = vmul.f32 %v18664_v1, %v18296_v60  ;;  %v4428_v40 = vadd.f32 %v4420_v62, %v18534_v53  ;;  %v7898_v59 = vmul.f32 %v18664_v1, %v18298_v9  ;;  %v21190_v20 = vld [vmem:[#allocation249_spill] sm:$0xff] }
0x2beb   :  { %14425 = vmatpush3.bf16.msra.mxu1 %v20231_v38  ;;  %14457 = vmatpush3.bf16.msra.mxu0 %v20538_v23  ;;  %v4454_v48 = vmax.f32 %v2690_v41, %v4425_v2  ;;  %v7903_v8 = vmul.f32 %v7895_v17, %v18506_v18  ;;  %v4456_v39 = vmax.f32 %v2692_v31, %v4427_v5  ;;  %v2693_v0 = vmax.f32 %v18561_v37, -4.0  ;;  %v21192_v17 = vld [vmem:[#allocation339_spill] sm:$0xff] }
0x2bec   :  { %14427 = vmatprep.subr.bf16.mxu1 %v20539_v25  ;;  %14459 = vmatprep.subr.bf16.mxu0 %v20540_v34  ;;  %v7905_v60 = vmul.f32 %v7897_v55, %v18510_v52  ;;  %v4455_v42 = vmax.f32 %v2691_v43, %v4426_v35  ;;  %v7904_v26 = vmul.f32 %v7896_v19, %v18512_v47  ;;  %v2694_v33 = vmax.f32 %v18605_v29, -4.0  ;;  %v21191_v43 = vld [vmem:[#allocation250_spill] sm:$0xff]  ;;  %v21193_v5 = vld [vmem:[#allocation39_spill] sm:$0xff] }
0x2bed   :  { %v6197_v9 = vmax.f32 %v4454_v48, %v18567_v13  ;;  %v7911_v38 = vadd.f32 %v7903_v8, %v18520_v16  ;;  %v6199_v23 = vmax.f32 %v4456_v39, %v18595_v12  ;;  %v4457_v41 = vmax.f32 %v2693_v0, %v4428_v40  ;;  %v21194_v19 = vld [vmem:[#allocation50_spill] sm:$0xff]  ;;  %v21197_v8 = vld [vmem:[#allocation252_spill] sm:$0xff] }
0x2bee   :  { %v7913_v22 = vadd.f32 %v7905_v60, %v18528_v21  ;;  %v6198_v37 = vmax.f32 %v4455_v42, %v18602_v24  ;;  %v7912_v25 = vadd.f32 %v7904_v26, %v18530_v49  ;;  %v7906_v34 = vmul.f32 %v7898_v59, %v18517_v50  ;;  %v21195_v59 = vld [vmem:[#allocation243_spill] sm:$0xff]  ;;  %v21198_v60 = vld [vmem:[#allocation253_spill] sm:$0xff]  ;;  %v21199_v42 = vld [vmem:[#allocation254_spill] sm:$0xff] }
0x2bef   :  { %14429 = vmatpush3.bf16.msra.mxu1 %v20541_v57  ;;  %14461 = vmatpush3.bf16.msra.mxu0 %v20542_v10  ;;  %v18701_v31 = vmax.f32 %v6197_v9, %v7911_v38  ;;  %v6200_v13 = vmax.f32 %v4457_v41, %v18622_v32  ;;  %v4429_v12 = vadd.f32 %v4421_v56, %v18577_v27  ;;  %v2696_v10 = vmax.f32 %v18608_v28, -4.0  ;;  %v21196_v28 = vld [vmem:[#allocation251_spill] sm:$0xff]  ;;  %v21200_v41 = vld [vmem:[#allocation40_spill] sm:$0xff] }
0x2bf0   :  { %14431 = vmatprep.subr.bf16.mxu1 %v21190_v20  ;;  %14463 = vmatprep.subr.bf16.mxu0 %v21191_v43  ;;  %v18708_v24 = vmax.f32 %v6199_v23, %v7913_v22  ;;  %v18710_v62 = vmax.f32 %v6198_v37, %v7912_v25  ;;  %v7914_v57 = vadd.f32 %v7906_v34, %v18534_v53  ;;  %v2695_v26 = vmax.f32 %v18617_v58, -4.0  ;;  %v21203_v43 = vld [vmem:[#allocation257_spill] sm:$0xff] }
0x2bf1   :  { %v4458_v2 = vmax.f32 %v2694_v33, %v4429_v12  ;;  %v7899_v32 = vmul.f32 %v18664_v1, %v21192_v17  ;;  %v4431_v29 = vadd.f32 %v4423_v11, %v18580_v4  ;;  %v7901_v56 = vmul.f32 %v18664_v1, %v21193_v5  ;;  %v21202_v33 = vld [vmem:[#allocation256_spill] sm:$0xff] }
0x2bf2   :  { %v18719_v55 = vmax.f32 %v6200_v13, %v7914_v57  ;;  %v4422_v35 = vmul.f32 %v4414_v45, %v18550_v14  ;;  %v7900_v40 = vmul.f32 %v18664_v1, %v21194_v19  ;;  %v4416_v48 = vmul.f32 %v18630_v63, %v21195_v59  ;;  %v21201_v13 = vld [vmem:[#allocation255_spill] sm:$0xff]  ;;  %v21204_v57 = vld [vmem:[#allocation258_spill] sm:$0xff]  ;;  %v21206_v5 = vld [vmem:[#allocation260_spill] sm:$0xff] }
0x2bf3   :  { %14433 = vmatpush3.bf16.msra.mxu1 %v21196_v28  ;;  %14465 = vmatpush3.bf16.msra.mxu0 %v21197_v8  ;;  %v6201_v39 = vmax.f32 %v4458_v2, %v18625_v46  ;;  %v7907_v11 = vmul.f32 %v7899_v32, %v18544_v6  ;;  %v4460_v0 = vmax.f32 %v2696_v10, %v4431_v29  ;;  %v21208_v19 = vld [vmem:[#allocation262_spill] sm:$0xff]  ;;  %v21209_v59 = vld [vmem:[#allocation263_spill] sm:$0xff]  ;;  %v21212_v8 = vld [vmem:[#allocation53_spill] sm:$0xff] }
0x2bf4   :  { %14435 = vmatprep.subr.bf16.mxu1 %v21198_v60  ;;  %14467 = vmatprep.subr.bf16.mxu0 %v21199_v42  ;;  %v7909_v45 = vmul.f32 %v7901_v56, %v18548_v30  ;;  %v4430_v9 = vadd.f32 %v4422_v35, %v18592_v3  ;;  %v7908_v63 = vmul.f32 %v7900_v40, %v18550_v14  ;;  %v21207_v35 = vld [vmem:[#allocation261_spill] sm:$0xff]  ;;  %v21215_v60 = vld [vmem:[#allocation268_spill] sm:$0xff]  ;;  %v21216_v42 = vld [vmem:[#allocation267_spill] sm:$0xff] }
0x2bf5   :  { %v7915_v38 = vadd.f32 %v7907_v11, %v18577_v27  ;;  %v6203_v23 = vmax.f32 %v4460_v0, %v18633_v54  ;;  %v4424_v46 = vmul.f32 %v4416_v48, %v18572_v15  ;;  %v7902_v22 = vmul.f32 %v18664_v1, %v21200_v41  ;;  %v21210_v48 = vld [vmem:[#allocation264_spill] sm:$0xff]  ;;  %v21213_v11 = vld [vmem:[#allocation266_spill] sm:$0xff]  ;;  %v21214_v0 = vld [vmem:[#allocation265_spill] sm:$0xff] }
0x2bf6   :  { %v7917_v37 = vadd.f32 %v7909_v45, %v18580_v4  ;;  %v4459_v25 = vmax.f32 %v2695_v26, %v4430_v9  ;;  %v6173_v34 = vadd.f32 %v18628_v61, %v18592_v3  ;;  %v7916_v58 = vadd.f32 %v7908_v63, %v18592_v3  ;;  %v21217_v45 = vld [vmem:[#allocation270_spill] sm:$0xff]  ;;  %v21218_v26 = vld [vmem:[#allocation269_spill] sm:$0xff]  ;;  %v21220_v63 = vld [vmem:[#allocation272_spill] sm:$0xff] }
0x2bf7   :  { %14437 = vmatpush3.bf16.msra.mxu1 %v21201_v13  ;;  %14469 = vmatpush3.bf16.msra.mxu0 %v21202_v33  ;;  %v18747_v12 = vmax.f32 %v6201_v39, %v7915_v38  ;;  %v2697_v54 = vmax.f32 %v18636_v51, -4.0  ;;  %v4432_v20 = vadd.f32 %v4424_v46, %v18610_v44  ;;  %v7910_v1 = vmul.f32 %v7902_v22, %v18572_v15  ;;  %v21205_v51 = vld [vmem:[#allocation259_spill] sm:$0xff]  ;;  %v21222_v38 = vld [vmem:[#allocation274_spill] sm:$0xff]  ;;  %v21224_v46 = vld [vmem:[#allocation276_spill] sm:$0xff] }
0x2bf8   :  { %14439 = vmatprep.subr.bf16.mxu1 %v21203_v43  ;;  %14471 = vmatprep.subr.bf16.mxu0 %v21204_v57  ;;  %v18754_v10 = vmax.f32 %v6203_v23, %v7917_v37  ;;  %v6202_v61 = vmax.f32 %v4459_v25, %v6173_v34  ;;  %v6175_v17 = vadd.f32 %v18639_v36, %v18610_v44  ;;  %v21211_v36 = vld [vmem:[#allocation41_spill] sm:$0xff]  ;;  %v21219_v9 = vmov 0.0   ;;  %v21225_v41 = vld [vmem:[#allocation275_spill] sm:$0xff]  ;;  %v21226_v22 = vld [vmem:[#allocation278_spill] sm:$0xff] }
0x2bf9   :  { %v4461_v2 = vmax.f32 %v2697_v54, %v4432_v20  ;;  %v7918_v32 = vadd.f32 %v7910_v1, %v18610_v44  ;;  %v8850_v28 = vmul.f32 %v18574_v7, %v21211_v36  ;;  %v8852_v39 = vmul.f32 %v18574_v7, %v21212_v8  ;;  %v21221_v7 = vld [vmem:[#allocation271_spill] sm:$0xff]  ;;  %v21223_v23 = vld [vmem:[#allocation273_spill] sm:$0xff]  ;;  %v21228_v25 = vld [vmem:[#allocation280_spill] sm:$0xff] }
0x2bfa   :  { %v18759_v29 = vmax.f32 %v6202_v61, %v7916_v58  ;;  %v21227_v37 = vld [vmem:[#allocation277_spill] sm:$0xff]  ;;  %v21229_v34 = vld [vmem:[#allocation279_spill] sm:$0xff]  ;;  %v21230_v58 = vld [vmem:[#allocation282_spill] sm:$0xff] }
0x2bfb   :  { %14441 = vmatpush3.bf16.msra.mxu1 %v21205_v51  ;;  %14473 = vmatpush3.bf16.msra.mxu0 %v21206_v5  ;;  %v6204_v56 = vmax.f32 %v4461_v2, %v6175_v17  ;;  %v21231_v13 = vld [vmem:[#allocation281_spill] sm:$0xff]  ;;  %v21232_v33 = vld [vmem:[#allocation284_spill] sm:$0xff]  ;;  %v21233_v54 = vld [vmem:[#allocation283_spill] sm:$0xff] }
0x2bfc   :  { %14443 = vmatprep.subr.bf16.mxu1 %v21207_v35  ;;  %14475 = vmatprep.subr.bf16.mxu0 %v21208_v19  ;;  %v21234_v20 = vld [vmem:[#allocation286_spill] sm:$0xff]  ;;  %v21235_v1 = vld [vmem:[#allocation285_spill] sm:$0xff]  ;;  %v21236_v43 = vld [vmem:[#allocation288_spill] sm:$0xff]  ;;  %v21246_v19 = vmov 0.0|0.0  }
0x2bfd   :  { %v18765_v40 = vmax.f32 %v6204_v56, %v7918_v32  ;;  %v21237_v57 = vld [vmem:[#allocation287_spill] sm:$0xff]  ;;  %v21238_v61 = vld [vmem:[#allocation290_spill] sm:$0xff]  ;;  %v21239_v2 = vld [vmem:[#allocation289_spill] sm:$0xff] }
0x2bfe   :  { %v21240_v17 = vld [vmem:[#allocation292_spill] sm:$0xff]  ;;  %v21241_v32 = vld [vmem:[#allocation291_spill] sm:$0xff]  ;;  %v21242_v51 = vld [vmem:[#allocation294_spill] sm:$0xff] }
0x2bff   :  { %14445 = vmatpush3.bf16.msra.mxu1 %v21209_v59  ;;  %14477 = vmatpush3.bf16.msra.mxu0 %v21210_v48  ;;  %v21243_v5 = vld [vmem:[#allocation293_spill] sm:$0xff]  ;;  %v21244_v56 = vld [vmem:[#allocation296_spill] sm:$0xff]  ;;  %v21245_v35 = vld [vmem:[#allocation295_spill] sm:$0xff] }
0x2c00   :  { %14479 = vmatprep.subr.bf16.mxu1 %v21213_v11  ;;  %14511 = vmatprep.subr.bf16.mxu0 %v21214_v0  ;;  %v21247_v59 = vld [vmem:[#allocation305_spill] sm:$0xff] }
0x2c02   :  { %9059 = vmatmul.mubr.f32.vlgmr.msra.gmra.mrb[84].mxu1 %v8850_v28  ;;  %9129 = vmatmul.mubr.f32.vlgmr.msra.gmra.mrb[86].mxu0 %v8852_v39 }
0x2c03   :  { %14481 = vmatpush1.bf16.msra.mxu1 %v21215_v60  ;;  %14513 = vmatpush1.bf16.msra.mxu0 %v21216_v42 }
0x2c04   :  { %14483 = vmatprep.subr.bf16.mxu1 %v21217_v45  ;;  %14515 = vmatprep.subr.bf16.mxu0 %v21218_v26 }
0x2c05   :  { %9199 = vmatprep.mubr.f32.mxu1 %v21219_v9  ;;  %9270 = vmatprep.mubr.f32.mxu0 %v21219_v9 }
0x2c07   :  { %14485 = vmatpush1.bf16.msra.mxu1 %v21220_v63  ;;  %14517 = vmatpush1.bf16.msra.mxu0 %v21221_v7 }
0x2c08   :  { %14487 = vmatprep.subr.bf16.mxu1 %v21222_v38  ;;  %14519 = vmatprep.subr.bf16.mxu0 %v21223_v23 }
0x2c0b   :  { %14489 = vmatpush1.bf16.msra.mxu1 %v21224_v46  ;;  %14521 = vmatpush1.bf16.msra.mxu0 %v21225_v41  ;;  %v14985_v46 = vld [vmem:[%s19969_s23] sm:$0xff] }
0x2c0c   :  { %14491 = vmatprep.subr.bf16.mxu1 %v21226_v22  ;;  %14523 = vmatprep.subr.bf16.mxu0 %v21227_v37  ;;  %v21248_v22 = vld [vmem:[#allocation297_spill] sm:$0xff]  ;;  %v21249_v37 = vld [vmem:[#allocation307_spill] sm:$0xff] }
0x2c0f   :  { %14493 = vmatpush1.bf16.msra.mxu1 %v21228_v25  ;;  %14525 = vmatpush1.bf16.msra.mxu0 %v21229_v34  ;;  %v21250_v25 = vld [vmem:[#allocation309_spill] sm:$0xff]  ;;  %v21251_v34 = vld [vmem:[#allocation298_spill] sm:$0xff] }
0x2c10   :  { %14495 = vmatprep.subr.bf16.mxu1 %v21230_v58  ;;  %14527 = vmatprep.subr.bf16.mxu0 %v21231_v13  ;;  %v21252_v58 = vld [vmem:[#allocation311_spill] sm:$0xff]  ;;  %v21253_v13 = vld [vmem:[#allocation313_spill] sm:$0xff] }
0x2c13   :  { %14497 = vmatpush1.bf16.msra.mxu1 %v21232_v33  ;;  %14529 = vmatpush1.bf16.msra.mxu0 %v21233_v54  ;;  %v21254_v33 = vld [vmem:[#allocation299_spill] sm:$0xff] }
0x2c14   :  { %14499 = vmatprep.subr.bf16.mxu1 %v21234_v20  ;;  %14531 = vmatprep.subr.bf16.mxu0 %v21235_v1  ;;  %v21255_v54 = vld [vmem:[#allocation315_spill] sm:$0xff]  ;;  %v21256_v20 = vld [vmem:[#allocation317_spill] sm:$0xff]  ;;  %v21257_v1 = vld [vmem:[#allocation300_spill] sm:$0xff] }
0x2c17   :  { %14501 = vmatpush1.bf16.msra.mxu1 %v21236_v43  ;;  %14533 = vmatpush1.bf16.msra.mxu0 %v21237_v57  ;;  %v21258_v43 = vld [vmem:[#allocation319_spill] sm:$0xff]  ;;  %v21259_v57 = vld [vmem:[#allocation321_spill] sm:$0xff] }
0x2c18   :  { %14503 = vmatprep.subr.bf16.mxu1 %v21238_v61  ;;  %14535 = vmatprep.subr.bf16.mxu0 %v21239_v2  ;;  %v21260_v61 = vld [vmem:[#allocation301_spill] sm:$0xff]  ;;  %v21261_v2 = vld [vmem:[#allocation323_spill] sm:$0xff] }
0x2c1b   :  { %14505 = vmatpush1.bf16.msra.mxu1 %v21240_v17  ;;  %14537 = vmatpush1.bf16.msra.mxu0 %v21241_v32  ;;  %v21262_v17 = vld [vmem:[#allocation325_spill] sm:$0xff]  ;;  %v21263_v32 = vld [vmem:[#allocation302_spill] sm:$0xff] }
0x2c1c   :  { %14507 = vmatprep.subr.bf16.mxu1 %v21242_v51  ;;  %14539 = vmatprep.subr.bf16.mxu0 %v21243_v5  ;;  %v21264_v51 = vld [vmem:[#allocation327_spill] sm:$0xff]  ;;  %v21265_v5 = vld [vmem:[#allocation329_spill] sm:$0xff] }
0x2c1f   :  { %14509 = vmatpush1.bf16.msra.mxu1 %v21244_v56  ;;  %14541 = vmatpush1.bf16.msra.mxu0 %v21245_v35  ;;  %v21266_v56 = vld [vmem:[#allocation303_spill] sm:$0xff] }
0x2c20   :  { %14542 = vmatprep.subr.bf16.mxu1 %v21246_v19  ;;  %14567 = vmatprep.subr.bf16.mxu0 %v21247_v59  ;;  %v21267_v35 = vld [vmem:[#allocation331_spill] sm:$0xff]  ;;  %v21268_v59 = vld [vmem:[#allocation333_spill] sm:$0xff] }
0x2cb5   :  { %v10644_v48 = vpop.f32.mrb[82].mxu1  ;;  %v10679_v36 = vpop.f32.mrb[84].mxu0 }
0x2cb6   :  { %v10645_v28 = vpop.f32.mrb[83].mxu1  ;;  %v10680_v8 = vpop.f32.mrb[85].mxu0 }
0x2cb7   :  { %v10646_v39 = vadd.f32 %v10645_v28, %v10644_v48  ;;  %v10681_v11 = vadd.f32 %v10680_v8, %v10679_v36  ;;  %v21269_v48 = vld [vmem:[#allocation304_spill] sm:$0xff]  ;;  %v21270_v36 = vld [vmem:[#allocation306_spill] sm:$0xff]  ;;  %v21271_v28 = vld [vmem:[#allocation335_spill] sm:$0xff] }
0x2cb8   :  { %v21272_v8 = vld [vmem:[#allocation337_spill] sm:$0xff] }
0x2cb9   :  { %v8991_v0 = vadd.f32 %v10681_v11, %v10646_v39  ;;  %v21273_v39 = vld [vmem:[#allocation308_spill] sm:$0xff]  ;;  %v21274_v11 = vld [vmem:[#allocation310_spill] sm:$0xff] }
0x2cd5   :  { %v10714_v60 = vpop.f32.mrb[84].mxu1  ;;  %v10749_v42 = vpop.f32.mrb[86].mxu0 }
0x2cd6   :  { %v10715_v45 = vpop.f32.mrb[85].mxu1  ;;  %v10750_v26 = vpop.f32.mrb[87].mxu0 }
0x2cd7   :  { %v10716_v63 = vadd.f32 %v10715_v45, %v10714_v60  ;;  %v10751_v7 = vadd.f32 %v10750_v26, %v10749_v42  ;;  %v21277_v60 = vld [vmem:[#allocation316_spill] sm:$0xff]  ;;  %v21278_v42 = vld [vmem:[#allocation318_spill] sm:$0xff] }
0x2cd8   :  { %v21279_v45 = vld [vmem:[#allocation320_spill] sm:$0xff]  ;;  %v21280_v26 = vld [vmem:[#allocation322_spill] sm:$0xff] }
0x2cd9   :  { %v9061_v38 = vadd.f32 %v10716_v63, %v8991_v0  ;;  %v21276_v0 = vld [vmem:[#allocation314_spill] sm:$0xff]  ;;  %v21281_v63 = vld [vmem:[#allocation324_spill] sm:$0xff] }
0x2cdb   :  { %v9131_v23 = vadd.f32 %v10751_v7, %v9061_v38  ;;  %v21282_v7 = vld [vmem:[#allocation326_spill] sm:$0xff]  ;;  %v21283_v38 = vld [vmem:[#allocation328_spill] sm:$0xff] }
0x2cdd   :  { %v9134_v41 = vadd.f32 %v14985_v46, %v9131_v23  ;;  %v21284_v23 = vld [vmem:[#allocation330_spill] sm:$0xff]  ;;  %v21285_v46 = vld [vmem:[#allocation332_spill] sm:$0xff] }
0x2cdf   :  { %9200 = vmatmul.mubr.f32.vlgmr.msra.gmra.mrb[86].mxu1 %v9134_v41  ;;  %9271 = vmatmul.mubr.f32.vlgmr.msra.gmra.mrb[88].mxu0 %v9134_v41 }
0x2ce0   :  { %14544 = vmatpush3.bf16.msra.mxu1 %v21248_v22  ;;  %11291 = vmatprep.mubr.msk.f32.mxu1 %vm15358_vm0, %v21219_v9  ;;  %v21287_v22 = vld [vmem:[#allocation336_spill] sm:$0xff] }
0x2ce1   :  { %14545 = vmatprep.subr.bf16.mxu1 %v21246_v19  ;;  %14569 = vmatpush1.bf16.msra.mxu0 %v21249_v37  ;;  %v21288_v37 = vld [vmem:[#allocation338_spill] sm:$0xff] }
0x2ce2   :  { %14571 = vmatprep.subr.bf16.mxu0 %v21250_v25  ;;  %9413 = vmatprep.mubr.f32.mxu0 %v21219_v9 }
0x2ce4   :  { %14547 = vmatpush3.bf16.msra.mxu1 %v21251_v34 }
0x2ce5   :  { %14548 = vmatprep.subr.bf16.mxu1 %v21246_v19  ;;  %14573 = vmatpush1.bf16.msra.mxu0 %v21252_v58 }
0x2ce6   :  { %14575 = vmatprep.subr.bf16.mxu0 %v21253_v13 }
0x2ce8   :  { %14550 = vmatpush3.bf16.msra.mxu1 %v21254_v33 }
0x2ce9   :  { %14551 = vmatprep.subr.bf16.mxu1 %v21246_v19  ;;  %14577 = vmatpush1.bf16.msra.mxu0 %v21255_v54  ;;  %v21289_v54 = vld [vmem:[#allocation52_spill] sm:$0xff] }
0x2cea   :  { %14579 = vmatprep.subr.bf16.mxu0 %v21256_v20 }
0x2cec   :  { %14553 = vmatpush3.bf16.msra.mxu1 %v21257_v1 }
0x2ced   :  { %14554 = vmatprep.subr.bf16.mxu1 %v21246_v19  ;;  %14581 = vmatpush1.bf16.msra.mxu0 %v21258_v43  ;;  %v14986_v43 = vld [vmem:[%s18972_s18] ss:$0 sm:$0xff]  ;;  %s15360_s18 = smov [#allocation27]  }
0x2cee   :  { %14583 = vmatprep.subr.bf16.mxu0 %v21259_v57  ;;  %s9743_s21 = sshll.u32 %s15360_s18, 4  ;;  %s9744_s21 = int_to_ptr.vmem [resolvable:$true] %s9743_s21 }
0x2cef   :  { %s15273_s24 = scalar_lea.vmem %s9744_s21, 640  ;;  %p15278_p7 = scmp.lt.s32.totalorder %s9744_s21, %s9744_s21 }
0x2cf0   :  { %14556 = vmatpush3.bf16.msra.mxu1 %v21260_v61  ;;  %p15274_p6 = scmp.ne.s32.totalorder %s9744_s21, %s15273_s24  ;;  %p15279_p8 = scmp.lt.s32.totalorder %s15273_s24, %s15273_s24 }
0x2cf1   :  { %14557 = vmatprep.subr.bf16.mxu1 %v21246_v19  ;;  %14585 = vmatpush1.bf16.msra.mxu0 %v21261_v2  ;;  %v21290_v2 = vld [vmem:[#allocation342_spill] sm:$0xff] }
0x2cf2   :  { %14587 = vmatprep.subr.bf16.mxu0 %v21262_v17  ;;  %v21291_v17 = vld [vmem:[#allocation343_spill] sm:$0xff]  ;;  %p15280_p9 = por %p15279_p8, %p15278_p7 }
0x2cf4   :  { %14559 = vmatpush3.bf16.msra.mxu1 %v21263_v32  ;;  %v21292_v32 = vld [vmem:[#allocation345_spill] sm:$0xff]  ;;  %p15281_p10 = pnand %p15280_p9, %p15274_p6 }
0x2cf5   :  { %14560 = vmatprep.subr.bf16.mxu1 %v21246_v19  ;;  %14589 = vmatpush1.bf16.msra.mxu0 %v21264_v51  ;;  %v21293_v51 = vld [vmem:[#allocation346_spill] sm:$0xff] }
0x2cf6   :  { %14591 = vmatprep.subr.bf16.mxu0 %v21265_v5  ;;  %v21294_v5 = vld [vmem:[#allocation347_spill] sm:$0xff] }
0x2cf8   :  { %14562 = vmatpush3.bf16.msra.mxu1 %v21266_v56  ;;  %v21295_v56 = vld [vmem:[#allocation348_spill] sm:$0xff] }
0x2cf9   :  { %14563 = vmatprep.subr.bf16.mxu1 %v21246_v19  ;;  %14593 = vmatpush1.bf16.msra.mxu0 %v21267_v35  ;;  %v21275_v19 = vld [vmem:[#allocation312_spill] sm:$0xff]  ;;  %v21296_v35 = vld [vmem:[#allocation349_spill] sm:$0xff] }
0x2cfa   :  { %14595 = vmatprep.subr.bf16.mxu0 %v21268_v59  ;;  %v21297_v59 = vld [vmem:[#allocation350_spill] sm:$0xff] }
0x2cfc   :  { %14565 = vmatpush3.bf16.msra.mxu1 %v21269_v48  ;;  %v21298_v48 = vld [vmem:[#allocation351_spill] sm:$0xff] }
0x2cfd   :  { %14599 = vmatprep.subr.bf16.mxu1 %v21270_v36  ;;  %14597 = vmatpush1.bf16.msra.mxu0 %v21271_v28  ;;  %v21299_v36 = vld [vmem:[#allocation352_spill] sm:$0xff]  ;;  %v21300_v28 = vld [vmem:[#allocation353_spill] sm:$0xff] }
0x2cfe   :  { %14631 = vmatprep.subr.bf16.mxu0 %v21272_v8  ;;  %v21301_v8 = vld [vmem:[#allocation354_spill] sm:$0xff] }
0x2cff   :  { %11292 = vmatmul.mubr.f32.vlgmr.msra.gmra.mrb[88].mxu1 %v9134_v41  ;;  %v21286_v41 = vld [vmem:[#allocation334_spill] sm:$0xff] }
0x2d00   :  { %14601 = vmatpush1.bf16.msra.mxu1 %v21273_v39  ;;  %9484 = vmatprep.mubr.f32.mxu1 %v21219_v9  ;;  %v21302_v39 = vld [vmem:[#allocation355_spill] sm:$0xff] }
0x2d01   :  { %14603 = vmatprep.subr.bf16.mxu1 %v21274_v11  ;;  %v21303_v11 = vld [vmem:[#allocation356_spill] sm:$0xff] }
0x2d04   :  { %14605 = vmatpush1.bf16.msra.mxu1 %v21275_v19  ;;  %v21305_v19 = vld [vmem:[#allocation358_spill] sm:$0xff] }
0x2d05   :  { %14607 = vmatprep.subr.bf16.mxu1 %v21276_v0  ;;  %v21306_v0 = vld [vmem:[#allocation359_spill] sm:$0xff] }
0x2d08   :  { %14609 = vmatpush1.bf16.msra.mxu1 %v21277_v60  ;;  %v21307_v60 = vld [vmem:[#allocation360_spill] sm:$0xff] }
0x2d09   :  { %14611 = vmatprep.subr.bf16.mxu1 %v21278_v42  ;;  %v21308_v42 = vld [vmem:[#allocation361_spill] sm:$0xff] }
0x2d0c   :  { %14613 = vmatpush1.bf16.msra.mxu1 %v21279_v45  ;;  %v21309_v45 = vld [vmem:[#allocation362_spill] sm:$0xff] }
0x2d0d   :  { %14615 = vmatprep.subr.bf16.mxu1 %v21280_v26  ;;  %v21310_v26 = vld [vmem:[#allocation363_spill] sm:$0xff] }
0x2d10   :  { %14617 = vmatpush1.bf16.msra.mxu1 %v21281_v63  ;;  %v21311_v63 = vld [vmem:[#allocation364_spill] sm:$0xff] }
0x2d11   :  { %14619 = vmatprep.subr.bf16.mxu1 %v21282_v7  ;;  %v21312_v7 = vld [vmem:[#allocation365_spill] sm:$0xff] }
0x2d14   :  { %14621 = vmatpush1.bf16.msra.mxu1 %v21283_v38  ;;  %v21313_v38 = vld [vmem:[#allocation366_spill] sm:$0xff] }
0x2d15   :  { %14623 = vmatprep.subr.bf16.mxu1 %v21284_v23  ;;  %v21314_v23 = vld [vmem:[#allocation367_spill] sm:$0xff] }
0x2d18   :  { %14625 = vmatpush1.bf16.msra.mxu1 %v21285_v46  ;;  %v21315_v46 = vld [vmem:[#allocation368_spill] sm:$0xff] }
0x2d19   :  { %14627 = vmatprep.subr.bf16.mxu1 %v21286_v41  ;;  %v21316_v41 = vld [vmem:[#allocation370_spill] sm:$0xff] }
0x2d1c   :  { %14629 = vmatpush1.bf16.msra.mxu1 %v21287_v22  ;;  %v21317_v22 = vld [vmem:[#allocation371_spill] sm:$0xff] }
0x2d1d   :  { %14663 = vmatprep.subr.bf16.mxu1 %v21288_v37  ;;  %v21318_v37 = vld [vmem:[#allocation372_spill] sm:$0xff] }
0x2db2   :  { %v9201_v25 = vpop.f32.mrb[86].mxu1  ;;  %v9272_v34 = vpop.f32.mrb[88].mxu0 }
0x2db3   :  { %v9203_v58 = vpop.f32.mrb[87].mxu1  ;;  %v9274_v13 = vpop.f32.mrb[89].mxu0  ;;  %v21319_v25 = vld [vmem:[#allocation373_spill] sm:$0xff] }
0x2dd2   :  { %v9343_v33 = vpop.f32.mrb[88].mxu1 }
0x2dd3   :  { %v9347_v20 = vadd.f32 %v9343_v33, %v21289_v54  ;;  %v11293_v1 = vpop.f32.mrb[89].mxu1 }
0x2dd5   :  { %v9348_v57 = vadd.f32 %v14986_v43, %v9347_v20 }
0x2dd7   :  { %9414 = vmatmul.mubr.f32.vlgmr.msra.gmra.mrb[90].mxu0 %v9348_v57  ;;  %9485 = vmatmul.mubr.f32.vlgmr.msra.gmra.mrb[90].mxu1 %v9348_v57  ;;  %v9633_v61 = vmul.f32 %v9348_v57, %v9348_v57 }
0x2dd8   :  { %14633 = vmatpush1.bf16.msra.mxu0 %v21290_v2  ;;  %14665 = vmatpush1.bf16.msra.mxu1 %v21291_v17 }
0x2dd9   :  { %9634 = vadd.xlane.f32.xlu1 %v9633_v61  ;;  %14635 = vmatprep.subr.bf16.mxu0 %v21292_v32 }
0x2dda   :  { %14667 = vmatprep.subr.bf16.mxu1 %v21293_v51  ;;  %9555 = vmatprep.mubr.f32.mxu0 %v21219_v9 }
0x2ddb   :  { %9626 = vmatprep.mubr.f32.mxu1 %v21219_v9  ;;  %v21304_v9 = vld [vmem:[#allocation357_spill] sm:$0xff] }
0x2ddc   :  { %14637 = vmatpush1.bf16.msra.mxu0 %v21294_v5  ;;  %14669 = vmatpush1.bf16.msra.mxu1 %v21295_v56 }
0x2ddd   :  { %14639 = vmatprep.subr.bf16.mxu0 %v21296_v35  ;;  %14671 = vmatprep.subr.bf16.mxu1 %v21297_v59 }
0x2de0   :  { %14641 = vmatpush1.bf16.msra.mxu0 %v21298_v48  ;;  %14673 = vmatpush1.bf16.msra.mxu1 %v21299_v36 }
0x2de1   :  { %14643 = vmatprep.subr.bf16.mxu0 %v21300_v28  ;;  %14675 = vmatprep.subr.bf16.mxu1 %v21301_v8 }
0x2de4   :  { %14645 = vmatpush1.bf16.msra.mxu0 %v21302_v39  ;;  %14677 = vmatpush1.bf16.msra.mxu1 %v21303_v11 }
0x2de5   :  { %14647 = vmatprep.subr.bf16.mxu0 %v21304_v9  ;;  %14679 = vmatprep.subr.bf16.mxu1 %v21305_v19 }
0x2de8   :  { %14649 = vmatpush1.bf16.msra.mxu0 %v21306_v0  ;;  %14681 = vmatpush1.bf16.msra.mxu1 %v21307_v60 }
0x2de9   :  { %14651 = vmatprep.subr.bf16.mxu0 %v21308_v42  ;;  %14683 = vmatprep.subr.bf16.mxu1 %v21309_v45 }
0x2dec   :  { %14653 = vmatpush1.bf16.msra.mxu0 %v21310_v26  ;;  %14685 = vmatpush1.bf16.msra.mxu1 %v21311_v63 }
0x2ded   :  { %14655 = vmatprep.subr.bf16.mxu0 %v21312_v7  ;;  %14687 = vmatprep.subr.bf16.mxu1 %v21313_v38 }
0x2df0   :  { %14657 = vmatpush1.bf16.msra.mxu0 %v21314_v23  ;;  %14689 = vmatpush1.bf16.msra.mxu1 %v21315_v46 }
0x2df1   :  { %14659 = vmatprep.subr.bf16.mxu0 %v21316_v41  ;;  %14691 = vmatprep.subr.bf16.mxu1 %v21317_v22 }
0x2df4   :  { %14661 = vmatpush1.bf16.msra.mxu0 %v21318_v37  ;;  %14693 = vmatpush1.bf16.msra.mxu1 %v21319_v25 }
0x2df7   :  { %9556 = vmatmul.mubr.f32.vlgmr.msra.gmra.mrb[92].mxu0 %v9348_v57  ;;  %9627 = vmatmul.mubr.f32.vlgmr.msra.gmra.mrb[92].mxu1 %v9348_v57 }
0x2df8   :  { %15284 = shalt.err (!%p15281_p10)
}
0x2df9   :  { %s15285_s5 = scalar_lea.hbm %s18974_s20, 640 }
0x2dfa   :  { %p15286_p11 = scmp.ne.s32.totalorder %s18974_s20, %s15285_s5  ;;  %p15289_p12 = scmp.lt.u32.totalorder %s15285_s5, %s18974_s20 }
0x2dfc   :  { %p15291_p13 = pnand %p15289_p12, %p15286_p11 }
0x2dfe   :  { %15294 = shalt.err (!%p15291_p13)
}
0x2dff   :  { %9749 = dma.vmem_to_hbm [thread:$0]  %s9744_s21, 640, %s18974_s20, [#allocation8], %s15350_s2, %s15350_s2, %s15351_s10  }
0x2e00   :  { %s21320_s10 = sld [smem:[#allocation390_spill]]  ;;  %s15361_s15 = smov [#allocation28]  }
0x2e01   :  { %s9756_s11 = sshll.u32 %s15361_s15, 4  ;;  %s9757_s11 = int_to_ptr.vmem [resolvable:$true] %s9756_s11 }
0x2e02   :  { %s15295_s22 = scalar_lea.vmem %s9757_s11, 128  ;;  %p15300_p1 = scmp.lt.s32.totalorder %s9757_s11, %s9757_s11 }
0x2e03   :  { %p15296_p0 = scmp.ne.s32.totalorder %s9757_s11, %s15295_s22  ;;  %p15301_p2 = scmp.lt.s32.totalorder %s15295_s22, %s15295_s22 }
0x2e05   :  { %p15302_p3 = por %p15301_p2, %p15300_p1 }
0x2e07   :  { %p15303_p4 = pnand %p15302_p3, %p15296_p0 }
0x2e66   :  { %v9635_v34 = vpop.xlane.xlu1 %9634 }
0x2e67   :  { %v9636_v58 = vmax.f32 %v9635_v34, 1e-16 }
0x2e69   :  { %14932 = vrsqrt.f32 %v9636_v58 }
0x2e73   :  { %v14933_v13 = vpop.eup %14932 }
0x2eaa   :  { %v9415_v33 = vpop.f32.mrb[90].mxu0  ;;  %v9486_v54 = vpop.f32.mrb[90].mxu1 }
0x2eab   :  { %v9638_v20 = vmul.f32 %v14933_v13, %v9415_v33  ;;  %v9640_v1 = vmul.f32 %v14933_v13, %v9486_v54  ;;  %v9417_v43 = vpop.f32.mrb[91].mxu0  ;;  %v9488_v57 = vpop.f32.mrb[91].mxu1 }
0x2eac   :  { %v9639_v61 = vmul.f32 %v14933_v13, %v9417_v43  ;;  %v9641_v2 = vmul.f32 %v14933_v13, %v9488_v57 }
0x2ead   :  { %v9646_v17 = vmul.f32 %v9638_v20, %v18506_v18  ;;  %v9648_v32 = vmul.f32 %v9640_v1, %v18510_v52 }
0x2eae   :  { %v9647_v51 = vmul.f32 %v9639_v61, %v18512_v47  ;;  %v9649_v5 = vmul.f32 %v9641_v2, %v18517_v50 }
0x2eaf   :  { %v9654_v56 = vadd.f32 %v9646_v17, %v18520_v16  ;;  %v9656_v35 = vadd.f32 %v9648_v32, %v18528_v21 }
0x2eb0   :  { %v9655_v59 = vadd.f32 %v9647_v51, %v18530_v49  ;;  %v9657_v48 = vadd.f32 %v9649_v5, %v18534_v53 }
0x2eb1   :  { %v9683_v36 = vmax.f32 %v18701_v31, %v9654_v56  ;;  %v9685_v28 = vmax.f32 %v18708_v24, %v9656_v35 }
0x2eb2   :  { %v9684_v18 = vmax.f32 %v18710_v62, %v9655_v59  ;;  %v9686_v52 = vmax.f32 %v18719_v55, %v9657_v48 }
0x2eb4   :  { %v9727_v8 = vmax.f32 %v9683_v36, %v9684_v18 }
0x2eb6   :  { %v9728_v47 = vmax.f32 %v9727_v8, %v9685_v28 }
0x2eb8   :  { %v9729_v39 = vmax.f32 %v9728_v47, %v9686_v52 }
0x2eca   :  { %v9557_v50 = vpop.f32.mrb[92].mxu0  ;;  %v9628_v11 = vpop.f32.mrb[92].mxu1 }
0x2ecb   :  { %v9642_v16 = vmul.f32 %v14933_v13, %v9557_v50  ;;  %v9644_v9 = vmul.f32 %v14933_v13, %v9628_v11  ;;  %v9559_v21 = vpop.f32.mrb[93].mxu0  ;;  %v9630_v19 = vpop.f32.mrb[93].mxu1 }
0x2ecc   :  { %v9643_v49 = vmul.f32 %v14933_v13, %v9559_v21  ;;  %v9645_v0 = vmul.f32 %v14933_v13, %v9630_v19 }
0x2ecd   :  { %v9650_v53 = vmul.f32 %v9642_v16, %v18544_v6  ;;  %v9652_v31 = vmul.f32 %v9644_v9, %v18548_v30 }
0x2ece   :  { %v9651_v24 = vmul.f32 %v9643_v49, %v18550_v14  ;;  %v9653_v62 = vmul.f32 %v9645_v0, %v18572_v15  ;;  %v9734_v15 = vld [vmem:[%s21320_s10] sm:$0xff] }
0x2ecf   :  { %v9658_v55 = vadd.f32 %v9650_v53, %v18577_v27  ;;  %v9660_v60 = vadd.f32 %v9652_v31, %v18580_v4  ;;  %vm9735_vm0 = vcmp.gt.f32.partialorder %v9734_v15, 0.0 }
0x2ed0   :  { %v9659_v42 = vadd.f32 %v9651_v24, %v18592_v3  ;;  %v9661_v45 = vadd.f32 %v9653_v62, %v18610_v44 }
0x2ed1   :  { %v9687_v26 = vmax.f32 %v18747_v12, %v9658_v55  ;;  %v9689_v63 = vmax.f32 %v18754_v10, %v9660_v60 }
0x2ed2   :  { %v9688_v6 = vmax.f32 %v18759_v29, %v9659_v42  ;;  %v9690_v30 = vmax.f32 %v18765_v40, %v9661_v45 }
0x2ed3   :  { %v9730_v7 = vmax.f32 %v9729_v39, %v9687_v26 }
0x2ed5   :  { %v9731_v14 = vmax.f32 %v9730_v7, %v9688_v6 }
0x2ed7   :  { %v9732_v27 = vmax.f32 %v9731_v14, %v9689_v63 }
0x2ed9   :  { %v9733_v4 = vmax.f32 %v9732_v27, %v9690_v30 }
0x2edb   :  { %v9736_v3 = vsel %vm9735_vm0, %v9733_v4, -1.0 }
0x2edc   :  { %9737 = vst [vmem:[#allocation28] sm:$0xff] %v9736_v3 }
0x2edd   :  { %15306 = shalt.err (!%p15303_p4)
}
0x2ede   :  { %s21321_s29 = sld [smem:[#allocation391_spill]] }
0x2ee4   :  { %s15307_s4 = scalar_lea.hbm %s21321_s29, 128 }
0x2ee5   :  { %p15308_p5 = scmp.ne.s32.totalorder %s21321_s29, %s15307_s4  ;;  %p15311_p6 = scmp.lt.u32.totalorder %s15307_s4, %s21321_s29 }
0x2ee7   :  { %p15313_p7 = pnand %p15311_p6, %p15308_p5 }
0x2ee9   :  { %15316 = shalt.err (!%p15313_p7)
}
0x2eea   :  { %9759 = dma.vmem_to_hbm [thread:$0]  %s9757_s11, 128, %s21321_s29, [#allocation29]  }
0x2eeb   :  { %15331 = dma.done.wait [#allocation8], 640  }
0x2eec   :  { %15332 = vsyncadd [#allocation8], 4294966656 }
0x2eed   :  { %15333 = dma.done.wait [#allocation29], 128  }
0x2eee   :  { %15334 = vsyncadd [#allocation29], 4294967168 }
0x2eef   :  { %9766 = vsyncpa [#allocation7], 1 }
0x2ef0   :  { %9767 = vsyncpa [#allocation10], 1 }
0x2ef1   :  { %9768 = vsyncpa [#allocation13], 1 }
0x2ef2   :  { %9769 = vsyncpa [#allocation16], 1 }
0x2ef3   :  { %9770 = vsyncpa [#allocation19], 1 }
0x2ef4   :  { %9771 = vsyncpa [#allocation22], 1 }
0x2ef5   :  { %9772 = vsyncpa [#allocation25], 1 }
0x2ef6   :  { %9773 = vsyncpa [#allocation8], 1 }
0x2ef7   :  { %9774 = vsyncpa [#allocation29], 1 }

</bundles_post_ra>
